<compile_context>
chip_gen: v7x
topology: tpu7x:2x2x1
jax: 0.10.0
libtpu: 0.0.40
codegen_flags: <defaults>
</compile_context>

<pallas_src>
import numpy as np
import jax
import jax.numpy as jnp
from jax.experimental import pallas as pl
from jax.experimental.pallas import tpu as pltpu


def _elu(v):
    # ELU(alpha=1); exp(min(v,0))-1 avoids overflow in the false branch.
    return jnp.where(v > 0, v, jnp.exp(jnp.minimum(v, 0.0)) - 1.0)


def eegnexb_kernel(x_ref, w1_ref, b1_ref, w2_ref, b2_ref, e3_ref, b3_ref,
                   pool_ref, w4_ref, b4_ref, w5_ref, b5_ref, wlf_ref, bl_ref,
                   o_ref, s1, s4, s5, col2, c2all, col4, col5, featrow):
    H = s1.shape[0]               # nChan
    T = s1.shape[2] - 31          # nTime
    T2 = s4.shape[1] - 30         # nTime // 4
    f32 = jnp.float32

    # Zero ONLY the halo (padding) columns; the interiors are fully rewritten
    # every grid step.  (Deliberately not guarded by program_id()==0 so the
    # kernel stays correct when the "parallel" batch axis is sharded across
    # TensorCores, each with its own scratch instance.)
    s4[:, pl.ds(0, 15)] = jnp.zeros((64, 15), f32)
    s4[:, pl.ds(T2 + 15, 15)] = jnp.zeros((64, 15), f32)
    s5[:, pl.ds(0, 30)] = jnp.zeros((32, 30), f32)
    s5[:, pl.ds(T2 + 30, 30)] = jnp.zeros((32, 30), f32)

    x = x_ref[0]                  # (H, T+31), already zero padded (15, 16)
    w1v = w1_ref[...]             # (32, 8, 1)   taps leading
    b1v = b1_ref[...]             # (8, 1)
    b2v = b2_ref[...]             # (32, 1)

    # --- Conv1 (1->8, k=(1,32), 'same') + BN1 + ELU ---------------------------
    # Single input channel (K=1): kept on the VPU as 32 broadcast MACs of an
    # (8,T) tile per EEG channel; the MXU gains nothing at K=1.
    for h in range(H):
        xh = x[h:h + 1, :]                              # (1, T+31)
        acc = jnp.zeros((8, T), f32)
        for k in range(32):
            acc = acc + w1v[k] * xh[:, k:k + T]         # (8,1) * (1,T)
        s1[h, :, pl.ds(0, 15)] = jnp.zeros((8, 15), f32)     # left halo
        s1[h, :, pl.ds(15, T)] = _elu(acc + b1v)
        s1[h, :, pl.ds(T + 15, 16)] = jnp.zeros((8, 16), f32)  # right halo

    # --- Conv2 (8->32, k=(1,32), 'same') + BN2 + ELU via im2col ---------------
    # One (32, 256) x (256, T) MXU matmul per EEG channel (K = 32 taps * 8 ch).
    for h in range(H):
        s1h = s1[h]                                     # (8, T+31)
        for k in range(32):
            col2[pl.ds(k * 8, 8), :] = s1h[:, k:k + T]
        c2h = _elu(jnp.dot(w2_ref[...], col2[...],
                           preferred_element_type=f32) + b2v)   # (32, T)
        c2all[pl.ds(h * 32, 32), :] = c2h

    # --- Conv3 (grouped spatial (nChan,1), 32->64, renormed) + BN3 + ELU ------
    # Single (64, 32*H) x (32*H, T) dot over the h-stacked conv2 output.
    a3 = _elu(jnp.dot(e3_ref[...], c2all[...],
                      preferred_element_type=f32) + b3_ref[...])  # (64, T)

    # --- AvgPool2d((1,4)) as matmul with a constant pooling matrix ------------
    # Dropout = identity in eval mode.
    s4[:, pl.ds(15, T2)] = jnp.dot(a3, pool_ref[...],
                                   preferred_element_type=f32)    # (64, T2)

    # --- Conv4 (64->32, k=(1,16), dilation 2, 'same') + BN4 + ELU -------------
    # Dilated im2col -> one (32, 1024) x (1024, T2) matmul.
    s4v = s4[...]
    for k in range(16):
        col4[pl.ds(k * 64, 64), :] = s4v[:, 2 * k:2 * k + T2]
    a4 = _elu(jnp.dot(w4_ref[...], col4[...],
                      preferred_element_type=f32) + b4_ref[...])  # (32, T2)
    s5[:, pl.ds(30, T2)] = a4

    # --- Conv5 (32->8, k=(1,16), dilation 4, 'same') + BN5 + ELU --------------
    # Dilated im2col -> one (8, 512) x (512, T2) matmul.
    s5v = s5[...]
    for k in range(16):
        col5[pl.ds(k * 32, 32), :] = s5v[:, 4 * k:4 * k + T2]
    feat = _elu(jnp.dot(w5_ref[...], col5[...],
                        preferred_element_type=f32) + b5_ref[...])  # (8, T2)

    # --- Flatten (c-major over time) into a lane-dense (1, 8*T2) row ----------
    for c in range(8):
        featrow[:, pl.ds(c * T2, T2)] = feat[c:c + 1, :]

    # --- Linear (renormed, max_norm=0.25) + LogSoftmax -------------------------
    logits = jnp.dot(featrow[...], wlf_ref[...],
                     preferred_element_type=f32) + bl_ref[...]    # (1, 4)
    m = jnp.max(logits, axis=-1, keepdims=True)
    lse = m + jnp.log(jnp.sum(jnp.exp(logits - m), axis=-1, keepdims=True))
    o_ref[...] = (logits - lse)[None, :, :]                       # (1, 1, 4)


def eegnexb_forward(x, kp):
    """x: (B, 1, nChan, nTime) float32 -> (B, 4) log-probs."""
    B, _, H, T = x.shape
    T2 = T // 4
    # pre-pad time for conv1's 'same' padding: kernel 32 -> (15, 16)
    xpad = jnp.pad(x[:, 0], ((0, 0), (0, 0), (15, 16)))

    weights = [kp['w1f'], kp['b1'], kp['w2f'], kp['b2'], kp['e3f'], kp['b3'],
               kp['pool'], kp['w4f'], kp['b4'], kp['w5f'], kp['b5'],
               kp['wlf'], kp['bl']]

    def full_spec(shape):
        nd = len(shape)
        def imap(b):
            return (0,) * nd
        return pl.BlockSpec(shape, imap)

    in_specs = [pl.BlockSpec((1, H, T + 31), lambda b: (b, 0, 0))]
    in_specs += [full_spec(w.shape) for w in weights]

    out = pl.pallas_call(
        eegnexb_kernel,
        out_shape=jax.ShapeDtypeStruct((B, 1, 4), jnp.float32),
        grid=(B,),
        in_specs=in_specs,
        out_specs=pl.BlockSpec((1, 1, 4), lambda b: (b, 0, 0)),
        scratch_shapes=[
            pltpu.VMEM((H, 8, T + 31), jnp.float32),   # conv1 out (padded for conv2)
            pltpu.VMEM((64, T2 + 30), jnp.float32),    # pooled out (padded for conv4)
            pltpu.VMEM((32, T2 + 60), jnp.float32),    # conv4 out (padded for conv5)
            pltpu.VMEM((256, T), jnp.float32),         # conv2 im2col slab (per h)
            pltpu.VMEM((32 * H, T), jnp.float32),      # h-stacked conv2 output
            pltpu.VMEM((1024, T2), jnp.float32),       # conv4 im2col slab
            pltpu.VMEM((512, T2), jnp.float32),        # conv5 im2col slab
            pltpu.VMEM((1, 8 * T2), jnp.float32),      # flattened feature row
        ],
        compiler_params=pltpu.CompilerParams(
            dimension_semantics=("parallel",)),
    )(xpad, *weights)
    return out[:, 0, :]


# ------------------------- parameters (synthetic, deterministic) ----------------

def make_params(key, H, T):
    T2 = T // 4
    ks = iter(jax.random.split(key, 32))
    nrm = lambda shape, s: s * jax.random.normal(next(ks), shape, jnp.float32)
    p = {}
    p['w1'] = nrm((8, 1, 1, 32), 0.2)        # Conv2d(1,8,(1,32))
    p['w2'] = nrm((32, 8, 1, 32), 0.1)       # Conv2d(8,32,(1,32))
    p['w3'] = nrm((64, 1, H, 1), 0.5)        # Conv2dWithConstraint(32,64,(H,1),groups=32)
    p['b3c'] = nrm((64,), 0.1)               # its bias (default bias=True)
    p['w4'] = nrm((32, 64, 1, 16), 0.05)     # Conv2d(64,32,(1,16),dilation=(1,2))
    p['w5'] = nrm((8, 32, 1, 16), 0.1)       # Conv2d(32,8,(1,16),dilation=(1,4))
    p['wl'] = nrm((4, 8 * T2), 0.1)          # LinearWithConstraint(8*T2, 4)
    p['bl'] = nrm((4,), 0.1)

    def bn(c):
        g = 1.0 + 0.1 * jax.random.normal(next(ks), (c,), jnp.float32)
        b = 0.1 * jax.random.normal(next(ks), (c,), jnp.float32)
        m = 0.1 * jax.random.normal(next(ks), (c,), jnp.float32)
        v = 0.5 + jax.random.uniform(next(ks), (c,), jnp.float32)
        return (g, b, m, v)

    p['bn1'], p['bn2'], p['bn3'] = bn(8), bn(32), bn(64)
    p['bn4'], p['bn5'] = bn(32), bn(8)
    return p


def renorm(w, maxnorm, eps=1e-7):
    # torch.renorm(p=2, dim=0, maxnorm)
    flat = w.reshape(w.shape[0], -1)
    n = jnp.sqrt(jnp.sum(flat * flat, axis=1))
    scale = jnp.where(n > maxnorm, maxnorm / (n + eps), 1.0)
    return w * scale.reshape((-1,) + (1,) * (w.ndim - 1))


def fold_kernel_params(p, H, T):
    """Renorm + fold inference BatchNorm into conv weights; lay out the conv
    weights as im2col-flattened matrices (rows = out channel, cols = tap*in)."""
    T2 = T // 4
    eps = 1e-5

    def bn_fold(bn):
        g, b, m, v = bn
        s = g / jnp.sqrt(v + eps)
        return s, b - m * s

    s1_, h1 = bn_fold(p['bn1'])
    s2_, h2 = bn_fold(p['bn2'])
    s3_, h3 = bn_fold(p['bn3'])
    s4_, h4 = bn_fold(p['bn4'])
    s5_, h5 = bn_fold(p['bn5'])

    kp = {}
    # conv1: taps leading, (32, 8, 1)
    kp['w1f'] = jnp.transpose(p['w1'][:, 0, 0, :] * s1_[:, None], (1, 0))[:, :, None]
    kp['b1'] = h1[:, None]

    # conv2 im2col weight: (32, 32taps*8ch), col index = k*8 + c
    w2s = p['w2'][:, :, 0, :] * s2_[:, None, None]                         # (32, 8, 32) [o,c,k]
    kp['w2f'] = jnp.transpose(w2s, (0, 2, 1)).reshape(32, 32 * 8)
    kp['b2'] = h2[:, None]

    # depthwise spatial conv -> dense (64, 32*H) matmul weight, col = h*32 + c
    w3r = renorm(p['w3'], 1.0)
    w3v = w3r[:, 0, :, 0] * s3_[:, None]                                   # (64, H)
    onehot = jax.nn.one_hot(jnp.arange(64) // 2, 32, dtype=jnp.float32)    # (64, 32)
    e3 = w3v.T[:, :, None] * onehot[None, :, :]                            # (H, 64, 32)
    kp['e3f'] = jnp.transpose(e3, (1, 0, 2)).reshape(64, H * 32)
    kp['b3'] = (s3_ * p['b3c'] + h3)[:, None]                              # BN(conv+bias) shift

    kp['pool'] = 0.25 * jnp.kron(jnp.eye(T2, dtype=jnp.float32),
                                 jnp.ones((4, 1), jnp.float32))            # (T, T2)

    # conv4 im2col weight: (32, 16taps*64ch), col = k*64 + c
    w4s = p['w4'][:, :, 0, :] * s4_[:, None, None]                         # (32, 64, 16)
    kp['w4f'] = jnp.transpose(w4s, (0, 2, 1)).reshape(32, 16 * 64)
    kp['b4'] = h4[:, None]

    # conv5 im2col weight: (8, 16taps*32ch), col = k*32 + c
    w5s = p['w5'][:, :, 0, :] * s5_[:, None, None]                         # (8, 32, 16)
    kp['w5f'] = jnp.transpose(w5s, (0, 2, 1)).reshape(8, 16 * 32)
    kp['b5'] = h5[:, None]

    wl_r = renorm(p['wl'], 0.25)                                           # (4, 8*T2)
    kp['wlf'] = wl_r.T                                                     # (8*T2, 4)
    kp['bl'] = p['bl'][None, :]                                            # (1, 4)
    return kp


# ------------------------------- pure-JAX reference ------------------------------

def reference_forward(x, p):
    dn = ('NCHW', 'OIHW', 'NCHW')
    hp = jax.lax.Precision.HIGHEST

    def conv(y, w, pad, dil=(1, 1), groups=1):
        return jax.lax.conv_general_dilated(
            y, w, window_strides=(1, 1), padding=pad, rhs_dilation=dil,
            dimension_numbers=dn, feature_group_count=groups, precision=hp)

    def bn(y, stats, eps=1e-5):
        g, b, m, v = (t[None, :, None, None] for t in stats)
        return g * (y - m) / jnp.sqrt(v + eps) + b

    elu = lambda v: jnp.where(v > 0, v, jnp.exp(jnp.minimum(v, 0.0)) - 1.0)

    y = elu(bn(conv(x, p['w1'], [(0, 0), (15, 16)]), p['bn1']))
    y = elu(bn(conv(y, p['w2'], [(0, 0), (15, 16)]), p['bn2']))
    y = conv(y, renorm(p['w3'], 1.0), [(0, 0), (0, 0)], groups=32)
    y = y + p['b3c'][None, :, None, None]
    y = elu(bn(y, p['bn3']))
    B, C, Hh, T = y.shape
    y = y.reshape(B, C, Hh, T // 4, 4).mean(-1)                      # AvgPool (1,4)
    y = elu(bn(conv(y, p['w4'], [(0, 0), (15, 15)], dil=(1, 2)), p['bn4']))
    y = elu(bn(conv(y, p['w5'], [(0, 0), (30, 30)], dil=(1, 4)), p['bn5']))
    f = y.reshape(B, -1)
    logits = jnp.matmul(f, renorm(p['wl'], 0.25).T, precision=hp) + p['bl'][None, :]
    return jax.nn.log_softmax(logits, axis=1)


if __name__ == "__main__":
    # small shapes consistent with the module: batch=2, nChan=4, nTime=64
    B, H, T = 2, 4, 64
    key = jax.random.PRNGKey(0)
    kx, kparams = jax.random.split(key)
    x = jax.random.normal(kx, (B, 1, H, T), jnp.float32)

    params = make_params(kparams, H, T)
    kernel_params = fold_kernel_params(params, H, T)

    out = eegnexb_forward(x, kernel_params)
    out = jax.block_until_ready(out)

    ref = reference_forward(x, params)
    np.testing.assert_allclose(np.asarray(out), np.asarray(ref), rtol=5e-3, atol=5e-3)
    assert out.shape == (B, 4)
    print("KERNEL_OK")
</pallas_src>

<mosaic_0001>
module attributes {stable_mosaic.version = 11 : i64} {
  func.func @eegnexb_kernel(%arg0: i32, %arg1: memref<1x4x95xf32, #tpu.memory_space<vmem>>, %arg2: memref<32x8x1xf32, #tpu.memory_space<vmem>>, %arg3: memref<8x1xf32, #tpu.memory_space<vmem>>, %arg4: memref<32x256xf32, #tpu.memory_space<vmem>>, %arg5: memref<32x1xf32, #tpu.memory_space<vmem>>, %arg6: memref<64x128xf32, #tpu.memory_space<vmem>>, %arg7: memref<64x1xf32, #tpu.memory_space<vmem>>, %arg8: memref<64x16xf32, #tpu.memory_space<vmem>>, %arg9: memref<32x1024xf32, #tpu.memory_space<vmem>>, %arg10: memref<32x1xf32, #tpu.memory_space<vmem>>, %arg11: memref<8x512xf32, #tpu.memory_space<vmem>>, %arg12: memref<8x1xf32, #tpu.memory_space<vmem>>, %arg13: memref<128x4xf32, #tpu.memory_space<vmem>>, %arg14: memref<1x4xf32, #tpu.memory_space<vmem>>, %arg15: memref<1x1x4xf32, #tpu.memory_space<vmem>>, %arg16: memref<4x8x95xf32, #tpu.memory_space<vmem>>, %arg17: memref<64x46xf32, #tpu.memory_space<vmem>>, %arg18: memref<32x76xf32, #tpu.memory_space<vmem>>, %arg19: memref<256x64xf32, #tpu.memory_space<vmem>>, %arg20: memref<128x64xf32, #tpu.memory_space<vmem>>, %arg21: memref<1024x16xf32, #tpu.memory_space<vmem>>, %arg22: memref<512x16xf32, #tpu.memory_space<vmem>>, %arg23: memref<1x128xf32, #tpu.memory_space<vmem>>) attributes {dimension_semantics = [#tpu.dimension_semantics<parallel>], iteration_bounds = array<i64: 2>, scalar_prefetch = 0 : i64, scratch_operands = 8 : i64, tpu.core_type = #tpu.core_type<tc>, window_params = [{transform_indices = @transform_0, window_bounds = array<i64: 1, 4, 95>}, {pipeline_mode = #tpu.pipeline_mode<synchronous>, transform_indices = @transform_1, window_bounds = array<i64: 32, 8, 1>}, {pipeline_mode = #tpu.pipeline_mode<synchronous>, transform_indices = @transform_2, window_bounds = array<i64: 8, 1>}, {pipeline_mode = #tpu.pipeline_mode<synchronous>, transform_indices = @transform_3, window_bounds = array<i64: 32, 256>}, {pipeline_mode = #tpu.pipeline_mode<synchronous>, transform_indices = @transform_4, window_bounds = array<i64: 32, 1>}, {pipeline_mode = #tpu.pipeline_mode<synchronous>, transform_indices = @transform_5, window_bounds = array<i64: 64, 128>}, {pipeline_mode = #tpu.pipeline_mode<synchronous>, transform_indices = @transform_6, window_bounds = array<i64: 64, 1>}, {pipeline_mode = #tpu.pipeline_mode<synchronous>, transform_indices = @transform_7, window_bounds = array<i64: 64, 16>}, {pipeline_mode = #tpu.pipeline_mode<synchronous>, transform_indices = @transform_8, window_bounds = array<i64: 32, 1024>}, {pipeline_mode = #tpu.pipeline_mode<synchronous>, transform_indices = @transform_9, window_bounds = array<i64: 32, 1>}, {pipeline_mode = #tpu.pipeline_mode<synchronous>, transform_indices = @transform_10, window_bounds = array<i64: 8, 512>}, {pipeline_mode = #tpu.pipeline_mode<synchronous>, transform_indices = @transform_11, window_bounds = array<i64: 8, 1>}, {pipeline_mode = #tpu.pipeline_mode<synchronous>, transform_indices = @transform_12, window_bounds = array<i64: 128, 4>}, {pipeline_mode = #tpu.pipeline_mode<synchronous>, transform_indices = @transform_13, window_bounds = array<i64: 1, 4>}, {transform_indices = @transform_14, window_bounds = array<i64: 1, 1, 4>}]} {
    %cst = arith.constant 0.000000e+00 : f32
    %0 = vector.broadcast %cst : f32 to vector<64x15xf32>
    %c0 = arith.constant 0 : index
    %c0_0 = arith.constant 0 : index
    %1 = vector.load %arg17[%c0, %c0_0] : memref<64x46xf32, #tpu.memory_space<vmem>>, vector<64x15xf32>
    tpu.vector_store %arg17[%c0, %c0_0], %0 {strides = array<i32>} : memref<64x46xf32, #tpu.memory_space<vmem>>, vector<64x15xf32>,
    %cst_1 = arith.constant 0.000000e+00 : f32
    %2 = vector.broadcast %cst_1 : f32 to vector<64x15xf32>
    %c0_2 = arith.constant 0 : index
    %c31 = arith.constant 31 : index
    %3 = vector.load %arg17[%c0_2, %c31] : memref<64x46xf32, #tpu.memory_space<vmem>>, vector<64x15xf32>
    tpu.vector_store %arg17[%c0_2, %c31], %2 {strides = array<i32>} : memref<64x46xf32, #tpu.memory_space<vmem>>, vector<64x15xf32>,
    %cst_3 = arith.constant 0.000000e+00 : f32
    %4 = vector.broadcast %cst_3 : f32 to vector<32x30xf32>
    %c0_4 = arith.constant 0 : index
    %c0_5 = arith.constant 0 : index
    %5 = vector.load %arg18[%c0_4, %c0_5] : memref<32x76xf32, #tpu.memory_space<vmem>>, vector<32x30xf32>
    tpu.vector_store %arg18[%c0_4, %c0_5], %4 {strides = array<i32>} : memref<32x76xf32, #tpu.memory_space<vmem>>, vector<32x30xf32>,
    %cst_6 = arith.constant 0.000000e+00 : f32
    %6 = vector.broadcast %cst_6 : f32 to vector<32x30xf32>
    %c0_7 = arith.constant 0 : index
    %c46 = arith.constant 46 : index
    %7 = vector.load %arg18[%c0_7, %c46] : memref<32x76xf32, #tpu.memory_space<vmem>>, vector<32x30xf32>
    tpu.vector_store %arg18[%c0_7, %c46], %6 {strides = array<i32>} : memref<32x76xf32, #tpu.memory_space<vmem>>, vector<32x30xf32>,
    %c0_8 = arith.constant 0 : index
    %c0_9 = arith.constant 0 : index
    %c0_10 = arith.constant 0 : index
    %8 = vector.load %arg1[%c0_8, %c0_9, %c0_10] : memref<1x4x95xf32, #tpu.memory_space<vmem>>, vector<1x4x95xf32>
    %9 = vector.shape_cast %8 : vector<1x4x95xf32> to vector<4x95xf32>
    %c0_11 = arith.constant 0 : index
    %c0_12 = arith.constant 0 : index
    %c0_13 = arith.constant 0 : index
    %10 = vector.load %arg2[%c0_11, %c0_12, %c0_13] : memref<32x8x1xf32, #tpu.memory_space<vmem>>, vector<32x8x1xf32>
    %c0_14 = arith.constant 0 : index
    %c0_15 = arith.constant 0 : index
    %11 = vector.load %arg3[%c0_14, %c0_15] : memref<8x1xf32, #tpu.memory_space<vmem>>, vector<8x1xf32>
    %c0_16 = arith.constant 0 : index
    %c0_17 = arith.constant 0 : index
    %12 = vector.load %arg5[%c0_16, %c0_17] : memref<32x1xf32, #tpu.memory_space<vmem>>, vector<32x1xf32>
    %13 = vector.extract_strided_slice %9 {offsets = [0, 0], sizes = [1, 95], strides = [1, 1]} : vector<4x95xf32> to vector<1x95xf32>
    %cst_18 = arith.constant 0.000000e+00 : f32
    %14 = vector.broadcast %cst_18 : f32 to vector<8x64xf32>
    %15 = vector.extract_strided_slice %10 {offsets = [0, 0, 0], sizes = [1, 8, 1], strides = [1, 1, 1]} : vector<32x8x1xf32> to vector<1x8x1xf32>
    %16 = vector.shape_cast %15 : vector<1x8x1xf32> to vector<8x1xf32>
    %17 = vector.extract_strided_slice %13 {offsets = [0, 0], sizes = [1, 64], strides = [1, 1]} : vector<1x95xf32> to vector<1x64xf32>
    %18 = vector.broadcast %16 : vector<8x1xf32> to vector<8x64xf32>
    %19 = vector.broadcast %17 : vector<1x64xf32> to vector<8x64xf32>
    %20 = arith.mulf %18, %19 : vector<8x64xf32>
    %21 = arith.addf %14, %20 : vector<8x64xf32>
    %22 = vector.extract_strided_slice %10 {offsets = [1, 0, 0], sizes = [1, 8, 1], strides = [1, 1, 1]} : vector<32x8x1xf32> to vector<1x8x1xf32>
    %23 = vector.shape_cast %22 : vector<1x8x1xf32> to vector<8x1xf32>
    %24 = vector.extract_strided_slice %13 {offsets = [0, 1], sizes = [1, 64], strides = [1, 1]} : vector<1x95xf32> to vector<1x64xf32>
    %25 = vector.broadcast %23 : vector<8x1xf32> to vector<8x64xf32>
    %26 = vector.broadcast %24 : vector<1x64xf32> to vector<8x64xf32>
    %27 = arith.mulf %25, %26 : vector<8x64xf32>
    %28 = arith.addf %21, %27 : vector<8x64xf32>
    %29 = vector.extract_strided_slice %10 {offsets = [2, 0, 0], sizes = [1, 8, 1], strides = [1, 1, 1]} : vector<32x8x1xf32> to vector<1x8x1xf32>
    %30 = vector.shape_cast %29 : vector<1x8x1xf32> to vector<8x1xf32>
    %31 = vector.extract_strided_slice %13 {offsets = [0, 2], sizes = [1, 64], strides = [1, 1]} : vector<1x95xf32> to vector<1x64xf32>
    %32 = vector.broadcast %30 : vector<8x1xf32> to vector<8x64xf32>
    %33 = vector.broadcast %31 : vector<1x64xf32> to vector<8x64xf32>
    %34 = arith.mulf %32, %33 : vector<8x64xf32>
    %35 = arith.addf %28, %34 : vector<8x64xf32>
    %36 = vector.extract_strided_slice %10 {offsets = [3, 0, 0], sizes = [1, 8, 1], strides = [1, 1, 1]} : vector<32x8x1xf32> to vector<1x8x1xf32>
    %37 = vector.shape_cast %36 : vector<1x8x1xf32> to vector<8x1xf32>
    %38 = vector.extract_strided_slice %13 {offsets = [0, 3], sizes = [1, 64], strides = [1, 1]} : vector<1x95xf32> to vector<1x64xf32>
    %39 = vector.broadcast %37 : vector<8x1xf32> to vector<8x64xf32>
    %40 = vector.broadcast %38 : vector<1x64xf32> to vector<8x64xf32>
    %41 = arith.mulf %39, %40 : vector<8x64xf32>
    %42 = arith.addf %35, %41 : vector<8x64xf32>
    %43 = vector.extract_strided_slice %10 {offsets = [4, 0, 0], sizes = [1, 8, 1], strides = [1, 1, 1]} : vector<32x8x1xf32> to vector<1x8x1xf32>
    %44 = vector.shape_cast %43 : vector<1x8x1xf32> to vector<8x1xf32>
    %45 = vector.extract_strided_slice %13 {offsets = [0, 4], sizes = [1, 64], strides = [1, 1]} : vector<1x95xf32> to vector<1x64xf32>
    %46 = vector.broadcast %44 : vector<8x1xf32> to vector<8x64xf32>
    %47 = vector.broadcast %45 : vector<1x64xf32> to vector<8x64xf32>
    %48 = arith.mulf %46, %47 : vector<8x64xf32>
    %49 = arith.addf %42, %48 : vector<8x64xf32>
    %50 = vector.extract_strided_slice %10 {offsets = [5, 0, 0], sizes = [1, 8, 1], strides = [1, 1, 1]} : vector<32x8x1xf32> to vector<1x8x1xf32>
    %51 = vector.shape_cast %50 : vector<1x8x1xf32> to vector<8x1xf32>
    %52 = vector.extract_strided_slice %13 {offsets = [0, 5], sizes = [1, 64], strides = [1, 1]} : vector<1x95xf32> to vector<1x64xf32>
    %53 = vector.broadcast %51 : vector<8x1xf32> to vector<8x64xf32>
    %54 = vector.broadcast %52 : vector<1x64xf32> to vector<8x64xf32>
    %55 = arith.mulf %53, %54 : vector<8x64xf32>
    %56 = arith.addf %49, %55 : vector<8x64xf32>
    %57 = vector.extract_strided_slice %10 {offsets = [6, 0, 0], sizes = [1, 8, 1], strides = [1, 1, 1]} : vector<32x8x1xf32> to vector<1x8x1xf32>
    %58 = vector.shape_cast %57 : vector<1x8x1xf32> to vector<8x1xf32>
    %59 = vector.extract_strided_slice %13 {offsets = [0, 6], sizes = [1, 64], strides = [1, 1]} : vector<1x95xf32> to vector<1x64xf32>
    %60 = vector.broadcast %58 : vector<8x1xf32> to vector<8x64xf32>
    %61 = vector.broadcast %59 : vector<1x64xf32> to vector<8x64xf32>
    %62 = arith.mulf %60, %61 : vector<8x64xf32>
    %63 = arith.addf %56, %62 : vector<8x64xf32>
    %64 = vector.extract_strided_slice %10 {offsets = [7, 0, 0], sizes = [1, 8, 1], strides = [1, 1, 1]} : vector<32x8x1xf32> to vector<1x8x1xf32>
    %65 = vector.shape_cast %64 : vector<1x8x1xf32> to vector<8x1xf32>
    %66 = vector.extract_strided_slice %13 {offsets = [0, 7], sizes = [1, 64], strides = [1, 1]} : vector<1x95xf32> to vector<1x64xf32>
    %67 = vector.broadcast %65 : vector<8x1xf32> to vector<8x64xf32>
    %68 = vector.broadcast %66 : vector<1x64xf32> to vector<8x64xf32>
    %69 = arith.mulf %67, %68 : vector<8x64xf32>
    %70 = arith.addf %63, %69 : vector<8x64xf32>
    %71 = vector.extract_strided_slice %10 {offsets = [8, 0, 0], sizes = [1, 8, 1], strides = [1, 1, 1]} : vector<32x8x1xf32> to vector<1x8x1xf32>
    %72 = vector.shape_cast %71 : vector<1x8x1xf32> to vector<8x1xf32>
    %73 = vector.extract_strided_slice %13 {offsets = [0, 8], sizes = [1, 64], strides = [1, 1]} : vector<1x95xf32> to vector<1x64xf32>
    %74 = vector.broadcast %72 : vector<8x1xf32> to vector<8x64xf32>
    %75 = vector.broadcast %73 : vector<1x64xf32> to vector<8x64xf32>
    %76 = arith.mulf %74, %75 : vector<8x64xf32>
    %77 = arith.addf %70, %76 : vector<8x64xf32>
    %78 = vector.extract_strided_slice %10 {offsets = [9, 0, 0], sizes = [1, 8, 1], strides = [1, 1, 1]} : vector<32x8x1xf32> to vector<1x8x1xf32>
    %79 = vector.shape_cast %78 : vector<1x8x1xf32> to vector<8x1xf32>
    %80 = vector.extract_strided_slice %13 {offsets = [0, 9], sizes = [1, 64], strides = [1, 1]} : vector<1x95xf32> to vector<1x64xf32>
    %81 = vector.broadcast %79 : vector<8x1xf32> to vector<8x64xf32>
    %82 = vector.broadcast %80 : vector<1x64xf32> to vector<8x64xf32>
    %83 = arith.mulf %81, %82 : vector<8x64xf32>
    %84 = arith.addf %77, %83 : vector<8x64xf32>
    %85 = vector.extract_strided_slice %10 {offsets = [10, 0, 0], sizes = [1, 8, 1], strides = [1, 1, 1]} : vector<32x8x1xf32> to vector<1x8x1xf32>
    %86 = vector.shape_cast %85 : vector<1x8x1xf32> to vector<8x1xf32>
    %87 = vector.extract_strided_slice %13 {offsets = [0, 10], sizes = [1, 64], strides = [1, 1]} : vector<1x95xf32> to vector<1x64xf32>
    %88 = vector.broadcast %86 : vector<8x1xf32> to vector<8x64xf32>
    %89 = vector.broadcast %87 : vector<1x64xf32> to vector<8x64xf32>
    %90 = arith.mulf %88, %89 : vector<8x64xf32>
    %91 = arith.addf %84, %90 : vector<8x64xf32>
    %92 = vector.extract_strided_slice %10 {offsets = [11, 0, 0], sizes = [1, 8, 1], strides = [1, 1, 1]} : vector<32x8x1xf32> to vector<1x8x1xf32>
    %93 = vector.shape_cast %92 : vector<1x8x1xf32> to vector<8x1xf32>
    %94 = vector.extract_strided_slice %13 {offsets = [0, 11], sizes = [1, 64], strides = [1, 1]} : vector<1x95xf32> to vector<1x64xf32>
    %95 = vector.broadcast %93 : vector<8x1xf32> to vector<8x64xf32>
    %96 = vector.broadcast %94 : vector<1x64xf32> to vector<8x64xf32>
    %97 = arith.mulf %95, %96 : vector<8x64xf32>
    %98 = arith.addf %91, %97 : vector<8x64xf32>
    %99 = vector.extract_strided_slice %10 {offsets = [12, 0, 0], sizes = [1, 8, 1], strides = [1, 1, 1]} : vector<32x8x1xf32> to vector<1x8x1xf32>
    %100 = vector.shape_cast %99 : vector<1x8x1xf32> to vector<8x1xf32>
    %101 = vector.extract_strided_slice %13 {offsets = [0, 12], sizes = [1, 64], strides = [1, 1]} : vector<1x95xf32> to vector<1x64xf32>
    %102 = vector.broadcast %100 : vector<8x1xf32> to vector<8x64xf32>
    %103 = vector.broadcast %101 : vector<1x64xf32> to vector<8x64xf32>
    %104 = arith.mulf %102, %103 : vector<8x64xf32>
    %105 = arith.addf %98, %104 : vector<8x64xf32>
    %106 = vector.extract_strided_slice %10 {offsets = [13, 0, 0], sizes = [1, 8, 1], strides = [1, 1, 1]} : vector<32x8x1xf32> to vector<1x8x1xf32>
    %107 = vector.shape_cast %106 : vector<1x8x1xf32> to vector<8x1xf32>
    %108 = vector.extract_strided_slice %13 {offsets = [0, 13], sizes = [1, 64], strides = [1, 1]} : vector<1x95xf32> to vector<1x64xf32>
    %109 = vector.broadcast %107 : vector<8x1xf32> to vector<8x64xf32>
    %110 = vector.broadcast %108 : vector<1x64xf32> to vector<8x64xf32>
    %111 = arith.mulf %109, %110 : vector<8x64xf32>
    %112 = arith.addf %105, %111 : vector<8x64xf32>
    %113 = vector.extract_strided_slice %10 {offsets = [14, 0, 0], sizes = [1, 8, 1], strides = [1, 1, 1]} : vector<32x8x1xf32> to vector<1x8x1xf32>
    %114 = vector.shape_cast %113 : vector<1x8x1xf32> to vector<8x1xf32>
    %115 = vector.extract_strided_slice %13 {offsets = [0, 14], sizes = [1, 64], strides = [1, 1]} : vector<1x95xf32> to vector<1x64xf32>
    %116 = vector.broadcast %114 : vector<8x1xf32> to vector<8x64xf32>
    %117 = vector.broadcast %115 : vector<1x64xf32> to vector<8x64xf32>
    %118 = arith.mulf %116, %117 : vector<8x64xf32>
    %119 = arith.addf %112, %118 : vector<8x64xf32>
    %120 = vector.extract_strided_slice %10 {offsets = [15, 0, 0], sizes = [1, 8, 1], strides = [1, 1, 1]} : vector<32x8x1xf32> to vector<1x8x1xf32>
    %121 = vector.shape_cast %120 : vector<1x8x1xf32> to vector<8x1xf32>
    %122 = vector.extract_strided_slice %13 {offsets = [0, 15], sizes = [1, 64], strides = [1, 1]} : vector<1x95xf32> to vector<1x64xf32>
    %123 = vector.broadcast %121 : vector<8x1xf32> to vector<8x64xf32>
    %124 = vector.broadcast %122 : vector<1x64xf32> to vector<8x64xf32>
    %125 = arith.mulf %123, %124 : vector<8x64xf32>
    %126 = arith.addf %119, %125 : vector<8x64xf32>
    %127 = vector.extract_strided_slice %10 {offsets = [16, 0, 0], sizes = [1, 8, 1], strides = [1, 1, 1]} : vector<32x8x1xf32> to vector<1x8x1xf32>
    %128 = vector.shape_cast %127 : vector<1x8x1xf32> to vector<8x1xf32>
    %129 = vector.extract_strided_slice %13 {offsets = [0, 16], sizes = [1, 64], strides = [1, 1]} : vector<1x95xf32> to vector<1x64xf32>
    %130 = vector.broadcast %128 : vector<8x1xf32> to vector<8x64xf32>
    %131 = vector.broadcast %129 : vector<1x64xf32> to vector<8x64xf32>
    %132 = arith.mulf %130, %131 : vector<8x64xf32>
    %133 = arith.addf %126, %132 : vector<8x64xf32>
    %134 = vector.extract_strided_slice %10 {offsets = [17, 0, 0], sizes = [1, 8, 1], strides = [1, 1, 1]} : vector<32x8x1xf32> to vector<1x8x1xf32>
    %135 = vector.shape_cast %134 : vector<1x8x1xf32> to vector<8x1xf32>
    %136 = vector.extract_strided_slice %13 {offsets = [0, 17], sizes = [1, 64], strides = [1, 1]} : vector<1x95xf32> to vector<1x64xf32>
    %137 = vector.broadcast %135 : vector<8x1xf32> to vector<8x64xf32>
    %138 = vector.broadcast %136 : vector<1x64xf32> to vector<8x64xf32>
    %139 = arith.mulf %137, %138 : vector<8x64xf32>
    %140 = arith.addf %133, %139 : vector<8x64xf32>
    %141 = vector.extract_strided_slice %10 {offsets = [18, 0, 0], sizes = [1, 8, 1], strides = [1, 1, 1]} : vector<32x8x1xf32> to vector<1x8x1xf32>
    %142 = vector.shape_cast %141 : vector<1x8x1xf32> to vector<8x1xf32>
    %143 = vector.extract_strided_slice %13 {offsets = [0, 18], sizes = [1, 64], strides = [1, 1]} : vector<1x95xf32> to vector<1x64xf32>
    %144 = vector.broadcast %142 : vector<8x1xf32> to vector<8x64xf32>
    %145 = vector.broadcast %143 : vector<1x64xf32> to vector<8x64xf32>
    %146 = arith.mulf %144, %145 : vector<8x64xf32>
    %147 = arith.addf %140, %146 : vector<8x64xf32>
    %148 = vector.extract_strided_slice %10 {offsets = [19, 0, 0], sizes = [1, 8, 1], strides = [1, 1, 1]} : vector<32x8x1xf32> to vector<1x8x1xf32>
    %149 = vector.shape_cast %148 : vector<1x8x1xf32> to vector<8x1xf32>
    %150 = vector.extract_strided_slice %13 {offsets = [0, 19], sizes = [1, 64], strides = [1, 1]} : vector<1x95xf32> to vector<1x64xf32>
    %151 = vector.broadcast %149 : vector<8x1xf32> to vector<8x64xf32>
    %152 = vector.broadcast %150 : vector<1x64xf32> to vector<8x64xf32>
    %153 = arith.mulf %151, %152 : vector<8x64xf32>
    %154 = arith.addf %147, %153 : vector<8x64xf32>
    %155 = vector.extract_strided_slice %10 {offsets = [20, 0, 0], sizes = [1, 8, 1], strides = [1, 1, 1]} : vector<32x8x1xf32> to vector<1x8x1xf32>
    %156 = vector.shape_cast %155 : vector<1x8x1xf32> to vector<8x1xf32>
    %157 = vector.extract_strided_slice %13 {offsets = [0, 20], sizes = [1, 64], strides = [1, 1]} : vector<1x95xf32> to vector<1x64xf32>
    %158 = vector.broadcast %156 : vector<8x1xf32> to vector<8x64xf32>
    %159 = vector.broadcast %157 : vector<1x64xf32> to vector<8x64xf32>
    %160 = arith.mulf %158, %159 : vector<8x64xf32>
    %161 = arith.addf %154, %160 : vector<8x64xf32>
    %162 = vector.extract_strided_slice %10 {offsets = [21, 0, 0], sizes = [1, 8, 1], strides = [1, 1, 1]} : vector<32x8x1xf32> to vector<1x8x1xf32>
    %163 = vector.shape_cast %162 : vector<1x8x1xf32> to vector<8x1xf32>
    %164 = vector.extract_strided_slice %13 {offsets = [0, 21], sizes = [1, 64], strides = [1, 1]} : vector<1x95xf32> to vector<1x64xf32>
    %165 = vector.broadcast %163 : vector<8x1xf32> to vector<8x64xf32>
    %166 = vector.broadcast %164 : vector<1x64xf32> to vector<8x64xf32>
    %167 = arith.mulf %165, %166 : vector<8x64xf32>
    %168 = arith.addf %161, %167 : vector<8x64xf32>
    %169 = vector.extract_strided_slice %10 {offsets = [22, 0, 0], sizes = [1, 8, 1], strides = [1, 1, 1]} : vector<32x8x1xf32> to vector<1x8x1xf32>
    %170 = vector.shape_cast %169 : vector<1x8x1xf32> to vector<8x1xf32>
    %171 = vector.extract_strided_slice %13 {offsets = [0, 22], sizes = [1, 64], strides = [1, 1]} : vector<1x95xf32> to vector<1x64xf32>
    %172 = vector.broadcast %170 : vector<8x1xf32> to vector<8x64xf32>
    %173 = vector.broadcast %171 : vector<1x64xf32> to vector<8x64xf32>
    %174 = arith.mulf %172, %173 : vector<8x64xf32>
    %175 = arith.addf %168, %174 : vector<8x64xf32>
    %176 = vector.extract_strided_slice %10 {offsets = [23, 0, 0], sizes = [1, 8, 1], strides = [1, 1, 1]} : vector<32x8x1xf32> to vector<1x8x1xf32>
    %177 = vector.shape_cast %176 : vector<1x8x1xf32> to vector<8x1xf32>
    %178 = vector.extract_strided_slice %13 {offsets = [0, 23], sizes = [1, 64], strides = [1, 1]} : vector<1x95xf32> to vector<1x64xf32>
    %179 = vector.broadcast %177 : vector<8x1xf32> to vector<8x64xf32>
    %180 = vector.broadcast %178 : vector<1x64xf32> to vector<8x64xf32>
    %181 = arith.mulf %179, %180 : vector<8x64xf32>
    %182 = arith.addf %175, %181 : vector<8x64xf32>
    %183 = vector.extract_strided_slice %10 {offsets = [24, 0, 0], sizes = [1, 8, 1], strides = [1, 1, 1]} : vector<32x8x1xf32> to vector<1x8x1xf32>
    %184 = vector.shape_cast %183 : vector<1x8x1xf32> to vector<8x1xf32>
    %185 = vector.extract_strided_slice %13 {offsets = [0, 24], sizes = [1, 64], strides = [1, 1]} : vector<1x95xf32> to vector<1x64xf32>
    %186 = vector.broadcast %184 : vector<8x1xf32> to vector<8x64xf32>
    %187 = vector.broadcast %185 : vector<1x64xf32> to vector<8x64xf32>
    %188 = arith.mulf %186, %187 : vector<8x64xf32>
    %189 = arith.addf %182, %188 : vector<8x64xf32>
    %190 = vector.extract_strided_slice %10 {offsets = [25, 0, 0], sizes = [1, 8, 1], strides = [1, 1, 1]} : vector<32x8x1xf32> to vector<1x8x1xf32>
    %191 = vector.shape_cast %190 : vector<1x8x1xf32> to vector<8x1xf32>
    %192 = vector.extract_strided_slice %13 {offsets = [0, 25], sizes = [1, 64], strides = [1, 1]} : vector<1x95xf32> to vector<1x64xf32>
    %193 = vector.broadcast %191 : vector<8x1xf32> to vector<8x64xf32>
    %194 = vector.broadcast %192 : vector<1x64xf32> to vector<8x64xf32>
    %195 = arith.mulf %193, %194 : vector<8x64xf32>
    %196 = arith.addf %189, %195 : vector<8x64xf32>
    %197 = vector.extract_strided_slice %10 {offsets = [26, 0, 0], sizes = [1, 8, 1], strides = [1, 1, 1]} : vector<32x8x1xf32> to vector<1x8x1xf32>
    %198 = vector.shape_cast %197 : vector<1x8x1xf32> to vector<8x1xf32>
    %199 = vector.extract_strided_slice %13 {offsets = [0, 26], sizes = [1, 64], strides = [1, 1]} : vector<1x95xf32> to vector<1x64xf32>
    %200 = vector.broadcast %198 : vector<8x1xf32> to vector<8x64xf32>
    %201 = vector.broadcast %199 : vector<1x64xf32> to vector<8x64xf32>
    %202 = arith.mulf %200, %201 : vector<8x64xf32>
    %203 = arith.addf %196, %202 : vector<8x64xf32>
    %204 = vector.extract_strided_slice %10 {offsets = [27, 0, 0], sizes = [1, 8, 1], strides = [1, 1, 1]} : vector<32x8x1xf32> to vector<1x8x1xf32>
    %205 = vector.shape_cast %204 : vector<1x8x1xf32> to vector<8x1xf32>
    %206 = vector.extract_strided_slice %13 {offsets = [0, 27], sizes = [1, 64], strides = [1, 1]} : vector<1x95xf32> to vector<1x64xf32>
    %207 = vector.broadcast %205 : vector<8x1xf32> to vector<8x64xf32>
    %208 = vector.broadcast %206 : vector<1x64xf32> to vector<8x64xf32>
    %209 = arith.mulf %207, %208 : vector<8x64xf32>
    %210 = arith.addf %203, %209 : vector<8x64xf32>
    %211 = vector.extract_strided_slice %10 {offsets = [28, 0, 0], sizes = [1, 8, 1], strides = [1, 1, 1]} : vector<32x8x1xf32> to vector<1x8x1xf32>
    %212 = vector.shape_cast %211 : vector<1x8x1xf32> to vector<8x1xf32>
    %213 = vector.extract_strided_slice %13 {offsets = [0, 28], sizes = [1, 64], strides = [1, 1]} : vector<1x95xf32> to vector<1x64xf32>
    %214 = vector.broadcast %212 : vector<8x1xf32> to vector<8x64xf32>
    %215 = vector.broadcast %213 : vector<1x64xf32> to vector<8x64xf32>
    %216 = arith.mulf %214, %215 : vector<8x64xf32>
    %217 = arith.addf %210, %216 : vector<8x64xf32>
    %218 = vector.extract_strided_slice %10 {offsets = [29, 0, 0], sizes = [1, 8, 1], strides = [1, 1, 1]} : vector<32x8x1xf32> to vector<1x8x1xf32>
    %219 = vector.shape_cast %218 : vector<1x8x1xf32> to vector<8x1xf32>
    %220 = vector.extract_strided_slice %13 {offsets = [0, 29], sizes = [1, 64], strides = [1, 1]} : vector<1x95xf32> to vector<1x64xf32>
    %221 = vector.broadcast %219 : vector<8x1xf32> to vector<8x64xf32>
    %222 = vector.broadcast %220 : vector<1x64xf32> to vector<8x64xf32>
    %223 = arith.mulf %221, %222 : vector<8x64xf32>
    %224 = arith.addf %217, %223 : vector<8x64xf32>
    %225 = vector.extract_strided_slice %10 {offsets = [30, 0, 0], sizes = [1, 8, 1], strides = [1, 1, 1]} : vector<32x8x1xf32> to vector<1x8x1xf32>
    %226 = vector.shape_cast %225 : vector<1x8x1xf32> to vector<8x1xf32>
    %227 = vector.extract_strided_slice %13 {offsets = [0, 30], sizes = [1, 64], strides = [1, 1]} : vector<1x95xf32> to vector<1x64xf32>
    %228 = vector.broadcast %226 : vector<8x1xf32> to vector<8x64xf32>
    %229 = vector.broadcast %227 : vector<1x64xf32> to vector<8x64xf32>
    %230 = arith.mulf %228, %229 : vector<8x64xf32>
    %231 = arith.addf %224, %230 : vector<8x64xf32>
    %232 = vector.extract_strided_slice %10 {offsets = [31, 0, 0], sizes = [1, 8, 1], strides = [1, 1, 1]} : vector<32x8x1xf32> to vector<1x8x1xf32>
    %233 = vector.shape_cast %232 : vector<1x8x1xf32> to vector<8x1xf32>
    %234 = vector.extract_strided_slice %13 {offsets = [0, 31], sizes = [1, 64], strides = [1, 1]} : vector<1x95xf32> to vector<1x64xf32>
    %235 = vector.broadcast %233 : vector<8x1xf32> to vector<8x64xf32>
    %236 = vector.broadcast %234 : vector<1x64xf32> to vector<8x64xf32>
    %237 = arith.mulf %235, %236 : vector<8x64xf32>
    %238 = arith.addf %231, %237 : vector<8x64xf32>
    %cst_19 = arith.constant 0.000000e+00 : f32
    %239 = vector.broadcast %cst_19 : f32 to vector<8x15xf32>
    %c0_20 = arith.constant 0 : index
    %c0_21 = arith.constant 0 : index
    %c0_22 = arith.constant 0 : index
    %240 = vector.load %arg16[%c0_20, %c0_21, %c0_22] : memref<4x8x95xf32, #tpu.memory_space<vmem>>, vector<1x8x15xf32>
    %241 = vector.shape_cast %240 : vector<1x8x15xf32> to vector<8x15xf32>
    %242 = vector.shape_cast %239 : vector<8x15xf32> to vector<1x8x15xf32>
    tpu.vector_store %arg16[%c0_20, %c0_21, %c0_22], %242 {strides = array<i32>} : memref<4x8x95xf32, #tpu.memory_space<vmem>>, vector<1x8x15xf32>,
    %243 = vector.broadcast %11 : vector<8x1xf32> to vector<8x64xf32>
    %244 = arith.addf %238, %243 : vector<8x64xf32>
    %cst_23 = arith.constant 0.000000e+00 : f32
    %245 = vector.broadcast %cst_23 : f32 to vector<8x64xf32>
    %246 = arith.cmpf ogt, %244, %245 : vector<8x64xf32>
    %cst_24 = arith.constant 0.000000e+00 : f32
    %247 = vector.broadcast %cst_24 : f32 to vector<8x64xf32>
    %248 = arith.minimumf %244, %247 : vector<8x64xf32>
    %249 = math.exp %248 : vector<8x64xf32>
    %cst_25 = arith.constant 1.000000e+00 : f32
    %250 = vector.broadcast %cst_25 : f32 to vector<8x64xf32>
    %251 = arith.subf %249, %250 : vector<8x64xf32>
    %252 = arith.select %246, %244, %251 : vector<8x64xi1>, vector<8x64xf32>
    %c0_26 = arith.constant 0 : index
    %c0_27 = arith.constant 0 : index
    %c15 = arith.constant 15 : index
    %253 = vector.load %arg16[%c0_26, %c0_27, %c15] : memref<4x8x95xf32, #tpu.memory_space<vmem>>, vector<1x8x64xf32>
    %254 = vector.shape_cast %253 : vector<1x8x64xf32> to vector<8x64xf32>
    %255 = vector.shape_cast %252 : vector<8x64xf32> to vector<1x8x64xf32>
    tpu.vector_store %arg16[%c0_26, %c0_27, %c15], %255 {strides = array<i32>} : memref<4x8x95xf32, #tpu.memory_space<vmem>>, vector<1x8x64xf32>,
    %cst_28 = arith.constant 0.000000e+00 : f32
    %256 = vector.broadcast %cst_28 : f32 to vector<8x16xf32>
    %c0_29 = arith.constant 0 : index
    %c0_30 = arith.constant 0 : index
    %c79 = arith.constant 79 : index
    %257 = vector.load %arg16[%c0_29, %c0_30, %c79] : memref<4x8x95xf32, #tpu.memory_space<vmem>>, vector<1x8x16xf32>
    %258 = vector.shape_cast %257 : vector<1x8x16xf32> to vector<8x16xf32>
    %259 = vector.shape_cast %256 : vector<8x16xf32> to vector<1x8x16xf32>
    tpu.vector_store %arg16[%c0_29, %c0_30, %c79], %259 {strides = array<i32>} : memref<4x8x95xf32, #tpu.memory_space<vmem>>, vector<1x8x16xf32>,
    %260 = vector.extract_strided_slice %9 {offsets = [1, 0], sizes = [1, 95], strides = [1, 1]} : vector<4x95xf32> to vector<1x95xf32>
    %cst_31 = arith.constant 0.000000e+00 : f32
    %261 = vector.broadcast %cst_31 : f32 to vector<8x64xf32>
    %262 = vector.extract_strided_slice %10 {offsets = [0, 0, 0], sizes = [1, 8, 1], strides = [1, 1, 1]} : vector<32x8x1xf32> to vector<1x8x1xf32>
    %263 = vector.shape_cast %262 : vector<1x8x1xf32> to vector<8x1xf32>
    %264 = vector.extract_strided_slice %260 {offsets = [0, 0], sizes = [1, 64], strides = [1, 1]} : vector<1x95xf32> to vector<1x64xf32>
    %265 = vector.broadcast %263 : vector<8x1xf32> to vector<8x64xf32>
    %266 = vector.broadcast %264 : vector<1x64xf32> to vector<8x64xf32>
    %267 = arith.mulf %265, %266 : vector<8x64xf32>
    %268 = arith.addf %261, %267 : vector<8x64xf32>
    %269 = vector.extract_strided_slice %10 {offsets = [1, 0, 0], sizes = [1, 8, 1], strides = [1, 1, 1]} : vector<32x8x1xf32> to vector<1x8x1xf32>
    %270 = vector.shape_cast %269 : vector<1x8x1xf32> to vector<8x1xf32>
    %271 = vector.extract_strided_slice %260 {offsets = [0, 1], sizes = [1, 64], strides = [1, 1]} : vector<1x95xf32> to vector<1x64xf32>
    %272 = vector.broadcast %270 : vector<8x1xf32> to vector<8x64xf32>
    %273 = vector.broadcast %271 : vector<1x64xf32> to vector<8x64xf32>
    %274 = arith.mulf %272, %273 : vector<8x64xf32>
    %275 = arith.addf %268, %274 : vector<8x64xf32>
    %276 = vector.extract_strided_slice %10 {offsets = [2, 0, 0], sizes = [1, 8, 1], strides = [1, 1, 1]} : vector<32x8x1xf32> to vector<1x8x1xf32>
    %277 = vector.shape_cast %276 : vector<1x8x1xf32> to vector<8x1xf32>
    %278 = vector.extract_strided_slice %260 {offsets = [0, 2], sizes = [1, 64], strides = [1, 1]} : vector<1x95xf32> to vector<1x64xf32>
    %279 = vector.broadcast %277 : vector<8x1xf32> to vector<8x64xf32>
    %280 = vector.broadcast %278 : vector<1x64xf32> to vector<8x64xf32>
    %281 = arith.mulf %279, %280 : vector<8x64xf32>
    %282 = arith.addf %275, %281 : vector<8x64xf32>
    %283 = vector.extract_strided_slice %10 {offsets = [3, 0, 0], sizes = [1, 8, 1], strides = [1, 1, 1]} : vector<32x8x1xf32> to vector<1x8x1xf32>
    %284 = vector.shape_cast %283 : vector<1x8x1xf32> to vector<8x1xf32>
    %285 = vector.extract_strided_slice %260 {offsets = [0, 3], sizes = [1, 64], strides = [1, 1]} : vector<1x95xf32> to vector<1x64xf32>
    %286 = vector.broadcast %284 : vector<8x1xf32> to vector<8x64xf32>
    %287 = vector.broadcast %285 : vector<1x64xf32> to vector<8x64xf32>
    %288 = arith.mulf %286, %287 : vector<8x64xf32>
    %289 = arith.addf %282, %288 : vector<8x64xf32>
    %290 = vector.extract_strided_slice %10 {offsets = [4, 0, 0], sizes = [1, 8, 1], strides = [1, 1, 1]} : vector<32x8x1xf32> to vector<1x8x1xf32>
    %291 = vector.shape_cast %290 : vector<1x8x1xf32> to vector<8x1xf32>
    %292 = vector.extract_strided_slice %260 {offsets = [0, 4], sizes = [1, 64], strides = [1, 1]} : vector<1x95xf32> to vector<1x64xf32>
    %293 = vector.broadcast %291 : vector<8x1xf32> to vector<8x64xf32>
    %294 = vector.broadcast %292 : vector<1x64xf32> to vector<8x64xf32>
    %295 = arith.mulf %293, %294 : vector<8x64xf32>
    %296 = arith.addf %289, %295 : vector<8x64xf32>
    %297 = vector.extract_strided_slice %10 {offsets = [5, 0, 0], sizes = [1, 8, 1], strides = [1, 1, 1]} : vector<32x8x1xf32> to vector<1x8x1xf32>
    %298 = vector.shape_cast %297 : vector<1x8x1xf32> to vector<8x1xf32>
    %299 = vector.extract_strided_slice %260 {offsets = [0, 5], sizes = [1, 64], strides = [1, 1]} : vector<1x95xf32> to vector<1x64xf32>
    %300 = vector.broadcast %298 : vector<8x1xf32> to vector<8x64xf32>
    %301 = vector.broadcast %299 : vector<1x64xf32> to vector<8x64xf32>
    %302 = arith.mulf %300, %301 : vector<8x64xf32>
    %303 = arith.addf %296, %302 : vector<8x64xf32>
    %304 = vector.extract_strided_slice %10 {offsets = [6, 0, 0], sizes = [1, 8, 1], strides = [1, 1, 1]} : vector<32x8x1xf32> to vector<1x8x1xf32>
    %305 = vector.shape_cast %304 : vector<1x8x1xf32> to vector<8x1xf32>
    %306 = vector.extract_strided_slice %260 {offsets = [0, 6], sizes = [1, 64], strides = [1, 1]} : vector<1x95xf32> to vector<1x64xf32>
    %307 = vector.broadcast %305 : vector<8x1xf32> to vector<8x64xf32>
    %308 = vector.broadcast %306 : vector<1x64xf32> to vector<8x64xf32>
    %309 = arith.mulf %307, %308 : vector<8x64xf32>
    %310 = arith.addf %303, %309 : vector<8x64xf32>
    %311 = vector.extract_strided_slice %10 {offsets = [7, 0, 0], sizes = [1, 8, 1], strides = [1, 1, 1]} : vector<32x8x1xf32> to vector<1x8x1xf32>
    %312 = vector.shape_cast %311 : vector<1x8x1xf32> to vector<8x1xf32>
    %313 = vector.extract_strided_slice %260 {offsets = [0, 7], sizes = [1, 64], strides = [1, 1]} : vector<1x95xf32> to vector<1x64xf32>
    %314 = vector.broadcast %312 : vector<8x1xf32> to vector<8x64xf32>
    %315 = vector.broadcast %313 : vector<1x64xf32> to vector<8x64xf32>
    %316 = arith.mulf %314, %315 : vector<8x64xf32>
    %317 = arith.addf %310, %316 : vector<8x64xf32>
    %318 = vector.extract_strided_slice %10 {offsets = [8, 0, 0], sizes = [1, 8, 1], strides = [1, 1, 1]} : vector<32x8x1xf32> to vector<1x8x1xf32>
    %319 = vector.shape_cast %318 : vector<1x8x1xf32> to vector<8x1xf32>
    %320 = vector.extract_strided_slice %260 {offsets = [0, 8], sizes = [1, 64], strides = [1, 1]} : vector<1x95xf32> to vector<1x64xf32>
    %321 = vector.broadcast %319 : vector<8x1xf32> to vector<8x64xf32>
    %322 = vector.broadcast %320 : vector<1x64xf32> to vector<8x64xf32>
    %323 = arith.mulf %321, %322 : vector<8x64xf32>
    %324 = arith.addf %317, %323 : vector<8x64xf32>
    %325 = vector.extract_strided_slice %10 {offsets = [9, 0, 0], sizes = [1, 8, 1], strides = [1, 1, 1]} : vector<32x8x1xf32> to vector<1x8x1xf32>
    %326 = vector.shape_cast %325 : vector<1x8x1xf32> to vector<8x1xf32>
    %327 = vector.extract_strided_slice %260 {offsets = [0, 9], sizes = [1, 64], strides = [1, 1]} : vector<1x95xf32> to vector<1x64xf32>
    %328 = vector.broadcast %326 : vector<8x1xf32> to vector<8x64xf32>
    %329 = vector.broadcast %327 : vector<1x64xf32> to vector<8x64xf32>
    %330 = arith.mulf %328, %329 : vector<8x64xf32>
    %331 = arith.addf %324, %330 : vector<8x64xf32>
    %332 = vector.extract_strided_slice %10 {offsets = [10, 0, 0], sizes = [1, 8, 1], strides = [1, 1, 1]} : vector<32x8x1xf32> to vector<1x8x1xf32>
    %333 = vector.shape_cast %332 : vector<1x8x1xf32> to vector<8x1xf32>
    %334 = vector.extract_strided_slice %260 {offsets = [0, 10], sizes = [1, 64], strides = [1, 1]} : vector<1x95xf32> to vector<1x64xf32>
    %335 = vector.broadcast %333 : vector<8x1xf32> to vector<8x64xf32>
    %336 = vector.broadcast %334 : vector<1x64xf32> to vector<8x64xf32>
    %337 = arith.mulf %335, %336 : vector<8x64xf32>
    %338 = arith.addf %331, %337 : vector<8x64xf32>
    %339 = vector.extract_strided_slice %10 {offsets = [11, 0, 0], sizes = [1, 8, 1], strides = [1, 1, 1]} : vector<32x8x1xf32> to vector<1x8x1xf32>
    %340 = vector.shape_cast %339 : vector<1x8x1xf32> to vector<8x1xf32>
    %341 = vector.extract_strided_slice %260 {offsets = [0, 11], sizes = [1, 64], strides = [1, 1]} : vector<1x95xf32> to vector<1x64xf32>
    %342 = vector.broadcast %340 : vector<8x1xf32> to vector<8x64xf32>
    %343 = vector.broadcast %341 : vector<1x64xf32> to vector<8x64xf32>
    %344 = arith.mulf %342, %343 : vector<8x64xf32>
    %345 = arith.addf %338, %344 : vector<8x64xf32>
    %346 = vector.extract_strided_slice %10 {offsets = [12, 0, 0], sizes = [1, 8, 1], strides = [1, 1, 1]} : vector<32x8x1xf32> to vector<1x8x1xf32>
    %347 = vector.shape_cast %346 : vector<1x8x1xf32> to vector<8x1xf32>
    %348 = vector.extract_strided_slice %260 {offsets = [0, 12], sizes = [1, 64], strides = [1, 1]} : vector<1x95xf32> to vector<1x64xf32>
    %349 = vector.broadcast %347 : vector<8x1xf32> to vector<8x64xf32>
    %350 = vector.broadcast %348 : vector<1x64xf32> to vector<8x64xf32>
    %351 = arith.mulf %349, %350 : vector<8x64xf32>
    %352 = arith.addf %345, %351 : vector<8x64xf32>
    %353 = vector.extract_strided_slice %10 {offsets = [13, 0, 0], sizes = [1, 8, 1], strides = [1, 1, 1]} : vector<32x8x1xf32> to vector<1x8x1xf32>
    %354 = vector.shape_cast %353 : vector<1x8x1xf32> to vector<8x1xf32>
    %355 = vector.extract_strided_slice %260 {offsets = [0, 13], sizes = [1, 64], strides = [1, 1]} : vector<1x95xf32> to vector<1x64xf32>
    %356 = vector.broadcast %354 : vector<8x1xf32> to vector<8x64xf32>
    %357 = vector.broadcast %355 : vector<1x64xf32> to vector<8x64xf32>
    %358 = arith.mulf %356, %357 : vector<8x64xf32>
    %359 = arith.addf %352, %358 : vector<8x64xf32>
    %360 = vector.extract_strided_slice %10 {offsets = [14, 0, 0], sizes = [1, 8, 1], strides = [1, 1, 1]} : vector<32x8x1xf32> to vector<1x8x1xf32>
    %361 = vector.shape_cast %360 : vector<1x8x1xf32> to vector<8x1xf32>
    %362 = vector.extract_strided_slice %260 {offsets = [0, 14], sizes = [1, 64], strides = [1, 1]} : vector<1x95xf32> to vector<1x64xf32>
    %363 = vector.broadcast %361 : vector<8x1xf32> to vector<8x64xf32>
    %364 = vector.broadcast %362 : vector<1x64xf32> to vector<8x64xf32>
    %365 = arith.mulf %363, %364 : vector<8x64xf32>
    %366 = arith.addf %359, %365 : vector<8x64xf32>
    %367 = vector.extract_strided_slice %10 {offsets = [15, 0, 0], sizes = [1, 8, 1], strides = [1, 1, 1]} : vector<32x8x1xf32> to vector<1x8x1xf32>
    %368 = vector.shape_cast %367 : vector<1x8x1xf32> to vector<8x1xf32>
    %369 = vector.extract_strided_slice %260 {offsets = [0, 15], sizes = [1, 64], strides = [1, 1]} : vector<1x95xf32> to vector<1x64xf32>
    %370 = vector.broadcast %368 : vector<8x1xf32> to vector<8x64xf32>
    %371 = vector.broadcast %369 : vector<1x64xf32> to vector<8x64xf32>
    %372 = arith.mulf %370, %371 : vector<8x64xf32>
    %373 = arith.addf %366, %372 : vector<8x64xf32>
    %374 = vector.extract_strided_slice %10 {offsets = [16, 0, 0], sizes = [1, 8, 1], strides = [1, 1, 1]} : vector<32x8x1xf32> to vector<1x8x1xf32>
    %375 = vector.shape_cast %374 : vector<1x8x1xf32> to vector<8x1xf32>
    %376 = vector.extract_strided_slice %260 {offsets = [0, 16], sizes = [1, 64], strides = [1, 1]} : vector<1x95xf32> to vector<1x64xf32>
    %377 = vector.broadcast %375 : vector<8x1xf32> to vector<8x64xf32>
    %378 = vector.broadcast %376 : vector<1x64xf32> to vector<8x64xf32>
    %379 = arith.mulf %377, %378 : vector<8x64xf32>
    %380 = arith.addf %373, %379 : vector<8x64xf32>
    %381 = vector.extract_strided_slice %10 {offsets = [17, 0, 0], sizes = [1, 8, 1], strides = [1, 1, 1]} : vector<32x8x1xf32> to vector<1x8x1xf32>
    %382 = vector.shape_cast %381 : vector<1x8x1xf32> to vector<8x1xf32>
    %383 = vector.extract_strided_slice %260 {offsets = [0, 17], sizes = [1, 64], strides = [1, 1]} : vector<1x95xf32> to vector<1x64xf32>
    %384 = vector.broadcast %382 : vector<8x1xf32> to vector<8x64xf32>
    %385 = vector.broadcast %383 : vector<1x64xf32> to vector<8x64xf32>
    %386 = arith.mulf %384, %385 : vector<8x64xf32>
    %387 = arith.addf %380, %386 : vector<8x64xf32>
    %388 = vector.extract_strided_slice %10 {offsets = [18, 0, 0], sizes = [1, 8, 1], strides = [1, 1, 1]} : vector<32x8x1xf32> to vector<1x8x1xf32>
    %389 = vector.shape_cast %388 : vector<1x8x1xf32> to vector<8x1xf32>
    %390 = vector.extract_strided_slice %260 {offsets = [0, 18], sizes = [1, 64], strides = [1, 1]} : vector<1x95xf32> to vector<1x64xf32>
    %391 = vector.broadcast %389 : vector<8x1xf32> to vector<8x64xf32>
    %392 = vector.broadcast %390 : vector<1x64xf32> to vector<8x64xf32>
    %393 = arith.mulf %391, %392 : vector<8x64xf32>
    %394 = arith.addf %387, %393 : vector<8x64xf32>
    %395 = vector.extract_strided_slice %10 {offsets = [19, 0, 0], sizes = [1, 8, 1], strides = [1, 1, 1]} : vector<32x8x1xf32> to vector<1x8x1xf32>
    %396 = vector.shape_cast %395 : vector<1x8x1xf32> to vector<8x1xf32>
    %397 = vector.extract_strided_slice %260 {offsets = [0, 19], sizes = [1, 64], strides = [1, 1]} : vector<1x95xf32> to vector<1x64xf32>
    %398 = vector.broadcast %396 : vector<8x1xf32> to vector<8x64xf32>
    %399 = vector.broadcast %397 : vector<1x64xf32> to vector<8x64xf32>
    %400 = arith.mulf %398, %399 : vector<8x64xf32>
    %401 = arith.addf %394, %400 : vector<8x64xf32>
    %402 = vector.extract_strided_slice %10 {offsets = [20, 0, 0], sizes = [1, 8, 1], strides = [1, 1, 1]} : vector<32x8x1xf32> to vector<1x8x1xf32>
    %403 = vector.shape_cast %402 : vector<1x8x1xf32> to vector<8x1xf32>
    %404 = vector.extract_strided_slice %260 {offsets = [0, 20], sizes = [1, 64], strides = [1, 1]} : vector<1x95xf32> to vector<1x64xf32>
    %405 = vector.broadcast %403 : vector<8x1xf32> to vector<8x64xf32>
    %406 = vector.broadcast %404 : vector<1x64xf32> to vector<8x64xf32>
    %407 = arith.mulf %405, %406 : vector<8x64xf32>
    %408 = arith.addf %401, %407 : vector<8x64xf32>
    %409 = vector.extract_strided_slice %10 {offsets = [21, 0, 0], sizes = [1, 8, 1], strides = [1, 1, 1]} : vector<32x8x1xf32> to vector<1x8x1xf32>
    %410 = vector.shape_cast %409 : vector<1x8x1xf32> to vector<8x1xf32>
    %411 = vector.extract_strided_slice %260 {offsets = [0, 21], sizes = [1, 64], strides = [1, 1]} : vector<1x95xf32> to vector<1x64xf32>
    %412 = vector.broadcast %410 : vector<8x1xf32> to vector<8x64xf32>
    %413 = vector.broadcast %411 : vector<1x64xf32> to vector<8x64xf32>
    %414 = arith.mulf %412, %413 : vector<8x64xf32>
    %415 = arith.addf %408, %414 : vector<8x64xf32>
    %416 = vector.extract_strided_slice %10 {offsets = [22, 0, 0], sizes = [1, 8, 1], strides = [1, 1, 1]} : vector<32x8x1xf32> to vector<1x8x1xf32>
    %417 = vector.shape_cast %416 : vector<1x8x1xf32> to vector<8x1xf32>
    %418 = vector.extract_strided_slice %260 {offsets = [0, 22], sizes = [1, 64], strides = [1, 1]} : vector<1x95xf32> to vector<1x64xf32>
    %419 = vector.broadcast %417 : vector<8x1xf32> to vector<8x64xf32>
    %420 = vector.broadcast %418 : vector<1x64xf32> to vector<8x64xf32>
    %421 = arith.mulf %419, %420 : vector<8x64xf32>
    %422 = arith.addf %415, %421 : vector<8x64xf32>
    %423 = vector.extract_strided_slice %10 {offsets = [23, 0, 0], sizes = [1, 8, 1], strides = [1, 1, 1]} : vector<32x8x1xf32> to vector<1x8x1xf32>
    %424 = vector.shape_cast %423 : vector<1x8x1xf32> to vector<8x1xf32>
    %425 = vector.extract_strided_slice %260 {offsets = [0, 23], sizes = [1, 64], strides = [1, 1]} : vector<1x95xf32> to vector<1x64xf32>
    %426 = vector.broadcast %424 : vector<8x1xf32> to vector<8x64xf32>
    %427 = vector.broadcast %425 : vector<1x64xf32> to vector<8x64xf32>
    %428 = arith.mulf %426, %427 : vector<8x64xf32>
    %429 = arith.addf %422, %428 : vector<8x64xf32>
    %430 = vector.extract_strided_slice %10 {offsets = [24, 0, 0], sizes = [1, 8, 1], strides = [1, 1, 1]} : vector<32x8x1xf32> to vector<1x8x1xf32>
    %431 = vector.shape_cast %430 : vector<1x8x1xf32> to vector<8x1xf32>
    %432 = vector.extract_strided_slice %260 {offsets = [0, 24], sizes = [1, 64], strides = [1, 1]} : vector<1x95xf32> to vector<1x64xf32>
    %433 = vector.broadcast %431 : vector<8x1xf32> to vector<8x64xf32>
    %434 = vector.broadcast %432 : vector<1x64xf32> to vector<8x64xf32>
    %435 = arith.mulf %433, %434 : vector<8x64xf32>
    %436 = arith.addf %429, %435 : vector<8x64xf32>
    %437 = vector.extract_strided_slice %10 {offsets = [25, 0, 0], sizes = [1, 8, 1], strides = [1, 1, 1]} : vector<32x8x1xf32> to vector<1x8x1xf32>
    %438 = vector.shape_cast %437 : vector<1x8x1xf32> to vector<8x1xf32>
    %439 = vector.extract_strided_slice %260 {offsets = [0, 25], sizes = [1, 64], strides = [1, 1]} : vector<1x95xf32> to vector<1x64xf32>
    %440 = vector.broadcast %438 : vector<8x1xf32> to vector<8x64xf32>
    %441 = vector.broadcast %439 : vector<1x64xf32> to vector<8x64xf32>
    %442 = arith.mulf %440, %441 : vector<8x64xf32>
    %443 = arith.addf %436, %442 : vector<8x64xf32>
    %444 = vector.extract_strided_slice %10 {offsets = [26, 0, 0], sizes = [1, 8, 1], strides = [1, 1, 1]} : vector<32x8x1xf32> to vector<1x8x1xf32>
    %445 = vector.shape_cast %444 : vector<1x8x1xf32> to vector<8x1xf32>
    %446 = vector.extract_strided_slice %260 {offsets = [0, 26], sizes = [1, 64], strides = [1, 1]} : vector<1x95xf32> to vector<1x64xf32>
    %447 = vector.broadcast %445 : vector<8x1xf32> to vector<8x64xf32>
    %448 = vector.broadcast %446 : vector<1x64xf32> to vector<8x64xf32>
    %449 = arith.mulf %447, %448 : vector<8x64xf32>
    %450 = arith.addf %443, %449 : vector<8x64xf32>
    %451 = vector.extract_strided_slice %10 {offsets = [27, 0, 0], sizes = [1, 8, 1], strides = [1, 1, 1]} : vector<32x8x1xf32> to vector<1x8x1xf32>
    %452 = vector.shape_cast %451 : vector<1x8x1xf32> to vector<8x1xf32>
    %453 = vector.extract_strided_slice %260 {offsets = [0, 27], sizes = [1, 64], strides = [1, 1]} : vector<1x95xf32> to vector<1x64xf32>
    %454 = vector.broadcast %452 : vector<8x1xf32> to vector<8x64xf32>
    %455 = vector.broadcast %453 : vector<1x64xf32> to vector<8x64xf32>
    %456 = arith.mulf %454, %455 : vector<8x64xf32>
    %457 = arith.addf %450, %456 : vector<8x64xf32>
    %458 = vector.extract_strided_slice %10 {offsets = [28, 0, 0], sizes = [1, 8, 1], strides = [1, 1, 1]} : vector<32x8x1xf32> to vector<1x8x1xf32>
    %459 = vector.shape_cast %458 : vector<1x8x1xf32> to vector<8x1xf32>
    %460 = vector.extract_strided_slice %260 {offsets = [0, 28], sizes = [1, 64], strides = [1, 1]} : vector<1x95xf32> to vector<1x64xf32>
    %461 = vector.broadcast %459 : vector<8x1xf32> to vector<8x64xf32>
    %462 = vector.broadcast %460 : vector<1x64xf32> to vector<8x64xf32>
    %463 = arith.mulf %461, %462 : vector<8x64xf32>
    %464 = arith.addf %457, %463 : vector<8x64xf32>
    %465 = vector.extract_strided_slice %10 {offsets = [29, 0, 0], sizes = [1, 8, 1], strides = [1, 1, 1]} : vector<32x8x1xf32> to vector<1x8x1xf32>
    %466 = vector.shape_cast %465 : vector<1x8x1xf32> to vector<8x1xf32>
    %467 = vector.extract_strided_slice %260 {offsets = [0, 29], sizes = [1, 64], strides = [1, 1]} : vector<1x95xf32> to vector<1x64xf32>
    %468 = vector.broadcast %466 : vector<8x1xf32> to vector<8x64xf32>
    %469 = vector.broadcast %467 : vector<1x64xf32> to vector<8x64xf32>
    %470 = arith.mulf %468, %469 : vector<8x64xf32>
    %471 = arith.addf %464, %470 : vector<8x64xf32>
    %472 = vector.extract_strided_slice %10 {offsets = [30, 0, 0], sizes = [1, 8, 1], strides = [1, 1, 1]} : vector<32x8x1xf32> to vector<1x8x1xf32>
    %473 = vector.shape_cast %472 : vector<1x8x1xf32> to vector<8x1xf32>
    %474 = vector.extract_strided_slice %260 {offsets = [0, 30], sizes = [1, 64], strides = [1, 1]} : vector<1x95xf32> to vector<1x64xf32>
    %475 = vector.broadcast %473 : vector<8x1xf32> to vector<8x64xf32>
    %476 = vector.broadcast %474 : vector<1x64xf32> to vector<8x64xf32>
    %477 = arith.mulf %475, %476 : vector<8x64xf32>
    %478 = arith.addf %471, %477 : vector<8x64xf32>
    %479 = vector.extract_strided_slice %10 {offsets = [31, 0, 0], sizes = [1, 8, 1], strides = [1, 1, 1]} : vector<32x8x1xf32> to vector<1x8x1xf32>
    %480 = vector.shape_cast %479 : vector<1x8x1xf32> to vector<8x1xf32>
    %481 = vector.extract_strided_slice %260 {offsets = [0, 31], sizes = [1, 64], strides = [1, 1]} : vector<1x95xf32> to vector<1x64xf32>
    %482 = vector.broadcast %480 : vector<8x1xf32> to vector<8x64xf32>
    %483 = vector.broadcast %481 : vector<1x64xf32> to vector<8x64xf32>
    %484 = arith.mulf %482, %483 : vector<8x64xf32>
    %485 = arith.addf %478, %484 : vector<8x64xf32>
    %cst_32 = arith.constant 0.000000e+00 : f32
    %486 = vector.broadcast %cst_32 : f32 to vector<8x15xf32>
    %c1 = arith.constant 1 : index
    %c0_33 = arith.constant 0 : index
    %c0_34 = arith.constant 0 : index
    %487 = vector.load %arg16[%c1, %c0_33, %c0_34] : memref<4x8x95xf32, #tpu.memory_space<vmem>>, vector<1x8x15xf32>
    %488 = vector.shape_cast %487 : vector<1x8x15xf32> to vector<8x15xf32>
    %489 = vector.shape_cast %486 : vector<8x15xf32> to vector<1x8x15xf32>
    tpu.vector_store %arg16[%c1, %c0_33, %c0_34], %489 {strides = array<i32>} : memref<4x8x95xf32, #tpu.memory_space<vmem>>, vector<1x8x15xf32>,
    %490 = vector.broadcast %11 : vector<8x1xf32> to vector<8x64xf32>
    %491 = arith.addf %485, %490 : vector<8x64xf32>
    %cst_35 = arith.constant 0.000000e+00 : f32
    %492 = vector.broadcast %cst_35 : f32 to vector<8x64xf32>
    %493 = arith.cmpf ogt, %491, %492 : vector<8x64xf32>
    %cst_36 = arith.constant 0.000000e+00 : f32
    %494 = vector.broadcast %cst_36 : f32 to vector<8x64xf32>
    %495 = arith.minimumf %491, %494 : vector<8x64xf32>
    %496 = math.exp %495 : vector<8x64xf32>
    %cst_37 = arith.constant 1.000000e+00 : f32
    %497 = vector.broadcast %cst_37 : f32 to vector<8x64xf32>
    %498 = arith.subf %496, %497 : vector<8x64xf32>
    %499 = arith.select %493, %491, %498 : vector<8x64xi1>, vector<8x64xf32>
    %c1_38 = arith.constant 1 : index
    %c0_39 = arith.constant 0 : index
    %c15_40 = arith.constant 15 : index
    %500 = vector.load %arg16[%c1_38, %c0_39, %c15_40] : memref<4x8x95xf32, #tpu.memory_space<vmem>>, vector<1x8x64xf32>
    %501 = vector.shape_cast %500 : vector<1x8x64xf32> to vector<8x64xf32>
    %502 = vector.shape_cast %499 : vector<8x64xf32> to vector<1x8x64xf32>
    tpu.vector_store %arg16[%c1_38, %c0_39, %c15_40], %502 {strides = array<i32>} : memref<4x8x95xf32, #tpu.memory_space<vmem>>, vector<1x8x64xf32>,
    %cst_41 = arith.constant 0.000000e+00 : f32
    %503 = vector.broadcast %cst_41 : f32 to vector<8x16xf32>
    %c1_42 = arith.constant 1 : index
    %c0_43 = arith.constant 0 : index
    %c79_44 = arith.constant 79 : index
    %504 = vector.load %arg16[%c1_42, %c0_43, %c79_44] : memref<4x8x95xf32, #tpu.memory_space<vmem>>, vector<1x8x16xf32>
    %505 = vector.shape_cast %504 : vector<1x8x16xf32> to vector<8x16xf32>
    %506 = vector.shape_cast %503 : vector<8x16xf32> to vector<1x8x16xf32>
    tpu.vector_store %arg16[%c1_42, %c0_43, %c79_44], %506 {strides = array<i32>} : memref<4x8x95xf32, #tpu.memory_space<vmem>>, vector<1x8x16xf32>,
    %507 = vector.extract_strided_slice %9 {offsets = [2, 0], sizes = [1, 95], strides = [1, 1]} : vector<4x95xf32> to vector<1x95xf32>
    %cst_45 = arith.constant 0.000000e+00 : f32
    %508 = vector.broadcast %cst_45 : f32 to vector<8x64xf32>
    %509 = vector.extract_strided_slice %10 {offsets = [0, 0, 0], sizes = [1, 8, 1], strides = [1, 1, 1]} : vector<32x8x1xf32> to vector<1x8x1xf32>
    %510 = vector.shape_cast %509 : vector<1x8x1xf32> to vector<8x1xf32>
    %511 = vector.extract_strided_slice %507 {offsets = [0, 0], sizes = [1, 64], strides = [1, 1]} : vector<1x95xf32> to vector<1x64xf32>
    %512 = vector.broadcast %510 : vector<8x1xf32> to vector<8x64xf32>
    %513 = vector.broadcast %511 : vector<1x64xf32> to vector<8x64xf32>
    %514 = arith.mulf %512, %513 : vector<8x64xf32>
    %515 = arith.addf %508, %514 : vector<8x64xf32>
    %516 = vector.extract_strided_slice %10 {offsets = [1, 0, 0], sizes = [1, 8, 1], strides = [1, 1, 1]} : vector<32x8x1xf32> to vector<1x8x1xf32>
    %517 = vector.shape_cast %516 : vector<1x8x1xf32> to vector<8x1xf32>
    %518 = vector.extract_strided_slice %507 {offsets = [0, 1], sizes = [1, 64], strides = [1, 1]} : vector<1x95xf32> to vector<1x64xf32>
    %519 = vector.broadcast %517 : vector<8x1xf32> to vector<8x64xf32>
    %520 = vector.broadcast %518 : vector<1x64xf32> to vector<8x64xf32>
    %521 = arith.mulf %519, %520 : vector<8x64xf32>
    %522 = arith.addf %515, %521 : vector<8x64xf32>
    %523 = vector.extract_strided_slice %10 {offsets = [2, 0, 0], sizes = [1, 8, 1], strides = [1, 1, 1]} : vector<32x8x1xf32> to vector<1x8x1xf32>
    %524 = vector.shape_cast %523 : vector<1x8x1xf32> to vector<8x1xf32>
    %525 = vector.extract_strided_slice %507 {offsets = [0, 2], sizes = [1, 64], strides = [1, 1]} : vector<1x95xf32> to vector<1x64xf32>
    %526 = vector.broadcast %524 : vector<8x1xf32> to vector<8x64xf32>
    %527 = vector.broadcast %525 : vector<1x64xf32> to vector<8x64xf32>
    %528 = arith.mulf %526, %527 : vector<8x64xf32>
    %529 = arith.addf %522, %528 : vector<8x64xf32>
    %530 = vector.extract_strided_slice %10 {offsets = [3, 0, 0], sizes = [1, 8, 1], strides = [1, 1, 1]} : vector<32x8x1xf32> to vector<1x8x1xf32>
    %531 = vector.shape_cast %530 : vector<1x8x1xf32> to vector<8x1xf32>
    %532 = vector.extract_strided_slice %507 {offsets = [0, 3], sizes = [1, 64], strides = [1, 1]} : vector<1x95xf32> to vector<1x64xf32>
    %533 = vector.broadcast %531 : vector<8x1xf32> to vector<8x64xf32>
    %534 = vector.broadcast %532 : vector<1x64xf32> to vector<8x64xf32>
    %535 = arith.mulf %533, %534 : vector<8x64xf32>
    %536 = arith.addf %529, %535 : vector<8x64xf32>
    %537 = vector.extract_strided_slice %10 {offsets = [4, 0, 0], sizes = [1, 8, 1], strides = [1, 1, 1]} : vector<32x8x1xf32> to vector<1x8x1xf32>
    %538 = vector.shape_cast %537 : vector<1x8x1xf32> to vector<8x1xf32>
    %539 = vector.extract_strided_slice %507 {offsets = [0, 4], sizes = [1, 64], strides = [1, 1]} : vector<1x95xf32> to vector<1x64xf32>
    %540 = vector.broadcast %538 : vector<8x1xf32> to vector<8x64xf32>
    %541 = vector.broadcast %539 : vector<1x64xf32> to vector<8x64xf32>
    %542 = arith.mulf %540, %541 : vector<8x64xf32>
    %543 = arith.addf %536, %542 : vector<8x64xf32>
    %544 = vector.extract_strided_slice %10 {offsets = [5, 0, 0], sizes = [1, 8, 1], strides = [1, 1, 1]} : vector<32x8x1xf32> to vector<1x8x1xf32>
    %545 = vector.shape_cast %544 : vector<1x8x1xf32> to vector<8x1xf32>
    %546 = vector.extract_strided_slice %507 {offsets = [0, 5], sizes = [1, 64], strides = [1, 1]} : vector<1x95xf32> to vector<1x64xf32>
    %547 = vector.broadcast %545 : vector<8x1xf32> to vector<8x64xf32>
    %548 = vector.broadcast %546 : vector<1x64xf32> to vector<8x64xf32>
    %549 = arith.mulf %547, %548 : vector<8x64xf32>
    %550 = arith.addf %543, %549 : vector<8x64xf32>
    %551 = vector.extract_strided_slice %10 {offsets = [6, 0, 0], sizes = [1, 8, 1], strides = [1, 1, 1]} : vector<32x8x1xf32> to vector<1x8x1xf32>
    %552 = vector.shape_cast %551 : vector<1x8x1xf32> to vector<8x1xf32>
    %553 = vector.extract_strided_slice %507 {offsets = [0, 6], sizes = [1, 64], strides = [1, 1]} : vector<1x95xf32> to vector<1x64xf32>
    %554 = vector.broadcast %552 : vector<8x1xf32> to vector<8x64xf32>
    %555 = vector.broadcast %553 : vector<1x64xf32> to vector<8x64xf32>
    %556 = arith.mulf %554, %555 : vector<8x64xf32>
    %557 = arith.addf %550, %556 : vector<8x64xf32>
    %558 = vector.extract_strided_slice %10 {offsets = [7, 0, 0], sizes = [1, 8, 1], strides = [1, 1, 1]} : vector<32x8x1xf32> to vector<1x8x1xf32>
    %559 = vector.shape_cast %558 : vector<1x8x1xf32> to vector<8x1xf32>
    %560 = vector.extract_strided_slice %507 {offsets = [0, 7], sizes = [1, 64], strides = [1, 1]} : vector<1x95xf32> to vector<1x64xf32>
    %561 = vector.broadcast %559 : vector<8x1xf32> to vector<8x64xf32>
    %562 = vector.broadcast %560 : vector<1x64xf32> to vector<8x64xf32>
    %563 = arith.mulf %561, %562 : vector<8x64xf32>
    %564 = arith.addf %557, %563 : vector<8x64xf32>
    %565 = vector.extract_strided_slice %10 {offsets = [8, 0, 0], sizes = [1, 8, 1], strides = [1, 1, 1]} : vector<32x8x1xf32> to vector<1x8x1xf32>
    %566 = vector.shape_cast %565 : vector<1x8x1xf32> to vector<8x1xf32>
    %567 = vector.extract_strided_slice %507 {offsets = [0, 8], sizes = [1, 64], strides = [1, 1]} : vector<1x95xf32> to vector<1x64xf32>
    %568 = vector.broadcast %566 : vector<8x1xf32> to vector<8x64xf32>
    %569 = vector.broadcast %567 : vector<1x64xf32> to vector<8x64xf32>
    %570 = arith.mulf %568, %569 : vector<8x64xf32>
    %571 = arith.addf %564, %570 : vector<8x64xf32>
    %572 = vector.extract_strided_slice %10 {offsets = [9, 0, 0], sizes = [1, 8, 1], strides = [1, 1, 1]} : vector<32x8x1xf32> to vector<1x8x1xf32>
    %573 = vector.shape_cast %572 : vector<1x8x1xf32> to vector<8x1xf32>
    %574 = vector.extract_strided_slice %507 {offsets = [0, 9], sizes = [1, 64], strides = [1, 1]} : vector<1x95xf32> to vector<1x64xf32>
    %575 = vector.broadcast %573 : vector<8x1xf32> to vector<8x64xf32>
    %576 = vector.broadcast %574 : vector<1x64xf32> to vector<8x64xf32>
    %577 = arith.mulf %575, %576 : vector<8x64xf32>
    %578 = arith.addf %571, %577 : vector<8x64xf32>
    %579 = vector.extract_strided_slice %10 {offsets = [10, 0, 0], sizes = [1, 8, 1], strides = [1, 1, 1]} : vector<32x8x1xf32> to vector<1x8x1xf32>
    %580 = vector.shape_cast %579 : vector<1x8x1xf32> to vector<8x1xf32>
    %581 = vector.extract_strided_slice %507 {offsets = [0, 10], sizes = [1, 64], strides = [1, 1]} : vector<1x95xf32> to vector<1x64xf32>
    %582 = vector.broadcast %580 : vector<8x1xf32> to vector<8x64xf32>
    %583 = vector.broadcast %581 : vector<1x64xf32> to vector<8x64xf32>
    %584 = arith.mulf %582, %583 : vector<8x64xf32>
    %585 = arith.addf %578, %584 : vector<8x64xf32>
    %586 = vector.extract_strided_slice %10 {offsets = [11, 0, 0], sizes = [1, 8, 1], strides = [1, 1, 1]} : vector<32x8x1xf32> to vector<1x8x1xf32>
    %587 = vector.shape_cast %586 : vector<1x8x1xf32> to vector<8x1xf32>
    %588 = vector.extract_strided_slice %507 {offsets = [0, 11], sizes = [1, 64], strides = [1, 1]} : vector<1x95xf32> to vector<1x64xf32>
    %589 = vector.broadcast %587 : vector<8x1xf32> to vector<8x64xf32>
    %590 = vector.broadcast %588 : vector<1x64xf32> to vector<8x64xf32>
    %591 = arith.mulf %589, %590 : vector<8x64xf32>
    %592 = arith.addf %585, %591 : vector<8x64xf32>
    %593 = vector.extract_strided_slice %10 {offsets = [12, 0, 0], sizes = [1, 8, 1], strides = [1, 1, 1]} : vector<32x8x1xf32> to vector<1x8x1xf32>
    %594 = vector.shape_cast %593 : vector<1x8x1xf32> to vector<8x1xf32>
    %595 = vector.extract_strided_slice %507 {offsets = [0, 12], sizes = [1, 64], strides = [1, 1]} : vector<1x95xf32> to vector<1x64xf32>
    %596 = vector.broadcast %594 : vector<8x1xf32> to vector<8x64xf32>
    %597 = vector.broadcast %595 : vector<1x64xf32> to vector<8x64xf32>
    %598 = arith.mulf %596, %597 : vector<8x64xf32>
    %599 = arith.addf %592, %598 : vector<8x64xf32>
    %600 = vector.extract_strided_slice %10 {offsets = [13, 0, 0], sizes = [1, 8, 1], strides = [1, 1, 1]} : vector<32x8x1xf32> to vector<1x8x1xf32>
    %601 = vector.shape_cast %600 : vector<1x8x1xf32> to vector<8x1xf32>
    %602 = vector.extract_strided_slice %507 {offsets = [0, 13], sizes = [1, 64], strides = [1, 1]} : vector<1x95xf32> to vector<1x64xf32>
    %603 = vector.broadcast %601 : vector<8x1xf32> to vector<8x64xf32>
    %604 = vector.broadcast %602 : vector<1x64xf32> to vector<8x64xf32>
    %605 = arith.mulf %603, %604 : vector<8x64xf32>
    %606 = arith.addf %599, %605 : vector<8x64xf32>
    %607 = vector.extract_strided_slice %10 {offsets = [14, 0, 0], sizes = [1, 8, 1], strides = [1, 1, 1]} : vector<32x8x1xf32> to vector<1x8x1xf32>
    %608 = vector.shape_cast %607 : vector<1x8x1xf32> to vector<8x1xf32>
    %609 = vector.extract_strided_slice %507 {offsets = [0, 14], sizes = [1, 64], strides = [1, 1]} : vector<1x95xf32> to vector<1x64xf32>
    %610 = vector.broadcast %608 : vector<8x1xf32> to vector<8x64xf32>
    %611 = vector.broadcast %609 : vector<1x64xf32> to vector<8x64xf32>
    %612 = arith.mulf %610, %611 : vector<8x64xf32>
    %613 = arith.addf %606, %612 : vector<8x64xf32>
    %614 = vector.extract_strided_slice %10 {offsets = [15, 0, 0], sizes = [1, 8, 1], strides = [1, 1, 1]} : vector<32x8x1xf32> to vector<1x8x1xf32>
    %615 = vector.shape_cast %614 : vector<1x8x1xf32> to vector<8x1xf32>
    %616 = vector.extract_strided_slice %507 {offsets = [0, 15], sizes = [1, 64], strides = [1, 1]} : vector<1x95xf32> to vector<1x64xf32>
    %617 = vector.broadcast %615 : vector<8x1xf32> to vector<8x64xf32>
    %618 = vector.broadcast %616 : vector<1x64xf32> to vector<8x64xf32>
    %619 = arith.mulf %617, %618 : vector<8x64xf32>
    %620 = arith.addf %613, %619 : vector<8x64xf32>
    %621 = vector.extract_strided_slice %10 {offsets = [16, 0, 0], sizes = [1, 8, 1], strides = [1, 1, 1]} : vector<32x8x1xf32> to vector<1x8x1xf32>
    %622 = vector.shape_cast %621 : vector<1x8x1xf32> to vector<8x1xf32>
    %623 = vector.extract_strided_slice %507 {offsets = [0, 16], sizes = [1, 64], strides = [1, 1]} : vector<1x95xf32> to vector<1x64xf32>
    %624 = vector.broadcast %622 : vector<8x1xf32> to vector<8x64xf32>
    %625 = vector.broadcast %623 : vector<1x64xf32> to vector<8x64xf32>
    %626 = arith.mulf %624, %625 : vector<8x64xf32>
    %627 = arith.addf %620, %626 : vector<8x64xf32>
    %628 = vector.extract_strided_slice %10 {offsets = [17, 0, 0], sizes = [1, 8, 1], strides = [1, 1, 1]} : vector<32x8x1xf32> to vector<1x8x1xf32>
    %629 = vector.shape_cast %628 : vector<1x8x1xf32> to vector<8x1xf32>
    %630 = vector.extract_strided_slice %507 {offsets = [0, 17], sizes = [1, 64], strides = [1, 1]} : vector<1x95xf32> to vector<1x64xf32>
    %631 = vector.broadcast %629 : vector<8x1xf32> to vector<8x64xf32>
    %632 = vector.broadcast %630 : vector<1x64xf32> to vector<8x64xf32>
    %633 = arith.mulf %631, %632 : vector<8x64xf32>
    %634 = arith.addf %627, %633 : vector<8x64xf32>
    %635 = vector.extract_strided_slice %10 {offsets = [18, 0, 0], sizes = [1, 8, 1], strides = [1, 1, 1]} : vector<32x8x1xf32> to vector<1x8x1xf32>
    %636 = vector.shape_cast %635 : vector<1x8x1xf32> to vector<8x1xf32>
    %637 = vector.extract_strided_slice %507 {offsets = [0, 18], sizes = [1, 64], strides = [1, 1]} : vector<1x95xf32> to vector<1x64xf32>
    %638 = vector.broadcast %636 : vector<8x1xf32> to vector<8x64xf32>
    %639 = vector.broadcast %637 : vector<1x64xf32> to vector<8x64xf32>
    %640 = arith.mulf %638, %639 : vector<8x64xf32>
    %641 = arith.addf %634, %640 : vector<8x64xf32>
    %642 = vector.extract_strided_slice %10 {offsets = [19, 0, 0], sizes = [1, 8, 1], strides = [1, 1, 1]} : vector<32x8x1xf32> to vector<1x8x1xf32>
    %643 = vector.shape_cast %642 : vector<1x8x1xf32> to vector<8x1xf32>
    %644 = vector.extract_strided_slice %507 {offsets = [0, 19], sizes = [1, 64], strides = [1, 1]} : vector<1x95xf32> to vector<1x64xf32>
    %645 = vector.broadcast %643 : vector<8x1xf32> to vector<8x64xf32>
    %646 = vector.broadcast %644 : vector<1x64xf32> to vector<8x64xf32>
    %647 = arith.mulf %645, %646 : vector<8x64xf32>
    %648 = arith.addf %641, %647 : vector<8x64xf32>
    %649 = vector.extract_strided_slice %10 {offsets = [20, 0, 0], sizes = [1, 8, 1], strides = [1, 1, 1]} : vector<32x8x1xf32> to vector<1x8x1xf32>
    %650 = vector.shape_cast %649 : vector<1x8x1xf32> to vector<8x1xf32>
    %651 = vector.extract_strided_slice %507 {offsets = [0, 20], sizes = [1, 64], strides = [1, 1]} : vector<1x95xf32> to vector<1x64xf32>
    %652 = vector.broadcast %650 : vector<8x1xf32> to vector<8x64xf32>
    %653 = vector.broadcast %651 : vector<1x64xf32> to vector<8x64xf32>
    %654 = arith.mulf %652, %653 : vector<8x64xf32>
    %655 = arith.addf %648, %654 : vector<8x64xf32>
    %656 = vector.extract_strided_slice %10 {offsets = [21, 0, 0], sizes = [1, 8, 1], strides = [1, 1, 1]} : vector<32x8x1xf32> to vector<1x8x1xf32>
    %657 = vector.shape_cast %656 : vector<1x8x1xf32> to vector<8x1xf32>
    %658 = vector.extract_strided_slice %507 {offsets = [0, 21], sizes = [1, 64], strides = [1, 1]} : vector<1x95xf32> to vector<1x64xf32>
    %659 = vector.broadcast %657 : vector<8x1xf32> to vector<8x64xf32>
    %660 = vector.broadcast %658 : vector<1x64xf32> to vector<8x64xf32>
    %661 = arith.mulf %659, %660 : vector<8x64xf32>
    %662 = arith.addf %655, %661 : vector<8x64xf32>
    %663 = vector.extract_strided_slice %10 {offsets = [22, 0, 0], sizes = [1, 8, 1], strides = [1, 1, 1]} : vector<32x8x1xf32> to vector<1x8x1xf32>
    %664 = vector.shape_cast %663 : vector<1x8x1xf32> to vector<8x1xf32>
    %665 = vector.extract_strided_slice %507 {offsets = [0, 22], sizes = [1, 64], strides = [1, 1]} : vector<1x95xf32> to vector<1x64xf32>
    %666 = vector.broadcast %664 : vector<8x1xf32> to vector<8x64xf32>
    %667 = vector.broadcast %665 : vector<1x64xf32> to vector<8x64xf32>
    %668 = arith.mulf %666, %667 : vector<8x64xf32>
    %669 = arith.addf %662, %668 : vector<8x64xf32>
    %670 = vector.extract_strided_slice %10 {offsets = [23, 0, 0], sizes = [1, 8, 1], strides = [1, 1, 1]} : vector<32x8x1xf32> to vector<1x8x1xf32>
    %671 = vector.shape_cast %670 : vector<1x8x1xf32> to vector<8x1xf32>
    %672 = vector.extract_strided_slice %507 {offsets = [0, 23], sizes = [1, 64], strides = [1, 1]} : vector<1x95xf32> to vector<1x64xf32>
    %673 = vector.broadcast %671 : vector<8x1xf32> to vector<8x64xf32>
    %674 = vector.broadcast %672 : vector<1x64xf32> to vector<8x64xf32>
    %675 = arith.mulf %673, %674 : vector<8x64xf32>
    %676 = arith.addf %669, %675 : vector<8x64xf32>
    %677 = vector.extract_strided_slice %10 {offsets = [24, 0, 0], sizes = [1, 8, 1], strides = [1, 1, 1]} : vector<32x8x1xf32> to vector<1x8x1xf32>
    %678 = vector.shape_cast %677 : vector<1x8x1xf32> to vector<8x1xf32>
    %679 = vector.extract_strided_slice %507 {offsets = [0, 24], sizes = [1, 64], strides = [1, 1]} : vector<1x95xf32> to vector<1x64xf32>
    %680 = vector.broadcast %678 : vector<8x1xf32> to vector<8x64xf32>
    %681 = vector.broadcast %679 : vector<1x64xf32> to vector<8x64xf32>
    %682 = arith.mulf %680, %681 : vector<8x64xf32>
    %683 = arith.addf %676, %682 : vector<8x64xf32>
    %684 = vector.extract_strided_slice %10 {offsets = [25, 0, 0], sizes = [1, 8, 1], strides = [1, 1, 1]} : vector<32x8x1xf32> to vector<1x8x1xf32>
    %685 = vector.shape_cast %684 : vector<1x8x1xf32> to vector<8x1xf32>
    %686 = vector.extract_strided_slice %507 {offsets = [0, 25], sizes = [1, 64], strides = [1, 1]} : vector<1x95xf32> to vector<1x64xf32>
    %687 = vector.broadcast %685 : vector<8x1xf32> to vector<8x64xf32>
    %688 = vector.broadcast %686 : vector<1x64xf32> to vector<8x64xf32>
    %689 = arith.mulf %687, %688 : vector<8x64xf32>
    %690 = arith.addf %683, %689 : vector<8x64xf32>
    %691 = vector.extract_strided_slice %10 {offsets = [26, 0, 0], sizes = [1, 8, 1], strides = [1, 1, 1]} : vector<32x8x1xf32> to vector<1x8x1xf32>
    %692 = vector.shape_cast %691 : vector<1x8x1xf32> to vector<8x1xf32>
    %693 = vector.extract_strided_slice %507 {offsets = [0, 26], sizes = [1, 64], strides = [1, 1]} : vector<1x95xf32> to vector<1x64xf32>
    %694 = vector.broadcast %692 : vector<8x1xf32> to vector<8x64xf32>
    %695 = vector.broadcast %693 : vector<1x64xf32> to vector<8x64xf32>
    %696 = arith.mulf %694, %695 : vector<8x64xf32>
    %697 = arith.addf %690, %696 : vector<8x64xf32>
    %698 = vector.extract_strided_slice %10 {offsets = [27, 0, 0], sizes = [1, 8, 1], strides = [1, 1, 1]} : vector<32x8x1xf32> to vector<1x8x1xf32>
    %699 = vector.shape_cast %698 : vector<1x8x1xf32> to vector<8x1xf32>
    %700 = vector.extract_strided_slice %507 {offsets = [0, 27], sizes = [1, 64], strides = [1, 1]} : vector<1x95xf32> to vector<1x64xf32>
    %701 = vector.broadcast %699 : vector<8x1xf32> to vector<8x64xf32>
    %702 = vector.broadcast %700 : vector<1x64xf32> to vector<8x64xf32>
    %703 = arith.mulf %701, %702 : vector<8x64xf32>
    %704 = arith.addf %697, %703 : vector<8x64xf32>
    %705 = vector.extract_strided_slice %10 {offsets = [28, 0, 0], sizes = [1, 8, 1], strides = [1, 1, 1]} : vector<32x8x1xf32> to vector<1x8x1xf32>
    %706 = vector.shape_cast %705 : vector<1x8x1xf32> to vector<8x1xf32>
    %707 = vector.extract_strided_slice %507 {offsets = [0, 28], sizes = [1, 64], strides = [1, 1]} : vector<1x95xf32> to vector<1x64xf32>
    %708 = vector.broadcast %706 : vector<8x1xf32> to vector<8x64xf32>
    %709 = vector.broadcast %707 : vector<1x64xf32> to vector<8x64xf32>
    %710 = arith.mulf %708, %709 : vector<8x64xf32>
    %711 = arith.addf %704, %710 : vector<8x64xf32>
    %712 = vector.extract_strided_slice %10 {offsets = [29, 0, 0], sizes = [1, 8, 1], strides = [1, 1, 1]} : vector<32x8x1xf32> to vector<1x8x1xf32>
    %713 = vector.shape_cast %712 : vector<1x8x1xf32> to vector<8x1xf32>
    %714 = vector.extract_strided_slice %507 {offsets = [0, 29], sizes = [1, 64], strides = [1, 1]} : vector<1x95xf32> to vector<1x64xf32>
    %715 = vector.broadcast %713 : vector<8x1xf32> to vector<8x64xf32>
    %716 = vector.broadcast %714 : vector<1x64xf32> to vector<8x64xf32>
    %717 = arith.mulf %715, %716 : vector<8x64xf32>
    %718 = arith.addf %711, %717 : vector<8x64xf32>
    %719 = vector.extract_strided_slice %10 {offsets = [30, 0, 0], sizes = [1, 8, 1], strides = [1, 1, 1]} : vector<32x8x1xf32> to vector<1x8x1xf32>
    %720 = vector.shape_cast %719 : vector<1x8x1xf32> to vector<8x1xf32>
    %721 = vector.extract_strided_slice %507 {offsets = [0, 30], sizes = [1, 64], strides = [1, 1]} : vector<1x95xf32> to vector<1x64xf32>
    %722 = vector.broadcast %720 : vector<8x1xf32> to vector<8x64xf32>
    %723 = vector.broadcast %721 : vector<1x64xf32> to vector<8x64xf32>
    %724 = arith.mulf %722, %723 : vector<8x64xf32>
    %725 = arith.addf %718, %724 : vector<8x64xf32>
    %726 = vector.extract_strided_slice %10 {offsets = [31, 0, 0], sizes = [1, 8, 1], strides = [1, 1, 1]} : vector<32x8x1xf32> to vector<1x8x1xf32>
    %727 = vector.shape_cast %726 : vector<1x8x1xf32> to vector<8x1xf32>
    %728 = vector.extract_strided_slice %507 {offsets = [0, 31], sizes = [1, 64], strides = [1, 1]} : vector<1x95xf32> to vector<1x64xf32>
    %729 = vector.broadcast %727 : vector<8x1xf32> to vector<8x64xf32>
    %730 = vector.broadcast %728 : vector<1x64xf32> to vector<8x64xf32>
    %731 = arith.mulf %729, %730 : vector<8x64xf32>
    %732 = arith.addf %725, %731 : vector<8x64xf32>
    %cst_46 = arith.constant 0.000000e+00 : f32
    %733 = vector.broadcast %cst_46 : f32 to vector<8x15xf32>
    %c2 = arith.constant 2 : index
    %c0_47 = arith.constant 0 : index
    %c0_48 = arith.constant 0 : index
    %734 = vector.load %arg16[%c2, %c0_47, %c0_48] : memref<4x8x95xf32, #tpu.memory_space<vmem>>, vector<1x8x15xf32>
    %735 = vector.shape_cast %734 : vector<1x8x15xf32> to vector<8x15xf32>
    %736 = vector.shape_cast %733 : vector<8x15xf32> to vector<1x8x15xf32>
    tpu.vector_store %arg16[%c2, %c0_47, %c0_48], %736 {strides = array<i32>} : memref<4x8x95xf32, #tpu.memory_space<vmem>>, vector<1x8x15xf32>,
    %737 = vector.broadcast %11 : vector<8x1xf32> to vector<8x64xf32>
    %738 = arith.addf %732, %737 : vector<8x64xf32>
    %cst_49 = arith.constant 0.000000e+00 : f32
    %739 = vector.broadcast %cst_49 : f32 to vector<8x64xf32>
    %740 = arith.cmpf ogt, %738, %739 : vector<8x64xf32>
    %cst_50 = arith.constant 0.000000e+00 : f32
    %741 = vector.broadcast %cst_50 : f32 to vector<8x64xf32>
    %742 = arith.minimumf %738, %741 : vector<8x64xf32>
    %743 = math.exp %742 : vector<8x64xf32>
    %cst_51 = arith.constant 1.000000e+00 : f32
    %744 = vector.broadcast %cst_51 : f32 to vector<8x64xf32>
    %745 = arith.subf %743, %744 : vector<8x64xf32>
    %746 = arith.select %740, %738, %745 : vector<8x64xi1>, vector<8x64xf32>
    %c2_52 = arith.constant 2 : index
    %c0_53 = arith.constant 0 : index
    %c15_54 = arith.constant 15 : index
    %747 = vector.load %arg16[%c2_52, %c0_53, %c15_54] : memref<4x8x95xf32, #tpu.memory_space<vmem>>, vector<1x8x64xf32>
    %748 = vector.shape_cast %747 : vector<1x8x64xf32> to vector<8x64xf32>
    %749 = vector.shape_cast %746 : vector<8x64xf32> to vector<1x8x64xf32>
    tpu.vector_store %arg16[%c2_52, %c0_53, %c15_54], %749 {strides = array<i32>} : memref<4x8x95xf32, #tpu.memory_space<vmem>>, vector<1x8x64xf32>,
    %cst_55 = arith.constant 0.000000e+00 : f32
    %750 = vector.broadcast %cst_55 : f32 to vector<8x16xf32>
    %c2_56 = arith.constant 2 : index
    %c0_57 = arith.constant 0 : index
    %c79_58 = arith.constant 79 : index
    %751 = vector.load %arg16[%c2_56, %c0_57, %c79_58] : memref<4x8x95xf32, #tpu.memory_space<vmem>>, vector<1x8x16xf32>
    %752 = vector.shape_cast %751 : vector<1x8x16xf32> to vector<8x16xf32>
    %753 = vector.shape_cast %750 : vector<8x16xf32> to vector<1x8x16xf32>
    tpu.vector_store %arg16[%c2_56, %c0_57, %c79_58], %753 {strides = array<i32>} : memref<4x8x95xf32, #tpu.memory_space<vmem>>, vector<1x8x16xf32>,
    %754 = vector.extract_strided_slice %9 {offsets = [3, 0], sizes = [1, 95], strides = [1, 1]} : vector<4x95xf32> to vector<1x95xf32>
    %cst_59 = arith.constant 0.000000e+00 : f32
    %755 = vector.broadcast %cst_59 : f32 to vector<8x64xf32>
    %756 = vector.extract_strided_slice %10 {offsets = [0, 0, 0], sizes = [1, 8, 1], strides = [1, 1, 1]} : vector<32x8x1xf32> to vector<1x8x1xf32>
    %757 = vector.shape_cast %756 : vector<1x8x1xf32> to vector<8x1xf32>
    %758 = vector.extract_strided_slice %754 {offsets = [0, 0], sizes = [1, 64], strides = [1, 1]} : vector<1x95xf32> to vector<1x64xf32>
    %759 = vector.broadcast %757 : vector<8x1xf32> to vector<8x64xf32>
    %760 = vector.broadcast %758 : vector<1x64xf32> to vector<8x64xf32>
    %761 = arith.mulf %759, %760 : vector<8x64xf32>
    %762 = arith.addf %755, %761 : vector<8x64xf32>
    %763 = vector.extract_strided_slice %10 {offsets = [1, 0, 0], sizes = [1, 8, 1], strides = [1, 1, 1]} : vector<32x8x1xf32> to vector<1x8x1xf32>
    %764 = vector.shape_cast %763 : vector<1x8x1xf32> to vector<8x1xf32>
    %765 = vector.extract_strided_slice %754 {offsets = [0, 1], sizes = [1, 64], strides = [1, 1]} : vector<1x95xf32> to vector<1x64xf32>
    %766 = vector.broadcast %764 : vector<8x1xf32> to vector<8x64xf32>
    %767 = vector.broadcast %765 : vector<1x64xf32> to vector<8x64xf32>
    %768 = arith.mulf %766, %767 : vector<8x64xf32>
    %769 = arith.addf %762, %768 : vector<8x64xf32>
    %770 = vector.extract_strided_slice %10 {offsets = [2, 0, 0], sizes = [1, 8, 1], strides = [1, 1, 1]} : vector<32x8x1xf32> to vector<1x8x1xf32>
    %771 = vector.shape_cast %770 : vector<1x8x1xf32> to vector<8x1xf32>
    %772 = vector.extract_strided_slice %754 {offsets = [0, 2], sizes = [1, 64], strides = [1, 1]} : vector<1x95xf32> to vector<1x64xf32>
    %773 = vector.broadcast %771 : vector<8x1xf32> to vector<8x64xf32>
    %774 = vector.broadcast %772 : vector<1x64xf32> to vector<8x64xf32>
    %775 = arith.mulf %773, %774 : vector<8x64xf32>
    %776 = arith.addf %769, %775 : vector<8x64xf32>
    %777 = vector.extract_strided_slice %10 {offsets = [3, 0, 0], sizes = [1, 8, 1], strides = [1, 1, 1]} : vector<32x8x1xf32> to vector<1x8x1xf32>
    %778 = vector.shape_cast %777 : vector<1x8x1xf32> to vector<8x1xf32>
    %779 = vector.extract_strided_slice %754 {offsets = [0, 3], sizes = [1, 64], strides = [1, 1]} : vector<1x95xf32> to vector<1x64xf32>
    %780 = vector.broadcast %778 : vector<8x1xf32> to vector<8x64xf32>
    %781 = vector.broadcast %779 : vector<1x64xf32> to vector<8x64xf32>
    %782 = arith.mulf %780, %781 : vector<8x64xf32>
    %783 = arith.addf %776, %782 : vector<8x64xf32>
    %784 = vector.extract_strided_slice %10 {offsets = [4, 0, 0], sizes = [1, 8, 1], strides = [1, 1, 1]} : vector<32x8x1xf32> to vector<1x8x1xf32>
    %785 = vector.shape_cast %784 : vector<1x8x1xf32> to vector<8x1xf32>
    %786 = vector.extract_strided_slice %754 {offsets = [0, 4], sizes = [1, 64], strides = [1, 1]} : vector<1x95xf32> to vector<1x64xf32>
    %787 = vector.broadcast %785 : vector<8x1xf32> to vector<8x64xf32>
    %788 = vector.broadcast %786 : vector<1x64xf32> to vector<8x64xf32>
    %789 = arith.mulf %787, %788 : vector<8x64xf32>
    %790 = arith.addf %783, %789 : vector<8x64xf32>
    %791 = vector.extract_strided_slice %10 {offsets = [5, 0, 0], sizes = [1, 8, 1], strides = [1, 1, 1]} : vector<32x8x1xf32> to vector<1x8x1xf32>
    %792 = vector.shape_cast %791 : vector<1x8x1xf32> to vector<8x1xf32>
    %793 = vector.extract_strided_slice %754 {offsets = [0, 5], sizes = [1, 64], strides = [1, 1]} : vector<1x95xf32> to vector<1x64xf32>
    %794 = vector.broadcast %792 : vector<8x1xf32> to vector<8x64xf32>
    %795 = vector.broadcast %793 : vector<1x64xf32> to vector<8x64xf32>
    %796 = arith.mulf %794, %795 : vector<8x64xf32>
    %797 = arith.addf %790, %796 : vector<8x64xf32>
    %798 = vector.extract_strided_slice %10 {offsets = [6, 0, 0], sizes = [1, 8, 1], strides = [1, 1, 1]} : vector<32x8x1xf32> to vector<1x8x1xf32>
    %799 = vector.shape_cast %798 : vector<1x8x1xf32> to vector<8x1xf32>
    %800 = vector.extract_strided_slice %754 {offsets = [0, 6], sizes = [1, 64], strides = [1, 1]} : vector<1x95xf32> to vector<1x64xf32>
    %801 = vector.broadcast %799 : vector<8x1xf32> to vector<8x64xf32>
    %802 = vector.broadcast %800 : vector<1x64xf32> to vector<8x64xf32>
    %803 = arith.mulf %801, %802 : vector<8x64xf32>
    %804 = arith.addf %797, %803 : vector<8x64xf32>
    %805 = vector.extract_strided_slice %10 {offsets = [7, 0, 0], sizes = [1, 8, 1], strides = [1, 1, 1]} : vector<32x8x1xf32> to vector<1x8x1xf32>
    %806 = vector.shape_cast %805 : vector<1x8x1xf32> to vector<8x1xf32>
    %807 = vector.extract_strided_slice %754 {offsets = [0, 7], sizes = [1, 64], strides = [1, 1]} : vector<1x95xf32> to vector<1x64xf32>
    %808 = vector.broadcast %806 : vector<8x1xf32> to vector<8x64xf32>
    %809 = vector.broadcast %807 : vector<1x64xf32> to vector<8x64xf32>
    %810 = arith.mulf %808, %809 : vector<8x64xf32>
    %811 = arith.addf %804, %810 : vector<8x64xf32>
    %812 = vector.extract_strided_slice %10 {offsets = [8, 0, 0], sizes = [1, 8, 1], strides = [1, 1, 1]} : vector<32x8x1xf32> to vector<1x8x1xf32>
    %813 = vector.shape_cast %812 : vector<1x8x1xf32> to vector<8x1xf32>
    %814 = vector.extract_strided_slice %754 {offsets = [0, 8], sizes = [1, 64], strides = [1, 1]} : vector<1x95xf32> to vector<1x64xf32>
    %815 = vector.broadcast %813 : vector<8x1xf32> to vector<8x64xf32>
    %816 = vector.broadcast %814 : vector<1x64xf32> to vector<8x64xf32>
    %817 = arith.mulf %815, %816 : vector<8x64xf32>
    %818 = arith.addf %811, %817 : vector<8x64xf32>
    %819 = vector.extract_strided_slice %10 {offsets = [9, 0, 0], sizes = [1, 8, 1], strides = [1, 1, 1]} : vector<32x8x1xf32> to vector<1x8x1xf32>
    %820 = vector.shape_cast %819 : vector<1x8x1xf32> to vector<8x1xf32>
    %821 = vector.extract_strided_slice %754 {offsets = [0, 9], sizes = [1, 64], strides = [1, 1]} : vector<1x95xf32> to vector<1x64xf32>
    %822 = vector.broadcast %820 : vector<8x1xf32> to vector<8x64xf32>
    %823 = vector.broadcast %821 : vector<1x64xf32> to vector<8x64xf32>
    %824 = arith.mulf %822, %823 : vector<8x64xf32>
    %825 = arith.addf %818, %824 : vector<8x64xf32>
    %826 = vector.extract_strided_slice %10 {offsets = [10, 0, 0], sizes = [1, 8, 1], strides = [1, 1, 1]} : vector<32x8x1xf32> to vector<1x8x1xf32>
    %827 = vector.shape_cast %826 : vector<1x8x1xf32> to vector<8x1xf32>
    %828 = vector.extract_strided_slice %754 {offsets = [0, 10], sizes = [1, 64], strides = [1, 1]} : vector<1x95xf32> to vector<1x64xf32>
    %829 = vector.broadcast %827 : vector<8x1xf32> to vector<8x64xf32>
    %830 = vector.broadcast %828 : vector<1x64xf32> to vector<8x64xf32>
    %831 = arith.mulf %829, %830 : vector<8x64xf32>
    %832 = arith.addf %825, %831 : vector<8x64xf32>
    %833 = vector.extract_strided_slice %10 {offsets = [11, 0, 0], sizes = [1, 8, 1], strides = [1, 1, 1]} : vector<32x8x1xf32> to vector<1x8x1xf32>
    %834 = vector.shape_cast %833 : vector<1x8x1xf32> to vector<8x1xf32>
    %835 = vector.extract_strided_slice %754 {offsets = [0, 11], sizes = [1, 64], strides = [1, 1]} : vector<1x95xf32> to vector<1x64xf32>
    %836 = vector.broadcast %834 : vector<8x1xf32> to vector<8x64xf32>
    %837 = vector.broadcast %835 : vector<1x64xf32> to vector<8x64xf32>
    %838 = arith.mulf %836, %837 : vector<8x64xf32>
    %839 = arith.addf %832, %838 : vector<8x64xf32>
    %840 = vector.extract_strided_slice %10 {offsets = [12, 0, 0], sizes = [1, 8, 1], strides = [1, 1, 1]} : vector<32x8x1xf32> to vector<1x8x1xf32>
    %841 = vector.shape_cast %840 : vector<1x8x1xf32> to vector<8x1xf32>
    %842 = vector.extract_strided_slice %754 {offsets = [0, 12], sizes = [1, 64], strides = [1, 1]} : vector<1x95xf32> to vector<1x64xf32>
    %843 = vector.broadcast %841 : vector<8x1xf32> to vector<8x64xf32>
    %844 = vector.broadcast %842 : vector<1x64xf32> to vector<8x64xf32>
    %845 = arith.mulf %843, %844 : vector<8x64xf32>
    %846 = arith.addf %839, %845 : vector<8x64xf32>
    %847 = vector.extract_strided_slice %10 {offsets = [13, 0, 0], sizes = [1, 8, 1], strides = [1, 1, 1]} : vector<32x8x1xf32> to vector<1x8x1xf32>
    %848 = vector.shape_cast %847 : vector<1x8x1xf32> to vector<8x1xf32>
    %849 = vector.extract_strided_slice %754 {offsets = [0, 13], sizes = [1, 64], strides = [1, 1]} : vector<1x95xf32> to vector<1x64xf32>
    %850 = vector.broadcast %848 : vector<8x1xf32> to vector<8x64xf32>
    %851 = vector.broadcast %849 : vector<1x64xf32> to vector<8x64xf32>
    %852 = arith.mulf %850, %851 : vector<8x64xf32>
    %853 = arith.addf %846, %852 : vector<8x64xf32>
    %854 = vector.extract_strided_slice %10 {offsets = [14, 0, 0], sizes = [1, 8, 1], strides = [1, 1, 1]} : vector<32x8x1xf32> to vector<1x8x1xf32>
    %855 = vector.shape_cast %854 : vector<1x8x1xf32> to vector<8x1xf32>
    %856 = vector.extract_strided_slice %754 {offsets = [0, 14], sizes = [1, 64], strides = [1, 1]} : vector<1x95xf32> to vector<1x64xf32>
    %857 = vector.broadcast %855 : vector<8x1xf32> to vector<8x64xf32>
    %858 = vector.broadcast %856 : vector<1x64xf32> to vector<8x64xf32>
    %859 = arith.mulf %857, %858 : vector<8x64xf32>
    %860 = arith.addf %853, %859 : vector<8x64xf32>
    %861 = vector.extract_strided_slice %10 {offsets = [15, 0, 0], sizes = [1, 8, 1], strides = [1, 1, 1]} : vector<32x8x1xf32> to vector<1x8x1xf32>
    %862 = vector.shape_cast %861 : vector<1x8x1xf32> to vector<8x1xf32>
    %863 = vector.extract_strided_slice %754 {offsets = [0, 15], sizes = [1, 64], strides = [1, 1]} : vector<1x95xf32> to vector<1x64xf32>
    %864 = vector.broadcast %862 : vector<8x1xf32> to vector<8x64xf32>
    %865 = vector.broadcast %863 : vector<1x64xf32> to vector<8x64xf32>
    %866 = arith.mulf %864, %865 : vector<8x64xf32>
    %867 = arith.addf %860, %866 : vector<8x64xf32>
    %868 = vector.extract_strided_slice %10 {offsets = [16, 0, 0], sizes = [1, 8, 1], strides = [1, 1, 1]} : vector<32x8x1xf32> to vector<1x8x1xf32>
    %869 = vector.shape_cast %868 : vector<1x8x1xf32> to vector<8x1xf32>
    %870 = vector.extract_strided_slice %754 {offsets = [0, 16], sizes = [1, 64], strides = [1, 1]} : vector<1x95xf32> to vector<1x64xf32>
    %871 = vector.broadcast %869 : vector<8x1xf32> to vector<8x64xf32>
    %872 = vector.broadcast %870 : vector<1x64xf32> to vector<8x64xf32>
    %873 = arith.mulf %871, %872 : vector<8x64xf32>
    %874 = arith.addf %867, %873 : vector<8x64xf32>
    %875 = vector.extract_strided_slice %10 {offsets = [17, 0, 0], sizes = [1, 8, 1], strides = [1, 1, 1]} : vector<32x8x1xf32> to vector<1x8x1xf32>
    %876 = vector.shape_cast %875 : vector<1x8x1xf32> to vector<8x1xf32>
    %877 = vector.extract_strided_slice %754 {offsets = [0, 17], sizes = [1, 64], strides = [1, 1]} : vector<1x95xf32> to vector<1x64xf32>
    %878 = vector.broadcast %876 : vector<8x1xf32> to vector<8x64xf32>
    %879 = vector.broadcast %877 : vector<1x64xf32> to vector<8x64xf32>
    %880 = arith.mulf %878, %879 : vector<8x64xf32>
    %881 = arith.addf %874, %880 : vector<8x64xf32>
    %882 = vector.extract_strided_slice %10 {offsets = [18, 0, 0], sizes = [1, 8, 1], strides = [1, 1, 1]} : vector<32x8x1xf32> to vector<1x8x1xf32>
    %883 = vector.shape_cast %882 : vector<1x8x1xf32> to vector<8x1xf32>
    %884 = vector.extract_strided_slice %754 {offsets = [0, 18], sizes = [1, 64], strides = [1, 1]} : vector<1x95xf32> to vector<1x64xf32>
    %885 = vector.broadcast %883 : vector<8x1xf32> to vector<8x64xf32>
    %886 = vector.broadcast %884 : vector<1x64xf32> to vector<8x64xf32>
    %887 = arith.mulf %885, %886 : vector<8x64xf32>
    %888 = arith.addf %881, %887 : vector<8x64xf32>
    %889 = vector.extract_strided_slice %10 {offsets = [19, 0, 0], sizes = [1, 8, 1], strides = [1, 1, 1]} : vector<32x8x1xf32> to vector<1x8x1xf32>
    %890 = vector.shape_cast %889 : vector<1x8x1xf32> to vector<8x1xf32>
    %891 = vector.extract_strided_slice %754 {offsets = [0, 19], sizes = [1, 64], strides = [1, 1]} : vector<1x95xf32> to vector<1x64xf32>
    %892 = vector.broadcast %890 : vector<8x1xf32> to vector<8x64xf32>
    %893 = vector.broadcast %891 : vector<1x64xf32> to vector<8x64xf32>
    %894 = arith.mulf %892, %893 : vector<8x64xf32>
    %895 = arith.addf %888, %894 : vector<8x64xf32>
    %896 = vector.extract_strided_slice %10 {offsets = [20, 0, 0], sizes = [1, 8, 1], strides = [1, 1, 1]} : vector<32x8x1xf32> to vector<1x8x1xf32>
    %897 = vector.shape_cast %896 : vector<1x8x1xf32> to vector<8x1xf32>
    %898 = vector.extract_strided_slice %754 {offsets = [0, 20], sizes = [1, 64], strides = [1, 1]} : vector<1x95xf32> to vector<1x64xf32>
    %899 = vector.broadcast %897 : vector<8x1xf32> to vector<8x64xf32>
    %900 = vector.broadcast %898 : vector<1x64xf32> to vector<8x64xf32>
    %901 = arith.mulf %899, %900 : vector<8x64xf32>
    %902 = arith.addf %895, %901 : vector<8x64xf32>
    %903 = vector.extract_strided_slice %10 {offsets = [21, 0, 0], sizes = [1, 8, 1], strides = [1, 1, 1]} : vector<32x8x1xf32> to vector<1x8x1xf32>
    %904 = vector.shape_cast %903 : vector<1x8x1xf32> to vector<8x1xf32>
    %905 = vector.extract_strided_slice %754 {offsets = [0, 21], sizes = [1, 64], strides = [1, 1]} : vector<1x95xf32> to vector<1x64xf32>
    %906 = vector.broadcast %904 : vector<8x1xf32> to vector<8x64xf32>
    %907 = vector.broadcast %905 : vector<1x64xf32> to vector<8x64xf32>
    %908 = arith.mulf %906, %907 : vector<8x64xf32>
    %909 = arith.addf %902, %908 : vector<8x64xf32>
    %910 = vector.extract_strided_slice %10 {offsets = [22, 0, 0], sizes = [1, 8, 1], strides = [1, 1, 1]} : vector<32x8x1xf32> to vector<1x8x1xf32>
    %911 = vector.shape_cast %910 : vector<1x8x1xf32> to vector<8x1xf32>
    %912 = vector.extract_strided_slice %754 {offsets = [0, 22], sizes = [1, 64], strides = [1, 1]} : vector<1x95xf32> to vector<1x64xf32>
    %913 = vector.broadcast %911 : vector<8x1xf32> to vector<8x64xf32>
    %914 = vector.broadcast %912 : vector<1x64xf32> to vector<8x64xf32>
    %915 = arith.mulf %913, %914 : vector<8x64xf32>
    %916 = arith.addf %909, %915 : vector<8x64xf32>
    %917 = vector.extract_strided_slice %10 {offsets = [23, 0, 0], sizes = [1, 8, 1], strides = [1, 1, 1]} : vector<32x8x1xf32> to vector<1x8x1xf32>
    %918 = vector.shape_cast %917 : vector<1x8x1xf32> to vector<8x1xf32>
    %919 = vector.extract_strided_slice %754 {offsets = [0, 23], sizes = [1, 64], strides = [1, 1]} : vector<1x95xf32> to vector<1x64xf32>
    %920 = vector.broadcast %918 : vector<8x1xf32> to vector<8x64xf32>
    %921 = vector.broadcast %919 : vector<1x64xf32> to vector<8x64xf32>
    %922 = arith.mulf %920, %921 : vector<8x64xf32>
    %923 = arith.addf %916, %922 : vector<8x64xf32>
    %924 = vector.extract_strided_slice %10 {offsets = [24, 0, 0], sizes = [1, 8, 1], strides = [1, 1, 1]} : vector<32x8x1xf32> to vector<1x8x1xf32>
    %925 = vector.shape_cast %924 : vector<1x8x1xf32> to vector<8x1xf32>
    %926 = vector.extract_strided_slice %754 {offsets = [0, 24], sizes = [1, 64], strides = [1, 1]} : vector<1x95xf32> to vector<1x64xf32>
    %927 = vector.broadcast %925 : vector<8x1xf32> to vector<8x64xf32>
    %928 = vector.broadcast %926 : vector<1x64xf32> to vector<8x64xf32>
    %929 = arith.mulf %927, %928 : vector<8x64xf32>
    %930 = arith.addf %923, %929 : vector<8x64xf32>
    %931 = vector.extract_strided_slice %10 {offsets = [25, 0, 0], sizes = [1, 8, 1], strides = [1, 1, 1]} : vector<32x8x1xf32> to vector<1x8x1xf32>
    %932 = vector.shape_cast %931 : vector<1x8x1xf32> to vector<8x1xf32>
    %933 = vector.extract_strided_slice %754 {offsets = [0, 25], sizes = [1, 64], strides = [1, 1]} : vector<1x95xf32> to vector<1x64xf32>
    %934 = vector.broadcast %932 : vector<8x1xf32> to vector<8x64xf32>
    %935 = vector.broadcast %933 : vector<1x64xf32> to vector<8x64xf32>
    %936 = arith.mulf %934, %935 : vector<8x64xf32>
    %937 = arith.addf %930, %936 : vector<8x64xf32>
    %938 = vector.extract_strided_slice %10 {offsets = [26, 0, 0], sizes = [1, 8, 1], strides = [1, 1, 1]} : vector<32x8x1xf32> to vector<1x8x1xf32>
    %939 = vector.shape_cast %938 : vector<1x8x1xf32> to vector<8x1xf32>
    %940 = vector.extract_strided_slice %754 {offsets = [0, 26], sizes = [1, 64], strides = [1, 1]} : vector<1x95xf32> to vector<1x64xf32>
    %941 = vector.broadcast %939 : vector<8x1xf32> to vector<8x64xf32>
    %942 = vector.broadcast %940 : vector<1x64xf32> to vector<8x64xf32>
    %943 = arith.mulf %941, %942 : vector<8x64xf32>
    %944 = arith.addf %937, %943 : vector<8x64xf32>
    %945 = vector.extract_strided_slice %10 {offsets = [27, 0, 0], sizes = [1, 8, 1], strides = [1, 1, 1]} : vector<32x8x1xf32> to vector<1x8x1xf32>
    %946 = vector.shape_cast %945 : vector<1x8x1xf32> to vector<8x1xf32>
    %947 = vector.extract_strided_slice %754 {offsets = [0, 27], sizes = [1, 64], strides = [1, 1]} : vector<1x95xf32> to vector<1x64xf32>
    %948 = vector.broadcast %946 : vector<8x1xf32> to vector<8x64xf32>
    %949 = vector.broadcast %947 : vector<1x64xf32> to vector<8x64xf32>
    %950 = arith.mulf %948, %949 : vector<8x64xf32>
    %951 = arith.addf %944, %950 : vector<8x64xf32>
    %952 = vector.extract_strided_slice %10 {offsets = [28, 0, 0], sizes = [1, 8, 1], strides = [1, 1, 1]} : vector<32x8x1xf32> to vector<1x8x1xf32>
    %953 = vector.shape_cast %952 : vector<1x8x1xf32> to vector<8x1xf32>
    %954 = vector.extract_strided_slice %754 {offsets = [0, 28], sizes = [1, 64], strides = [1, 1]} : vector<1x95xf32> to vector<1x64xf32>
    %955 = vector.broadcast %953 : vector<8x1xf32> to vector<8x64xf32>
    %956 = vector.broadcast %954 : vector<1x64xf32> to vector<8x64xf32>
    %957 = arith.mulf %955, %956 : vector<8x64xf32>
    %958 = arith.addf %951, %957 : vector<8x64xf32>
    %959 = vector.extract_strided_slice %10 {offsets = [29, 0, 0], sizes = [1, 8, 1], strides = [1, 1, 1]} : vector<32x8x1xf32> to vector<1x8x1xf32>
    %960 = vector.shape_cast %959 : vector<1x8x1xf32> to vector<8x1xf32>
    %961 = vector.extract_strided_slice %754 {offsets = [0, 29], sizes = [1, 64], strides = [1, 1]} : vector<1x95xf32> to vector<1x64xf32>
    %962 = vector.broadcast %960 : vector<8x1xf32> to vector<8x64xf32>
    %963 = vector.broadcast %961 : vector<1x64xf32> to vector<8x64xf32>
    %964 = arith.mulf %962, %963 : vector<8x64xf32>
    %965 = arith.addf %958, %964 : vector<8x64xf32>
    %966 = vector.extract_strided_slice %10 {offsets = [30, 0, 0], sizes = [1, 8, 1], strides = [1, 1, 1]} : vector<32x8x1xf32> to vector<1x8x1xf32>
    %967 = vector.shape_cast %966 : vector<1x8x1xf32> to vector<8x1xf32>
    %968 = vector.extract_strided_slice %754 {offsets = [0, 30], sizes = [1, 64], strides = [1, 1]} : vector<1x95xf32> to vector<1x64xf32>
    %969 = vector.broadcast %967 : vector<8x1xf32> to vector<8x64xf32>
    %970 = vector.broadcast %968 : vector<1x64xf32> to vector<8x64xf32>
    %971 = arith.mulf %969, %970 : vector<8x64xf32>
    %972 = arith.addf %965, %971 : vector<8x64xf32>
    %973 = vector.extract_strided_slice %10 {offsets = [31, 0, 0], sizes = [1, 8, 1], strides = [1, 1, 1]} : vector<32x8x1xf32> to vector<1x8x1xf32>
    %974 = vector.shape_cast %973 : vector<1x8x1xf32> to vector<8x1xf32>
    %975 = vector.extract_strided_slice %754 {offsets = [0, 31], sizes = [1, 64], strides = [1, 1]} : vector<1x95xf32> to vector<1x64xf32>
    %976 = vector.broadcast %974 : vector<8x1xf32> to vector<8x64xf32>
    %977 = vector.broadcast %975 : vector<1x64xf32> to vector<8x64xf32>
    %978 = arith.mulf %976, %977 : vector<8x64xf32>
    %979 = arith.addf %972, %978 : vector<8x64xf32>
    %cst_60 = arith.constant 0.000000e+00 : f32
    %980 = vector.broadcast %cst_60 : f32 to vector<8x15xf32>
    %c3 = arith.constant 3 : index
    %c0_61 = arith.constant 0 : index
    %c0_62 = arith.constant 0 : index
    %981 = vector.load %arg16[%c3, %c0_61, %c0_62] : memref<4x8x95xf32, #tpu.memory_space<vmem>>, vector<1x8x15xf32>
    %982 = vector.shape_cast %981 : vector<1x8x15xf32> to vector<8x15xf32>
    %983 = vector.shape_cast %980 : vector<8x15xf32> to vector<1x8x15xf32>
    tpu.vector_store %arg16[%c3, %c0_61, %c0_62], %983 {strides = array<i32>} : memref<4x8x95xf32, #tpu.memory_space<vmem>>, vector<1x8x15xf32>,
    %984 = vector.broadcast %11 : vector<8x1xf32> to vector<8x64xf32>
    %985 = arith.addf %979, %984 : vector<8x64xf32>
    %cst_63 = arith.constant 0.000000e+00 : f32
    %986 = vector.broadcast %cst_63 : f32 to vector<8x64xf32>
    %987 = arith.cmpf ogt, %985, %986 : vector<8x64xf32>
    %cst_64 = arith.constant 0.000000e+00 : f32
    %988 = vector.broadcast %cst_64 : f32 to vector<8x64xf32>
    %989 = arith.minimumf %985, %988 : vector<8x64xf32>
    %990 = math.exp %989 : vector<8x64xf32>
    %cst_65 = arith.constant 1.000000e+00 : f32
    %991 = vector.broadcast %cst_65 : f32 to vector<8x64xf32>
    %992 = arith.subf %990, %991 : vector<8x64xf32>
    %993 = arith.select %987, %985, %992 : vector<8x64xi1>, vector<8x64xf32>
    %c3_66 = arith.constant 3 : index
    %c0_67 = arith.constant 0 : index
    %c15_68 = arith.constant 15 : index
    %994 = vector.load %arg16[%c3_66, %c0_67, %c15_68] : memref<4x8x95xf32, #tpu.memory_space<vmem>>, vector<1x8x64xf32>
    %995 = vector.shape_cast %994 : vector<1x8x64xf32> to vector<8x64xf32>
    %996 = vector.shape_cast %993 : vector<8x64xf32> to vector<1x8x64xf32>
    tpu.vector_store %arg16[%c3_66, %c0_67, %c15_68], %996 {strides = array<i32>} : memref<4x8x95xf32, #tpu.memory_space<vmem>>, vector<1x8x64xf32>,
    %cst_69 = arith.constant 0.000000e+00 : f32
    %997 = vector.broadcast %cst_69 : f32 to vector<8x16xf32>
    %c3_70 = arith.constant 3 : index
    %c0_71 = arith.constant 0 : index
    %c79_72 = arith.constant 79 : index
    %998 = vector.load %arg16[%c3_70, %c0_71, %c79_72] : memref<4x8x95xf32, #tpu.memory_space<vmem>>, vector<1x8x16xf32>
    %999 = vector.shape_cast %998 : vector<1x8x16xf32> to vector<8x16xf32>
    %1000 = vector.shape_cast %997 : vector<8x16xf32> to vector<1x8x16xf32>
    tpu.vector_store %arg16[%c3_70, %c0_71, %c79_72], %1000 {strides = array<i32>} : memref<4x8x95xf32, #tpu.memory_space<vmem>>, vector<1x8x16xf32>,
    %c0_73 = arith.constant 0 : index
    %c0_74 = arith.constant 0 : index
    %c0_75 = arith.constant 0 : index
    %1001 = vector.load %arg16[%c0_73, %c0_74, %c0_75] : memref<4x8x95xf32, #tpu.memory_space<vmem>>, vector<1x8x95xf32>
    %1002 = vector.shape_cast %1001 : vector<1x8x95xf32> to vector<8x95xf32>
    %1003 = vector.extract_strided_slice %1002 {offsets = [0, 0], sizes = [8, 64], strides = [1, 1]} : vector<8x95xf32> to vector<8x64xf32>
    %c0_76 = arith.constant 0 : index
    %c0_77 = arith.constant 0 : index
    %1004 = vector.load %arg19[%c0_76, %c0_77] : memref<256x64xf32, #tpu.memory_space<vmem>>, vector<8x64xf32>
    tpu.vector_store %arg19[%c0_76, %c0_77], %1003 {strides = array<i32>} : memref<256x64xf32, #tpu.memory_space<vmem>>, vector<8x64xf32>,
    %1005 = vector.extract_strided_slice %1002 {offsets = [0, 1], sizes = [8, 64], strides = [1, 1]} : vector<8x95xf32> to vector<8x64xf32>
    %c8 = arith.constant 8 : index
    %c0_78 = arith.constant 0 : index
    %1006 = vector.load %arg19[%c8, %c0_78] : memref<256x64xf32, #tpu.memory_space<vmem>>, vector<8x64xf32>
    tpu.vector_store %arg19[%c8, %c0_78], %1005 {strides = array<i32>} : memref<256x64xf32, #tpu.memory_space<vmem>>, vector<8x64xf32>,
    %1007 = vector.extract_strided_slice %1002 {offsets = [0, 2], sizes = [8, 64], strides = [1, 1]} : vector<8x95xf32> to vector<8x64xf32>
    %c16 = arith.constant 16 : index
    %c0_79 = arith.constant 0 : index
    %1008 = vector.load %arg19[%c16, %c0_79] : memref<256x64xf32, #tpu.memory_space<vmem>>, vector<8x64xf32>
    tpu.vector_store %arg19[%c16, %c0_79], %1007 {strides = array<i32>} : memref<256x64xf32, #tpu.memory_space<vmem>>, vector<8x64xf32>,
    %1009 = vector.extract_strided_slice %1002 {offsets = [0, 3], sizes = [8, 64], strides = [1, 1]} : vector<8x95xf32> to vector<8x64xf32>
    %c24 = arith.constant 24 : index
    %c0_80 = arith.constant 0 : index
    %1010 = vector.load %arg19[%c24, %c0_80] : memref<256x64xf32, #tpu.memory_space<vmem>>, vector<8x64xf32>
    tpu.vector_store %arg19[%c24, %c0_80], %1009 {strides = array<i32>} : memref<256x64xf32, #tpu.memory_space<vmem>>, vector<8x64xf32>,
    %1011 = vector.extract_strided_slice %1002 {offsets = [0, 4], sizes = [8, 64], strides = [1, 1]} : vector<8x95xf32> to vector<8x64xf32>
    %c32 = arith.constant 32 : index
    %c0_81 = arith.constant 0 : index
    %1012 = vector.load %arg19[%c32, %c0_81] : memref<256x64xf32, #tpu.memory_space<vmem>>, vector<8x64xf32>
    tpu.vector_store %arg19[%c32, %c0_81], %1011 {strides = array<i32>} : memref<256x64xf32, #tpu.memory_space<vmem>>, vector<8x64xf32>,
    %1013 = vector.extract_strided_slice %1002 {offsets = [0, 5], sizes = [8, 64], strides = [1, 1]} : vector<8x95xf32> to vector<8x64xf32>
    %c40 = arith.constant 40 : index
    %c0_82 = arith.constant 0 : index
    %1014 = vector.load %arg19[%c40, %c0_82] : memref<256x64xf32, #tpu.memory_space<vmem>>, vector<8x64xf32>
    tpu.vector_store %arg19[%c40, %c0_82], %1013 {strides = array<i32>} : memref<256x64xf32, #tpu.memory_space<vmem>>, vector<8x64xf32>,
    %1015 = vector.extract_strided_slice %1002 {offsets = [0, 6], sizes = [8, 64], strides = [1, 1]} : vector<8x95xf32> to vector<8x64xf32>
    %c48 = arith.constant 48 : index
    %c0_83 = arith.constant 0 : index
    %1016 = vector.load %arg19[%c48, %c0_83] : memref<256x64xf32, #tpu.memory_space<vmem>>, vector<8x64xf32>
    tpu.vector_store %arg19[%c48, %c0_83], %1015 {strides = array<i32>} : memref<256x64xf32, #tpu.memory_space<vmem>>, vector<8x64xf32>,
    %1017 = vector.extract_strided_slice %1002 {offsets = [0, 7], sizes = [8, 64], strides = [1, 1]} : vector<8x95xf32> to vector<8x64xf32>
    %c56 = arith.constant 56 : index
    %c0_84 = arith.constant 0 : index
    %1018 = vector.load %arg19[%c56, %c0_84] : memref<256x64xf32, #tpu.memory_space<vmem>>, vector<8x64xf32>
    tpu.vector_store %arg19[%c56, %c0_84], %1017 {strides = array<i32>} : memref<256x64xf32, #tpu.memory_space<vmem>>, vector<8x64xf32>,
    %1019 = vector.extract_strided_slice %1002 {offsets = [0, 8], sizes = [8, 64], strides = [1, 1]} : vector<8x95xf32> to vector<8x64xf32>
    %c64 = arith.constant 64 : index
    %c0_85 = arith.constant 0 : index
    %1020 = vector.load %arg19[%c64, %c0_85] : memref<256x64xf32, #tpu.memory_space<vmem>>, vector<8x64xf32>
    tpu.vector_store %arg19[%c64, %c0_85], %1019 {strides = array<i32>} : memref<256x64xf32, #tpu.memory_space<vmem>>, vector<8x64xf32>,
    %1021 = vector.extract_strided_slice %1002 {offsets = [0, 9], sizes = [8, 64], strides = [1, 1]} : vector<8x95xf32> to vector<8x64xf32>
    %c72 = arith.constant 72 : index
    %c0_86 = arith.constant 0 : index
    %1022 = vector.load %arg19[%c72, %c0_86] : memref<256x64xf32, #tpu.memory_space<vmem>>, vector<8x64xf32>
    tpu.vector_store %arg19[%c72, %c0_86], %1021 {strides = array<i32>} : memref<256x64xf32, #tpu.memory_space<vmem>>, vector<8x64xf32>,
    %1023 = vector.extract_strided_slice %1002 {offsets = [0, 10], sizes = [8, 64], strides = [1, 1]} : vector<8x95xf32> to vector<8x64xf32>
    %c80 = arith.constant 80 : index
    %c0_87 = arith.constant 0 : index
    %1024 = vector.load %arg19[%c80, %c0_87] : memref<256x64xf32, #tpu.memory_space<vmem>>, vector<8x64xf32>
    tpu.vector_store %arg19[%c80, %c0_87], %1023 {strides = array<i32>} : memref<256x64xf32, #tpu.memory_space<vmem>>, vector<8x64xf32>,
    %1025 = vector.extract_strided_slice %1002 {offsets = [0, 11], sizes = [8, 64], strides = [1, 1]} : vector<8x95xf32> to vector<8x64xf32>
    %c88 = arith.constant 88 : index
    %c0_88 = arith.constant 0 : index
    %1026 = vector.load %arg19[%c88, %c0_88] : memref<256x64xf32, #tpu.memory_space<vmem>>, vector<8x64xf32>
    tpu.vector_store %arg19[%c88, %c0_88], %1025 {strides = array<i32>} : memref<256x64xf32, #tpu.memory_space<vmem>>, vector<8x64xf32>,
    %1027 = vector.extract_strided_slice %1002 {offsets = [0, 12], sizes = [8, 64], strides = [1, 1]} : vector<8x95xf32> to vector<8x64xf32>
    %c96 = arith.constant 96 : index
    %c0_89 = arith.constant 0 : index
    %1028 = vector.load %arg19[%c96, %c0_89] : memref<256x64xf32, #tpu.memory_space<vmem>>, vector<8x64xf32>
    tpu.vector_store %arg19[%c96, %c0_89], %1027 {strides = array<i32>} : memref<256x64xf32, #tpu.memory_space<vmem>>, vector<8x64xf32>,
    %1029 = vector.extract_strided_slice %1002 {offsets = [0, 13], sizes = [8, 64], strides = [1, 1]} : vector<8x95xf32> to vector<8x64xf32>
    %c104 = arith.constant 104 : index
    %c0_90 = arith.constant 0 : index
    %1030 = vector.load %arg19[%c104, %c0_90] : memref<256x64xf32, #tpu.memory_space<vmem>>, vector<8x64xf32>
    tpu.vector_store %arg19[%c104, %c0_90], %1029 {strides = array<i32>} : memref<256x64xf32, #tpu.memory_space<vmem>>, vector<8x64xf32>,
    %1031 = vector.extract_strided_slice %1002 {offsets = [0, 14], sizes = [8, 64], strides = [1, 1]} : vector<8x95xf32> to vector<8x64xf32>
    %c112 = arith.constant 112 : index
    %c0_91 = arith.constant 0 : index
    %1032 = vector.load %arg19[%c112, %c0_91] : memref<256x64xf32, #tpu.memory_space<vmem>>, vector<8x64xf32>
    tpu.vector_store %arg19[%c112, %c0_91], %1031 {strides = array<i32>} : memref<256x64xf32, #tpu.memory_space<vmem>>, vector<8x64xf32>,
    %1033 = vector.extract_strided_slice %1002 {offsets = [0, 15], sizes = [8, 64], strides = [1, 1]} : vector<8x95xf32> to vector<8x64xf32>
    %c120 = arith.constant 120 : index
    %c0_92 = arith.constant 0 : index
    %1034 = vector.load %arg19[%c120, %c0_92] : memref<256x64xf32, #tpu.memory_space<vmem>>, vector<8x64xf32>
    tpu.vector_store %arg19[%c120, %c0_92], %1033 {strides = array<i32>} : memref<256x64xf32, #tpu.memory_space<vmem>>, vector<8x64xf32>,
    %1035 = vector.extract_strided_slice %1002 {offsets = [0, 16], sizes = [8, 64], strides = [1, 1]} : vector<8x95xf32> to vector<8x64xf32>
    %c128 = arith.constant 128 : index
    %c0_93 = arith.constant 0 : index
    %1036 = vector.load %arg19[%c128, %c0_93] : memref<256x64xf32, #tpu.memory_space<vmem>>, vector<8x64xf32>
    tpu.vector_store %arg19[%c128, %c0_93], %1035 {strides = array<i32>} : memref<256x64xf32, #tpu.memory_space<vmem>>, vector<8x64xf32>,
    %1037 = vector.extract_strided_slice %1002 {offsets = [0, 17], sizes = [8, 64], strides = [1, 1]} : vector<8x95xf32> to vector<8x64xf32>
    %c136 = arith.constant 136 : index
    %c0_94 = arith.constant 0 : index
    %1038 = vector.load %arg19[%c136, %c0_94] : memref<256x64xf32, #tpu.memory_space<vmem>>, vector<8x64xf32>
    tpu.vector_store %arg19[%c136, %c0_94], %1037 {strides = array<i32>} : memref<256x64xf32, #tpu.memory_space<vmem>>, vector<8x64xf32>,
    %1039 = vector.extract_strided_slice %1002 {offsets = [0, 18], sizes = [8, 64], strides = [1, 1]} : vector<8x95xf32> to vector<8x64xf32>
    %c144 = arith.constant 144 : index
    %c0_95 = arith.constant 0 : index
    %1040 = vector.load %arg19[%c144, %c0_95] : memref<256x64xf32, #tpu.memory_space<vmem>>, vector<8x64xf32>
    tpu.vector_store %arg19[%c144, %c0_95], %1039 {strides = array<i32>} : memref<256x64xf32, #tpu.memory_space<vmem>>, vector<8x64xf32>,
    %1041 = vector.extract_strided_slice %1002 {offsets = [0, 19], sizes = [8, 64], strides = [1, 1]} : vector<8x95xf32> to vector<8x64xf32>
    %c152 = arith.constant 152 : index
    %c0_96 = arith.constant 0 : index
    %1042 = vector.load %arg19[%c152, %c0_96] : memref<256x64xf32, #tpu.memory_space<vmem>>, vector<8x64xf32>
    tpu.vector_store %arg19[%c152, %c0_96], %1041 {strides = array<i32>} : memref<256x64xf32, #tpu.memory_space<vmem>>, vector<8x64xf32>,
    %1043 = vector.extract_strided_slice %1002 {offsets = [0, 20], sizes = [8, 64], strides = [1, 1]} : vector<8x95xf32> to vector<8x64xf32>
    %c160 = arith.constant 160 : index
    %c0_97 = arith.constant 0 : index
    %1044 = vector.load %arg19[%c160, %c0_97] : memref<256x64xf32, #tpu.memory_space<vmem>>, vector<8x64xf32>
    tpu.vector_store %arg19[%c160, %c0_97], %1043 {strides = array<i32>} : memref<256x64xf32, #tpu.memory_space<vmem>>, vector<8x64xf32>,
    %1045 = vector.extract_strided_slice %1002 {offsets = [0, 21], sizes = [8, 64], strides = [1, 1]} : vector<8x95xf32> to vector<8x64xf32>
    %c168 = arith.constant 168 : index
    %c0_98 = arith.constant 0 : index
    %1046 = vector.load %arg19[%c168, %c0_98] : memref<256x64xf32, #tpu.memory_space<vmem>>, vector<8x64xf32>
    tpu.vector_store %arg19[%c168, %c0_98], %1045 {strides = array<i32>} : memref<256x64xf32, #tpu.memory_space<vmem>>, vector<8x64xf32>,
    %1047 = vector.extract_strided_slice %1002 {offsets = [0, 22], sizes = [8, 64], strides = [1, 1]} : vector<8x95xf32> to vector<8x64xf32>
    %c176 = arith.constant 176 : index
    %c0_99 = arith.constant 0 : index
    %1048 = vector.load %arg19[%c176, %c0_99] : memref<256x64xf32, #tpu.memory_space<vmem>>, vector<8x64xf32>
    tpu.vector_store %arg19[%c176, %c0_99], %1047 {strides = array<i32>} : memref<256x64xf32, #tpu.memory_space<vmem>>, vector<8x64xf32>,
    %1049 = vector.extract_strided_slice %1002 {offsets = [0, 23], sizes = [8, 64], strides = [1, 1]} : vector<8x95xf32> to vector<8x64xf32>
    %c184 = arith.constant 184 : index
    %c0_100 = arith.constant 0 : index
    %1050 = vector.load %arg19[%c184, %c0_100] : memref<256x64xf32, #tpu.memory_space<vmem>>, vector<8x64xf32>
    tpu.vector_store %arg19[%c184, %c0_100], %1049 {strides = array<i32>} : memref<256x64xf32, #tpu.memory_space<vmem>>, vector<8x64xf32>,
    %1051 = vector.extract_strided_slice %1002 {offsets = [0, 24], sizes = [8, 64], strides = [1, 1]} : vector<8x95xf32> to vector<8x64xf32>
    %c192 = arith.constant 192 : index
    %c0_101 = arith.constant 0 : index
    %1052 = vector.load %arg19[%c192, %c0_101] : memref<256x64xf32, #tpu.memory_space<vmem>>, vector<8x64xf32>
    tpu.vector_store %arg19[%c192, %c0_101], %1051 {strides = array<i32>} : memref<256x64xf32, #tpu.memory_space<vmem>>, vector<8x64xf32>,
    %1053 = vector.extract_strided_slice %1002 {offsets = [0, 25], sizes = [8, 64], strides = [1, 1]} : vector<8x95xf32> to vector<8x64xf32>
    %c200 = arith.constant 200 : index
    %c0_102 = arith.constant 0 : index
    %1054 = vector.load %arg19[%c200, %c0_102] : memref<256x64xf32, #tpu.memory_space<vmem>>, vector<8x64xf32>
    tpu.vector_store %arg19[%c200, %c0_102], %1053 {strides = array<i32>} : memref<256x64xf32, #tpu.memory_space<vmem>>, vector<8x64xf32>,
    %1055 = vector.extract_strided_slice %1002 {offsets = [0, 26], sizes = [8, 64], strides = [1, 1]} : vector<8x95xf32> to vector<8x64xf32>
    %c208 = arith.constant 208 : index
    %c0_103 = arith.constant 0 : index
    %1056 = vector.load %arg19[%c208, %c0_103] : memref<256x64xf32, #tpu.memory_space<vmem>>, vector<8x64xf32>
    tpu.vector_store %arg19[%c208, %c0_103], %1055 {strides = array<i32>} : memref<256x64xf32, #tpu.memory_space<vmem>>, vector<8x64xf32>,
    %1057 = vector.extract_strided_slice %1002 {offsets = [0, 27], sizes = [8, 64], strides = [1, 1]} : vector<8x95xf32> to vector<8x64xf32>
    %c216 = arith.constant 216 : index
    %c0_104 = arith.constant 0 : index
    %1058 = vector.load %arg19[%c216, %c0_104] : memref<256x64xf32, #tpu.memory_space<vmem>>, vector<8x64xf32>
    tpu.vector_store %arg19[%c216, %c0_104], %1057 {strides = array<i32>} : memref<256x64xf32, #tpu.memory_space<vmem>>, vector<8x64xf32>,
    %1059 = vector.extract_strided_slice %1002 {offsets = [0, 28], sizes = [8, 64], strides = [1, 1]} : vector<8x95xf32> to vector<8x64xf32>
    %c224 = arith.constant 224 : index
    %c0_105 = arith.constant 0 : index
    %1060 = vector.load %arg19[%c224, %c0_105] : memref<256x64xf32, #tpu.memory_space<vmem>>, vector<8x64xf32>
    tpu.vector_store %arg19[%c224, %c0_105], %1059 {strides = array<i32>} : memref<256x64xf32, #tpu.memory_space<vmem>>, vector<8x64xf32>,
    %1061 = vector.extract_strided_slice %1002 {offsets = [0, 29], sizes = [8, 64], strides = [1, 1]} : vector<8x95xf32> to vector<8x64xf32>
    %c232 = arith.constant 232 : index
    %c0_106 = arith.constant 0 : index
    %1062 = vector.load %arg19[%c232, %c0_106] : memref<256x64xf32, #tpu.memory_space<vmem>>, vector<8x64xf32>
    tpu.vector_store %arg19[%c232, %c0_106], %1061 {strides = array<i32>} : memref<256x64xf32, #tpu.memory_space<vmem>>, vector<8x64xf32>,
    %1063 = vector.extract_strided_slice %1002 {offsets = [0, 30], sizes = [8, 64], strides = [1, 1]} : vector<8x95xf32> to vector<8x64xf32>
    %c240 = arith.constant 240 : index
    %c0_107 = arith.constant 0 : index
    %1064 = vector.load %arg19[%c240, %c0_107] : memref<256x64xf32, #tpu.memory_space<vmem>>, vector<8x64xf32>
    tpu.vector_store %arg19[%c240, %c0_107], %1063 {strides = array<i32>} : memref<256x64xf32, #tpu.memory_space<vmem>>, vector<8x64xf32>,
    %1065 = vector.extract_strided_slice %1002 {offsets = [0, 31], sizes = [8, 64], strides = [1, 1]} : vector<8x95xf32> to vector<8x64xf32>
    %c248 = arith.constant 248 : index
    %c0_108 = arith.constant 0 : index
    %1066 = vector.load %arg19[%c248, %c0_108] : memref<256x64xf32, #tpu.memory_space<vmem>>, vector<8x64xf32>
    tpu.vector_store %arg19[%c248, %c0_108], %1065 {strides = array<i32>} : memref<256x64xf32, #tpu.memory_space<vmem>>, vector<8x64xf32>,
    %c0_109 = arith.constant 0 : index
    %c0_110 = arith.constant 0 : index
    %1067 = vector.load %arg4[%c0_109, %c0_110] : memref<32x256xf32, #tpu.memory_space<vmem>>, vector<32x256xf32>
    %c0_111 = arith.constant 0 : index
    %c0_112 = arith.constant 0 : index
    %1068 = vector.load %arg19[%c0_111, %c0_112] : memref<256x64xf32, #tpu.memory_space<vmem>>, vector<256x64xf32>
    %cst_113 = arith.constant dense<0.000000e+00> : vector<32x64xf32>
    %1069 = tpu.matmul %1067, %1068, %cst_113 {dimension_numbers = #tpu.dot_dimension_numbers<[1], [0], [0], [1], [0, 0, 1, 1], [], []>} : vector<32x256xf32>, vector<256x64xf32>, vector<32x64xf32> -> vector<32x64xf32>
    %1070 = vector.broadcast %12 : vector<32x1xf32> to vector<32x64xf32>
    %1071 = arith.addf %1069, %1070 : vector<32x64xf32>
    %cst_114 = arith.constant 0.000000e+00 : f32
    %1072 = vector.broadcast %cst_114 : f32 to vector<32x64xf32>
    %1073 = arith.cmpf ogt, %1071, %1072 : vector<32x64xf32>
    %cst_115 = arith.constant 0.000000e+00 : f32
    %1074 = vector.broadcast %cst_115 : f32 to vector<32x64xf32>
    %1075 = arith.minimumf %1071, %1074 : vector<32x64xf32>
    %1076 = math.exp %1075 : vector<32x64xf32>
    %cst_116 = arith.constant 1.000000e+00 : f32
    %1077 = vector.broadcast %cst_116 : f32 to vector<32x64xf32>
    %1078 = arith.subf %1076, %1077 : vector<32x64xf32>
    %1079 = arith.select %1073, %1071, %1078 : vector<32x64xi1>, vector<32x64xf32>
    %c0_117 = arith.constant 0 : index
    %c0_118 = arith.constant 0 : index
    %1080 = vector.load %arg20[%c0_117, %c0_118] : memref<128x64xf32, #tpu.memory_space<vmem>>, vector<32x64xf32>
    tpu.vector_store %arg20[%c0_117, %c0_118], %1079 {strides = array<i32>} : memref<128x64xf32, #tpu.memory_space<vmem>>, vector<32x64xf32>,
    %c1_119 = arith.constant 1 : index
    %c0_120 = arith.constant 0 : index
    %c0_121 = arith.constant 0 : index
    %1081 = vector.load %arg16[%c1_119, %c0_120, %c0_121] : memref<4x8x95xf32, #tpu.memory_space<vmem>>, vector<1x8x95xf32>
    %1082 = vector.shape_cast %1081 : vector<1x8x95xf32> to vector<8x95xf32>
    %1083 = vector.extract_strided_slice %1082 {offsets = [0, 0], sizes = [8, 64], strides = [1, 1]} : vector<8x95xf32> to vector<8x64xf32>
    %c0_122 = arith.constant 0 : index
    %c0_123 = arith.constant 0 : index
    %1084 = vector.load %arg19[%c0_122, %c0_123] : memref<256x64xf32, #tpu.memory_space<vmem>>, vector<8x64xf32>
    tpu.vector_store %arg19[%c0_122, %c0_123], %1083 {strides = array<i32>} : memref<256x64xf32, #tpu.memory_space<vmem>>, vector<8x64xf32>,
    %1085 = vector.extract_strided_slice %1082 {offsets = [0, 1], sizes = [8, 64], strides = [1, 1]} : vector<8x95xf32> to vector<8x64xf32>
    %c8_124 = arith.constant 8 : index
    %c0_125 = arith.constant 0 : index
    %1086 = vector.load %arg19[%c8_124, %c0_125] : memref<256x64xf32, #tpu.memory_space<vmem>>, vector<8x64xf32>
    tpu.vector_store %arg19[%c8_124, %c0_125], %1085 {strides = array<i32>} : memref<256x64xf32, #tpu.memory_space<vmem>>, vector<8x64xf32>,
    %1087 = vector.extract_strided_slice %1082 {offsets = [0, 2], sizes = [8, 64], strides = [1, 1]} : vector<8x95xf32> to vector<8x64xf32>
    %c16_126 = arith.constant 16 : index
    %c0_127 = arith.constant 0 : index
    %1088 = vector.load %arg19[%c16_126, %c0_127] : memref<256x64xf32, #tpu.memory_space<vmem>>, vector<8x64xf32>
    tpu.vector_store %arg19[%c16_126, %c0_127], %1087 {strides = array<i32>} : memref<256x64xf32, #tpu.memory_space<vmem>>, vector<8x64xf32>,
    %1089 = vector.extract_strided_slice %1082 {offsets = [0, 3], sizes = [8, 64], strides = [1, 1]} : vector<8x95xf32> to vector<8x64xf32>
    %c24_128 = arith.constant 24 : index
    %c0_129 = arith.constant 0 : index
    %1090 = vector.load %arg19[%c24_128, %c0_129] : memref<256x64xf32, #tpu.memory_space<vmem>>, vector<8x64xf32>
    tpu.vector_store %arg19[%c24_128, %c0_129], %1089 {strides = array<i32>} : memref<256x64xf32, #tpu.memory_space<vmem>>, vector<8x64xf32>,
    %1091 = vector.extract_strided_slice %1082 {offsets = [0, 4], sizes = [8, 64], strides = [1, 1]} : vector<8x95xf32> to vector<8x64xf32>
    %c32_130 = arith.constant 32 : index
    %c0_131 = arith.constant 0 : index
    %1092 = vector.load %arg19[%c32_130, %c0_131] : memref<256x64xf32, #tpu.memory_space<vmem>>, vector<8x64xf32>
    tpu.vector_store %arg19[%c32_130, %c0_131], %1091 {strides = array<i32>} : memref<256x64xf32, #tpu.memory_space<vmem>>, vector<8x64xf32>,
    %1093 = vector.extract_strided_slice %1082 {offsets = [0, 5], sizes = [8, 64], strides = [1, 1]} : vector<8x95xf32> to vector<8x64xf32>
    %c40_132 = arith.constant 40 : index
    %c0_133 = arith.constant 0 : index
    %1094 = vector.load %arg19[%c40_132, %c0_133] : memref<256x64xf32, #tpu.memory_space<vmem>>, vector<8x64xf32>
    tpu.vector_store %arg19[%c40_132, %c0_133], %1093 {strides = array<i32>} : memref<256x64xf32, #tpu.memory_space<vmem>>, vector<8x64xf32>,
    %1095 = vector.extract_strided_slice %1082 {offsets = [0, 6], sizes = [8, 64], strides = [1, 1]} : vector<8x95xf32> to vector<8x64xf32>
    %c48_134 = arith.constant 48 : index
    %c0_135 = arith.constant 0 : index
    %1096 = vector.load %arg19[%c48_134, %c0_135] : memref<256x64xf32, #tpu.memory_space<vmem>>, vector<8x64xf32>
    tpu.vector_store %arg19[%c48_134, %c0_135], %1095 {strides = array<i32>} : memref<256x64xf32, #tpu.memory_space<vmem>>, vector<8x64xf32>,
    %1097 = vector.extract_strided_slice %1082 {offsets = [0, 7], sizes = [8, 64], strides = [1, 1]} : vector<8x95xf32> to vector<8x64xf32>
    %c56_136 = arith.constant 56 : index
    %c0_137 = arith.constant 0 : index
    %1098 = vector.load %arg19[%c56_136, %c0_137] : memref<256x64xf32, #tpu.memory_space<vmem>>, vector<8x64xf32>
    tpu.vector_store %arg19[%c56_136, %c0_137], %1097 {strides = array<i32>} : memref<256x64xf32, #tpu.memory_space<vmem>>, vector<8x64xf32>,
    %1099 = vector.extract_strided_slice %1082 {offsets = [0, 8], sizes = [8, 64], strides = [1, 1]} : vector<8x95xf32> to vector<8x64xf32>
    %c64_138 = arith.constant 64 : index
    %c0_139 = arith.constant 0 : index
    %1100 = vector.load %arg19[%c64_138, %c0_139] : memref<256x64xf32, #tpu.memory_space<vmem>>, vector<8x64xf32>
    tpu.vector_store %arg19[%c64_138, %c0_139], %1099 {strides = array<i32>} : memref<256x64xf32, #tpu.memory_space<vmem>>, vector<8x64xf32>,
    %1101 = vector.extract_strided_slice %1082 {offsets = [0, 9], sizes = [8, 64], strides = [1, 1]} : vector<8x95xf32> to vector<8x64xf32>
    %c72_140 = arith.constant 72 : index
    %c0_141 = arith.constant 0 : index
    %1102 = vector.load %arg19[%c72_140, %c0_141] : memref<256x64xf32, #tpu.memory_space<vmem>>, vector<8x64xf32>
    tpu.vector_store %arg19[%c72_140, %c0_141], %1101 {strides = array<i32>} : memref<256x64xf32, #tpu.memory_space<vmem>>, vector<8x64xf32>,
    %1103 = vector.extract_strided_slice %1082 {offsets = [0, 10], sizes = [8, 64], strides = [1, 1]} : vector<8x95xf32> to vector<8x64xf32>
    %c80_142 = arith.constant 80 : index
    %c0_143 = arith.constant 0 : index
    %1104 = vector.load %arg19[%c80_142, %c0_143] : memref<256x64xf32, #tpu.memory_space<vmem>>, vector<8x64xf32>
    tpu.vector_store %arg19[%c80_142, %c0_143], %1103 {strides = array<i32>} : memref<256x64xf32, #tpu.memory_space<vmem>>, vector<8x64xf32>,
    %1105 = vector.extract_strided_slice %1082 {offsets = [0, 11], sizes = [8, 64], strides = [1, 1]} : vector<8x95xf32> to vector<8x64xf32>
    %c88_144 = arith.constant 88 : index
    %c0_145 = arith.constant 0 : index
    %1106 = vector.load %arg19[%c88_144, %c0_145] : memref<256x64xf32, #tpu.memory_space<vmem>>, vector<8x64xf32>
    tpu.vector_store %arg19[%c88_144, %c0_145], %1105 {strides = array<i32>} : memref<256x64xf32, #tpu.memory_space<vmem>>, vector<8x64xf32>,
    %1107 = vector.extract_strided_slice %1082 {offsets = [0, 12], sizes = [8, 64], strides = [1, 1]} : vector<8x95xf32> to vector<8x64xf32>
    %c96_146 = arith.constant 96 : index
    %c0_147 = arith.constant 0 : index
    %1108 = vector.load %arg19[%c96_146, %c0_147] : memref<256x64xf32, #tpu.memory_space<vmem>>, vector<8x64xf32>
    tpu.vector_store %arg19[%c96_146, %c0_147], %1107 {strides = array<i32>} : memref<256x64xf32, #tpu.memory_space<vmem>>, vector<8x64xf32>,
    %1109 = vector.extract_strided_slice %1082 {offsets = [0, 13], sizes = [8, 64], strides = [1, 1]} : vector<8x95xf32> to vector<8x64xf32>
    %c104_148 = arith.constant 104 : index
    %c0_149 = arith.constant 0 : index
    %1110 = vector.load %arg19[%c104_148, %c0_149] : memref<256x64xf32, #tpu.memory_space<vmem>>, vector<8x64xf32>
    tpu.vector_store %arg19[%c104_148, %c0_149], %1109 {strides = array<i32>} : memref<256x64xf32, #tpu.memory_space<vmem>>, vector<8x64xf32>,
    %1111 = vector.extract_strided_slice %1082 {offsets = [0, 14], sizes = [8, 64], strides = [1, 1]} : vector<8x95xf32> to vector<8x64xf32>
    %c112_150 = arith.constant 112 : index
    %c0_151 = arith.constant 0 : index
    %1112 = vector.load %arg19[%c112_150, %c0_151] : memref<256x64xf32, #tpu.memory_space<vmem>>, vector<8x64xf32>
    tpu.vector_store %arg19[%c112_150, %c0_151], %1111 {strides = array<i32>} : memref<256x64xf32, #tpu.memory_space<vmem>>, vector<8x64xf32>,
    %1113 = vector.extract_strided_slice %1082 {offsets = [0, 15], sizes = [8, 64], strides = [1, 1]} : vector<8x95xf32> to vector<8x64xf32>
    %c120_152 = arith.constant 120 : index
    %c0_153 = arith.constant 0 : index
    %1114 = vector.load %arg19[%c120_152, %c0_153] : memref<256x64xf32, #tpu.memory_space<vmem>>, vector<8x64xf32>
    tpu.vector_store %arg19[%c120_152, %c0_153], %1113 {strides = array<i32>} : memref<256x64xf32, #tpu.memory_space<vmem>>, vector<8x64xf32>,
    %1115 = vector.extract_strided_slice %1082 {offsets = [0, 16], sizes = [8, 64], strides = [1, 1]} : vector<8x95xf32> to vector<8x64xf32>
    %c128_154 = arith.constant 128 : index
    %c0_155 = arith.constant 0 : index
    %1116 = vector.load %arg19[%c128_154, %c0_155] : memref<256x64xf32, #tpu.memory_space<vmem>>, vector<8x64xf32>
    tpu.vector_store %arg19[%c128_154, %c0_155], %1115 {strides = array<i32>} : memref<256x64xf32, #tpu.memory_space<vmem>>, vector<8x64xf32>,
    %1117 = vector.extract_strided_slice %1082 {offsets = [0, 17], sizes = [8, 64], strides = [1, 1]} : vector<8x95xf32> to vector<8x64xf32>
    %c136_156 = arith.constant 136 : index
    %c0_157 = arith.constant 0 : index
    %1118 = vector.load %arg19[%c136_156, %c0_157] : memref<256x64xf32, #tpu.memory_space<vmem>>, vector<8x64xf32>
    tpu.vector_store %arg19[%c136_156, %c0_157], %1117 {strides = array<i32>} : memref<256x64xf32, #tpu.memory_space<vmem>>, vector<8x64xf32>,
    %1119 = vector.extract_strided_slice %1082 {offsets = [0, 18], sizes = [8, 64], strides = [1, 1]} : vector<8x95xf32> to vector<8x64xf32>
    %c144_158 = arith.constant 144 : index
    %c0_159 = arith.constant 0 : index
    %1120 = vector.load %arg19[%c144_158, %c0_159] : memref<256x64xf32, #tpu.memory_space<vmem>>, vector<8x64xf32>
    tpu.vector_store %arg19[%c144_158, %c0_159], %1119 {strides = array<i32>} : memref<256x64xf32, #tpu.memory_space<vmem>>, vector<8x64xf32>,
    %1121 = vector.extract_strided_slice %1082 {offsets = [0, 19], sizes = [8, 64], strides = [1, 1]} : vector<8x95xf32> to vector<8x64xf32>
    %c152_160 = arith.constant 152 : index
    %c0_161 = arith.constant 0 : index
    %1122 = vector.load %arg19[%c152_160, %c0_161] : memref<256x64xf32, #tpu.memory_space<vmem>>, vector<8x64xf32>
    tpu.vector_store %arg19[%c152_160, %c0_161], %1121 {strides = array<i32>} : memref<256x64xf32, #tpu.memory_space<vmem>>, vector<8x64xf32>,
    %1123 = vector.extract_strided_slice %1082 {offsets = [0, 20], sizes = [8, 64], strides = [1, 1]} : vector<8x95xf32> to vector<8x64xf32>
    %c160_162 = arith.constant 160 : index
    %c0_163 = arith.constant 0 : index
    %1124 = vector.load %arg19[%c160_162, %c0_163] : memref<256x64xf32, #tpu.memory_space<vmem>>, vector<8x64xf32>
    tpu.vector_store %arg19[%c160_162, %c0_163], %1123 {strides = array<i32>} : memref<256x64xf32, #tpu.memory_space<vmem>>, vector<8x64xf32>,
    %1125 = vector.extract_strided_slice %1082 {offsets = [0, 21], sizes = [8, 64], strides = [1, 1]} : vector<8x95xf32> to vector<8x64xf32>
    %c168_164 = arith.constant 168 : index
    %c0_165 = arith.constant 0 : index
    %1126 = vector.load %arg19[%c168_164, %c0_165] : memref<256x64xf32, #tpu.memory_space<vmem>>, vector<8x64xf32>
    tpu.vector_store %arg19[%c168_164, %c0_165], %1125 {strides = array<i32>} : memref<256x64xf32, #tpu.memory_space<vmem>>, vector<8x64xf32>,
    %1127 = vector.extract_strided_slice %1082 {offsets = [0, 22], sizes = [8, 64], strides = [1, 1]} : vector<8x95xf32> to vector<8x64xf32>
    %c176_166 = arith.constant 176 : index
    %c0_167 = arith.constant 0 : index
    %1128 = vector.load %arg19[%c176_166, %c0_167] : memref<256x64xf32, #tpu.memory_space<vmem>>, vector<8x64xf32>
    tpu.vector_store %arg19[%c176_166, %c0_167], %1127 {strides = array<i32>} : memref<256x64xf32, #tpu.memory_space<vmem>>, vector<8x64xf32>,
    %1129 = vector.extract_strided_slice %1082 {offsets = [0, 23], sizes = [8, 64], strides = [1, 1]} : vector<8x95xf32> to vector<8x64xf32>
    %c184_168 = arith.constant 184 : index
    %c0_169 = arith.constant 0 : index
    %1130 = vector.load %arg19[%c184_168, %c0_169] : memref<256x64xf32, #tpu.memory_space<vmem>>, vector<8x64xf32>
    tpu.vector_store %arg19[%c184_168, %c0_169], %1129 {strides = array<i32>} : memref<256x64xf32, #tpu.memory_space<vmem>>, vector<8x64xf32>,
    %1131 = vector.extract_strided_slice %1082 {offsets = [0, 24], sizes = [8, 64], strides = [1, 1]} : vector<8x95xf32> to vector<8x64xf32>
    %c192_170 = arith.constant 192 : index
    %c0_171 = arith.constant 0 : index
    %1132 = vector.load %arg19[%c192_170, %c0_171] : memref<256x64xf32, #tpu.memory_space<vmem>>, vector<8x64xf32>
    tpu.vector_store %arg19[%c192_170, %c0_171], %1131 {strides = array<i32>} : memref<256x64xf32, #tpu.memory_space<vmem>>, vector<8x64xf32>,
    %1133 = vector.extract_strided_slice %1082 {offsets = [0, 25], sizes = [8, 64], strides = [1, 1]} : vector<8x95xf32> to vector<8x64xf32>
    %c200_172 = arith.constant 200 : index
    %c0_173 = arith.constant 0 : index
    %1134 = vector.load %arg19[%c200_172, %c0_173] : memref<256x64xf32, #tpu.memory_space<vmem>>, vector<8x64xf32>
    tpu.vector_store %arg19[%c200_172, %c0_173], %1133 {strides = array<i32>} : memref<256x64xf32, #tpu.memory_space<vmem>>, vector<8x64xf32>,
    %1135 = vector.extract_strided_slice %1082 {offsets = [0, 26], sizes = [8, 64], strides = [1, 1]} : vector<8x95xf32> to vector<8x64xf32>
    %c208_174 = arith.constant 208 : index
    %c0_175 = arith.constant 0 : index
    %1136 = vector.load %arg19[%c208_174, %c0_175] : memref<256x64xf32, #tpu.memory_space<vmem>>, vector<8x64xf32>
    tpu.vector_store %arg19[%c208_174, %c0_175], %1135 {strides = array<i32>} : memref<256x64xf32, #tpu.memory_space<vmem>>, vector<8x64xf32>,
    %1137 = vector.extract_strided_slice %1082 {offsets = [0, 27], sizes = [8, 64], strides = [1, 1]} : vector<8x95xf32> to vector<8x64xf32>
    %c216_176 = arith.constant 216 : index
    %c0_177 = arith.constant 0 : index
    %1138 = vector.load %arg19[%c216_176, %c0_177] : memref<256x64xf32, #tpu.memory_space<vmem>>, vector<8x64xf32>
    tpu.vector_store %arg19[%c216_176, %c0_177], %1137 {strides = array<i32>} : memref<256x64xf32, #tpu.memory_space<vmem>>, vector<8x64xf32>,
    %1139 = vector.extract_strided_slice %1082 {offsets = [0, 28], sizes = [8, 64], strides = [1, 1]} : vector<8x95xf32> to vector<8x64xf32>
    %c224_178 = arith.constant 224 : index
    %c0_179 = arith.constant 0 : index
    %1140 = vector.load %arg19[%c224_178, %c0_179] : memref<256x64xf32, #tpu.memory_space<vmem>>, vector<8x64xf32>
    tpu.vector_store %arg19[%c224_178, %c0_179], %1139 {strides = array<i32>} : memref<256x64xf32, #tpu.memory_space<vmem>>, vector<8x64xf32>,
    %1141 = vector.extract_strided_slice %1082 {offsets = [0, 29], sizes = [8, 64], strides = [1, 1]} : vector<8x95xf32> to vector<8x64xf32>
    %c232_180 = arith.constant 232 : index
    %c0_181 = arith.constant 0 : index
    %1142 = vector.load %arg19[%c232_180, %c0_181] : memref<256x64xf32, #tpu.memory_space<vmem>>, vector<8x64xf32>
    tpu.vector_store %arg19[%c232_180, %c0_181], %1141 {strides = array<i32>} : memref<256x64xf32, #tpu.memory_space<vmem>>, vector<8x64xf32>,
    %1143 = vector.extract_strided_slice %1082 {offsets = [0, 30], sizes = [8, 64], strides = [1, 1]} : vector<8x95xf32> to vector<8x64xf32>
    %c240_182 = arith.constant 240 : index
    %c0_183 = arith.constant 0 : index
    %1144 = vector.load %arg19[%c240_182, %c0_183] : memref<256x64xf32, #tpu.memory_space<vmem>>, vector<8x64xf32>
    tpu.vector_store %arg19[%c240_182, %c0_183], %1143 {strides = array<i32>} : memref<256x64xf32, #tpu.memory_space<vmem>>, vector<8x64xf32>,
    %1145 = vector.extract_strided_slice %1082 {offsets = [0, 31], sizes = [8, 64], strides = [1, 1]} : vector<8x95xf32> to vector<8x64xf32>
    %c248_184 = arith.constant 248 : index
    %c0_185 = arith.constant 0 : index
    %1146 = vector.load %arg19[%c248_184, %c0_185] : memref<256x64xf32, #tpu.memory_space<vmem>>, vector<8x64xf32>
    tpu.vector_store %arg19[%c248_184, %c0_185], %1145 {strides = array<i32>} : memref<256x64xf32, #tpu.memory_space<vmem>>, vector<8x64xf32>,
    %c0_186 = arith.constant 0 : index
    %c0_187 = arith.constant 0 : index
    %1147 = vector.load %arg4[%c0_186, %c0_187] : memref<32x256xf32, #tpu.memory_space<vmem>>, vector<32x256xf32>
    %c0_188 = arith.constant 0 : index
    %c0_189 = arith.constant 0 : index
    %1148 = vector.load %arg19[%c0_188, %c0_189] : memref<256x64xf32, #tpu.memory_space<vmem>>, vector<256x64xf32>
    %cst_190 = arith.constant dense<0.000000e+00> : vector<32x64xf32>
    %1149 = tpu.matmul %1147, %1148, %cst_190 {dimension_numbers = #tpu.dot_dimension_numbers<[1], [0], [0], [1], [0, 0, 1, 1], [], []>} : vector<32x256xf32>, vector<256x64xf32>, vector<32x64xf32> -> vector<32x64xf32>
    %1150 = vector.broadcast %12 : vector<32x1xf32> to vector<32x64xf32>
    %1151 = arith.addf %1149, %1150 : vector<32x64xf32>
    %cst_191 = arith.constant 0.000000e+00 : f32
    %1152 = vector.broadcast %cst_191 : f32 to vector<32x64xf32>
    %1153 = arith.cmpf ogt, %1151, %1152 : vector<32x64xf32>
    %cst_192 = arith.constant 0.000000e+00 : f32
    %1154 = vector.broadcast %cst_192 : f32 to vector<32x64xf32>
    %1155 = arith.minimumf %1151, %1154 : vector<32x64xf32>
    %1156 = math.exp %1155 : vector<32x64xf32>
    %cst_193 = arith.constant 1.000000e+00 : f32
    %1157 = vector.broadcast %cst_193 : f32 to vector<32x64xf32>
    %1158 = arith.subf %1156, %1157 : vector<32x64xf32>
    %1159 = arith.select %1153, %1151, %1158 : vector<32x64xi1>, vector<32x64xf32>
    %c32_194 = arith.constant 32 : index
    %c0_195 = arith.constant 0 : index
    %1160 = vector.load %arg20[%c32_194, %c0_195] : memref<128x64xf32, #tpu.memory_space<vmem>>, vector<32x64xf32>
    tpu.vector_store %arg20[%c32_194, %c0_195], %1159 {strides = array<i32>} : memref<128x64xf32, #tpu.memory_space<vmem>>, vector<32x64xf32>,
    %c2_196 = arith.constant 2 : index
    %c0_197 = arith.constant 0 : index
    %c0_198 = arith.constant 0 : index
    %1161 = vector.load %arg16[%c2_196, %c0_197, %c0_198] : memref<4x8x95xf32, #tpu.memory_space<vmem>>, vector<1x8x95xf32>
    %1162 = vector.shape_cast %1161 : vector<1x8x95xf32> to vector<8x95xf32>
    %1163 = vector.extract_strided_slice %1162 {offsets = [0, 0], sizes = [8, 64], strides = [1, 1]} : vector<8x95xf32> to vector<8x64xf32>
    %c0_199 = arith.constant 0 : index
    %c0_200 = arith.constant 0 : index
    %1164 = vector.load %arg19[%c0_199, %c0_200] : memref<256x64xf32, #tpu.memory_space<vmem>>, vector<8x64xf32>
    tpu.vector_store %arg19[%c0_199, %c0_200], %1163 {strides = array<i32>} : memref<256x64xf32, #tpu.memory_space<vmem>>, vector<8x64xf32>,
    %1165 = vector.extract_strided_slice %1162 {offsets = [0, 1], sizes = [8, 64], strides = [1, 1]} : vector<8x95xf32> to vector<8x64xf32>
    %c8_201 = arith.constant 8 : index
    %c0_202 = arith.constant 0 : index
    %1166 = vector.load %arg19[%c8_201, %c0_202] : memref<256x64xf32, #tpu.memory_space<vmem>>, vector<8x64xf32>
    tpu.vector_store %arg19[%c8_201, %c0_202], %1165 {strides = array<i32>} : memref<256x64xf32, #tpu.memory_space<vmem>>, vector<8x64xf32>,
    %1167 = vector.extract_strided_slice %1162 {offsets = [0, 2], sizes = [8, 64], strides = [1, 1]} : vector<8x95xf32> to vector<8x64xf32>
    %c16_203 = arith.constant 16 : index
    %c0_204 = arith.constant 0 : index
    %1168 = vector.load %arg19[%c16_203, %c0_204] : memref<256x64xf32, #tpu.memory_space<vmem>>, vector<8x64xf32>
    tpu.vector_store %arg19[%c16_203, %c0_204], %1167 {strides = array<i32>} : memref<256x64xf32, #tpu.memory_space<vmem>>, vector<8x64xf32>,
    %1169 = vector.extract_strided_slice %1162 {offsets = [0, 3], sizes = [8, 64], strides = [1, 1]} : vector<8x95xf32> to vector<8x64xf32>
    %c24_205 = arith.constant 24 : index
    %c0_206 = arith.constant 0 : index
    %1170 = vector.load %arg19[%c24_205, %c0_206] : memref<256x64xf32, #tpu.memory_space<vmem>>, vector<8x64xf32>
    tpu.vector_store %arg19[%c24_205, %c0_206], %1169 {strides = array<i32>} : memref<256x64xf32, #tpu.memory_space<vmem>>, vector<8x64xf32>,
    %1171 = vector.extract_strided_slice %1162 {offsets = [0, 4], sizes = [8, 64], strides = [1, 1]} : vector<8x95xf32> to vector<8x64xf32>
    %c32_207 = arith.constant 32 : index
    %c0_208 = arith.constant 0 : index
    %1172 = vector.load %arg19[%c32_207, %c0_208] : memref<256x64xf32, #tpu.memory_space<vmem>>, vector<8x64xf32>
    tpu.vector_store %arg19[%c32_207, %c0_208], %1171 {strides = array<i32>} : memref<256x64xf32, #tpu.memory_space<vmem>>, vector<8x64xf32>,
    %1173 = vector.extract_strided_slice %1162 {offsets = [0, 5], sizes = [8, 64], strides = [1, 1]} : vector<8x95xf32> to vector<8x64xf32>
    %c40_209 = arith.constant 40 : index
    %c0_210 = arith.constant 0 : index
    %1174 = vector.load %arg19[%c40_209, %c0_210] : memref<256x64xf32, #tpu.memory_space<vmem>>, vector<8x64xf32>
    tpu.vector_store %arg19[%c40_209, %c0_210], %1173 {strides = array<i32>} : memref<256x64xf32, #tpu.memory_space<vmem>>, vector<8x64xf32>,
    %1175 = vector.extract_strided_slice %1162 {offsets = [0, 6], sizes = [8, 64], strides = [1, 1]} : vector<8x95xf32> to vector<8x64xf32>
    %c48_211 = arith.constant 48 : index
    %c0_212 = arith.constant 0 : index
    %1176 = vector.load %arg19[%c48_211, %c0_212] : memref<256x64xf32, #tpu.memory_space<vmem>>, vector<8x64xf32>
    tpu.vector_store %arg19[%c48_211, %c0_212], %1175 {strides = array<i32>} : memref<256x64xf32, #tpu.memory_space<vmem>>, vector<8x64xf32>,
    %1177 = vector.extract_strided_slice %1162 {offsets = [0, 7], sizes = [8, 64], strides = [1, 1]} : vector<8x95xf32> to vector<8x64xf32>
    %c56_213 = arith.constant 56 : index
    %c0_214 = arith.constant 0 : index
    %1178 = vector.load %arg19[%c56_213, %c0_214] : memref<256x64xf32, #tpu.memory_space<vmem>>, vector<8x64xf32>
    tpu.vector_store %arg19[%c56_213, %c0_214], %1177 {strides = array<i32>} : memref<256x64xf32, #tpu.memory_space<vmem>>, vector<8x64xf32>,
    %1179 = vector.extract_strided_slice %1162 {offsets = [0, 8], sizes = [8, 64], strides = [1, 1]} : vector<8x95xf32> to vector<8x64xf32>
    %c64_215 = arith.constant 64 : index
    %c0_216 = arith.constant 0 : index
    %1180 = vector.load %arg19[%c64_215, %c0_216] : memref<256x64xf32, #tpu.memory_space<vmem>>, vector<8x64xf32>
    tpu.vector_store %arg19[%c64_215, %c0_216], %1179 {strides = array<i32>} : memref<256x64xf32, #tpu.memory_space<vmem>>, vector<8x64xf32>,
    %1181 = vector.extract_strided_slice %1162 {offsets = [0, 9], sizes = [8, 64], strides = [1, 1]} : vector<8x95xf32> to vector<8x64xf32>
    %c72_217 = arith.constant 72 : index
    %c0_218 = arith.constant 0 : index
    %1182 = vector.load %arg19[%c72_217, %c0_218] : memref<256x64xf32, #tpu.memory_space<vmem>>, vector<8x64xf32>
    tpu.vector_store %arg19[%c72_217, %c0_218], %1181 {strides = array<i32>} : memref<256x64xf32, #tpu.memory_space<vmem>>, vector<8x64xf32>,
    %1183 = vector.extract_strided_slice %1162 {offsets = [0, 10], sizes = [8, 64], strides = [1, 1]} : vector<8x95xf32> to vector<8x64xf32>
    %c80_219 = arith.constant 80 : index
    %c0_220 = arith.constant 0 : index
    %1184 = vector.load %arg19[%c80_219, %c0_220] : memref<256x64xf32, #tpu.memory_space<vmem>>, vector<8x64xf32>
    tpu.vector_store %arg19[%c80_219, %c0_220], %1183 {strides = array<i32>} : memref<256x64xf32, #tpu.memory_space<vmem>>, vector<8x64xf32>,
    %1185 = vector.extract_strided_slice %1162 {offsets = [0, 11], sizes = [8, 64], strides = [1, 1]} : vector<8x95xf32> to vector<8x64xf32>
    %c88_221 = arith.constant 88 : index
    %c0_222 = arith.constant 0 : index
    %1186 = vector.load %arg19[%c88_221, %c0_222] : memref<256x64xf32, #tpu.memory_space<vmem>>, vector<8x64xf32>
    tpu.vector_store %arg19[%c88_221, %c0_222], %1185 {strides = array<i32>} : memref<256x64xf32, #tpu.memory_space<vmem>>, vector<8x64xf32>,
    %1187 = vector.extract_strided_slice %1162 {offsets = [0, 12], sizes = [8, 64], strides = [1, 1]} : vector<8x95xf32> to vector<8x64xf32>
    %c96_223 = arith.constant 96 : index
    %c0_224 = arith.constant 0 : index
    %1188 = vector.load %arg19[%c96_223, %c0_224] : memref<256x64xf32, #tpu.memory_space<vmem>>, vector<8x64xf32>
    tpu.vector_store %arg19[%c96_223, %c0_224], %1187 {strides = array<i32>} : memref<256x64xf32, #tpu.memory_space<vmem>>, vector<8x64xf32>,
    %1189 = vector.extract_strided_slice %1162 {offsets = [0, 13], sizes = [8, 64], strides = [1, 1]} : vector<8x95xf32> to vector<8x64xf32>
    %c104_225 = arith.constant 104 : index
    %c0_226 = arith.constant 0 : index
    %1190 = vector.load %arg19[%c104_225, %c0_226] : memref<256x64xf32, #tpu.memory_space<vmem>>, vector<8x64xf32>
    tpu.vector_store %arg19[%c104_225, %c0_226], %1189 {strides = array<i32>} : memref<256x64xf32, #tpu.memory_space<vmem>>, vector<8x64xf32>,
    %1191 = vector.extract_strided_slice %1162 {offsets = [0, 14], sizes = [8, 64], strides = [1, 1]} : vector<8x95xf32> to vector<8x64xf32>
    %c112_227 = arith.constant 112 : index
    %c0_228 = arith.constant 0 : index
    %1192 = vector.load %arg19[%c112_227, %c0_228] : memref<256x64xf32, #tpu.memory_space<vmem>>, vector<8x64xf32>
    tpu.vector_store %arg19[%c112_227, %c0_228], %1191 {strides = array<i32>} : memref<256x64xf32, #tpu.memory_space<vmem>>, vector<8x64xf32>,
    %1193 = vector.extract_strided_slice %1162 {offsets = [0, 15], sizes = [8, 64], strides = [1, 1]} : vector<8x95xf32> to vector<8x64xf32>
    %c120_229 = arith.constant 120 : index
    %c0_230 = arith.constant 0 : index
    %1194 = vector.load %arg19[%c120_229, %c0_230] : memref<256x64xf32, #tpu.memory_space<vmem>>, vector<8x64xf32>
    tpu.vector_store %arg19[%c120_229, %c0_230], %1193 {strides = array<i32>} : memref<256x64xf32, #tpu.memory_space<vmem>>, vector<8x64xf32>,
    %1195 = vector.extract_strided_slice %1162 {offsets = [0, 16], sizes = [8, 64], strides = [1, 1]} : vector<8x95xf32> to vector<8x64xf32>
    %c128_231 = arith.constant 128 : index
    %c0_232 = arith.constant 0 : index
    %1196 = vector.load %arg19[%c128_231, %c0_232] : memref<256x64xf32, #tpu.memory_space<vmem>>, vector<8x64xf32>
    tpu.vector_store %arg19[%c128_231, %c0_232], %1195 {strides = array<i32>} : memref<256x64xf32, #tpu.memory_space<vmem>>, vector<8x64xf32>,
    %1197 = vector.extract_strided_slice %1162 {offsets = [0, 17], sizes = [8, 64], strides = [1, 1]} : vector<8x95xf32> to vector<8x64xf32>
    %c136_233 = arith.constant 136 : index
    %c0_234 = arith.constant 0 : index
    %1198 = vector.load %arg19[%c136_233, %c0_234] : memref<256x64xf32, #tpu.memory_space<vmem>>, vector<8x64xf32>
    tpu.vector_store %arg19[%c136_233, %c0_234], %1197 {strides = array<i32>} : memref<256x64xf32, #tpu.memory_space<vmem>>, vector<8x64xf32>,
    %1199 = vector.extract_strided_slice %1162 {offsets = [0, 18], sizes = [8, 64], strides = [1, 1]} : vector<8x95xf32> to vector<8x64xf32>
    %c144_235 = arith.constant 144 : index
    %c0_236 = arith.constant 0 : index
    %1200 = vector.load %arg19[%c144_235, %c0_236] : memref<256x64xf32, #tpu.memory_space<vmem>>, vector<8x64xf32>
    tpu.vector_store %arg19[%c144_235, %c0_236], %1199 {strides = array<i32>} : memref<256x64xf32, #tpu.memory_space<vmem>>, vector<8x64xf32>,
    %1201 = vector.extract_strided_slice %1162 {offsets = [0, 19], sizes = [8, 64], strides = [1, 1]} : vector<8x95xf32> to vector<8x64xf32>
    %c152_237 = arith.constant 152 : index
    %c0_238 = arith.constant 0 : index
    %1202 = vector.load %arg19[%c152_237, %c0_238] : memref<256x64xf32, #tpu.memory_space<vmem>>, vector<8x64xf32>
    tpu.vector_store %arg19[%c152_237, %c0_238], %1201 {strides = array<i32>} : memref<256x64xf32, #tpu.memory_space<vmem>>, vector<8x64xf32>,
    %1203 = vector.extract_strided_slice %1162 {offsets = [0, 20], sizes = [8, 64], strides = [1, 1]} : vector<8x95xf32> to vector<8x64xf32>
    %c160_239 = arith.constant 160 : index
    %c0_240 = arith.constant 0 : index
    %1204 = vector.load %arg19[%c160_239, %c0_240] : memref<256x64xf32, #tpu.memory_space<vmem>>, vector<8x64xf32>
    tpu.vector_store %arg19[%c160_239, %c0_240], %1203 {strides = array<i32>} : memref<256x64xf32, #tpu.memory_space<vmem>>, vector<8x64xf32>,
    %1205 = vector.extract_strided_slice %1162 {offsets = [0, 21], sizes = [8, 64], strides = [1, 1]} : vector<8x95xf32> to vector<8x64xf32>
    %c168_241 = arith.constant 168 : index
    %c0_242 = arith.constant 0 : index
    %1206 = vector.load %arg19[%c168_241, %c0_242] : memref<256x64xf32, #tpu.memory_space<vmem>>, vector<8x64xf32>
    tpu.vector_store %arg19[%c168_241, %c0_242], %1205 {strides = array<i32>} : memref<256x64xf32, #tpu.memory_space<vmem>>, vector<8x64xf32>,
    %1207 = vector.extract_strided_slice %1162 {offsets = [0, 22], sizes = [8, 64], strides = [1, 1]} : vector<8x95xf32> to vector<8x64xf32>
    %c176_243 = arith.constant 176 : index
    %c0_244 = arith.constant 0 : index
    %1208 = vector.load %arg19[%c176_243, %c0_244] : memref<256x64xf32, #tpu.memory_space<vmem>>, vector<8x64xf32>
    tpu.vector_store %arg19[%c176_243, %c0_244], %1207 {strides = array<i32>} : memref<256x64xf32, #tpu.memory_space<vmem>>, vector<8x64xf32>,
    %1209 = vector.extract_strided_slice %1162 {offsets = [0, 23], sizes = [8, 64], strides = [1, 1]} : vector<8x95xf32> to vector<8x64xf32>
    %c184_245 = arith.constant 184 : index
    %c0_246 = arith.constant 0 : index
    %1210 = vector.load %arg19[%c184_245, %c0_246] : memref<256x64xf32, #tpu.memory_space<vmem>>, vector<8x64xf32>
    tpu.vector_store %arg19[%c184_245, %c0_246], %1209 {strides = array<i32>} : memref<256x64xf32, #tpu.memory_space<vmem>>, vector<8x64xf32>,
    %1211 = vector.extract_strided_slice %1162 {offsets = [0, 24], sizes = [8, 64], strides = [1, 1]} : vector<8x95xf32> to vector<8x64xf32>
    %c192_247 = arith.constant 192 : index
    %c0_248 = arith.constant 0 : index
    %1212 = vector.load %arg19[%c192_247, %c0_248] : memref<256x64xf32, #tpu.memory_space<vmem>>, vector<8x64xf32>
    tpu.vector_store %arg19[%c192_247, %c0_248], %1211 {strides = array<i32>} : memref<256x64xf32, #tpu.memory_space<vmem>>, vector<8x64xf32>,
    %1213 = vector.extract_strided_slice %1162 {offsets = [0, 25], sizes = [8, 64], strides = [1, 1]} : vector<8x95xf32> to vector<8x64xf32>
    %c200_249 = arith.constant 200 : index
    %c0_250 = arith.constant 0 : index
    %1214 = vector.load %arg19[%c200_249, %c0_250] : memref<256x64xf32, #tpu.memory_space<vmem>>, vector<8x64xf32>
    tpu.vector_store %arg19[%c200_249, %c0_250], %1213 {strides = array<i32>} : memref<256x64xf32, #tpu.memory_space<vmem>>, vector<8x64xf32>,
    %1215 = vector.extract_strided_slice %1162 {offsets = [0, 26], sizes = [8, 64], strides = [1, 1]} : vector<8x95xf32> to vector<8x64xf32>
    %c208_251 = arith.constant 208 : index
    %c0_252 = arith.constant 0 : index
    %1216 = vector.load %arg19[%c208_251, %c0_252] : memref<256x64xf32, #tpu.memory_space<vmem>>, vector<8x64xf32>
    tpu.vector_store %arg19[%c208_251, %c0_252], %1215 {strides = array<i32>} : memref<256x64xf32, #tpu.memory_space<vmem>>, vector<8x64xf32>,
    %1217 = vector.extract_strided_slice %1162 {offsets = [0, 27], sizes = [8, 64], strides = [1, 1]} : vector<8x95xf32> to vector<8x64xf32>
    %c216_253 = arith.constant 216 : index
    %c0_254 = arith.constant 0 : index
    %1218 = vector.load %arg19[%c216_253, %c0_254] : memref<256x64xf32, #tpu.memory_space<vmem>>, vector<8x64xf32>
    tpu.vector_store %arg19[%c216_253, %c0_254], %1217 {strides = array<i32>} : memref<256x64xf32, #tpu.memory_space<vmem>>, vector<8x64xf32>,
    %1219 = vector.extract_strided_slice %1162 {offsets = [0, 28], sizes = [8, 64], strides = [1, 1]} : vector<8x95xf32> to vector<8x64xf32>
    %c224_255 = arith.constant 224 : index
    %c0_256 = arith.constant 0 : index
    %1220 = vector.load %arg19[%c224_255, %c0_256] : memref<256x64xf32, #tpu.memory_space<vmem>>, vector<8x64xf32>
    tpu.vector_store %arg19[%c224_255, %c0_256], %1219 {strides = array<i32>} : memref<256x64xf32, #tpu.memory_space<vmem>>, vector<8x64xf32>,
    %1221 = vector.extract_strided_slice %1162 {offsets = [0, 29], sizes = [8, 64], strides = [1, 1]} : vector<8x95xf32> to vector<8x64xf32>
    %c232_257 = arith.constant 232 : index
    %c0_258 = arith.constant 0 : index
    %1222 = vector.load %arg19[%c232_257, %c0_258] : memref<256x64xf32, #tpu.memory_space<vmem>>, vector<8x64xf32>
    tpu.vector_store %arg19[%c232_257, %c0_258], %1221 {strides = array<i32>} : memref<256x64xf32, #tpu.memory_space<vmem>>, vector<8x64xf32>,
    %1223 = vector.extract_strided_slice %1162 {offsets = [0, 30], sizes = [8, 64], strides = [1, 1]} : vector<8x95xf32> to vector<8x64xf32>
    %c240_259 = arith.constant 240 : index
    %c0_260 = arith.constant 0 : index
    %1224 = vector.load %arg19[%c240_259, %c0_260] : memref<256x64xf32, #tpu.memory_space<vmem>>, vector<8x64xf32>
    tpu.vector_store %arg19[%c240_259, %c0_260], %1223 {strides = array<i32>} : memref<256x64xf32, #tpu.memory_space<vmem>>, vector<8x64xf32>,
    %1225 = vector.extract_strided_slice %1162 {offsets = [0, 31], sizes = [8, 64], strides = [1, 1]} : vector<8x95xf32> to vector<8x64xf32>
    %c248_261 = arith.constant 248 : index
    %c0_262 = arith.constant 0 : index
    %1226 = vector.load %arg19[%c248_261, %c0_262] : memref<256x64xf32, #tpu.memory_space<vmem>>, vector<8x64xf32>
    tpu.vector_store %arg19[%c248_261, %c0_262], %1225 {strides = array<i32>} : memref<256x64xf32, #tpu.memory_space<vmem>>, vector<8x64xf32>,
    %c0_263 = arith.constant 0 : index
    %c0_264 = arith.constant 0 : index
    %1227 = vector.load %arg4[%c0_263, %c0_264] : memref<32x256xf32, #tpu.memory_space<vmem>>, vector<32x256xf32>
    %c0_265 = arith.constant 0 : index
    %c0_266 = arith.constant 0 : index
    %1228 = vector.load %arg19[%c0_265, %c0_266] : memref<256x64xf32, #tpu.memory_space<vmem>>, vector<256x64xf32>
    %cst_267 = arith.constant dense<0.000000e+00> : vector<32x64xf32>
    %1229 = tpu.matmul %1227, %1228, %cst_267 {dimension_numbers = #tpu.dot_dimension_numbers<[1], [0], [0], [1], [0, 0, 1, 1], [], []>} : vector<32x256xf32>, vector<256x64xf32>, vector<32x64xf32> -> vector<32x64xf32>
    %1230 = vector.broadcast %12 : vector<32x1xf32> to vector<32x64xf32>
    %1231 = arith.addf %1229, %1230 : vector<32x64xf32>
    %cst_268 = arith.constant 0.000000e+00 : f32
    %1232 = vector.broadcast %cst_268 : f32 to vector<32x64xf32>
    %1233 = arith.cmpf ogt, %1231, %1232 : vector<32x64xf32>
    %cst_269 = arith.constant 0.000000e+00 : f32
    %1234 = vector.broadcast %cst_269 : f32 to vector<32x64xf32>
    %1235 = arith.minimumf %1231, %1234 : vector<32x64xf32>
    %1236 = math.exp %1235 : vector<32x64xf32>
    %cst_270 = arith.constant 1.000000e+00 : f32
    %1237 = vector.broadcast %cst_270 : f32 to vector<32x64xf32>
    %1238 = arith.subf %1236, %1237 : vector<32x64xf32>
    %1239 = arith.select %1233, %1231, %1238 : vector<32x64xi1>, vector<32x64xf32>
    %c64_271 = arith.constant 64 : index
    %c0_272 = arith.constant 0 : index
    %1240 = vector.load %arg20[%c64_271, %c0_272] : memref<128x64xf32, #tpu.memory_space<vmem>>, vector<32x64xf32>
    tpu.vector_store %arg20[%c64_271, %c0_272], %1239 {strides = array<i32>} : memref<128x64xf32, #tpu.memory_space<vmem>>, vector<32x64xf32>,
    %c3_273 = arith.constant 3 : index
    %c0_274 = arith.constant 0 : index
    %c0_275 = arith.constant 0 : index
    %1241 = vector.load %arg16[%c3_273, %c0_274, %c0_275] : memref<4x8x95xf32, #tpu.memory_space<vmem>>, vector<1x8x95xf32>
    %1242 = vector.shape_cast %1241 : vector<1x8x95xf32> to vector<8x95xf32>
    %1243 = vector.extract_strided_slice %1242 {offsets = [0, 0], sizes = [8, 64], strides = [1, 1]} : vector<8x95xf32> to vector<8x64xf32>
    %c0_276 = arith.constant 0 : index
    %c0_277 = arith.constant 0 : index
    %1244 = vector.load %arg19[%c0_276, %c0_277] : memref<256x64xf32, #tpu.memory_space<vmem>>, vector<8x64xf32>
    tpu.vector_store %arg19[%c0_276, %c0_277], %1243 {strides = array<i32>} : memref<256x64xf32, #tpu.memory_space<vmem>>, vector<8x64xf32>,
    %1245 = vector.extract_strided_slice %1242 {offsets = [0, 1], sizes = [8, 64], strides = [1, 1]} : vector<8x95xf32> to vector<8x64xf32>
    %c8_278 = arith.constant 8 : index
    %c0_279 = arith.constant 0 : index
    %1246 = vector.load %arg19[%c8_278, %c0_279] : memref<256x64xf32, #tpu.memory_space<vmem>>, vector<8x64xf32>
    tpu.vector_store %arg19[%c8_278, %c0_279], %1245 {strides = array<i32>} : memref<256x64xf32, #tpu.memory_space<vmem>>, vector<8x64xf32>,
    %1247 = vector.extract_strided_slice %1242 {offsets = [0, 2], sizes = [8, 64], strides = [1, 1]} : vector<8x95xf32> to vector<8x64xf32>
    %c16_280 = arith.constant 16 : index
    %c0_281 = arith.constant 0 : index
    %1248 = vector.load %arg19[%c16_280, %c0_281] : memref<256x64xf32, #tpu.memory_space<vmem>>, vector<8x64xf32>
    tpu.vector_store %arg19[%c16_280, %c0_281], %1247 {strides = array<i32>} : memref<256x64xf32, #tpu.memory_space<vmem>>, vector<8x64xf32>,
    %1249 = vector.extract_strided_slice %1242 {offsets = [0, 3], sizes = [8, 64], strides = [1, 1]} : vector<8x95xf32> to vector<8x64xf32>
    %c24_282 = arith.constant 24 : index
    %c0_283 = arith.constant 0 : index
    %1250 = vector.load %arg19[%c24_282, %c0_283] : memref<256x64xf32, #tpu.memory_space<vmem>>, vector<8x64xf32>
    tpu.vector_store %arg19[%c24_282, %c0_283], %1249 {strides = array<i32>} : memref<256x64xf32, #tpu.memory_space<vmem>>, vector<8x64xf32>,
    %1251 = vector.extract_strided_slice %1242 {offsets = [0, 4], sizes = [8, 64], strides = [1, 1]} : vector<8x95xf32> to vector<8x64xf32>
    %c32_284 = arith.constant 32 : index
    %c0_285 = arith.constant 0 : index
    %1252 = vector.load %arg19[%c32_284, %c0_285] : memref<256x64xf32, #tpu.memory_space<vmem>>, vector<8x64xf32>
    tpu.vector_store %arg19[%c32_284, %c0_285], %1251 {strides = array<i32>} : memref<256x64xf32, #tpu.memory_space<vmem>>, vector<8x64xf32>,
    %1253 = vector.extract_strided_slice %1242 {offsets = [0, 5], sizes = [8, 64], strides = [1, 1]} : vector<8x95xf32> to vector<8x64xf32>
    %c40_286 = arith.constant 40 : index
    %c0_287 = arith.constant 0 : index
    %1254 = vector.load %arg19[%c40_286, %c0_287] : memref<256x64xf32, #tpu.memory_space<vmem>>, vector<8x64xf32>
    tpu.vector_store %arg19[%c40_286, %c0_287], %1253 {strides = array<i32>} : memref<256x64xf32, #tpu.memory_space<vmem>>, vector<8x64xf32>,
    %1255 = vector.extract_strided_slice %1242 {offsets = [0, 6], sizes = [8, 64], strides = [1, 1]} : vector<8x95xf32> to vector<8x64xf32>
    %c48_288 = arith.constant 48 : index
    %c0_289 = arith.constant 0 : index
    %1256 = vector.load %arg19[%c48_288, %c0_289] : memref<256x64xf32, #tpu.memory_space<vmem>>, vector<8x64xf32>
    tpu.vector_store %arg19[%c48_288, %c0_289], %1255 {strides = array<i32>} : memref<256x64xf32, #tpu.memory_space<vmem>>, vector<8x64xf32>,
    %1257 = vector.extract_strided_slice %1242 {offsets = [0, 7], sizes = [8, 64], strides = [1, 1]} : vector<8x95xf32> to vector<8x64xf32>
    %c56_290 = arith.constant 56 : index
    %c0_291 = arith.constant 0 : index
    %1258 = vector.load %arg19[%c56_290, %c0_291] : memref<256x64xf32, #tpu.memory_space<vmem>>, vector<8x64xf32>
    tpu.vector_store %arg19[%c56_290, %c0_291], %1257 {strides = array<i32>} : memref<256x64xf32, #tpu.memory_space<vmem>>, vector<8x64xf32>,
    %1259 = vector.extract_strided_slice %1242 {offsets = [0, 8], sizes = [8, 64], strides = [1, 1]} : vector<8x95xf32> to vector<8x64xf32>
    %c64_292 = arith.constant 64 : index
    %c0_293 = arith.constant 0 : index
    %1260 = vector.load %arg19[%c64_292, %c0_293] : memref<256x64xf32, #tpu.memory_space<vmem>>, vector<8x64xf32>
    tpu.vector_store %arg19[%c64_292, %c0_293], %1259 {strides = array<i32>} : memref<256x64xf32, #tpu.memory_space<vmem>>, vector<8x64xf32>,
    %1261 = vector.extract_strided_slice %1242 {offsets = [0, 9], sizes = [8, 64], strides = [1, 1]} : vector<8x95xf32> to vector<8x64xf32>
    %c72_294 = arith.constant 72 : index
    %c0_295 = arith.constant 0 : index
    %1262 = vector.load %arg19[%c72_294, %c0_295] : memref<256x64xf32, #tpu.memory_space<vmem>>, vector<8x64xf32>
    tpu.vector_store %arg19[%c72_294, %c0_295], %1261 {strides = array<i32>} : memref<256x64xf32, #tpu.memory_space<vmem>>, vector<8x64xf32>,
    %1263 = vector.extract_strided_slice %1242 {offsets = [0, 10], sizes = [8, 64], strides = [1, 1]} : vector<8x95xf32> to vector<8x64xf32>
    %c80_296 = arith.constant 80 : index
    %c0_297 = arith.constant 0 : index
    %1264 = vector.load %arg19[%c80_296, %c0_297] : memref<256x64xf32, #tpu.memory_space<vmem>>, vector<8x64xf32>
    tpu.vector_store %arg19[%c80_296, %c0_297], %1263 {strides = array<i32>} : memref<256x64xf32, #tpu.memory_space<vmem>>, vector<8x64xf32>,
    %1265 = vector.extract_strided_slice %1242 {offsets = [0, 11], sizes = [8, 64], strides = [1, 1]} : vector<8x95xf32> to vector<8x64xf32>
    %c88_298 = arith.constant 88 : index
    %c0_299 = arith.constant 0 : index
    %1266 = vector.load %arg19[%c88_298, %c0_299] : memref<256x64xf32, #tpu.memory_space<vmem>>, vector<8x64xf32>
    tpu.vector_store %arg19[%c88_298, %c0_299], %1265 {strides = array<i32>} : memref<256x64xf32, #tpu.memory_space<vmem>>, vector<8x64xf32>,
    %1267 = vector.extract_strided_slice %1242 {offsets = [0, 12], sizes = [8, 64], strides = [1, 1]} : vector<8x95xf32> to vector<8x64xf32>
    %c96_300 = arith.constant 96 : index
    %c0_301 = arith.constant 0 : index
    %1268 = vector.load %arg19[%c96_300, %c0_301] : memref<256x64xf32, #tpu.memory_space<vmem>>, vector<8x64xf32>
    tpu.vector_store %arg19[%c96_300, %c0_301], %1267 {strides = array<i32>} : memref<256x64xf32, #tpu.memory_space<vmem>>, vector<8x64xf32>,
    %1269 = vector.extract_strided_slice %1242 {offsets = [0, 13], sizes = [8, 64], strides = [1, 1]} : vector<8x95xf32> to vector<8x64xf32>
    %c104_302 = arith.constant 104 : index
    %c0_303 = arith.constant 0 : index
    %1270 = vector.load %arg19[%c104_302, %c0_303] : memref<256x64xf32, #tpu.memory_space<vmem>>, vector<8x64xf32>
    tpu.vector_store %arg19[%c104_302, %c0_303], %1269 {strides = array<i32>} : memref<256x64xf32, #tpu.memory_space<vmem>>, vector<8x64xf32>,
    %1271 = vector.extract_strided_slice %1242 {offsets = [0, 14], sizes = [8, 64], strides = [1, 1]} : vector<8x95xf32> to vector<8x64xf32>
    %c112_304 = arith.constant 112 : index
    %c0_305 = arith.constant 0 : index
    %1272 = vector.load %arg19[%c112_304, %c0_305] : memref<256x64xf32, #tpu.memory_space<vmem>>, vector<8x64xf32>
    tpu.vector_store %arg19[%c112_304, %c0_305], %1271 {strides = array<i32>} : memref<256x64xf32, #tpu.memory_space<vmem>>, vector<8x64xf32>,
    %1273 = vector.extract_strided_slice %1242 {offsets = [0, 15], sizes = [8, 64], strides = [1, 1]} : vector<8x95xf32> to vector<8x64xf32>
    %c120_306 = arith.constant 120 : index
    %c0_307 = arith.constant 0 : index
    %1274 = vector.load %arg19[%c120_306, %c0_307] : memref<256x64xf32, #tpu.memory_space<vmem>>, vector<8x64xf32>
    tpu.vector_store %arg19[%c120_306, %c0_307], %1273 {strides = array<i32>} : memref<256x64xf32, #tpu.memory_space<vmem>>, vector<8x64xf32>,
    %1275 = vector.extract_strided_slice %1242 {offsets = [0, 16], sizes = [8, 64], strides = [1, 1]} : vector<8x95xf32> to vector<8x64xf32>
    %c128_308 = arith.constant 128 : index
    %c0_309 = arith.constant 0 : index
    %1276 = vector.load %arg19[%c128_308, %c0_309] : memref<256x64xf32, #tpu.memory_space<vmem>>, vector<8x64xf32>
    tpu.vector_store %arg19[%c128_308, %c0_309], %1275 {strides = array<i32>} : memref<256x64xf32, #tpu.memory_space<vmem>>, vector<8x64xf32>,
    %1277 = vector.extract_strided_slice %1242 {offsets = [0, 17], sizes = [8, 64], strides = [1, 1]} : vector<8x95xf32> to vector<8x64xf32>
    %c136_310 = arith.constant 136 : index
    %c0_311 = arith.constant 0 : index
    %1278 = vector.load %arg19[%c136_310, %c0_311] : memref<256x64xf32, #tpu.memory_space<vmem>>, vector<8x64xf32>
    tpu.vector_store %arg19[%c136_310, %c0_311], %1277 {strides = array<i32>} : memref<256x64xf32, #tpu.memory_space<vmem>>, vector<8x64xf32>,
    %1279 = vector.extract_strided_slice %1242 {offsets = [0, 18], sizes = [8, 64], strides = [1, 1]} : vector<8x95xf32> to vector<8x64xf32>
    %c144_312 = arith.constant 144 : index
    %c0_313 = arith.constant 0 : index
    %1280 = vector.load %arg19[%c144_312, %c0_313] : memref<256x64xf32, #tpu.memory_space<vmem>>, vector<8x64xf32>
    tpu.vector_store %arg19[%c144_312, %c0_313], %1279 {strides = array<i32>} : memref<256x64xf32, #tpu.memory_space<vmem>>, vector<8x64xf32>,
    %1281 = vector.extract_strided_slice %1242 {offsets = [0, 19], sizes = [8, 64], strides = [1, 1]} : vector<8x95xf32> to vector<8x64xf32>
    %c152_314 = arith.constant 152 : index
    %c0_315 = arith.constant 0 : index
    %1282 = vector.load %arg19[%c152_314, %c0_315] : memref<256x64xf32, #tpu.memory_space<vmem>>, vector<8x64xf32>
    tpu.vector_store %arg19[%c152_314, %c0_315], %1281 {strides = array<i32>} : memref<256x64xf32, #tpu.memory_space<vmem>>, vector<8x64xf32>,
    %1283 = vector.extract_strided_slice %1242 {offsets = [0, 20], sizes = [8, 64], strides = [1, 1]} : vector<8x95xf32> to vector<8x64xf32>
    %c160_316 = arith.constant 160 : index
    %c0_317 = arith.constant 0 : index
    %1284 = vector.load %arg19[%c160_316, %c0_317] : memref<256x64xf32, #tpu.memory_space<vmem>>, vector<8x64xf32>
    tpu.vector_store %arg19[%c160_316, %c0_317], %1283 {strides = array<i32>} : memref<256x64xf32, #tpu.memory_space<vmem>>, vector<8x64xf32>,
    %1285 = vector.extract_strided_slice %1242 {offsets = [0, 21], sizes = [8, 64], strides = [1, 1]} : vector<8x95xf32> to vector<8x64xf32>
    %c168_318 = arith.constant 168 : index
    %c0_319 = arith.constant 0 : index
    %1286 = vector.load %arg19[%c168_318, %c0_319] : memref<256x64xf32, #tpu.memory_space<vmem>>, vector<8x64xf32>
    tpu.vector_store %arg19[%c168_318, %c0_319], %1285 {strides = array<i32>} : memref<256x64xf32, #tpu.memory_space<vmem>>, vector<8x64xf32>,
    %1287 = vector.extract_strided_slice %1242 {offsets = [0, 22], sizes = [8, 64], strides = [1, 1]} : vector<8x95xf32> to vector<8x64xf32>
    %c176_320 = arith.constant 176 : index
    %c0_321 = arith.constant 0 : index
    %1288 = vector.load %arg19[%c176_320, %c0_321] : memref<256x64xf32, #tpu.memory_space<vmem>>, vector<8x64xf32>
    tpu.vector_store %arg19[%c176_320, %c0_321], %1287 {strides = array<i32>} : memref<256x64xf32, #tpu.memory_space<vmem>>, vector<8x64xf32>,
    %1289 = vector.extract_strided_slice %1242 {offsets = [0, 23], sizes = [8, 64], strides = [1, 1]} : vector<8x95xf32> to vector<8x64xf32>
    %c184_322 = arith.constant 184 : index
    %c0_323 = arith.constant 0 : index
    %1290 = vector.load %arg19[%c184_322, %c0_323] : memref<256x64xf32, #tpu.memory_space<vmem>>, vector<8x64xf32>
    tpu.vector_store %arg19[%c184_322, %c0_323], %1289 {strides = array<i32>} : memref<256x64xf32, #tpu.memory_space<vmem>>, vector<8x64xf32>,
    %1291 = vector.extract_strided_slice %1242 {offsets = [0, 24], sizes = [8, 64], strides = [1, 1]} : vector<8x95xf32> to vector<8x64xf32>
    %c192_324 = arith.constant 192 : index
    %c0_325 = arith.constant 0 : index
    %1292 = vector.load %arg19[%c192_324, %c0_325] : memref<256x64xf32, #tpu.memory_space<vmem>>, vector<8x64xf32>
    tpu.vector_store %arg19[%c192_324, %c0_325], %1291 {strides = array<i32>} : memref<256x64xf32, #tpu.memory_space<vmem>>, vector<8x64xf32>,
    %1293 = vector.extract_strided_slice %1242 {offsets = [0, 25], sizes = [8, 64], strides = [1, 1]} : vector<8x95xf32> to vector<8x64xf32>
    %c200_326 = arith.constant 200 : index
    %c0_327 = arith.constant 0 : index
    %1294 = vector.load %arg19[%c200_326, %c0_327] : memref<256x64xf32, #tpu.memory_space<vmem>>, vector<8x64xf32>
    tpu.vector_store %arg19[%c200_326, %c0_327], %1293 {strides = array<i32>} : memref<256x64xf32, #tpu.memory_space<vmem>>, vector<8x64xf32>,
    %1295 = vector.extract_strided_slice %1242 {offsets = [0, 26], sizes = [8, 64], strides = [1, 1]} : vector<8x95xf32> to vector<8x64xf32>
    %c208_328 = arith.constant 208 : index
    %c0_329 = arith.constant 0 : index
    %1296 = vector.load %arg19[%c208_328, %c0_329] : memref<256x64xf32, #tpu.memory_space<vmem>>, vector<8x64xf32>
    tpu.vector_store %arg19[%c208_328, %c0_329], %1295 {strides = array<i32>} : memref<256x64xf32, #tpu.memory_space<vmem>>, vector<8x64xf32>,
    %1297 = vector.extract_strided_slice %1242 {offsets = [0, 27], sizes = [8, 64], strides = [1, 1]} : vector<8x95xf32> to vector<8x64xf32>
    %c216_330 = arith.constant 216 : index
    %c0_331 = arith.constant 0 : index
    %1298 = vector.load %arg19[%c216_330, %c0_331] : memref<256x64xf32, #tpu.memory_space<vmem>>, vector<8x64xf32>
    tpu.vector_store %arg19[%c216_330, %c0_331], %1297 {strides = array<i32>} : memref<256x64xf32, #tpu.memory_space<vmem>>, vector<8x64xf32>,
    %1299 = vector.extract_strided_slice %1242 {offsets = [0, 28], sizes = [8, 64], strides = [1, 1]} : vector<8x95xf32> to vector<8x64xf32>
    %c224_332 = arith.constant 224 : index
    %c0_333 = arith.constant 0 : index
    %1300 = vector.load %arg19[%c224_332, %c0_333] : memref<256x64xf32, #tpu.memory_space<vmem>>, vector<8x64xf32>
    tpu.vector_store %arg19[%c224_332, %c0_333], %1299 {strides = array<i32>} : memref<256x64xf32, #tpu.memory_space<vmem>>, vector<8x64xf32>,
    %1301 = vector.extract_strided_slice %1242 {offsets = [0, 29], sizes = [8, 64], strides = [1, 1]} : vector<8x95xf32> to vector<8x64xf32>
    %c232_334 = arith.constant 232 : index
    %c0_335 = arith.constant 0 : index
    %1302 = vector.load %arg19[%c232_334, %c0_335] : memref<256x64xf32, #tpu.memory_space<vmem>>, vector<8x64xf32>
    tpu.vector_store %arg19[%c232_334, %c0_335], %1301 {strides = array<i32>} : memref<256x64xf32, #tpu.memory_space<vmem>>, vector<8x64xf32>,
    %1303 = vector.extract_strided_slice %1242 {offsets = [0, 30], sizes = [8, 64], strides = [1, 1]} : vector<8x95xf32> to vector<8x64xf32>
    %c240_336 = arith.constant 240 : index
    %c0_337 = arith.constant 0 : index
    %1304 = vector.load %arg19[%c240_336, %c0_337] : memref<256x64xf32, #tpu.memory_space<vmem>>, vector<8x64xf32>
    tpu.vector_store %arg19[%c240_336, %c0_337], %1303 {strides = array<i32>} : memref<256x64xf32, #tpu.memory_space<vmem>>, vector<8x64xf32>,
    %1305 = vector.extract_strided_slice %1242 {offsets = [0, 31], sizes = [8, 64], strides = [1, 1]} : vector<8x95xf32> to vector<8x64xf32>
    %c248_338 = arith.constant 248 : index
    %c0_339 = arith.constant 0 : index
    %1306 = vector.load %arg19[%c248_338, %c0_339] : memref<256x64xf32, #tpu.memory_space<vmem>>, vector<8x64xf32>
    tpu.vector_store %arg19[%c248_338, %c0_339], %1305 {strides = array<i32>} : memref<256x64xf32, #tpu.memory_space<vmem>>, vector<8x64xf32>,
    %c0_340 = arith.constant 0 : index
    %c0_341 = arith.constant 0 : index
    %1307 = vector.load %arg4[%c0_340, %c0_341] : memref<32x256xf32, #tpu.memory_space<vmem>>, vector<32x256xf32>
    %c0_342 = arith.constant 0 : index
    %c0_343 = arith.constant 0 : index
    %1308 = vector.load %arg19[%c0_342, %c0_343] : memref<256x64xf32, #tpu.memory_space<vmem>>, vector<256x64xf32>
    %cst_344 = arith.constant dense<0.000000e+00> : vector<32x64xf32>
    %1309 = tpu.matmul %1307, %1308, %cst_344 {dimension_numbers = #tpu.dot_dimension_numbers<[1], [0], [0], [1], [0, 0, 1, 1], [], []>} : vector<32x256xf32>, vector<256x64xf32>, vector<32x64xf32> -> vector<32x64xf32>
    %1310 = vector.broadcast %12 : vector<32x1xf32> to vector<32x64xf32>
    %1311 = arith.addf %1309, %1310 : vector<32x64xf32>
    %cst_345 = arith.constant 0.000000e+00 : f32
    %1312 = vector.broadcast %cst_345 : f32 to vector<32x64xf32>
    %1313 = arith.cmpf ogt, %1311, %1312 : vector<32x64xf32>
    %cst_346 = arith.constant 0.000000e+00 : f32
    %1314 = vector.broadcast %cst_346 : f32 to vector<32x64xf32>
    %1315 = arith.minimumf %1311, %1314 : vector<32x64xf32>
    %1316 = math.exp %1315 : vector<32x64xf32>
    %cst_347 = arith.constant 1.000000e+00 : f32
    %1317 = vector.broadcast %cst_347 : f32 to vector<32x64xf32>
    %1318 = arith.subf %1316, %1317 : vector<32x64xf32>
    %1319 = arith.select %1313, %1311, %1318 : vector<32x64xi1>, vector<32x64xf32>
    %c96_348 = arith.constant 96 : index
    %c0_349 = arith.constant 0 : index
    %1320 = vector.load %arg20[%c96_348, %c0_349] : memref<128x64xf32, #tpu.memory_space<vmem>>, vector<32x64xf32>
    tpu.vector_store %arg20[%c96_348, %c0_349], %1319 {strides = array<i32>} : memref<128x64xf32, #tpu.memory_space<vmem>>, vector<32x64xf32>,
    %c0_350 = arith.constant 0 : index
    %c0_351 = arith.constant 0 : index
    %1321 = vector.load %arg6[%c0_350, %c0_351] : memref<64x128xf32, #tpu.memory_space<vmem>>, vector<64x128xf32>
    %c0_352 = arith.constant 0 : index
    %c0_353 = arith.constant 0 : index
    %1322 = vector.load %arg20[%c0_352, %c0_353] : memref<128x64xf32, #tpu.memory_space<vmem>>, vector<128x64xf32>
    %cst_354 = arith.constant dense<0.000000e+00> : vector<64x64xf32>
    %1323 = tpu.matmul %1321, %1322, %cst_354 {dimension_numbers = #tpu.dot_dimension_numbers<[1], [0], [0], [1], [0, 0, 1, 1], [], []>} : vector<64x128xf32>, vector<128x64xf32>, vector<64x64xf32> -> vector<64x64xf32>
    %c0_355 = arith.constant 0 : index
    %c0_356 = arith.constant 0 : index
    %1324 = vector.load %arg7[%c0_355, %c0_356] : memref<64x1xf32, #tpu.memory_space<vmem>>, vector<64x1xf32>
    %1325 = vector.broadcast %1324 : vector<64x1xf32> to vector<64x64xf32>
    %1326 = arith.addf %1323, %1325 : vector<64x64xf32>
    %cst_357 = arith.constant 0.000000e+00 : f32
    %1327 = vector.broadcast %cst_357 : f32 to vector<64x64xf32>
    %1328 = arith.cmpf ogt, %1326, %1327 : vector<64x64xf32>
    %cst_358 = arith.constant 0.000000e+00 : f32
    %1329 = vector.broadcast %cst_358 : f32 to vector<64x64xf32>
    %1330 = arith.minimumf %1326, %1329 : vector<64x64xf32>
    %1331 = math.exp %1330 : vector<64x64xf32>
    %cst_359 = arith.constant 1.000000e+00 : f32
    %1332 = vector.broadcast %cst_359 : f32 to vector<64x64xf32>
    %1333 = arith.subf %1331, %1332 : vector<64x64xf32>
    %1334 = arith.select %1328, %1326, %1333 : vector<64x64xi1>, vector<64x64xf32>
    %c0_360 = arith.constant 0 : index
    %c0_361 = arith.constant 0 : index
    %1335 = vector.load %arg8[%c0_360, %c0_361] : memref<64x16xf32, #tpu.memory_space<vmem>>, vector<64x16xf32>
    %cst_362 = arith.constant dense<0.000000e+00> : vector<64x16xf32>
    %1336 = tpu.matmul %1334, %1335, %cst_362 {dimension_numbers = #tpu.dot_dimension_numbers<[1], [0], [0], [1], [0, 0, 1, 1], [], []>} : vector<64x64xf32>, vector<64x16xf32>, vector<64x16xf32> -> vector<64x16xf32>
    %c0_363 = arith.constant 0 : index
    %c15_364 = arith.constant 15 : index
    %1337 = vector.load %arg17[%c0_363, %c15_364] : memref<64x46xf32, #tpu.memory_space<vmem>>, vector<64x16xf32>
    tpu.vector_store %arg17[%c0_363, %c15_364], %1336 {strides = array<i32>} : memref<64x46xf32, #tpu.memory_space<vmem>>, vector<64x16xf32>,
    %c0_365 = arith.constant 0 : index
    %c0_366 = arith.constant 0 : index
    %1338 = vector.load %arg17[%c0_365, %c0_366] : memref<64x46xf32, #tpu.memory_space<vmem>>, vector<64x46xf32>
    %1339 = vector.extract_strided_slice %1338 {offsets = [0, 0], sizes = [64, 16], strides = [1, 1]} : vector<64x46xf32> to vector<64x16xf32>
    %c0_367 = arith.constant 0 : index
    %c0_368 = arith.constant 0 : index
    %1340 = vector.load %arg21[%c0_367, %c0_368] : memref<1024x16xf32, #tpu.memory_space<vmem>>, vector<64x16xf32>
    tpu.vector_store %arg21[%c0_367, %c0_368], %1339 {strides = array<i32>} : memref<1024x16xf32, #tpu.memory_space<vmem>>, vector<64x16xf32>,
    %1341 = vector.extract_strided_slice %1338 {offsets = [0, 2], sizes = [64, 16], strides = [1, 1]} : vector<64x46xf32> to vector<64x16xf32>
    %c64_369 = arith.constant 64 : index
    %c0_370 = arith.constant 0 : index
    %1342 = vector.load %arg21[%c64_369, %c0_370] : memref<1024x16xf32, #tpu.memory_space<vmem>>, vector<64x16xf32>
    tpu.vector_store %arg21[%c64_369, %c0_370], %1341 {strides = array<i32>} : memref<1024x16xf32, #tpu.memory_space<vmem>>, vector<64x16xf32>,
    %1343 = vector.extract_strided_slice %1338 {offsets = [0, 4], sizes = [64, 16], strides = [1, 1]} : vector<64x46xf32> to vector<64x16xf32>
    %c128_371 = arith.constant 128 : index
    %c0_372 = arith.constant 0 : index
    %1344 = vector.load %arg21[%c128_371, %c0_372] : memref<1024x16xf32, #tpu.memory_space<vmem>>, vector<64x16xf32>
    tpu.vector_store %arg21[%c128_371, %c0_372], %1343 {strides = array<i32>} : memref<1024x16xf32, #tpu.memory_space<vmem>>, vector<64x16xf32>,
    %1345 = vector.extract_strided_slice %1338 {offsets = [0, 6], sizes = [64, 16], strides = [1, 1]} : vector<64x46xf32> to vector<64x16xf32>
    %c192_373 = arith.constant 192 : index
    %c0_374 = arith.constant 0 : index
    %1346 = vector.load %arg21[%c192_373, %c0_374] : memref<1024x16xf32, #tpu.memory_space<vmem>>, vector<64x16xf32>
    tpu.vector_store %arg21[%c192_373, %c0_374], %1345 {strides = array<i32>} : memref<1024x16xf32, #tpu.memory_space<vmem>>, vector<64x16xf32>,
    %1347 = vector.extract_strided_slice %1338 {offsets = [0, 8], sizes = [64, 16], strides = [1, 1]} : vector<64x46xf32> to vector<64x16xf32>
    %c256 = arith.constant 256 : index
    %c0_375 = arith.constant 0 : index
    %1348 = vector.load %arg21[%c256, %c0_375] : memref<1024x16xf32, #tpu.memory_space<vmem>>, vector<64x16xf32>
    tpu.vector_store %arg21[%c256, %c0_375], %1347 {strides = array<i32>} : memref<1024x16xf32, #tpu.memory_space<vmem>>, vector<64x16xf32>,
    %1349 = vector.extract_strided_slice %1338 {offsets = [0, 10], sizes = [64, 16], strides = [1, 1]} : vector<64x46xf32> to vector<64x16xf32>
    %c320 = arith.constant 320 : index
    %c0_376 = arith.constant 0 : index
    %1350 = vector.load %arg21[%c320, %c0_376] : memref<1024x16xf32, #tpu.memory_space<vmem>>, vector<64x16xf32>
    tpu.vector_store %arg21[%c320, %c0_376], %1349 {strides = array<i32>} : memref<1024x16xf32, #tpu.memory_space<vmem>>, vector<64x16xf32>,
    %1351 = vector.extract_strided_slice %1338 {offsets = [0, 12], sizes = [64, 16], strides = [1, 1]} : vector<64x46xf32> to vector<64x16xf32>
    %c384 = arith.constant 384 : index
    %c0_377 = arith.constant 0 : index
    %1352 = vector.load %arg21[%c384, %c0_377] : memref<1024x16xf32, #tpu.memory_space<vmem>>, vector<64x16xf32>
    tpu.vector_store %arg21[%c384, %c0_377], %1351 {strides = array<i32>} : memref<1024x16xf32, #tpu.memory_space<vmem>>, vector<64x16xf32>,
    %1353 = vector.extract_strided_slice %1338 {offsets = [0, 14], sizes = [64, 16], strides = [1, 1]} : vector<64x46xf32> to vector<64x16xf32>
    %c448 = arith.constant 448 : index
    %c0_378 = arith.constant 0 : index
    %1354 = vector.load %arg21[%c448, %c0_378] : memref<1024x16xf32, #tpu.memory_space<vmem>>, vector<64x16xf32>
    tpu.vector_store %arg21[%c448, %c0_378], %1353 {strides = array<i32>} : memref<1024x16xf32, #tpu.memory_space<vmem>>, vector<64x16xf32>,
    %1355 = vector.extract_strided_slice %1338 {offsets = [0, 16], sizes = [64, 16], strides = [1, 1]} : vector<64x46xf32> to vector<64x16xf32>
    %c512 = arith.constant 512 : index
    %c0_379 = arith.constant 0 : index
    %1356 = vector.load %arg21[%c512, %c0_379] : memref<1024x16xf32, #tpu.memory_space<vmem>>, vector<64x16xf32>
    tpu.vector_store %arg21[%c512, %c0_379], %1355 {strides = array<i32>} : memref<1024x16xf32, #tpu.memory_space<vmem>>, vector<64x16xf32>,
    %1357 = vector.extract_strided_slice %1338 {offsets = [0, 18], sizes = [64, 16], strides = [1, 1]} : vector<64x46xf32> to vector<64x16xf32>
    %c576 = arith.constant 576 : index
    %c0_380 = arith.constant 0 : index
    %1358 = vector.load %arg21[%c576, %c0_380] : memref<1024x16xf32, #tpu.memory_space<vmem>>, vector<64x16xf32>
    tpu.vector_store %arg21[%c576, %c0_380], %1357 {strides = array<i32>} : memref<1024x16xf32, #tpu.memory_space<vmem>>, vector<64x16xf32>,
    %1359 = vector.extract_strided_slice %1338 {offsets = [0, 20], sizes = [64, 16], strides = [1, 1]} : vector<64x46xf32> to vector<64x16xf32>
    %c640 = arith.constant 640 : index
    %c0_381 = arith.constant 0 : index
    %1360 = vector.load %arg21[%c640, %c0_381] : memref<1024x16xf32, #tpu.memory_space<vmem>>, vector<64x16xf32>
    tpu.vector_store %arg21[%c640, %c0_381], %1359 {strides = array<i32>} : memref<1024x16xf32, #tpu.memory_space<vmem>>, vector<64x16xf32>,
    %1361 = vector.extract_strided_slice %1338 {offsets = [0, 22], sizes = [64, 16], strides = [1, 1]} : vector<64x46xf32> to vector<64x16xf32>
    %c704 = arith.constant 704 : index
    %c0_382 = arith.constant 0 : index
    %1362 = vector.load %arg21[%c704, %c0_382] : memref<1024x16xf32, #tpu.memory_space<vmem>>, vector<64x16xf32>
    tpu.vector_store %arg21[%c704, %c0_382], %1361 {strides = array<i32>} : memref<1024x16xf32, #tpu.memory_space<vmem>>, vector<64x16xf32>,
    %1363 = vector.extract_strided_slice %1338 {offsets = [0, 24], sizes = [64, 16], strides = [1, 1]} : vector<64x46xf32> to vector<64x16xf32>
    %c768 = arith.constant 768 : index
    %c0_383 = arith.constant 0 : index
    %1364 = vector.load %arg21[%c768, %c0_383] : memref<1024x16xf32, #tpu.memory_space<vmem>>, vector<64x16xf32>
    tpu.vector_store %arg21[%c768, %c0_383], %1363 {strides = array<i32>} : memref<1024x16xf32, #tpu.memory_space<vmem>>, vector<64x16xf32>,
    %1365 = vector.extract_strided_slice %1338 {offsets = [0, 26], sizes = [64, 16], strides = [1, 1]} : vector<64x46xf32> to vector<64x16xf32>
    %c832 = arith.constant 832 : index
    %c0_384 = arith.constant 0 : index
    %1366 = vector.load %arg21[%c832, %c0_384] : memref<1024x16xf32, #tpu.memory_space<vmem>>, vector<64x16xf32>
    tpu.vector_store %arg21[%c832, %c0_384], %1365 {strides = array<i32>} : memref<1024x16xf32, #tpu.memory_space<vmem>>, vector<64x16xf32>,
    %1367 = vector.extract_strided_slice %1338 {offsets = [0, 28], sizes = [64, 16], strides = [1, 1]} : vector<64x46xf32> to vector<64x16xf32>
    %c896 = arith.constant 896 : index
    %c0_385 = arith.constant 0 : index
    %1368 = vector.load %arg21[%c896, %c0_385] : memref<1024x16xf32, #tpu.memory_space<vmem>>, vector<64x16xf32>
    tpu.vector_store %arg21[%c896, %c0_385], %1367 {strides = array<i32>} : memref<1024x16xf32, #tpu.memory_space<vmem>>, vector<64x16xf32>,
    %1369 = vector.extract_strided_slice %1338 {offsets = [0, 30], sizes = [64, 16], strides = [1, 1]} : vector<64x46xf32> to vector<64x16xf32>
    %c960 = arith.constant 960 : index
    %c0_386 = arith.constant 0 : index
    %1370 = vector.load %arg21[%c960, %c0_386] : memref<1024x16xf32, #tpu.memory_space<vmem>>, vector<64x16xf32>
    tpu.vector_store %arg21[%c960, %c0_386], %1369 {strides = array<i32>} : memref<1024x16xf32, #tpu.memory_space<vmem>>, vector<64x16xf32>,
    %c0_387 = arith.constant 0 : index
    %c0_388 = arith.constant 0 : index
    %1371 = vector.load %arg9[%c0_387, %c0_388] : memref<32x1024xf32, #tpu.memory_space<vmem>>, vector<32x1024xf32>
    %c0_389 = arith.constant 0 : index
    %c0_390 = arith.constant 0 : index
    %1372 = vector.load %arg21[%c0_389, %c0_390] : memref<1024x16xf32, #tpu.memory_space<vmem>>, vector<1024x16xf32>
    %cst_391 = arith.constant dense<0.000000e+00> : vector<32x16xf32>
    %1373 = tpu.matmul %1371, %1372, %cst_391 {dimension_numbers = #tpu.dot_dimension_numbers<[1], [0], [0], [1], [0, 0, 1, 1], [], []>} : vector<32x1024xf32>, vector<1024x16xf32>, vector<32x16xf32> -> vector<32x16xf32>
    %c0_392 = arith.constant 0 : index
    %c0_393 = arith.constant 0 : index
    %1374 = vector.load %arg10[%c0_392, %c0_393] : memref<32x1xf32, #tpu.memory_space<vmem>>, vector<32x1xf32>
    %1375 = vector.broadcast %1374 : vector<32x1xf32> to vector<32x16xf32>
    %1376 = arith.addf %1373, %1375 : vector<32x16xf32>
    %cst_394 = arith.constant 0.000000e+00 : f32
    %1377 = vector.broadcast %cst_394 : f32 to vector<32x16xf32>
    %1378 = arith.cmpf ogt, %1376, %1377 : vector<32x16xf32>
    %cst_395 = arith.constant 0.000000e+00 : f32
    %1379 = vector.broadcast %cst_395 : f32 to vector<32x16xf32>
    %1380 = arith.minimumf %1376, %1379 : vector<32x16xf32>
    %1381 = math.exp %1380 : vector<32x16xf32>
    %cst_396 = arith.constant 1.000000e+00 : f32
    %1382 = vector.broadcast %cst_396 : f32 to vector<32x16xf32>
    %1383 = arith.subf %1381, %1382 : vector<32x16xf32>
    %1384 = arith.select %1378, %1376, %1383 : vector<32x16xi1>, vector<32x16xf32>
    %c0_397 = arith.constant 0 : index
    %c30 = arith.constant 30 : index
    %1385 = vector.load %arg18[%c0_397, %c30] : memref<32x76xf32, #tpu.memory_space<vmem>>, vector<32x16xf32>
    tpu.vector_store %arg18[%c0_397, %c30], %1384 {strides = array<i32>} : memref<32x76xf32, #tpu.memory_space<vmem>>, vector<32x16xf32>,
    %c0_398 = arith.constant 0 : index
    %c0_399 = arith.constant 0 : index
    %1386 = vector.load %arg18[%c0_398, %c0_399] : memref<32x76xf32, #tpu.memory_space<vmem>>, vector<32x76xf32>
    %1387 = vector.extract_strided_slice %1386 {offsets = [0, 0], sizes = [32, 16], strides = [1, 1]} : vector<32x76xf32> to vector<32x16xf32>
    %c0_400 = arith.constant 0 : index
    %c0_401 = arith.constant 0 : index
    %1388 = vector.load %arg22[%c0_400, %c0_401] : memref<512x16xf32, #tpu.memory_space<vmem>>, vector<32x16xf32>
    tpu.vector_store %arg22[%c0_400, %c0_401], %1387 {strides = array<i32>} : memref<512x16xf32, #tpu.memory_space<vmem>>, vector<32x16xf32>,
    %1389 = vector.extract_strided_slice %1386 {offsets = [0, 4], sizes = [32, 16], strides = [1, 1]} : vector<32x76xf32> to vector<32x16xf32>
    %c32_402 = arith.constant 32 : index
    %c0_403 = arith.constant 0 : index
    %1390 = vector.load %arg22[%c32_402, %c0_403] : memref<512x16xf32, #tpu.memory_space<vmem>>, vector<32x16xf32>
    tpu.vector_store %arg22[%c32_402, %c0_403], %1389 {strides = array<i32>} : memref<512x16xf32, #tpu.memory_space<vmem>>, vector<32x16xf32>,
    %1391 = vector.extract_strided_slice %1386 {offsets = [0, 8], sizes = [32, 16], strides = [1, 1]} : vector<32x76xf32> to vector<32x16xf32>
    %c64_404 = arith.constant 64 : index
    %c0_405 = arith.constant 0 : index
    %1392 = vector.load %arg22[%c64_404, %c0_405] : memref<512x16xf32, #tpu.memory_space<vmem>>, vector<32x16xf32>
    tpu.vector_store %arg22[%c64_404, %c0_405], %1391 {strides = array<i32>} : memref<512x16xf32, #tpu.memory_space<vmem>>, vector<32x16xf32>,
    %1393 = vector.extract_strided_slice %1386 {offsets = [0, 12], sizes = [32, 16], strides = [1, 1]} : vector<32x76xf32> to vector<32x16xf32>
    %c96_406 = arith.constant 96 : index
    %c0_407 = arith.constant 0 : index
    %1394 = vector.load %arg22[%c96_406, %c0_407] : memref<512x16xf32, #tpu.memory_space<vmem>>, vector<32x16xf32>
    tpu.vector_store %arg22[%c96_406, %c0_407], %1393 {strides = array<i32>} : memref<512x16xf32, #tpu.memory_space<vmem>>, vector<32x16xf32>,
    %1395 = vector.extract_strided_slice %1386 {offsets = [0, 16], sizes = [32, 16], strides = [1, 1]} : vector<32x76xf32> to vector<32x16xf32>
    %c128_408 = arith.constant 128 : index
    %c0_409 = arith.constant 0 : index
    %1396 = vector.load %arg22[%c128_408, %c0_409] : memref<512x16xf32, #tpu.memory_space<vmem>>, vector<32x16xf32>
    tpu.vector_store %arg22[%c128_408, %c0_409], %1395 {strides = array<i32>} : memref<512x16xf32, #tpu.memory_space<vmem>>, vector<32x16xf32>,
    %1397 = vector.extract_strided_slice %1386 {offsets = [0, 20], sizes = [32, 16], strides = [1, 1]} : vector<32x76xf32> to vector<32x16xf32>
    %c160_410 = arith.constant 160 : index
    %c0_411 = arith.constant 0 : index
    %1398 = vector.load %arg22[%c160_410, %c0_411] : memref<512x16xf32, #tpu.memory_space<vmem>>, vector<32x16xf32>
    tpu.vector_store %arg22[%c160_410, %c0_411], %1397 {strides = array<i32>} : memref<512x16xf32, #tpu.memory_space<vmem>>, vector<32x16xf32>,
    %1399 = vector.extract_strided_slice %1386 {offsets = [0, 24], sizes = [32, 16], strides = [1, 1]} : vector<32x76xf32> to vector<32x16xf32>
    %c192_412 = arith.constant 192 : index
    %c0_413 = arith.constant 0 : index
    %1400 = vector.load %arg22[%c192_412, %c0_413] : memref<512x16xf32, #tpu.memory_space<vmem>>, vector<32x16xf32>
    tpu.vector_store %arg22[%c192_412, %c0_413], %1399 {strides = array<i32>} : memref<512x16xf32, #tpu.memory_space<vmem>>, vector<32x16xf32>,
    %1401 = vector.extract_strided_slice %1386 {offsets = [0, 28], sizes = [32, 16], strides = [1, 1]} : vector<32x76xf32> to vector<32x16xf32>
    %c224_414 = arith.constant 224 : index
    %c0_415 = arith.constant 0 : index
    %1402 = vector.load %arg22[%c224_414, %c0_415] : memref<512x16xf32, #tpu.memory_space<vmem>>, vector<32x16xf32>
    tpu.vector_store %arg22[%c224_414, %c0_415], %1401 {strides = array<i32>} : memref<512x16xf32, #tpu.memory_space<vmem>>, vector<32x16xf32>,
    %1403 = vector.extract_strided_slice %1386 {offsets = [0, 32], sizes = [32, 16], strides = [1, 1]} : vector<32x76xf32> to vector<32x16xf32>
    %c256_416 = arith.constant 256 : index
    %c0_417 = arith.constant 0 : index
    %1404 = vector.load %arg22[%c256_416, %c0_417] : memref<512x16xf32, #tpu.memory_space<vmem>>, vector<32x16xf32>
    tpu.vector_store %arg22[%c256_416, %c0_417], %1403 {strides = array<i32>} : memref<512x16xf32, #tpu.memory_space<vmem>>, vector<32x16xf32>,
    %1405 = vector.extract_strided_slice %1386 {offsets = [0, 36], sizes = [32, 16], strides = [1, 1]} : vector<32x76xf32> to vector<32x16xf32>
    %c288 = arith.constant 288 : index
    %c0_418 = arith.constant 0 : index
    %1406 = vector.load %arg22[%c288, %c0_418] : memref<512x16xf32, #tpu.memory_space<vmem>>, vector<32x16xf32>
    tpu.vector_store %arg22[%c288, %c0_418], %1405 {strides = array<i32>} : memref<512x16xf32, #tpu.memory_space<vmem>>, vector<32x16xf32>,
    %1407 = vector.extract_strided_slice %1386 {offsets = [0, 40], sizes = [32, 16], strides = [1, 1]} : vector<32x76xf32> to vector<32x16xf32>
    %c320_419 = arith.constant 320 : index
    %c0_420 = arith.constant 0 : index
    %1408 = vector.load %arg22[%c320_419, %c0_420] : memref<512x16xf32, #tpu.memory_space<vmem>>, vector<32x16xf32>
    tpu.vector_store %arg22[%c320_419, %c0_420], %1407 {strides = array<i32>} : memref<512x16xf32, #tpu.memory_space<vmem>>, vector<32x16xf32>,
    %1409 = vector.extract_strided_slice %1386 {offsets = [0, 44], sizes = [32, 16], strides = [1, 1]} : vector<32x76xf32> to vector<32x16xf32>
    %c352 = arith.constant 352 : index
    %c0_421 = arith.constant 0 : index
    %1410 = vector.load %arg22[%c352, %c0_421] : memref<512x16xf32, #tpu.memory_space<vmem>>, vector<32x16xf32>
    tpu.vector_store %arg22[%c352, %c0_421], %1409 {strides = array<i32>} : memref<512x16xf32, #tpu.memory_space<vmem>>, vector<32x16xf32>,
    %1411 = vector.extract_strided_slice %1386 {offsets = [0, 48], sizes = [32, 16], strides = [1, 1]} : vector<32x76xf32> to vector<32x16xf32>
    %c384_422 = arith.constant 384 : index
    %c0_423 = arith.constant 0 : index
    %1412 = vector.load %arg22[%c384_422, %c0_423] : memref<512x16xf32, #tpu.memory_space<vmem>>, vector<32x16xf32>
    tpu.vector_store %arg22[%c384_422, %c0_423], %1411 {strides = array<i32>} : memref<512x16xf32, #tpu.memory_space<vmem>>, vector<32x16xf32>,
    %1413 = vector.extract_strided_slice %1386 {offsets = [0, 52], sizes = [32, 16], strides = [1, 1]} : vector<32x76xf32> to vector<32x16xf32>
    %c416 = arith.constant 416 : index
    %c0_424 = arith.constant 0 : index
    %1414 = vector.load %arg22[%c416, %c0_424] : memref<512x16xf32, #tpu.memory_space<vmem>>, vector<32x16xf32>
    tpu.vector_store %arg22[%c416, %c0_424], %1413 {strides = array<i32>} : memref<512x16xf32, #tpu.memory_space<vmem>>, vector<32x16xf32>,
    %1415 = vector.extract_strided_slice %1386 {offsets = [0, 56], sizes = [32, 16], strides = [1, 1]} : vector<32x76xf32> to vector<32x16xf32>
    %c448_425 = arith.constant 448 : index
    %c0_426 = arith.constant 0 : index
    %1416 = vector.load %arg22[%c448_425, %c0_426] : memref<512x16xf32, #tpu.memory_space<vmem>>, vector<32x16xf32>
    tpu.vector_store %arg22[%c448_425, %c0_426], %1415 {strides = array<i32>} : memref<512x16xf32, #tpu.memory_space<vmem>>, vector<32x16xf32>,
    %1417 = vector.extract_strided_slice %1386 {offsets = [0, 60], sizes = [32, 16], strides = [1, 1]} : vector<32x76xf32> to vector<32x16xf32>
    %c480 = arith.constant 480 : index
    %c0_427 = arith.constant 0 : index
    %1418 = vector.load %arg22[%c480, %c0_427] : memref<512x16xf32, #tpu.memory_space<vmem>>, vector<32x16xf32>
    tpu.vector_store %arg22[%c480, %c0_427], %1417 {strides = array<i32>} : memref<512x16xf32, #tpu.memory_space<vmem>>, vector<32x16xf32>,
    %c0_428 = arith.constant 0 : index
    %c0_429 = arith.constant 0 : index
    %1419 = vector.load %arg11[%c0_428, %c0_429] : memref<8x512xf32, #tpu.memory_space<vmem>>, vector<8x512xf32>
    %c0_430 = arith.constant 0 : index
    %c0_431 = arith.constant 0 : index
    %1420 = vector.load %arg22[%c0_430, %c0_431] : memref<512x16xf32, #tpu.memory_space<vmem>>, vector<512x16xf32>
    %cst_432 = arith.constant dense<0.000000e+00> : vector<8x16xf32>
    %1421 = tpu.matmul %1419, %1420, %cst_432 {dimension_numbers = #tpu.dot_dimension_numbers<[1], [0], [0], [1], [0, 0, 1, 1], [], []>} : vector<8x512xf32>, vector<512x16xf32>, vector<8x16xf32> -> vector<8x16xf32>
    %c0_433 = arith.constant 0 : index
    %c0_434 = arith.constant 0 : index
    %1422 = vector.load %arg12[%c0_433, %c0_434] : memref<8x1xf32, #tpu.memory_space<vmem>>, vector<8x1xf32>
    %1423 = vector.broadcast %1422 : vector<8x1xf32> to vector<8x16xf32>
    %1424 = arith.addf %1421, %1423 : vector<8x16xf32>
    %cst_435 = arith.constant 0.000000e+00 : f32
    %1425 = vector.broadcast %cst_435 : f32 to vector<8x16xf32>
    %1426 = arith.cmpf ogt, %1424, %1425 : vector<8x16xf32>
    %cst_436 = arith.constant 0.000000e+00 : f32
    %1427 = vector.broadcast %cst_436 : f32 to vector<8x16xf32>
    %1428 = arith.minimumf %1424, %1427 : vector<8x16xf32>
    %1429 = math.exp %1428 : vector<8x16xf32>
    %cst_437 = arith.constant 1.000000e+00 : f32
    %1430 = vector.broadcast %cst_437 : f32 to vector<8x16xf32>
    %1431 = arith.subf %1429, %1430 : vector<8x16xf32>
    %1432 = arith.select %1426, %1424, %1431 : vector<8x16xi1>, vector<8x16xf32>
    %1433 = vector.extract_strided_slice %1432 {offsets = [0, 0], sizes = [1, 16], strides = [1, 1]} : vector<8x16xf32> to vector<1x16xf32>
    %c0_438 = arith.constant 0 : index
    %c0_439 = arith.constant 0 : index
    %1434 = vector.load %arg23[%c0_438, %c0_439] : memref<1x128xf32, #tpu.memory_space<vmem>>, vector<1x16xf32>
    tpu.vector_store %arg23[%c0_438, %c0_439], %1433 {strides = array<i32>} : memref<1x128xf32, #tpu.memory_space<vmem>>, vector<1x16xf32>,
    %1435 = vector.extract_strided_slice %1432 {offsets = [1, 0], sizes = [1, 16], strides = [1, 1]} : vector<8x16xf32> to vector<1x16xf32>
    %c0_440 = arith.constant 0 : index
    %c16_441 = arith.constant 16 : index
    %1436 = vector.load %arg23[%c0_440, %c16_441] : memref<1x128xf32, #tpu.memory_space<vmem>>, vector<1x16xf32>
    tpu.vector_store %arg23[%c0_440, %c16_441], %1435 {strides = array<i32>} : memref<1x128xf32, #tpu.memory_space<vmem>>, vector<1x16xf32>,
    %1437 = vector.extract_strided_slice %1432 {offsets = [2, 0], sizes = [1, 16], strides = [1, 1]} : vector<8x16xf32> to vector<1x16xf32>
    %c0_442 = arith.constant 0 : index
    %c32_443 = arith.constant 32 : index
    %1438 = vector.load %arg23[%c0_442, %c32_443] : memref<1x128xf32, #tpu.memory_space<vmem>>, vector<1x16xf32>
    tpu.vector_store %arg23[%c0_442, %c32_443], %1437 {strides = array<i32>} : memref<1x128xf32, #tpu.memory_space<vmem>>, vector<1x16xf32>,
    %1439 = vector.extract_strided_slice %1432 {offsets = [3, 0], sizes = [1, 16], strides = [1, 1]} : vector<8x16xf32> to vector<1x16xf32>
    %c0_444 = arith.constant 0 : index
    %c48_445 = arith.constant 48 : index
    %1440 = vector.load %arg23[%c0_444, %c48_445] : memref<1x128xf32, #tpu.memory_space<vmem>>, vector<1x16xf32>
    tpu.vector_store %arg23[%c0_444, %c48_445], %1439 {strides = array<i32>} : memref<1x128xf32, #tpu.memory_space<vmem>>, vector<1x16xf32>,
    %1441 = vector.extract_strided_slice %1432 {offsets = [4, 0], sizes = [1, 16], strides = [1, 1]} : vector<8x16xf32> to vector<1x16xf32>
    %c0_446 = arith.constant 0 : index
    %c64_447 = arith.constant 64 : index
    %1442 = vector.load %arg23[%c0_446, %c64_447] : memref<1x128xf32, #tpu.memory_space<vmem>>, vector<1x16xf32>
    tpu.vector_store %arg23[%c0_446, %c64_447], %1441 {strides = array<i32>} : memref<1x128xf32, #tpu.memory_space<vmem>>, vector<1x16xf32>,
    %1443 = vector.extract_strided_slice %1432 {offsets = [5, 0], sizes = [1, 16], strides = [1, 1]} : vector<8x16xf32> to vector<1x16xf32>
    %c0_448 = arith.constant 0 : index
    %c80_449 = arith.constant 80 : index
    %1444 = vector.load %arg23[%c0_448, %c80_449] : memref<1x128xf32, #tpu.memory_space<vmem>>, vector<1x16xf32>
    tpu.vector_store %arg23[%c0_448, %c80_449], %1443 {strides = array<i32>} : memref<1x128xf32, #tpu.memory_space<vmem>>, vector<1x16xf32>,
    %1445 = vector.extract_strided_slice %1432 {offsets = [6, 0], sizes = [1, 16], strides = [1, 1]} : vector<8x16xf32> to vector<1x16xf32>
    %c0_450 = arith.constant 0 : index
    %c96_451 = arith.constant 96 : index
    %1446 = vector.load %arg23[%c0_450, %c96_451] : memref<1x128xf32, #tpu.memory_space<vmem>>, vector<1x16xf32>
    tpu.vector_store %arg23[%c0_450, %c96_451], %1445 {strides = array<i32>} : memref<1x128xf32, #tpu.memory_space<vmem>>, vector<1x16xf32>,
    %1447 = vector.extract_strided_slice %1432 {offsets = [7, 0], sizes = [1, 16], strides = [1, 1]} : vector<8x16xf32> to vector<1x16xf32>
    %c0_452 = arith.constant 0 : index
    %c112_453 = arith.constant 112 : index
    %1448 = vector.load %arg23[%c0_452, %c112_453] : memref<1x128xf32, #tpu.memory_space<vmem>>, vector<1x16xf32>
    tpu.vector_store %arg23[%c0_452, %c112_453], %1447 {strides = array<i32>} : memref<1x128xf32, #tpu.memory_space<vmem>>, vector<1x16xf32>,
    %c0_454 = arith.constant 0 : index
    %c0_455 = arith.constant 0 : index
    %1449 = vector.load %arg23[%c0_454, %c0_455] : memref<1x128xf32, #tpu.memory_space<vmem>>, vector<1x128xf32>
    %c0_456 = arith.constant 0 : index
    %c0_457 = arith.constant 0 : index
    %1450 = vector.load %arg13[%c0_456, %c0_457] : memref<128x4xf32, #tpu.memory_space<vmem>>, vector<128x4xf32>
    %cst_458 = arith.constant dense<0.000000e+00> : vector<1x4xf32>
    %1451 = tpu.matmul %1449, %1450, %cst_458 {dimension_numbers = #tpu.dot_dimension_numbers<[1], [0], [0], [1], [0, 0, 1, 1], [], []>} : vector<1x128xf32>, vector<128x4xf32>, vector<1x4xf32> -> vector<1x4xf32>
    %c0_459 = arith.constant 0 : index
    %c0_460 = arith.constant 0 : index
    %1452 = vector.load %arg14[%c0_459, %c0_460] : memref<1x4xf32, #tpu.memory_space<vmem>>, vector<1x4xf32>
    %1453 = arith.addf %1451, %1452 : vector<1x4xf32>
    %cst_461 = arith.constant dense<0xFF800000> : vector<1xf32>
    %1454 = vector.multi_reduction <maximumf>, %1453, %cst_461 [1] : vector<1x4xf32> to vector<1xf32>
    %1455 = vector.shape_cast %1454 : vector<1xf32> to vector<1x1xf32>
    %1456 = vector.broadcast %1455 : vector<1x1xf32> to vector<1x4xf32>
    %1457 = arith.subf %1453, %1456 : vector<1x4xf32>
    %1458 = math.exp %1457 : vector<1x4xf32>
    %cst_462 = arith.constant dense<0.000000e+00> : vector<1xf32>
    %1459 = vector.multi_reduction <add>, %1458, %cst_462 [1] : vector<1x4xf32> to vector<1xf32>
    %1460 = vector.shape_cast %1459 : vector<1xf32> to vector<1x1xf32>
    %1461 = math.log %1460 : vector<1x1xf32>
    %1462 = arith.addf %1455, %1461 : vector<1x1xf32>
    %1463 = vector.broadcast %1462 : vector<1x1xf32> to vector<1x4xf32>
    %1464 = arith.subf %1453, %1463 : vector<1x4xf32>
    %1465 = vector.shape_cast %1464 : vector<1x4xf32> to vector<1x1x4xf32>
    %c0_463 = arith.constant 0 : index
    %c0_464 = arith.constant 0 : index
    %c0_465 = arith.constant 0 : index
    %1466 = vector.load %arg15[%c0_463, %c0_464, %c0_465] : memref<1x1x4xf32, #tpu.memory_space<vmem>>, vector<1x1x4xf32>
    tpu.vector_store %arg15[%c0_463, %c0_464, %c0_465], %1465 {strides = array<i32>} : memref<1x1x4xf32, #tpu.memory_space<vmem>>, vector<1x1x4xf32>,
    return
  }
  func.func @transform_0(%arg0: i32) -> (i32, i32, i32) {
    %c0_i32 = arith.constant 0 : i32
    %c0_i32_0 = arith.constant 0 : i32
    %c0_i32_1 = arith.constant 0 : i32
    return %arg0, %c0_i32, %c0_i32_0 : i32, i32, i32
  }
  func.func @transform_1(%arg0: i32) -> (i32, i32, i32) {
    %c0_i32 = arith.constant 0 : i32
    %c0_i32_0 = arith.constant 0 : i32
    %c0_i32_1 = arith.constant 0 : i32
    %c0_i32_2 = arith.constant 0 : i32
    return %c0_i32, %c0_i32_0, %c0_i32_1 : i32, i32, i32
  }
  func.func @transform_2(%arg0: i32) -> (i32, i32) {
    %c0_i32 = arith.constant 0 : i32
    %c0_i32_0 = arith.constant 0 : i32
    %c0_i32_1 = arith.constant 0 : i32
    return %c0_i32, %c0_i32_0 : i32, i32
  }
  func.func @transform_3(%arg0: i32) -> (i32, i32) {
    %c0_i32 = arith.constant 0 : i32
    %c0_i32_0 = arith.constant 0 : i32
    %c0_i32_1 = arith.constant 0 : i32
    return %c0_i32, %c0_i32_0 : i32, i32
  }
  func.func @transform_4(%arg0: i32) -> (i32, i32) {
    %c0_i32 = arith.constant 0 : i32
    %c0_i32_0 = arith.constant 0 : i32
    %c0_i32_1 = arith.constant 0 : i32
    return %c0_i32, %c0_i32_0 : i32, i32
  }
  func.func @transform_5(%arg0: i32) -> (i32, i32) {
    %c0_i32 = arith.constant 0 : i32
    %c0_i32_0 = arith.constant 0 : i32
    %c0_i32_1 = arith.constant 0 : i32
    return %c0_i32, %c0_i32_0 : i32, i32
  }
  func.func @transform_6(%arg0: i32) -> (i32, i32) {
    %c0_i32 = arith.constant 0 : i32
    %c0_i32_0 = arith.constant 0 : i32
    %c0_i32_1 = arith.constant 0 : i32
    return %c0_i32, %c0_i32_0 : i32, i32
  }
  func.func @transform_7(%arg0: i32) -> (i32, i32) {
    %c0_i32 = arith.constant 0 : i32
    %c0_i32_0 = arith.constant 0 : i32
    %c0_i32_1 = arith.constant 0 : i32
    return %c0_i32, %c0_i32_0 : i32, i32
  }
  func.func @transform_8(%arg0: i32) -> (i32, i32) {
    %c0_i32 = arith.constant 0 : i32
    %c0_i32_0 = arith.constant 0 : i32
    %c0_i32_1 = arith.constant 0 : i32
    return %c0_i32, %c0_i32_0 : i32, i32
  }
  func.func @transform_9(%arg0: i32) -> (i32, i32) {
    %c0_i32 = arith.constant 0 : i32
    %c0_i32_0 = arith.constant 0 : i32
    %c0_i32_1 = arith.constant 0 : i32
    return %c0_i32, %c0_i32_0 : i32, i32
  }
  func.func @transform_10(%arg0: i32) -> (i32, i32) {
    %c0_i32 = arith.constant 0 : i32
    %c0_i32_0 = arith.constant 0 : i32
    %c0_i32_1 = arith.constant 0 : i32
    return %c0_i32, %c0_i32_0 : i32, i32
  }
  func.func @transform_11(%arg0: i32) -> (i32, i32) {
    %c0_i32 = arith.constant 0 : i32
    %c0_i32_0 = arith.constant 0 : i32
    %c0_i32_1 = arith.constant 0 : i32
    return %c0_i32, %c0_i32_0 : i32, i32
  }
  func.func @transform_12(%arg0: i32) -> (i32, i32) {
    %c0_i32 = arith.constant 0 : i32
    %c0_i32_0 = arith.constant 0 : i32
    %c0_i32_1 = arith.constant 0 : i32
    return %c0_i32, %c0_i32_0 : i32, i32
  }
  func.func @transform_13(%arg0: i32) -> (i32, i32) {
    %c0_i32 = arith.constant 0 : i32
    %c0_i32_0 = arith.constant 0 : i32
    %c0_i32_1 = arith.constant 0 : i32
    return %c0_i32, %c0_i32_0 : i32, i32
  }
  func.func @transform_14(%arg0: i32) -> (i32, i32, i32) {
    %c0_i32 = arith.constant 0 : i32
    %c0_i32_0 = arith.constant 0 : i32
    %c0_i32_1 = arith.constant 0 : i32
    return %arg0, %c0_i32, %c0_i32_0 : i32, i32, i32
  }
}

</mosaic_0001>

<bundles_post_ra>
// kernel: tpu_custom_call.1
= control target key start
LH: loop header
LB: loop body
LE: loop exit
PB: predicated region body
PF: predicated region fallthrough
CT: control target
= control target key end

     0   :  { %s8446_s0 = inlined_call_operand.vmem [shape: f32[2,4,95], index: 0, kind: input, shape index: {}]   ;;  %s8447_s1 = inlined_call_operand.vmem [shape: f32[32,8,1], index: 1, kind: input, shape index: {}]   ;;  %s8448_s2 = inlined_call_operand.vmem [shape: f32[8,1], index: 2, kind: input, shape index: {}]   ;;  %s8449_s3 = inlined_call_operand.vmem [shape: f32[32,256], index: 3, kind: input, shape index: {}]   ;;  %s8450_s4 = inlined_call_operand.vmem [shape: f32[32,1], index: 4, kind: input, shape index: {}]   ;;  %s8451_s5 = inlined_call_operand.vmem [shape: f32[64,128], index: 5, kind: input, shape index: {}]   ;;  %s8452_s6 = inlined_call_operand.vmem [shape: f32[64,1], index: 6, kind: input, shape index: {}]   ;;  %s8453_s7 = inlined_call_operand.vmem [shape: f32[64,16], index: 7, kind: input, shape index: {}]   ;;  %s8454_s8 = inlined_call_operand.vmem [shape: f32[32,1024], index: 8, kind: input, shape index: {}]   ;;  %s8455_s9 = inlined_call_operand.vmem [shape: f32[32,1], index: 9, kind: input, shape index: {}]   ;;  %s8456_s10 = inlined_call_operand.vmem [shape: f32[8,512], index: 10, kind: input, shape index: {}]   ;;  %s8457_s11 = inlined_call_operand.vmem [shape: f32[8,1], index: 11, kind: input, shape index: {}]   ;;  %s8458_s12 = inlined_call_operand.vmem [shape: f32[128,4], index: 12, kind: input, shape index: {}]   ;;  %s8459_s13 = inlined_call_operand.vmem [shape: f32[1,4], index: 13, kind: input, shape index: {}]   ;;  %s8460_s14 = inlined_call_operand.hbm [shape: f32[2,1,4], index: 14, kind: output, shape index: {}]  }
   0x1   :  { %8548 = sst [smem:[#allocation32_spill]] %s8446_s0 }
   0x2   :  { %8549 = sst [smem:[#allocation33_spill]] %s8447_s1 }
   0x3   :  { %8550 = sst [smem:[#allocation34_spill]] %s8448_s2 }
   0x4   :  { %8551 = sst [smem:[#allocation35_spill]] %s8450_s4 }
   0x5   :  { %8552 = sst [smem:[#allocation36_spill]] %s8451_s5 }
   0x6   :  { %8553 = sst [smem:[#allocation37_spill]] %s8452_s6 }
   0x7   :  { %8554 = sst [smem:[#allocation38_spill]] %s8453_s7 }
   0x8   :  { %8555 = sst [smem:[#allocation39_spill]] %s8454_s8 }
   0x9   :  { %8556 = sst [smem:[#allocation40_spill]] %s8455_s9 }
   0xa   :  { %8557 = sst [smem:[#allocation41_spill]] %s8456_s10 }
   0xb   :  { %8558 = sst [smem:[#allocation42_spill]] %s8457_s11 }
   0xc   :  { %8559 = sst [smem:[#allocation43_spill]] %s8458_s12 }
   0xd   :  { %8560 = sst [smem:[#allocation44_spill]] %s8459_s13 }
   0xe   :  { %8561 = sst [smem:[#allocation45_spill]] %s8460_s14 }
   0xf   :  { %19 = vsyncpa [#allocation11], 0 }
  0x10   :  { %21 = vsyncpa [#allocation11 + $0x1], 0  ;;  %s6197_s29 = smov 0   ;;  %s6199_s30 = smov 0  }
  0x11   :  { %s6201_s15 = smov 0   ;;  %s6203_s16 = smov 0  }
  0x12 LB: > { %8562 = sst [smem:[#allocation13_spill]] %s6058_s29  ;;  %s6218_s17 = sadd.s32 4294967295, %s6070_s16   ;;  %s6070_s16 = sphi %s6203_s16, %s8651_s16   ;;  %s6066_s15 = sphi %s6201_s15, %s8654_s15   ;;  %s6062_s30 = sphi %s6199_s30, %s8653_s30   ;;  %s6058_s29 = sphi %s6197_s29, %s8652_s29  }
  0x13   : > { %8563 = sst [smem:[#allocation14_spill]] %s6062_s30  ;;  %s4821_s18 = sadd.s32 4294967294, %s6070_s16  }
  0x14   : > { %8564 = sst [smem:[#allocation15_spill]] %s6066_s15  ;;  %s6222_s19 = sadd.s32 1, %s6070_s16  }
  0x15   : > { %8565 = sst [smem:[#allocation16_spill]] %s6070_s16  ;;  %s333_s20 = sadd.s32 1, %s6066_s15 }
  0x16   : > { %8566 = sst [smem:[#allocation17_spill]] %s6218_s17  ;;  %s330_s21 = ssub.s32 %s6070_s16, %s6222_s19 }
  0x17   : > { %8567 = sst [smem:[#allocation18_spill]] %s6222_s19  ;;  %p343_p0 = scmp.ne.s32.totalorder %s6066_s15, %s6062_s30 }
  0x18   : > { %p331_p1 = scmp.eq.s32.totalorder %s330_s21, 0  ;;  %p344_p2 = scmp.eq.s32.totalorder %s6218_s17, 1 }
  0x19   : > { %p349_p3 = scmp.ne.s32.totalorder %s6062_s30, %s6058_s29  ;;  %p350_p4 = scmp.eq.s32.totalorder %s4821_s18, 1 }
  0x1a   : > { %s6233_s22 = scalar_select %p331_p1, %s6066_s15, %s333_s20  }
  0x1b   : > { %p6235_p5 = por %p344_p2, %p343_p0  ;;  %p6239_p6 = por %p350_p4, %p349_p3 }
  0x1c   : > { %8568 = sst [smem:[#allocation19_spill]] %s6233_s22  ;;  %p4824_p7 = scmp.ge.s32.totalorder %s6070_s16, 1 }
  0x1d   : > { %s8569_s23 = scalar_select %p6235_p5, 1, 0 }
  0x1e   : > { %s8571_s24 = scalar_select %p6239_p6, 1, 0 }
  0x1f   : > { %8570 = sst [smem:[#allocation20_spill]] %s8569_s23  ;;  %p414_p8 = scmp.lt.s32.totalorder %s6070_s16, 3 }
  0x20   : > { %8572 = sst [smem:[#allocation21_spill]] %s8571_s24 }
  0x21   : > { %p415_p9 = pnand %p4824_p7, %p414_p8 }
  0x23   : > { %418 = sbr.rel (%p415_p9) target bundleno = 3714 (0xe82), region = 76 }
  0x2a   : > { %s8573_s1 = sld [smem:[#allocation33_spill]]  ;;  %p458_p10 = scmp.lt.s32.totalorder %s6218_s17, 1  ;;  %v533_v2 = vlaneseq  ;;  %v6072_v3 = vmov 0   ;;  %vm462_vm0 = vcmask 121856   ;;  %vm897_vm5 = vcmask 646264  }
  0x2b   : > { %5937 = vset.pattern.permute.xlu1 %v6072_v3  ;;  %5936 = vset.pattern.permute.xlu0 %v6072_v3  ;;  %s8574_s0 = sld [smem:[#allocation32_spill]]  ;;  %s8491_s28 = smov 127   ;;  %vm899_vm6 = vcmask 777848   ;;  %vm1523_vm7 = vcmask 523264  }
  0x2c   : > { %s459_s18 = scalar_select %p458_p10, %s6218_s17, 1  ;;  %v6259_v6 = vshrl.u32 %v533_v2, 7 }
  0x2d   : > { %s8495_s20 = smov 126   ;;  %s8465_s25 = smov 123  }
  0x2e   : > { %s4825_s27 = sshll.u32 %s459_s18, 2  ;;  %v1317_v9 = vsub.s32 3, %v6259_v6  ;;  %v535_v38 = vsub.s32 0, %v6259_v6  ;;  %v903_v47 = vsub.s32 1, %v6259_v6  ;;  %s8503_s18 = smov 124  }
  0x2f   : > { %s8467_s22 = smov 122   ;;  %s8469_s26 = smov 121  }
  0x30   : > { %v494_v0 = vld [vmem:[%s8573_s1 + $0x18] sm:$0xff]  ;;  %v492_v1 = vld [vmem:[%s8573_s1 + $0x8] sm:$0xff]  ;;  %v495_v4 = vld [vmem:[%s8573_s1 + $0x20] sm:$0xff]  ;;  %s8471_s15 = smov 120   ;;  %s8473_s19 = smov 119  }
  0x31   : > { %563 = vperm.xlu1 %5937, %v494_v0   ;;  %541 = vperm.xlu0 %5936, %v492_v1   ;;  %v493_v5 = vld [vmem:[%s8573_s1 + $0x10] sm:$0xff]  ;;  %v496_v8 = vld [vmem:[%s8573_s1 + $0x28] sm:$0xff]  ;;  %s461_s21 = scalar_lea.vmem %s8574_s0, %s4825_s27  ;;  %v499_v11 = vld [vmem:[%s8573_s1 + $0x40] sm:$0xff]  ;;  %s8475_s24 = smov 118  }
  0x32   : > { %v497_v7 = vld [vmem:[%s8573_s1 + $0x30] sm:$0xff]  ;;  %v6271_v10 = vld [vmem:[%s461_s21] sm:$0xf]  ;;  %v498_v12 = vld [vmem:[%s8573_s1 + $0x38] sm:$0xff]  ;;  %s8499_s21 = smov 125   ;;  %s8487_s27 = smov 117  }
  0x33   : > { %v6280_v13 = vrot.slane %v6271_v10, %v1317_v9  ;;  %v501_v14 = vld [vmem:[%s8573_s1 + $0x50] sm:$0xff]  ;;  %v500_v15 = vld [vmem:[%s8573_s1 + $0x48] sm:$0xff]  ;;  %v503_v16 = vld [vmem:[%s8573_s1 + $0x60] sm:$0xff]  ;;  %v6356_v39 = vrot.slane %v6271_v10, %v535_v38  ;;  %v6383_v51 = vrot.slane %v6271_v10, %v903_v47  ;;  %s8583_s2 = sld [smem:[#allocation34_spill]]  ;;  %s8519_s0 = smov 99  }
  0x34   : > { %v502_v17 = vld [vmem:[%s8573_s1 + $0x58] sm:$0xff]  ;;  %v505_v18 = vld [vmem:[%s8573_s1 + $0x70] sm:$0xff]  ;;  %v504_v19 = vld [vmem:[%s8573_s1 + $0x68] sm:$0xff]  ;;  %s8589_s29 = smov 113   ;;  %s8591_s16 = smov 112  }
  0x35   : > { %574 = vperm.xlu1 %5937, %v495_v4   ;;  %552 = vperm.xlu0 %5936, %v493_v5   ;;  %v507_v20 = vld [vmem:[%s8573_s1 + $0x80] sm:$0xff]  ;;  %v506_v21 = vld [vmem:[%s8573_s1 + $0x78] sm:$0xff]  ;;  %v509_v22 = vld [vmem:[%s8573_s1 + $0x90] sm:$0xff]  ;;  %s8593_s14 = smov 99   ;;  %s8594_s23 = smov 111  }
  0x36   : > { %v508_v23 = vld [vmem:[%s8573_s1 + $0x88] sm:$0xff]  ;;  %v511_v24 = vld [vmem:[%s8573_s1 + $0xa0] sm:$0xff]  ;;  %v510_v25 = vld [vmem:[%s8573_s1 + $0x98] sm:$0xff]  ;;  %s8596_s17 = smov 98   ;;  %s8597_s30 = smov 110  }
  0x37   : > { %v513_v26 = vld [vmem:[%s8573_s1 + $0xb0] sm:$0xff]  ;;  %v512_v27 = vld [vmem:[%s8573_s1 + $0xa8] sm:$0xff]  ;;  %v515_v28 = vld [vmem:[%s8573_s1 + $0xc0] sm:$0xff]  ;;  %s8599_s13 = smov 97   ;;  %s8601_s12 = smov 109  }
  0x38   : > { %v514_v29 = vld [vmem:[%s8573_s1 + $0xb8] sm:$0xff]  ;;  %v517_v30 = vld [vmem:[%s8573_s1 + $0xd0] sm:$0xff]  ;;  %v516_v31 = vld [vmem:[%s8573_s1 + $0xc8] sm:$0xff]  ;;  %s8603_s11 = smov 108   ;;  %s8605_s10 = smov 107  }
  0x39   : > { %596 = vperm.xlu1 %5937, %v497_v7   ;;  %585 = vperm.xlu0 %5936, %v496_v8   ;;  %v519_v32 = vld [vmem:[%s8573_s1 + $0xe0] sm:$0xff]  ;;  %v518_v33 = vld [vmem:[%s8573_s1 + $0xd8] sm:$0xff]  ;;  %v520_v34 = vld [vmem:[%s8573_s1 + $0xe8] sm:$0xff]  ;;  %s8607_s9 = smov 106   ;;  %s8610_s8 = smov 105  }
  0x3a   : > { %v491_v35 = vld [vmem:[%s8573_s1] sm:$0xff]  ;;  %v521_v36 = vld [vmem:[%s8573_s1 + $0xf0] sm:$0xff]  ;;  %v522_v37 = vld [vmem:[%s8573_s1 + $0xf8] sm:$0xff]  ;;  %s8587_s1 = smov 114   ;;  %s8612_s7 = smov 104  }
  0x3b   : > { %s8540_s5 = smov 15   ;;  %s8624_s6 = smov 126  }
  0x3c   : > { %s8625_s4 = smov 125  }
  0x3d   : > { %618 = vperm.xlu1 %5937, %v499_v11   ;;  %607 = vperm.xlu0 %5936, %v498_v12  }
  0x41   : > { %640 = vperm.xlu1 %5937, %v501_v14   ;;  %629 = vperm.xlu0 %5936, %v500_v15  }
  0x45   : > { %662 = vperm.xlu1 %5937, %v503_v16   ;;  %651 = vperm.xlu0 %5936, %v502_v17  }
  0x49   : > { %684 = vperm.xlu1 %5937, %v505_v18   ;;  %673 = vperm.xlu0 %5936, %v504_v19  }
  0x4d   : > { %706 = vperm.xlu1 %5937, %v507_v20   ;;  %695 = vperm.xlu0 %5936, %v506_v21  }
  0x51   : > { %728 = vperm.xlu1 %5937, %v509_v22   ;;  %717 = vperm.xlu0 %5936, %v508_v23  }
  0x55   : > { %750 = vperm.xlu1 %5937, %v511_v24   ;;  %739 = vperm.xlu0 %5936, %v510_v25   ;;  %v1110_v24 = vsub.s32 2, %v6259_v6 }
  0x59   : > { %772 = vperm.xlu1 %5937, %v513_v26   ;;  %761 = vperm.xlu0 %5936, %v512_v27  }
  0x5d   : > { %794 = vperm.xlu1 %5937, %v515_v28   ;;  %783 = vperm.xlu0 %5936, %v514_v29   ;;  %v6483_v28 = vrot.slane %v6271_v10, %v1110_v24 }
  0x61   : > { %816 = vperm.xlu1 %5937, %v517_v30   ;;  %805 = vperm.xlu0 %5936, %v516_v31  }
  0x65   : > { %838 = vperm.xlu1 %5937, %v519_v32   ;;  %827 = vperm.xlu0 %5936, %v518_v33  }
  0x69   : > { %849 = vperm.xlu0 %5936, %v520_v34   ;;  %530 = vperm.xlu1 %5937, %v491_v35  }
  0x6d   : > { %860 = vperm.xlu0 %5936, %v521_v36   ;;  %871 = vperm.xlu1 %5937, %v522_v37  }
  0xb0   : > { %v6358_v40 = vpop.permute.xlu1 %563  ;;  %v6360_v41 = vpop.permute.xlu0 %541 }
  0xb1   : > { %v544_v42 = vmul.f32 %v6360_v41, %v6356_v39  ;;  %v566_v43 = vmul.f32 %v6358_v40, %v6356_v39  ;;  %v907_v53 = vmul.f32 %v6383_v51, %v6360_v41  ;;  %v919_v59 = vmul.f32 %v6383_v51, %v6358_v40 }
  0xb2   : > { %v1114_v29 = vmul.f32 %v6483_v28, %v6360_v41  ;;  %v1126_v36 = vmul.f32 %v6483_v28, %v6358_v40 }
  0xb3   : > { %546 = vrot.lane.b32.xlu0 %v544_v42, %s8491_s28 }
  0xb4   : > { %v6367_v44 = vpop.permute.xlu1 %574  ;;  %v6369_v45 = vpop.permute.xlu0 %552 }
  0xb5   : > { %v555_v46 = vmul.f32 %v6369_v45, %v6356_v39  ;;  %v577_v49 = vmul.f32 %v6367_v44, %v6356_v39  ;;  %v913_v56 = vmul.f32 %v6383_v51, %v6369_v45  ;;  %v925_v62 = vmul.f32 %v6383_v51, %v6367_v44 }
  0xb6   : > { %v1120_v33 = vmul.f32 %v6483_v28, %v6369_v45 }
  0xb7   : > { %557 = vrot.lane.b32.xlu1 %v555_v46, %s8495_s20  ;;  %568 = vrot.lane.b32.xlu0 %v566_v43, %s8499_s21  ;;  %v1132_v46 = vmul.f32 %v6483_v28, %v6367_v44 }
  0xb8   : > { %v6376_v48 = vpop.permute.xlu0 %585  ;;  %v6385_v52 = vpop.permute.xlu1 %596 }
  0xb9   : > { %v588_v50 = vmul.f32 %v6376_v48, %v6356_v39  ;;  %v599_v54 = vmul.f32 %v6385_v52, %v6356_v39  ;;  %v931_v1 = vmul.f32 %v6383_v51, %v6376_v48  ;;  %v937_v4 = vmul.f32 %v6383_v51, %v6385_v52 }
  0xbb   : > { %579 = vrot.lane.b32.xlu1 %v577_v49, %s8503_s18  ;;  %590 = vrot.lane.b32.xlu0 %v588_v50, %s8465_s25  ;;  %v1138_v50 = vmul.f32 %v6483_v28, %v6376_v48 }
  0xbc   : > { %v6393_v55 = vpop.permute.xlu0 %607  ;;  %v6401_v58 = vpop.permute.xlu1 %618 }
  0xbd   : > { %v610_v57 = vmul.f32 %v6393_v55, %v6356_v39  ;;  %v621_v60 = vmul.f32 %v6401_v58, %v6356_v39  ;;  %v943_v8 = vmul.f32 %v6383_v51, %v6393_v55  ;;  %v949_v12 = vmul.f32 %v6383_v51, %v6401_v58 }
  0xbf   : > { %909 = vrot.lane.b32.xlu1 %v907_v53, %s8491_s28  ;;  %601 = vrot.lane.b32.xlu0 %v599_v54, %s8467_s22 }
  0xc0   : > { %v6409_v61 = vpop.permute.xlu0 %629  ;;  %v6417_v0 = vpop.permute.xlu1 %640 }
  0xc1   : > { %v632_v63 = vmul.f32 %v6409_v61, %v6356_v39  ;;  %v643_v2 = vmul.f32 %v6417_v0, %v6356_v39  ;;  %v955_v16 = vmul.f32 %v6383_v51, %v6409_v61  ;;  %v961_v19 = vmul.f32 %v6383_v51, %v6417_v0 }
  0xc3   : > { %915 = vrot.lane.b32.xlu1 %v913_v56, %s8495_s20  ;;  %612 = vrot.lane.b32.xlu0 %v610_v57, %s8469_s26  ;;  %v1321_v56 = vmul.f32 %v6280_v13, %v6360_v41  ;;  %v1327_v41 = vmul.f32 %v6280_v13, %v6369_v45 }
  0xc4   : > { %v6425_v3 = vpop.permute.xlu0 %651  ;;  %v6433_v7 = vpop.permute.xlu1 %662 }
  0xc5   : > { %v654_v5 = vmul.f32 %v6425_v3, %v6356_v39  ;;  %v665_v9 = vmul.f32 %v6433_v7, %v6356_v39  ;;  %v967_v22 = vmul.f32 %v6383_v51, %v6425_v3  ;;  %v973_v26 = vmul.f32 %v6383_v51, %v6433_v7 }
  0xc7   : > { %921 = vrot.lane.b32.xlu1 %v919_v59, %s8499_s21  ;;  %623 = vrot.lane.b32.xlu0 %v621_v60, %s8471_s15 }
  0xc8   : > { %v6441_v11 = vpop.permute.xlu0 %673  ;;  %v6449_v15 = vpop.permute.xlu1 %684 }
  0xc9   : > { %v676_v14 = vmul.f32 %v6441_v11, %v6356_v39  ;;  %v687_v17 = vmul.f32 %v6449_v15, %v6356_v39  ;;  %v979_v6 = vmul.f32 %v6383_v51, %v6441_v11  ;;  %v985_v31 = vmul.f32 %v6383_v51, %v6449_v15 }
  0xcb   : > { %927 = vrot.lane.b32.xlu1 %v925_v62, %s8503_s18  ;;  %634 = vrot.lane.b32.xlu0 %v632_v63, %s8473_s19  ;;  %v1144_v62 = vmul.f32 %v6483_v28, %v6385_v52 }
  0xcc   : > { %v6457_v18 = vpop.permute.xlu0 %695  ;;  %v6465_v21 = vpop.permute.xlu1 %706 }
  0xcd   : > { %v698_v20 = vmul.f32 %v6457_v18, %v6356_v39  ;;  %v709_v23 = vmul.f32 %v6465_v21, %v6356_v39  ;;  %v991_v35 = vmul.f32 %v6383_v51, %v6457_v18  ;;  %v997_v42 = vmul.f32 %v6383_v51, %v6465_v21 }
  0xcf   : > { %933 = vrot.lane.b32.xlu1 %v931_v1, %s8465_s25  ;;  %645 = vrot.lane.b32.xlu0 %v643_v2, %s8475_s24  ;;  %s8477_s25 = smov 116  }
  0xd0   : > { %v6474_v25 = vpop.permute.xlu0 %717  ;;  %v6491_v30 = vpop.permute.xlu1 %728 }
  0xd1   : > { %v720_v27 = vmul.f32 %v6474_v25, %v6356_v39  ;;  %v731_v10 = vmul.f32 %v6491_v30, %v6356_v39  ;;  %v1003_v49 = vmul.f32 %v6383_v51, %v6474_v25  ;;  %v1009_v60 = vmul.f32 %v6383_v51, %v6491_v30 }
  0xd3   : > { %939 = vrot.lane.b32.xlu1 %v937_v4, %s8467_s22  ;;  %656 = vrot.lane.b32.xlu0 %v654_v5, %s8487_s27  ;;  %s8479_s22 = smov 115  }
  0xd4   : > { %v6499_v32 = vpop.permute.xlu0 %739  ;;  %v6513_v37 = vpop.permute.xlu1 %750 }
  0xd5   : > { %v742_v34 = vmul.f32 %v6499_v32, %v6356_v39  ;;  %v753_v38 = vmul.f32 %v6513_v37, %v6356_v39  ;;  %v1015_v5 = vmul.f32 %v6383_v51, %v6499_v32 }
  0xd7   : > { %945 = vrot.lane.b32.xlu1 %v943_v8, %s8469_s26  ;;  %667 = vrot.lane.b32.xlu0 %v665_v9, %s8477_s25  ;;  %s8481_s26 = smov 114   ;;  %v1150_v8 = vmul.f32 %v6483_v28, %v6393_v55  ;;  %v1333_v9 = vmul.f32 %v6280_v13, %v6358_v40 }
  0xd8   : > { %v6521_v43 = vpop.permute.xlu0 %761  ;;  %v6535_v53 = vpop.permute.xlu1 %772 }
  0xd9   : > { %v764_v47 = vmul.f32 %v6521_v43, %v6356_v39  ;;  %v775_v57 = vmul.f32 %v6535_v53, %v6356_v39 }
  0xdb   : > { %951 = vrot.lane.b32.xlu1 %v949_v12, %s8471_s15  ;;  %678 = vrot.lane.b32.xlu0 %v676_v14, %s8479_s22  ;;  %s8483_s15 = smov 113  }
  0xdc   : > { %v6539_v54 = vpop.permute.xlu0 %783  ;;  %v6547_v59 = vpop.permute.xlu1 %794 }
  0xdd   : > { %v786_v1 = vmul.f32 %v6539_v54, %v6356_v39  ;;  %v797_v12 = vmul.f32 %v6547_v59, %v6356_v39 }
  0xdf   : > { %957 = vrot.lane.b32.xlu1 %v955_v16, %s8473_s19  ;;  %689 = vrot.lane.b32.xlu0 %v687_v17, %s8481_s26  ;;  %s8485_s19 = smov 112   ;;  %v1021_v16 = vmul.f32 %v6383_v51, %v6513_v37  ;;  %v1156_v17 = vmul.f32 %v6483_v28, %v6401_v58 }
  0xe0   : > { %v6553_v63 = vpop.permute.xlu0 %805  ;;  %v6561_v2 = vpop.permute.xlu1 %816 }
  0xe3   : > { %963 = vrot.lane.b32.xlu1 %v961_v19, %s8475_s24  ;;  %700 = vrot.lane.b32.xlu0 %v698_v20, %s8483_s15  ;;  %s8489_s24 = smov 111   ;;  %v1339_v20 = vmul.f32 %v6280_v13, %v6367_v44 }
  0xe4   : > { %v6565_v4 = vpop.permute.xlu0 %827  ;;  %v6573_v45 = vpop.permute.xlu1 %838 }
  0xe7   : > { %969 = vrot.lane.b32.xlu1 %v967_v22, %s8487_s27  ;;  %711 = vrot.lane.b32.xlu0 %v709_v23, %s8485_s19  ;;  %s8509_s27 = smov 106   ;;  %v808_v22 = vmul.f32 %v6553_v63, %v6356_v39 }
  0xe8   : > { %v6579_v14 = vpop.permute.xlu0 %849  ;;  %v6587_v19 = vpop.permute.xlu1 %530 }
  0xeb   : > { %975 = vrot.lane.b32.xlu1 %v973_v26, %s8477_s25  ;;  %722 = vrot.lane.b32.xlu0 %v720_v27, %s8489_s24  ;;  %s8493_s25 = smov 110   ;;  %v1027_v26 = vmul.f32 %v6383_v51, %v6521_v43  ;;  %v1162_v27 = vmul.f32 %v6483_v28, %v6409_v61 }
  0xec   : > { %v6591_v40 = vpop.permute.xlu0 %860  ;;  %v6599_v23 = vpop.permute.xlu1 %871 }
  0xef   : > { %981 = vrot.lane.b32.xlu1 %v979_v6, %s8479_s22  ;;  %1116 = vrot.lane.b32.xlu0 %v1114_v29, %s8491_s28  ;;  %s8497_s22 = smov 109   ;;  %v1345_v29 = vmul.f32 %v6280_v13, %v6376_v48 }
  0xf3   : > { %733 = vrot.lane.b32.xlu1 %v731_v10, %s8493_s25  ;;  %987 = vrot.lane.b32.xlu0 %v985_v31, %s8481_s26  ;;  %s8501_s26 = smov 108   ;;  %v819_v10 = vmul.f32 %v6561_v2, %v6356_v39 }
  0xf7   : > { %1122 = vrot.lane.b32.xlu1 %v1120_v33, %s8495_s20  ;;  %744 = vrot.lane.b32.xlu0 %v742_v34, %s8497_s22  ;;  %v1033_v34 = vmul.f32 %v6383_v51, %v6535_v53 }
  0xfb   : > { %993 = vrot.lane.b32.xlu1 %v991_v35, %s8483_s15  ;;  %1128 = vrot.lane.b32.xlu0 %v1126_v36, %s8499_s21  ;;  %s8505_s15 = smov 107   ;;  %v1168_v35 = vmul.f32 %v6483_v28, %v6417_v0 }
  0xff   : > { %755 = vrot.lane.b32.xlu1 %v753_v38, %s8501_s26  ;;  %999 = vrot.lane.b32.xlu0 %v997_v42, %s8485_s19  ;;  %s8575_s19 = smov 123   ;;  %v1351_v38 = vmul.f32 %v6280_v13, %v6385_v52  ;;  %v830_v42 = vmul.f32 %v6565_v4, %v6356_v39 }
 0x103   : > { %1134 = vrot.lane.b32.xlu1 %v1132_v46, %s8503_s18  ;;  %766 = vrot.lane.b32.xlu0 %v764_v47, %s8505_s15 }
 0x107   : > { %1005 = vrot.lane.b32.xlu1 %v1003_v49, %s8489_s24  ;;  %1140 = vrot.lane.b32.xlu0 %v1138_v50, %s8575_s19  ;;  %s8576_s24 = smov 122   ;;  %v1039_v49 = vmul.f32 %v6383_v51, %v6539_v54  ;;  %v1174_v50 = vmul.f32 %v6483_v28, %v6425_v3 }
 0x10b   : > { %1323 = vrot.lane.b32.xlu1 %v1321_v56, %s8491_s28  ;;  %777 = vrot.lane.b32.xlu0 %v775_v57, %s8509_s27  ;;  %s8513_s28 = smov 105   ;;  %v1357_v57 = vmul.f32 %v6280_v13, %v6393_v55  ;;  %v523_v55 = vld [vmem:[%s8583_s2] sm:$0xff]  ;;  %s8588_s2 = smov 101  }
 0x10f   : > { %1011 = vrot.lane.b32.xlu1 %v1009_v60, %s8493_s25  ;;  %1146 = vrot.lane.b32.xlu0 %v1144_v62, %s8576_s24  ;;  %s8577_s25 = smov 121   ;;  %v841_v60 = vmul.f32 %v6573_v45, %v6356_v39 }
 0x113   : > { %1329 = vrot.lane.b32.xlu1 %v1327_v41, %s8495_s20  ;;  %788 = vrot.lane.b32.xlu0 %v786_v1, %s8513_s28  ;;  %s8517_s20 = smov 104   ;;  %v1045_v1 = vmul.f32 %v6383_v51, %v6547_v59 }
 0x117   : > { %1017 = vrot.lane.b32.xlu1 %v1015_v5, %s8497_s22  ;;  %1152 = vrot.lane.b32.xlu0 %v1150_v8, %s8577_s25  ;;  %s8578_s22 = smov 120   ;;  %v1180_v5 = vmul.f32 %v6483_v28, %v6433_v7 }
 0x11b   : > { %1335 = vrot.lane.b32.xlu1 %v1333_v9, %s8499_s21  ;;  %799 = vrot.lane.b32.xlu0 %v797_v12, %s8517_s20  ;;  %s8515_s21 = smov 103   ;;  %v1363_v12 = vmul.f32 %v6280_v13, %v6401_v58 }
 0x11f   : > { %1023 = vrot.lane.b32.xlu1 %v1021_v16, %s8501_s26  ;;  %1158 = vrot.lane.b32.xlu0 %v1156_v17, %s8578_s22  ;;  %s8579_s26 = smov 119  }
 0x123   : > { %1341 = vrot.lane.b32.xlu1 %v1339_v20, %s8503_s18  ;;  %810 = vrot.lane.b32.xlu0 %v808_v22, %s8515_s21  ;;  %s8507_s18 = smov 102   ;;  %v852_v20 = vmul.f32 %v6579_v14, %v6356_v39  ;;  %v1051_v22 = vmul.f32 %v6383_v51, %v6553_v63  ;;  %s8584_s21 = smov 103  }
 0x125   : > { %v6601_v24 = vpop.permute.xlu0 %546 }
 0x127   : > { %1029 = vrot.lane.b32.xlu1 %v1027_v26, %s8505_s15  ;;  %1164 = vrot.lane.b32.xlu0 %v1162_v27, %s8579_s26  ;;  %s8580_s15 = smov 118   ;;  %v1186_v27 = vmul.f32 %v6483_v28, %v6441_v11 }
 0x129   : > { %v6609_v44 = vpop.permute.xlu1 %557  ;;  %v6611_v6 = vpop.permute.xlu0 %568 }
 0x12b   : > { %1347 = vrot.lane.b32.xlu1 %v1345_v29, %s8575_s19  ;;  %821 = vrot.lane.b32.xlu0 %v819_v10, %s8507_s18  ;;  %s8511_s18 = smov 101   ;;  %v1369_v29 = vmul.f32 %v6280_v13, %v6409_v61 }
 0x12d   : > { %v6619_v31 = vpop.permute.xlu1 %579  ;;  %v6621_v33 = vpop.permute.xlu0 %590 }
 0x12f   : > { %1035 = vrot.lane.b32.xlu1 %v1033_v34, %s8509_s27  ;;  %1170 = vrot.lane.b32.xlu0 %v1168_v35, %s8580_s15  ;;  %s8581_s27 = smov 117   ;;  %v863_v35 = vmul.f32 %v6591_v40, %v6356_v39 }
 0x131   : > { %v6629_v48 = vpop.permute.xlu1 %909  ;;  %v6631_v36 = vpop.permute.xlu0 %601 }
 0x133   : > { %1353 = vrot.lane.b32.xlu1 %v1351_v38, %s8576_s24  ;;  %832 = vrot.lane.b32.xlu0 %v830_v42, %s8511_s18  ;;  %s8521_s18 = smov 100   ;;  %v1057_v38 = vmul.f32 %v6383_v51, %v6561_v2 }
 0x135   : > { %v6639_v46 = vpop.permute.xlu1 %915  ;;  %v6641_v47 = vpop.permute.xlu0 %612 }
 0x137   : > { %1041 = vrot.lane.b32.xlu1 %v1039_v49, %s8513_s28  ;;  %1176 = vrot.lane.b32.xlu0 %v1174_v50, %s8581_s27  ;;  %s8582_s28 = smov 116   ;;  %v1192_v49 = vmul.f32 %v6483_v28, %v6449_v15  ;;  %v1375_v50 = vmul.f32 %v6280_v13, %v6417_v0 }
 0x139   : > { %v6649_v52 = vpop.permute.xlu1 %921  ;;  %v6651_v56 = vpop.permute.xlu0 %623 }
 0x13b   : > { %1359 = vrot.lane.b32.xlu1 %v1357_v57, %s8577_s25  ;;  %843 = vrot.lane.b32.xlu0 %v841_v60, %s8521_s18  ;;  %s8586_s18 = smov 102  }
 0x13d   : > { %v6659_v62 = vpop.permute.xlu1 %927  ;;  %v6661_v41 = vpop.permute.xlu0 %634 }
 0x13f   : > { %1047 = vrot.lane.b32.xlu1 %v1045_v1, %s8517_s20  ;;  %1182 = vrot.lane.b32.xlu0 %v1180_v5, %s8582_s28  ;;  %s8585_s20 = smov 115   ;;  %v874_v1 = vmul.f32 %v6599_v23, %v6356_v39  ;;  %v1063_v5 = vmul.f32 %v6383_v51, %v6565_v4 }
 0x141   : > { %v6672_v8 = vpop.permute.xlu1 %933  ;;  %v6674_v9 = vpop.permute.xlu0 %645 }
 0x143   : > { %1365 = vrot.lane.b32.xlu1 %v1363_v12, %s8578_s22  ;;  %883 = vperm.xlu0 %5936, %v523_v55   ;;  %v1198_v12 = vmul.f32 %v6483_v28, %v6457_v18 }
 0x145   : > { %v6679_v16 = vpop.permute.xlu1 %939  ;;  %v6681_v17 = vpop.permute.xlu0 %656 }
 0x147   : > { %854 = vrot.lane.b32.xlu1 %v852_v20, %s8519_s0  ;;  %1053 = vrot.lane.b32.xlu0 %v1051_v22, %s8584_s21  ;;  %s8523_s0 = smov 98   ;;  %v1381_v20 = vmul.f32 %v6280_v13, %v6425_v3 }
 0x149   : > { %v6689_v26 = vpop.permute.xlu1 %945  ;;  %v6691_v58 = vpop.permute.xlu0 %667 }
 0x14b   : > { %1188 = vrot.lane.b32.xlu1 %v1186_v27, %s8585_s20  ;;  %1371 = vrot.lane.b32.xlu0 %v1369_v29, %s8579_s26  ;;  %v1069_v29 = vmul.f32 %v6383_v51, %v6573_v45 }
 0x14d   : > { %v6699_v10 = vpop.permute.xlu1 %951  ;;  %v6701_v34 = vpop.permute.xlu0 %678 }
 0x14f   : > { %865 = vrot.lane.b32.xlu1 %v863_v35, %s8523_s0  ;;  %1059 = vrot.lane.b32.xlu0 %v1057_v38, %s8586_s18  ;;  %s8526_s0 = smov 97   ;;  %v1204_v35 = vmul.f32 %v6483_v28, %v6465_v21 }
 0x151   : > { %v6709_v61 = vpop.permute.xlu1 %957  ;;  %v6711_v42 = vpop.permute.xlu0 %689 }
 0x153   : > { %1194 = vrot.lane.b32.xlu1 %v1192_v49, %s8587_s1  ;;  %1377 = vrot.lane.b32.xlu0 %v1375_v50, %s8580_s15  ;;  %v1387_v49 = vmul.f32 %v6280_v13, %v6433_v7  ;;  %v1075_v50 = vmul.f32 %v6383_v51, %v6579_v14 }
 0x155   : > { %v6719_v57 = vpop.permute.xlu1 %963  ;;  %v6721_v60 = vpop.permute.xlu0 %700 }
 0x157   : > { %876 = vrot.lane.b32.xlu1 %v874_v1, %s8526_s0  ;;  %1065 = vrot.lane.b32.xlu0 %v1063_v5, %s8588_s2  ;;  %s8590_s0 = smov 100  }
 0x159   : > { %v6729_v0 = vpop.permute.xlu1 %969  ;;  %v6731_v55 = vpop.permute.xlu0 %711 }
 0x15b   : > { %1200 = vrot.lane.b32.xlu1 %v1198_v12, %s8589_s29  ;;  %1383 = vrot.lane.b32.xlu0 %v1381_v20, %s8581_s27  ;;  %v1210_v12 = vmul.f32 %v6483_v28, %v6474_v25  ;;  %v1393_v20 = vmul.f32 %v6280_v13, %v6441_v11 }
 0x15d   : > { %v6739_v22 = vpop.permute.xlu1 %975  ;;  %v6741_v27 = vpop.permute.xlu0 %722 }
 0x15f   : > { %1071 = vrot.lane.b32.xlu1 %v1069_v29, %s8590_s0  ;;  %1206 = vrot.lane.b32.xlu0 %v1204_v35, %s8591_s16  ;;  %v1081_v35 = vmul.f32 %v6383_v51, %v6591_v40 }
 0x161   : > { %v6749_v38 = vpop.permute.xlu1 %981  ;;  %v6751_v3 = vpop.permute.xlu0 %1116 }
 0x162   : > { %8592 = vst [vmem:[#allocation22_spill] sm:$0xff] %v6751_v3 }
 0x163   : > { %1389 = vrot.lane.b32.xlu1 %v1387_v49, %s8582_s28  ;;  %1077 = vrot.lane.b32.xlu0 %v1075_v50, %s8593_s14  ;;  %v1216_v49 = vmul.f32 %v6483_v28, %v6491_v30 }
 0x165   : > { %v6759_v1 = vpop.permute.xlu1 %733  ;;  %v6761_v5 = vpop.permute.xlu0 %987 }
 0x167   : > { %1212 = vrot.lane.b32.xlu1 %v1210_v12, %s8594_s23  ;;  %1395 = vrot.lane.b32.xlu0 %v1393_v20, %s8585_s20  ;;  %v1399_v12 = vmul.f32 %v6280_v13, %v6449_v15  ;;  %v1087_v20 = vmul.f32 %v6383_v51, %v6599_v23 }
 0x169   : > { %v6769_v7 = vpop.permute.xlu1 %1122  ;;  %v6771_v29 = vpop.permute.xlu0 %744 }
 0x16a   : > { %8595 = vst [vmem:[#allocation23_spill] sm:$0xff] %v6769_v7 }
 0x16b   : > { %1083 = vrot.lane.b32.xlu1 %v1081_v35, %s8596_s17  ;;  %1218 = vrot.lane.b32.xlu0 %v1216_v49, %s8597_s30  ;;  %v1222_v35 = vmul.f32 %v6483_v28, %v6499_v32  ;;  %v1405_v49 = vmul.f32 %v6280_v13, %v6457_v18 }
 0x16d   : > { %v6779_v50 = vpop.permute.xlu1 %993  ;;  %v6781_v11 = vpop.permute.xlu0 %1128 }
 0x16e   : > { %8598 = vst [vmem:[#allocation24_spill] sm:$0xff] %v6781_v11 }
 0x16f   : > { %1401 = vrot.lane.b32.xlu1 %v1399_v12, %s8587_s1  ;;  %1089 = vrot.lane.b32.xlu0 %v1087_v20, %s8599_s13  ;;  %v1228_v12 = vmul.f32 %v6483_v28, %v6513_v37  ;;  %v1411_v20 = vmul.f32 %v6280_v13, %v6465_v21 }
 0x171   : > { %v6789_v7 = vpop.permute.xlu1 %755  ;;  %v6791_v3 = vpop.permute.xlu0 %999 }
 0x172   : > { %8600 = vst [vmem:[#allocation25_spill] sm:$0xff] %v6791_v3 }
 0x173   : > { %1224 = vrot.lane.b32.xlu1 %v1222_v35, %s8601_s12  ;;  %1407 = vrot.lane.b32.xlu0 %v1405_v49, %s8589_s29  ;;  %v1234_v35 = vmul.f32 %v6483_v28, %v6521_v43  ;;  %v1417_v49 = vmul.f32 %v6280_v13, %v6474_v25  ;;  %s8626_s29 = smov 124  }
 0x175   : > { %v6799_v15 = vpop.permute.xlu1 %1134  ;;  %v6801_v11 = vpop.permute.xlu0 %766 }
 0x176   : > { %8602 = vst [vmem:[#allocation26_spill] sm:$0xff] %v6799_v15 }
 0x177   : > { %1230 = vrot.lane.b32.xlu1 %v1228_v12, %s8603_s11  ;;  %1413 = vrot.lane.b32.xlu0 %v1411_v20, %s8591_s16  ;;  %v1240_v12 = vmul.f32 %v6483_v28, %v6535_v53  ;;  %v1423_v20 = vmul.f32 %v6280_v13, %v6491_v30  ;;  %v537_v30 = vmul.f32 %v6356_v39, %v6587_v19 }
 0x179   : > { %v6809_v3 = vpop.permute.xlu1 %1005  ;;  %v6811_v18 = vpop.permute.xlu0 %1140 }
 0x17a   : > { %8604 = vst [vmem:[#allocation27_spill] sm:$0xff] %v6811_v18 }
 0x17b   : > { %1236 = vrot.lane.b32.xlu1 %v1234_v35, %s8605_s10  ;;  %1419 = vrot.lane.b32.xlu0 %v1417_v49, %s8594_s23  ;;  %v1246_v35 = vmul.f32 %v6483_v28, %v6539_v54  ;;  %v1429_v49 = vmul.f32 %v6280_v13, %v6499_v32 }
 0x17d   : > { %v6819_v15 = vpop.permute.xlu1 %1323  ;;  %v6821_v21 = vpop.permute.xlu0 %777 }
 0x17e   : > { %8606 = vst [vmem:[#allocation28_spill] sm:$0xff] %v6819_v15  ;;  %v1252_v15 = vmul.f32 %v6483_v28, %v6547_v59 }
 0x17f   : > { %1242 = vrot.lane.b32.xlu1 %v1240_v12, %s8607_s9  ;;  %1425 = vrot.lane.b32.xlu0 %v1423_v20, %s8597_s30 }
 0x181   : > { %v6829_v18 = vpop.permute.xlu1 %1011  ;;  %v6831_v25 = vpop.permute.xlu0 %1146 }
 0x182   : > { %8608 = vst [vmem:[#allocation29_spill] sm:$0xff] %v6829_v18  ;;  %8609 = vst [vmem:[#allocation30_spill] sm:$0xff] %v6831_v25  ;;  %v1435_v25 = vmul.f32 %v6280_v13, %v6513_v37  ;;  %v549_v18 = vadd.f32 %v6601_v24, %v537_v30 }
 0x183   : > { %1248 = vrot.lane.b32.xlu1 %v1246_v35, %s8610_s8  ;;  %1431 = vrot.lane.b32.xlu0 %v1429_v49, %s8601_s12  ;;  %v1258_v49 = vmul.f32 %v6483_v28, %v6553_v63 }
 0x184   : > { %v560_v32 = vadd.f32 %v6609_v44, %v549_v18  ;;  %v1264_v44 = vmul.f32 %v6483_v28, %v6561_v2  ;;  %v1447_v18 = vmul.f32 %v6280_v13, %v6535_v53 }
 0x185   : > { %v6841_v12 = vpop.permute.xlu1 %1329  ;;  %v6843_v20 = vpop.permute.xlu0 %788 }
 0x186   : > { %8611 = vst [vmem:[#allocation31_spill] sm:$0xff] %v6841_v12  ;;  %v1441_v12 = vmul.f32 %v6280_v13, %v6521_v43  ;;  %v571_v37 = vadd.f32 %v6611_v6, %v560_v32  ;;  %v1270_v6 = vmul.f32 %v6483_v28, %v6565_v4 }
 0x187   : > { %1254 = vrot.lane.b32.xlu1 %v1252_v15, %s8612_s7  ;;  %1437 = vrot.lane.b32.xlu0 %v1435_v25, %s8603_s11 }
 0x188   : > { %v582_v43 = vadd.f32 %v6619_v31, %v571_v37  ;;  %v1276_v31 = vmul.f32 %v6483_v28, %v6573_v45  ;;  %v1459_v37 = vmul.f32 %v6280_v13, %v6547_v59 }
 0x189   : > { %v6853_v35 = vpop.permute.xlu1 %1017  ;;  %v6855_v39 = vpop.permute.xlu0 %1152 }
 0x18a   : > { %v593_v53 = vadd.f32 %v6621_v33, %v582_v43  ;;  %v1282_v33 = vmul.f32 %v6483_v28, %v6579_v14 }
 0x18b   : > { %1260 = vrot.lane.b32.xlu1 %v1258_v49, %s8584_s21  ;;  %1443 = vrot.lane.b32.xlu0 %v1441_v12, %s8605_s10  ;;  %v1453_v12 = vmul.f32 %v6280_v13, %v6539_v54 }
 0x18c   : > { %v604_v54 = vadd.f32 %v6631_v36, %v593_v53  ;;  %v1288_v36 = vmul.f32 %v6483_v28, %v6591_v40  ;;  %v1471_v53 = vmul.f32 %v6280_v13, %v6561_v2 }
 0x18d   : > { %v6864_v24 = vpop.permute.xlu1 %1335  ;;  %v6866_v15 = vpop.permute.xlu0 %799 }
 0x18e   : > { %v615_v43 = vadd.f32 %v6641_v47, %v604_v54  ;;  %v1477_v54 = vmul.f32 %v6280_v13, %v6565_v4 }
 0x18f   : > { %1266 = vrot.lane.b32.xlu1 %v1264_v44, %s8586_s18  ;;  %1449 = vrot.lane.b32.xlu0 %v1447_v18, %s8607_s9  ;;  %v1465_v18 = vmul.f32 %v6280_v13, %v6553_v63 }
 0x190   : > { %v626_v59 = vadd.f32 %v6651_v56, %v615_v43  ;;  %v1294_v56 = vmul.f32 %v6483_v28, %v6599_v23 }
 0x191   : > { %v6875_v25 = vpop.permute.xlu1 %1023  ;;  %v6877_v30 = vpop.permute.xlu0 %1158 }
 0x192   : > { %v637_v63 = vadd.f32 %v6661_v41, %v626_v59 }
 0x193   : > { %1272 = vrot.lane.b32.xlu1 %v1270_v6, %s8588_s2  ;;  %1455 = vrot.lane.b32.xlu0 %v1453_v12, %s8610_s8 }
 0x194   : > { %v648_v47 = vadd.f32 %v6674_v9, %v637_v63  ;;  %v1483_v9 = vmul.f32 %v6280_v13, %v6573_v45  ;;  %v1501_v45 = vmul.f32 %v6280_v13, %v6599_v23 }
 0x195   : > { %v6886_v32 = vpop.permute.xlu1 %1341  ;;  %v6888_v49 = vpop.permute.xlu0 %810 }
 0x197   : > { %1278 = vrot.lane.b32.xlu1 %v1276_v31, %s8590_s0  ;;  %1461 = vrot.lane.b32.xlu0 %v1459_v37, %s8612_s7 }
 0x199   : > { %v6897_v44 = vpop.permute.xlu1 %1029  ;;  %v6904_v6 = vpop.permute.xlu0 %1164 }
 0x19b   : > { %1284 = vrot.lane.b32.xlu1 %v1282_v33, %s8593_s14  ;;  %1467 = vrot.lane.b32.xlu0 %v1465_v18, %s8584_s21  ;;  %v659_v33 = vadd.f32 %v6681_v17, %v648_v47  ;;  %v1489_v18 = vmul.f32 %v6280_v13, %v6579_v14 }
 0x19d   : > { %v6909_v12 = vpop.permute.xlu1 %1347  ;;  %v822_v31 = vpop.permute.xlu0 %821  ;;  %v670_v2 = vadd.f32 %v6691_v58, %v659_v33  ;;  %v1495_v58 = vmul.f32 %v6280_v13, %v6591_v40 }
 0x19f   : > { %1290 = vrot.lane.b32.xlu1 %v1288_v36, %s8596_s17  ;;  %1473 = vrot.lane.b32.xlu0 %v1471_v53, %s8586_s18  ;;  %v681_v43 = vadd.f32 %v6701_v34, %v670_v2 }
 0x1a1   : > { %v6919_v37 = vpop.permute.xlu1 %1035  ;;  %v6936_v59 = vpop.permute.xlu0 %1170  ;;  %v692_v4 = vadd.f32 %v6711_v42, %v681_v43  ;;  %v905_v42 = vmul.f32 %v6383_v51, %v6587_v19 }
 0x1a3   : > { %1296 = vrot.lane.b32.xlu1 %v1294_v56, %s8599_s13  ;;  %1479 = vrot.lane.b32.xlu0 %v1477_v54, %s8588_s2  ;;  %v703_v14 = vadd.f32 %v6721_v60, %v692_v4  ;;  %v912_v40 = vadd.f32 %v6629_v48, %v905_v42 }
 0x1a5   : > { %v6929_v41 = vpop.permute.xlu1 %1353  ;;  %v714_v34 = vadd.f32 %v6731_v55, %v703_v14  ;;  %v833_v36 = vpop.permute.xlu0 %832  ;;  %v918_v60 = vadd.f32 %v6639_v46, %v912_v40 }
 0x1a7   : > { %1485 = vrot.lane.b32.xlu1 %v1483_v9, %s8590_s0  ;;  %1491 = vrot.lane.b32.xlu0 %v1489_v18, %s8593_s14  ;;  %v725_v63 = vadd.f32 %v6741_v27, %v714_v34  ;;  %v924_v55 = vadd.f32 %v6649_v52, %v918_v60 }
 0x1a9   : > { %v6941_v17 = vpop.permute.xlu1 %1041  ;;  %v736_v23 = vadd.f32 %v6759_v1, %v725_v63  ;;  %v6962_v54 = vpop.permute.xlu0 %1176  ;;  %v930_v33 = vadd.f32 %v6659_v62, %v924_v55 }
 0x1ab   : > { %1497 = vrot.lane.b32.xlu1 %v1495_v58, %s8596_s17  ;;  %1503 = vrot.lane.b32.xlu0 %v1501_v45, %s8599_s13  ;;  %v747_v56 = vadd.f32 %v6771_v29, %v736_v23  ;;  %v936_v27 = vadd.f32 %v6672_v8, %v930_v33 }
 0x1ad   : > { %v6953_v53 = vpop.permute.xlu1 %1359  ;;  %v758_v51 = vadd.f32 %v6789_v7, %v747_v56  ;;  %v844_v1 = vpop.permute.xlu0 %843  ;;  %v942_v9 = vadd.f32 %v6679_v16, %v936_v27  ;;  %v8615_v27 = vld [vmem:[#allocation23_spill] sm:$0xff] }
 0x1af   : > { %v769_v48 = vadd.f32 %v6801_v11, %v758_v51  ;;  %v948_v52 = vadd.f32 %v6689_v26, %v942_v9  ;;  %v6104_v26 = vmov 0.0   ;;  %v8614_v51 = vld [vmem:[#allocation22_spill] sm:$0xff]  ;;  %v8616_v9 = vld [vmem:[#allocation29_spill] sm:$0xff] }
 0x1b0   : > { %880 = vst.msk [vmem:[#allocation2] sm:$0xff] %vm462_vm0, %v6104_v26  ;;  %463 = vst.msk [vmem:[#allocation3] sm:$0xff] %vm462_vm0, %v6104_v26 }
 0x1b1   : > { %v6959_v47 = vpop.permute.xlu1 %1047  ;;  %v780_v46 = vadd.f32 %v6821_v21, %v769_v48  ;;  %v954_v62 = vadd.f32 %v6699_v10, %v948_v52  ;;  %v6980_v4 = vpop.permute.xlu0 %1182  ;;  %464 = vst.msk [vmem:[#allocation3 + $0x8] sm:$0xff] %vm462_vm0, %v6104_v26  ;;  %465 = vst.msk [vmem:[#allocation3 + $0x10] sm:$0xff] %vm462_vm0, %v6104_v26 }
 0x1b2   : > { %466 = vst.msk [vmem:[#allocation3 + $0x18] sm:$0xff] %vm462_vm0, %v6104_v26  ;;  %467 = vst.msk [vmem:[#allocation3 + $0x20] sm:$0xff] %vm462_vm0, %v6104_v26 }
 0x1b3   : > { %v791_v18 = vadd.f32 %v6843_v20, %v780_v46  ;;  %v960_v8 = vadd.f32 %v6709_v61, %v954_v62  ;;  %468 = vst.msk [vmem:[#allocation3 + $0x28] sm:$0xff] %vm462_vm0, %v6104_v26  ;;  %469 = vst.msk [vmem:[#allocation3 + $0x30] sm:$0xff] %vm462_vm0, %v6104_v26  ;;  %v8618_v62 = vld [vmem:[#allocation26_spill] sm:$0xff] }
 0x1b4   : > { %470 = vst.msk [vmem:[#allocation3 + $0x38] sm:$0xff] %vm462_vm0, %v6104_v26  ;;  %1094 = vst.msk [vmem:[#allocation2 + $0x8] sm:$0xff] %vm462_vm0, %v6104_v26 }
 0x1b5   : > { %v6967_v2 = vpop.permute.xlu1 %1365  ;;  %v802_v7 = vadd.f32 %v6866_v15, %v791_v18  ;;  %v966_v16 = vadd.f32 %v6719_v57, %v960_v8  ;;  %1301 = vst.msk [vmem:[#allocation2 + $0x10] sm:$0xff] %vm462_vm0, %v6104_v26  ;;  %1508 = vst.msk [vmem:[#allocation2 + $0x18] sm:$0xff] %vm462_vm0, %v6104_v26  ;;  %v8617_v18 = vld [vmem:[#allocation24_spill] sm:$0xff] }
 0x1b7   : > { %v813_v11 = vadd.f32 %v6888_v49, %v802_v7  ;;  %v972_v10 = vadd.f32 %v6729_v0, %v966_v16  ;;  %v1112_v0 = vmul.f32 %v6483_v28, %v6587_v19 }
 0x1b9   : > { %v855_v29 = vpop.permute.xlu1 %854  ;;  %v824_v21 = vadd.f32 %v822_v31, %v813_v11  ;;  %v978_v57 = vadd.f32 %v6739_v22, %v972_v10  ;;  %v8613_v22 = vld [vmem:[#allocation25_spill] sm:$0xff]  ;;  %v1119_v33 = vadd.f32 %v8614_v51, %v1112_v0  ;;  %v8620_v10 = vld [vmem:[#allocation30_spill] sm:$0xff] }
 0x1bb   : > { %v835_v20 = vadd.f32 %v833_v36, %v824_v21  ;;  %v984_v14 = vadd.f32 %v6749_v38, %v978_v57  ;;  %v1125_v46 = vadd.f32 %v8615_v27, %v1119_v33 }
 0x1bd   : > { %v6977_v43 = vpop.permute.xlu1 %1188  ;;  %v846_v61 = vadd.f32 %v844_v1, %v835_v20  ;;  %v990_v36 = vadd.f32 %v6761_v5, %v984_v14  ;;  %v1131_v52 = vadd.f32 %v8617_v18, %v1125_v46  ;;  %v8622_v18 = vld [vmem:[#allocation31_spill] sm:$0xff] }
 0x1bf   : > { %v857_v49 = vadd.f32 %v855_v29, %v846_v61  ;;  %v996_v23 = vadd.f32 %v6779_v50, %v990_v36  ;;  %v1137_v11 = vadd.f32 %v8618_v62, %v1131_v52 }
 0x1c1   : > { %v866_v58 = vpop.permute.xlu1 %865  ;;  %v1002_v56 = vadd.f32 %v8613_v22, %v996_v23 }
 0x1c2   : > { %v6984_v45 = vpop.permute.xlu0 %883  ;;  %v868_v34 = vadd.f32 %v866_v58, %v857_v49 }
 0x1c3   : > { %v1008_v5 = vadd.f32 %v6809_v3, %v1002_v56  ;;  %v8619_v3 = vld [vmem:[#allocation27_spill] sm:$0xff] }
 0x1c4   : > { %v1143_v16 = vadd.f32 %v8619_v3, %v1137_v11 }
 0x1c5   : > { %v1195_v15 = vpop.permute.xlu1 %1194  ;;  %v1014_v29 = vadd.f32 %v8616_v9, %v1008_v5  ;;  %v8621_v9 = vld [vmem:[#allocation28_spill] sm:$0xff] }
 0x1c6   : > { %v1054_v31 = vpop.permute.xlu0 %1053  ;;  %v1149_v61 = vadd.f32 %v8620_v10, %v1143_v16 }
 0x1c7   : > { %v1020_v7 = vadd.f32 %v6853_v35, %v1014_v29 }
 0x1c8   : > { %v1155_v14 = vadd.f32 %v6855_v39, %v1149_v61 }
 0x1c9   : > { %v877_v42 = vpop.permute.xlu1 %876  ;;  %v1026_v8 = vadd.f32 %v6875_v25, %v1020_v7 }
 0x1ca   : > { %v879_v63 = vadd.f32 %v877_v42, %v868_v34  ;;  %v7002_v40 = vpop.permute.xlu0 %1371  ;;  %v1161_v25 = vadd.f32 %v6877_v30, %v1155_v14 }
 0x1cb   : > { %v1032_v20 = vadd.f32 %v6897_v44, %v1026_v8 }
 0x1cc   : > { %v886_v60 = vadd.f32 %v6984_v45, %v879_v63  ;;  %v1167_v44 = vadd.f32 %v6904_v6, %v1161_v25 }
 0x1cd   : > { %v1201_v55 = vpop.permute.xlu1 %1200  ;;  %v1038_v57 = vadd.f32 %v6919_v37, %v1032_v20 }
 0x1ce   : > { %v888_v38 = vmin.f32 %v886_v60, 0.0  ;;  %v1060_v48 = vpop.permute.xlu0 %1059  ;;  %vm887_vm1 = vcmp.gt.f32.partialorder %v886_v60, 0.0  ;;  %v1173_v56 = vadd.f32 %v6936_v59, %v1167_v44  ;;  %v1319_v59 = vmul.f32 %v6280_v13, %v6587_v19 }
 0x1cf   : > { %v1044_v35 = vadd.f32 %v6941_v17, %v1038_v57 }
 0x1d0   : > { %v889_v1 = vmul.f32 1.442695, %v888_v38  ;;  %v1179_v51 = vadd.f32 %v6962_v54, %v1173_v56  ;;  %v1326_v29 = vadd.f32 %v8621_v9, %v1319_v59 }
 0x1d1   : > { %v1072_v50 = vpop.permute.xlu1 %1071  ;;  %v1050_v42 = vadd.f32 %v6959_v47, %v1044_v35 }
 0x1d2   : > { %5938 = vpow2.f32 %v889_v1  ;;  %v7014_v28 = vpop.permute.xlu0 %1377  ;;  %v1185_v47 = vadd.f32 %v6980_v4, %v1179_v51  ;;  %v1332_v52 = vadd.f32 %v8622_v18, %v1326_v29 }
 0x1d3   : > { %v1056_v22 = vadd.f32 %v1054_v31, %v1050_v42 }
 0x1d4   : > { %v1191_v6 = vadd.f32 %v6977_v43, %v1185_v47  ;;  %v1338_v43 = vadd.f32 %v6864_v24, %v1332_v52 }
 0x1d5   : > { %v7019_v21 = vpop.permute.xlu1 %1389  ;;  %v1062_v39 = vadd.f32 %v1060_v48, %v1056_v22 }
 0x1d6   : > { %v1066_v58 = vpop.permute.xlu0 %1065  ;;  %v1197_v31 = vadd.f32 %v1195_v15, %v1191_v6  ;;  %v1344_v15 = vadd.f32 %v6886_v32, %v1338_v43 }
 0x1d7   : > { %v1068_v33 = vadd.f32 %v1066_v58, %v1062_v39 }
 0x1d8   : > { %v1203_v1 = vadd.f32 %v1201_v55, %v1197_v31  ;;  %v1350_v3 = vadd.f32 %v6909_v12, %v1344_v15 }
 0x1d9   : > { %v1213_v49 = vpop.permute.xlu1 %1212  ;;  %v1074_v27 = vadd.f32 %v1072_v50, %v1068_v33 }
 0x1da   : > { %v7026_v34 = vpop.permute.xlu0 %1383  ;;  %v1356_v58 = vadd.f32 %v6929_v41, %v1350_v3 }
 0x1dc   : > { %v5939_v36 = vpop.eup %5938  ;;  %v1362_v24 = vadd.f32 %v6953_v53, %v1356_v58 }
 0x1dd   : > { %v1084_v63 = vpop.permute.xlu1 %1083  ;;  %v4826_v23 = vadd.f32 -1.0, %v5939_v36 }
 0x1de   : > { %v1207_v0 = vpop.permute.xlu0 %1206 }
 0x1df   : > { %v892_v37 = vsel %vm887_vm1, %v886_v60, %v4826_v23  ;;  %v1209_v54 = vadd.f32 %v1207_v0, %v1203_v1 }
 0x1e0   : > { %894 = vrot.lane.b32.xlu1 %v892_v37, %s8540_s5 }
 0x1e1   : > { %v1402_v17 = vpop.permute.xlu1 %1401  ;;  %v1215_v50 = vadd.f32 %v1213_v49, %v1209_v54  ;;  %v1368_v49 = vadd.f32 %v6967_v2, %v1362_v24 }
 0x1e2   : > { %v1078_v30 = vpop.permute.xlu0 %1077 }
 0x1e3   : > { %v1080_v60 = vadd.f32 %v1078_v30, %v1074_v27  ;;  %v1374_v36 = vadd.f32 %v7002_v40, %v1368_v49 }
 0x1e5   : > { %v1225_v38 = vpop.permute.xlu1 %1224  ;;  %v1086_v4 = vadd.f32 %v1084_v63, %v1080_v60  ;;  %v1380_v25 = vadd.f32 %v7014_v28, %v1374_v36 }
 0x1e6   : > { %v1396_v5 = vpop.permute.xlu0 %1395 }
 0x1e7   : > { %v1386_v41 = vadd.f32 %v7026_v34, %v1380_v25 }
 0x1e9   : > { %v1231_v46 = vpop.permute.xlu1 %1230  ;;  %v1392_v37 = vadd.f32 %v7019_v21, %v1386_v41 }
 0x1ea   : > { %v1219_v48 = vpop.permute.xlu0 %1218 }
 0x1eb   : > { %v1221_v8 = vadd.f32 %v1219_v48, %v1215_v50  ;;  %v1398_v56 = vadd.f32 %v1396_v5, %v1392_v37 }
 0x1ed   : > { %v1237_v7 = vpop.permute.xlu1 %1236  ;;  %v1227_v61 = vadd.f32 %v1225_v38, %v1221_v8  ;;  %v1404_v30 = vadd.f32 %v1402_v17, %v1398_v56 }
 0x1ee   : > { %v1090_v62 = vpop.permute.xlu0 %1089 }
 0x1ef   : > { %v1092_v11 = vadd.f32 %v1090_v62, %v1086_v4  ;;  %v1233_v14 = vadd.f32 %v1231_v46, %v1227_v61 }
 0x1f1   : > { %v1095_v13 = vadd.f32 %v1092_v11, %v6984_v45  ;;  %v1243_v19 = vpop.permute.xlu1 %1242  ;;  %v1239_v42 = vadd.f32 %v1237_v7, %v1233_v14 }
 0x1f2   : > { %v1408_v55 = vpop.permute.xlu0 %1407 }
 0x1f3   : > { %v1097_v16 = vmin.f32 %v1095_v13, 0.0  ;;  %v1245_v0 = vadd.f32 %v1243_v19, %v1239_v42  ;;  %vm1096_vm2 = vcmp.gt.f32.partialorder %v1095_v13, 0.0  ;;  %v1410_v38 = vadd.f32 %v1408_v55, %v1404_v30 }
 0x1f5   : > { %v1098_v20 = vmul.f32 1.442695, %v1097_v16  ;;  %v1249_v10 = vpop.permute.xlu1 %1248 }
 0x1f6   : > { %v1414_v57 = vpop.permute.xlu0 %1413  ;;  %v1251_v40 = vadd.f32 %v1249_v10, %v1245_v0 }
 0x1f7   : > { %5940 = vpow2.f32 %v1098_v20  ;;  %v1416_v27 = vadd.f32 %v1414_v57, %v1410_v38 }
 0x1f9   : > { %v1255_v32 = vpop.permute.xlu1 %1254 }
 0x1fa   : > { %v1420_v35 = vpop.permute.xlu0 %1419  ;;  %v1257_v51 = vadd.f32 %v1255_v32, %v1251_v40 }
 0x1fb   : > { %v1422_v21 = vadd.f32 %v1420_v35, %v1416_v27 }
 0x1fd   : > { %v1261_v12 = vpop.permute.xlu1 %1260 }
 0x1fe   : > { %v1426_v63 = vpop.permute.xlu0 %1425  ;;  %v1263_v47 = vadd.f32 %v1261_v12, %v1257_v51 }
 0x1ff   : > { %v1428_v1 = vadd.f32 %v1426_v63, %v1422_v21 }
 0x201   : > { %v5941_v23 = vpop.eup %5940  ;;  %v1267_v44 = vpop.permute.xlu1 %1266 }
 0x202   : > { %v1432_v22 = vpop.permute.xlu0 %1431  ;;  %v4827_v53 = vadd.f32 -1.0, %v5941_v23  ;;  %v1269_v6 = vadd.f32 %v1267_v44, %v1263_v47  ;;  %v7194_v47 = vld [vmem:[%s8449_s3 + $0x8] sm:$0xff] }
 0x203   : > { %v1434_v29 = vadd.f32 %v1432_v22, %v1428_v1  ;;  %1774 = vmatprep.mubr.f32.mxu0 %v7194_v47  ;;  %2054 = vmatprep.mubr.f32.mxu1 %v7194_v47 }
 0x204   : > { %v1101_v2 = vsel %vm1096_vm2, %v1095_v13, %v4827_v53 }
 0x205   : > { %v1273_v39 = vpop.permute.xlu1 %1272  ;;  %1103 = vrot.lane.b32.xlu0 %v1101_v2, %s8540_s5 }
 0x206   : > { %v1438_v28 = vpop.permute.xlu0 %1437  ;;  %v1275_v59 = vadd.f32 %v1273_v39, %v1269_v6 }
 0x207   : > { %v1440_v18 = vadd.f32 %v1438_v28, %v1434_v29 }
 0x209   : > { %v1279_v33 = vpop.permute.xlu1 %1278 }
 0x20a   : > { %v1444_v34 = vpop.permute.xlu0 %1443  ;;  %v1281_v46 = vadd.f32 %v1279_v33, %v1275_v59 }
 0x20b   : > { %v1446_v4 = vadd.f32 %v1444_v34, %v1440_v18 }
 0x20d   : > { %v1285_v31 = vpop.permute.xlu1 %1284 }
 0x20e   : > { %v1450_v60 = vpop.permute.xlu0 %1449  ;;  %v1287_v48 = vadd.f32 %v1285_v31, %v1281_v46 }
 0x20f   : > { %v1452_v43 = vadd.f32 %v1450_v60, %v1446_v4 }
 0x211   : > { %v1291_v5 = vpop.permute.xlu1 %1290 }
 0x212   : > { %v1456_v9 = vpop.permute.xlu0 %1455  ;;  %v1293_v54 = vadd.f32 %v1291_v5, %v1287_v48 }
 0x213   : > { %v1458_v15 = vadd.f32 %v1456_v9, %v1452_v43 }
 0x215   : > { %v1297_v52 = vpop.permute.xlu1 %1296 }
 0x216   : > { %v1299_v17 = vadd.f32 %v1297_v52, %v1293_v54  ;;  %v1462_v7 = vpop.permute.xlu0 %1461 }
 0x217   : > { %v1464_v19 = vadd.f32 %v1462_v7, %v1458_v15 }
 0x218   : > { %v1302_v62 = vadd.f32 %v1299_v17, %v6984_v45 }
 0x219   : > { %v1486_v16 = vpop.permute.xlu1 %1485 }
 0x21a   : > { %v1304_v11 = vmin.f32 %v1302_v62, 0.0  ;;  %v1468_v50 = vpop.permute.xlu0 %1467  ;;  %vm1303_vm3 = vcmp.gt.f32.partialorder %v1302_v62, 0.0 }
 0x21b   : > { %v1470_v55 = vadd.f32 %v1468_v50, %v1464_v19 }
 0x21c   : > { %v1305_v13 = vmul.f32 1.442695, %v1304_v11 }
 0x21d   : > { %v1498_v49 = vpop.permute.xlu1 %1497 }
 0x21e   : > { %5942 = vpow2.f32 %v1305_v13  ;;  %v1474_v8 = vpop.permute.xlu0 %1473 }
 0x21f   : > { %v1476_v3 = vadd.f32 %v1474_v8, %v1470_v55 }
 0x222   : > { %v1480_v58 = vpop.permute.xlu0 %1479 }
 0x223   : > { %v1482_v20 = vadd.f32 %v1480_v58, %v1476_v3 }
 0x225   : > { %v1488_v10 = vadd.f32 %v1486_v16, %v1482_v20 }
 0x226   : > { %v1492_v61 = vpop.permute.xlu0 %1491 }
 0x227   : > { %v1494_v57 = vadd.f32 %v1492_v61, %v1488_v10 }
 0x228   : > { %v5943_v24 = vpop.eup %5942 }
 0x229   : > { %v1500_v32 = vadd.f32 %v1498_v49, %v1494_v57  ;;  %v4828_v14 = vadd.f32 -1.0, %v5943_v24 }
 0x22a   : > { %v1504_v35 = vpop.permute.xlu0 %1503 }
 0x22b   : > { %v1506_v36 = vadd.f32 %v1504_v35, %v1500_v32  ;;  %v1308_v25 = vsel %vm1303_vm3, %v1302_v62, %v4828_v14 }
 0x22c   : > { %1310 = vrot.lane.b32.xlu1 %v1308_v25, %s8540_s5 }
 0x22d   : > { %v1509_v12 = vadd.f32 %v1506_v36, %v6984_v45 }
 0x22f   : > { %v1511_v42 = vmin.f32 %v1509_v12, 0.0  ;;  %vm1510_vm4 = vcmp.gt.f32.partialorder %v1509_v12, 0.0 }
 0x231   : > { %v1512_v63 = vmul.f32 1.442695, %v1511_v42 }
 0x233   : > { %5944 = vpow2.f32 %v1512_v63 }
 0x23d   : > { %v5945_v41 = vpop.eup %5944 }
 0x23e   : > { %v4829_v23 = vadd.f32 -1.0, %v5945_v41 }
 0x240   : > { %v1515_v44 = vsel %vm1510_vm4, %v1509_v12, %v4829_v23 }
 0x241   : > { %1517 = vrot.lane.b32.xlu0 %v1515_v44, %s8540_s5  ;;  %s8623_s5 = smov 127  }
 0x252   : > { %v895_v0 = vpop.permute.xlu1 %894 }
 0x253   : > { %898 = vst.msk [vmem:[#allocation2] sm:$0xff] %vm897_vm5, %v895_v0 }
 0x254   : > { %900 = vst.msk [vmem:[#allocation2] sm:$0xff] %vm899_vm6, %v6104_v26 }
 0x25b   : > { %v7060_v22 = vld [vmem:[#allocation2] sm:$0xff] }
 0x25c   : > { %1586 = vrot.lane.b32.xlu1 %v7060_v22, %s8591_s16  ;;  %1590 = vrot.lane.b32.xlu0 %v7060_v22, %s8594_s23  ;;  %1524 = vst.msk [vmem:[#allocation5] sm:$0xff] %vm1523_vm7, %v7060_v22 }
 0x260   : > { %1526 = vrot.lane.b32.xlu1 %v7060_v22, %s8623_s5  ;;  %1594 = vrot.lane.b32.xlu0 %v7060_v22, %s8597_s30 }
 0x263   : > { %v7087_v37 = vld [vmem:[#allocation5] sm:$0xff] }
 0x264   : > { %1598 = vrot.lane.b32.xlu1 %v7060_v22, %s8601_s12  ;;  %1530 = vrot.lane.b32.xlu0 %v7060_v22, %s8624_s6 }
 0x268   : > { %1534 = vrot.lane.b32.xlu1 %v7060_v22, %s8625_s4  ;;  %1602 = vrot.lane.b32.xlu0 %v7060_v22, %s8603_s11 }
 0x26c   : > { %1606 = vrot.lane.b32.xlu1 %v7060_v22, %s8605_s10 }
 0x277   : > { %v1104_v45 = vpop.permute.xlu0 %1103 }
 0x278   : > { %1106 = vst.msk [vmem:[#allocation2 + $0x8] sm:$0xff] %vm897_vm5, %v1104_v45 }
 0x279   : > { %1107 = vst.msk [vmem:[#allocation2 + $0x8] sm:$0xff] %vm899_vm6, %v6104_v26 }
 0x280   : > { %v7085_v53 = vld [vmem:[#allocation2 + $0x8] sm:$0xff] }
 0x281   : > { %1886 = vrot.lane.b32.xlu0 %v7085_v53, %s8591_s16  ;;  %1890 = vrot.lane.b32.xlu1 %v7085_v53, %s8594_s23  ;;  %1824 = vst.msk [vmem:[#allocation5] sm:$0xff] %vm1523_vm7, %v7085_v53 }
 0x285   : > { %1538 = vrot.lane.b32.xlu0 %v7060_v22, %s8626_s29  ;;  %1542 = vrot.lane.b32.xlu1 %v7060_v22, %s8575_s19 }
 0x288   : > { %v7136_v39 = vld [vmem:[#allocation5] sm:$0xff] }
 0x289   : > { %1826 = vrot.lane.b32.xlu0 %v7085_v53, %s8623_s5  ;;  %1610 = vrot.lane.b32.xlu1 %v7060_v22, %s8607_s9 }
 0x28d   : > { %1614 = vrot.lane.b32.xlu0 %v7060_v22, %s8610_s8  ;;  %1894 = vrot.lane.b32.xlu1 %v7085_v53, %s8597_s30 }
 0x291   : > { %1898 = vrot.lane.b32.xlu0 %v7085_v53, %s8601_s12  ;;  %1546 = vrot.lane.b32.xlu1 %v7060_v22, %s8576_s24 }
 0x295   : > { %1550 = vrot.lane.b32.xlu0 %v7060_v22, %s8577_s25  ;;  %1830 = vrot.lane.b32.xlu1 %v7085_v53, %s8624_s6 }
 0x299   : > { %1834 = vrot.lane.b32.xlu0 %v7085_v53, %s8625_s4  ;;  %1618 = vrot.lane.b32.xlu1 %v7060_v22, %s8612_s7 }
 0x29d   : > { %1622 = vrot.lane.b32.xlu0 %v7060_v22, %s8584_s21  ;;  %1902 = vrot.lane.b32.xlu1 %v7085_v53, %s8603_s11 }
 0x29e   : > { %v1311_v2 = vpop.permute.xlu1 %1310 }
 0x29f   : > { %1313 = vst.msk [vmem:[#allocation2 + $0x10] sm:$0xff] %vm897_vm5, %v1311_v2 }
 0x2a0   : > { %1314 = vst.msk [vmem:[#allocation2 + $0x10] sm:$0xff] %vm899_vm6, %v6104_v26 }
 0x2a1   : > { %1906 = vrot.lane.b32.xlu0 %v7085_v53, %s8605_s10  ;;  %1554 = vrot.lane.b32.xlu1 %v7060_v22, %s8578_s22 }
 0x2a5   : > { %1558 = vrot.lane.b32.xlu0 %v7060_v22, %s8579_s26  ;;  %1838 = vrot.lane.b32.xlu1 %v7085_v53, %s8626_s29 }
 0x2a7   : > { %v7134_v56 = vld [vmem:[#allocation2 + $0x10] sm:$0xff] }
 0x2a8   : > { %2104 = vst.msk [vmem:[#allocation5] sm:$0xff] %vm1523_vm7, %v7134_v56 }
 0x2a9   : > { %1842 = vrot.lane.b32.xlu0 %v7085_v53, %s8575_s19  ;;  %1626 = vrot.lane.b32.xlu1 %v7060_v22, %s8586_s18 }
 0x2ad   : > { %1630 = vrot.lane.b32.xlu0 %v7060_v22, %s8588_s2  ;;  %1910 = vrot.lane.b32.xlu1 %v7085_v53, %s8607_s9 }
 0x2af   : > { %v7222_v7 = vld [vmem:[#allocation5] sm:$0xff] }
 0x2b1   : > { %1914 = vrot.lane.b32.xlu0 %v7085_v53, %s8610_s8  ;;  %1562 = vrot.lane.b32.xlu1 %v7060_v22, %s8580_s15 }
 0x2b3   : > { %v1518_v40 = vpop.permute.xlu0 %1517 }
 0x2b4   : > { %1520 = vst.msk [vmem:[#allocation2 + $0x18] sm:$0xff] %vm897_vm5, %v1518_v40 }
 0x2b5   : > { %1521 = vst.msk [vmem:[#allocation2 + $0x18] sm:$0xff] %vm899_vm6, %v6104_v26  ;;  %1566 = vrot.lane.b32.xlu0 %v7060_v22, %s8581_s27  ;;  %1846 = vrot.lane.b32.xlu1 %v7085_v53, %s8576_s24 }
 0x2b9   : > { %1850 = vrot.lane.b32.xlu0 %v7085_v53, %s8577_s25  ;;  %1634 = vrot.lane.b32.xlu1 %v7060_v22, %s8590_s0 }
 0x2bc   : > { %v7220_v52 = vld [vmem:[#allocation2 + $0x18] sm:$0xff] }
 0x2bd   : > { %1638 = vrot.lane.b32.xlu0 %v7060_v22, %s8593_s14  ;;  %1918 = vrot.lane.b32.xlu1 %v7085_v53, %s8612_s7  ;;  %2384 = vst.msk [vmem:[#allocation5] sm:$0xff] %vm1523_vm7, %v7220_v52 }
 0x2c1   : > { %1922 = vrot.lane.b32.xlu0 %v7085_v53, %s8584_s21  ;;  %1570 = vrot.lane.b32.xlu1 %v7060_v22, %s8582_s28 }
 0x2c5   : > { %1574 = vrot.lane.b32.xlu0 %v7060_v22, %s8585_s20  ;;  %1854 = vrot.lane.b32.xlu1 %v7085_v53, %s8578_s22  ;;  %s8627_s22 = smov 113  }
 0x2c9   : > { %1858 = vrot.lane.b32.xlu0 %v7085_v53, %s8579_s26  ;;  %1642 = vrot.lane.b32.xlu1 %v7060_v22, %s8596_s17  ;;  %s8634_s26 = sld [smem:[#allocation38_spill]] }
 0x2cd   : > { %1646 = vrot.lane.b32.xlu0 %v7060_v22, %s8599_s13  ;;  %1926 = vrot.lane.b32.xlu1 %v7085_v53, %s8586_s18  ;;  %s6111_s18 = smov 72  }
 0x2ce   : > { %v1587_v28 = vpop.permute.xlu1 %1586  ;;  %v1591_v51 = vpop.permute.xlu0 %1590 }
 0x2cf   : > { %1589 = vst.msk [vmem:[#allocation5 + $0x80] sm:$0xff] %vm1523_vm7, %v1587_v28  ;;  %1593 = vst.msk [vmem:[#allocation5 + $0x88] sm:$0xff] %vm1523_vm7, %v1591_v51 }
 0x2d1   : > { %1930 = vrot.lane.b32.xlu0 %v7085_v53, %s8588_s2  ;;  %1578 = vrot.lane.b32.xlu1 %v7060_v22, %s8587_s1 }
 0x2d2   : > { %v1527_v30 = vpop.permute.xlu1 %1526  ;;  %v1595_v33 = vpop.permute.xlu0 %1594 }
 0x2d3   : > { %1529 = vst.msk [vmem:[#allocation5 + $0x8] sm:$0xff] %vm1523_vm7, %v1527_v30  ;;  %1597 = vst.msk [vmem:[#allocation5 + $0x90] sm:$0xff] %vm1523_vm7, %v1595_v33 }
 0x2d5   : > { %1582 = vrot.lane.b32.xlu0 %v7060_v22, %s8627_s22  ;;  %1862 = vrot.lane.b32.xlu1 %v7085_v53, %s8580_s15 }
 0x2d6   : > { %v1599_v34 = vpop.permute.xlu1 %1598  ;;  %v1531_v38 = vpop.permute.xlu0 %1530  ;;  %v1674_v6 = vld [vmem:[#allocation5 + $0x80] sm:$0xff]  ;;  %v1675_v27 = vld [vmem:[#allocation5 + $0x88] sm:$0xff] }
 0x2d7   : > { %1601 = vst.msk [vmem:[#allocation5 + $0x98] sm:$0xff] %vm1523_vm7, %v1599_v34  ;;  %1533 = vst.msk [vmem:[#allocation5 + $0x10] sm:$0xff] %vm1523_vm7, %v1531_v38  ;;  %v5456_v31 = vpack.c.bf16 %v1675_v27, %v1674_v6 }
 0x2d9   : > { %1866 = vrot.lane.b32.xlu0 %v7085_v53, %s8581_s27  ;;  %1934 = vrot.lane.b32.xlu1 %v7085_v53, %s8590_s0 }
 0x2da   : > { %v1535_v59 = vpop.permute.xlu1 %1534  ;;  %5457 = vmatprep.subr.bf16.mxu0 %v5456_v31  ;;  %v1603_v60 = vpop.permute.xlu0 %1602  ;;  %v1659_v21 = vld [vmem:[#allocation5 + $0x8] sm:$0xff]  ;;  %v1676_v1 = vld [vmem:[#allocation5 + $0x90] sm:$0xff] }
 0x2db   : > { %1537 = vst.msk [vmem:[#allocation5 + $0x18] sm:$0xff] %vm1523_vm7, %v1535_v59  ;;  %1605 = vst.msk [vmem:[#allocation5 + $0xa0] sm:$0xff] %vm1523_vm7, %v1603_v60  ;;  %v5458_v46 = vpack.c.bf16 %v1659_v21, %v7087_v37 }
 0x2dd   : > { %1938 = vrot.lane.b32.xlu0 %v7085_v53, %s8593_s14  ;;  %2166 = vrot.lane.b32.xlu1 %v7134_v56, %s8591_s16 }
 0x2de   : > { %v1607_v5 = vpop.permute.xlu1 %1606  ;;  %5459 = vmatpush3.bf16.msra.mxu0 %v5458_v46  ;;  %v1677_v48 = vld [vmem:[#allocation5 + $0x98] sm:$0xff]  ;;  %v1660_v29 = vld [vmem:[#allocation5 + $0x10] sm:$0xff] }
 0x2df   : > { %1609 = vst.msk [vmem:[#allocation5 + $0xa8] sm:$0xff] %vm1523_vm7, %v1607_v5  ;;  %v5460_v9 = vpack.c.bf16 %v1677_v48, %v1676_v1 }
 0x2e1   : > { %2170 = vrot.lane.b32.xlu0 %v7134_v56, %s8594_s23  ;;  %1870 = vrot.lane.b32.xlu1 %v7085_v53, %s8582_s28 }
 0x2e2   : > { %5461 = vmatprep.subr.bf16.mxu0 %v5460_v9  ;;  %v1661_v54 = vld [vmem:[#allocation5 + $0x18] sm:$0xff]  ;;  %v1678_v17 = vld [vmem:[#allocation5 + $0xa0] sm:$0xff] }
 0x2e3   : > { %v5462_v18 = vpack.c.bf16 %v1661_v54, %v1660_v29 }
 0x2e5   : > { %1874 = vrot.lane.b32.xlu0 %v7085_v53, %s8585_s20  ;;  %2106 = vrot.lane.b32.xlu1 %v7134_v56, %s8623_s5 }
 0x2e6   : > { %5463 = vmatpush3.bf16.msra.mxu0 %v5462_v18  ;;  %v1679_v4 = vld [vmem:[#allocation5 + $0xa8] sm:$0xff] }
 0x2e7   : > { %v5464_v62 = vpack.c.bf16 %v1679_v4, %v1678_v17 }
 0x2e9   : > { %1942 = vrot.lane.b32.xlu0 %v7085_v53, %s8596_s17  ;;  %1946 = vrot.lane.b32.xlu1 %v7085_v53, %s8599_s13 }
 0x2ea   : > { %5465 = vmatprep.subr.bf16.mxu0 %v5464_v62 }
 0x2ed   : > { %2174 = vrot.lane.b32.xlu0 %v7134_v56, %s8597_s30  ;;  %2178 = vrot.lane.b32.xlu1 %v7134_v56, %s8601_s12 }
 0x2f1   : > { %1878 = vrot.lane.b32.xlu0 %v7085_v53, %s8587_s1  ;;  %1882 = vrot.lane.b32.xlu1 %v7085_v53, %s8627_s22 }
 0x2f3   : > { %v1887_v43 = vpop.permute.xlu0 %1886  ;;  %v1891_v11 = vpop.permute.xlu1 %1890 }
 0x2f4   : > { %1889 = vst.msk [vmem:[#allocation5 + $0x80] sm:$0xff] %vm1523_vm7, %v1887_v43  ;;  %1893 = vst.msk [vmem:[#allocation5 + $0x88] sm:$0xff] %vm1523_vm7, %v1891_v11 }
 0x2f5   : > { %2110 = vrot.lane.b32.xlu0 %v7134_v56, %s8624_s6  ;;  %2114 = vrot.lane.b32.xlu1 %v7134_v56, %s8625_s4 }
 0x2f7   : > { %v1539_v50 = vpop.permute.xlu0 %1538  ;;  %v1543_v15 = vpop.permute.xlu1 %1542 }
 0x2f8   : > { %1541 = vst.msk [vmem:[#allocation5 + $0x20] sm:$0xff] %vm1523_vm7, %v1539_v50  ;;  %1545 = vst.msk [vmem:[#allocation5 + $0x28] sm:$0xff] %vm1523_vm7, %v1543_v15 }
 0x2f9   : > { %2182 = vrot.lane.b32.xlu0 %v7134_v56, %s8603_s11  ;;  %2186 = vrot.lane.b32.xlu1 %v7134_v56, %s8605_s10 }
 0x2fb   : > { %v1827_v13 = vpop.permute.xlu0 %1826  ;;  %v1611_v19 = vpop.permute.xlu1 %1610  ;;  %v1974_v8 = vld [vmem:[#allocation5 + $0x80] sm:$0xff]  ;;  %v1975_v55 = vld [vmem:[#allocation5 + $0x88] sm:$0xff] }
 0x2fc   : > { %1829 = vst.msk [vmem:[#allocation5 + $0x8] sm:$0xff] %vm1523_vm7, %v1827_v13  ;;  %1613 = vst.msk [vmem:[#allocation5 + $0xb0] sm:$0xff] %vm1523_vm7, %v1611_v19  ;;  %v5488_v3 = vpack.c.bf16 %v1975_v55, %v1974_v8 }
 0x2fd   : > { %2446 = vrot.lane.b32.xlu0 %v7220_v52, %s8591_s16  ;;  %2450 = vrot.lane.b32.xlu1 %v7220_v52, %s8594_s23  ;;  %s8631_s23 = sld [smem:[#allocation35_spill]] }
 0x2fe   : > { %5489 = vmatprep.subr.bf16.mxu1 %v5488_v3 }
 0x2ff   : > { %v1615_v16 = vpop.permute.xlu0 %1614  ;;  %v1895_v58 = vpop.permute.xlu1 %1894  ;;  %v1662_v20 = vld [vmem:[#allocation5 + $0x20] sm:$0xff]  ;;  %v1663_v10 = vld [vmem:[#allocation5 + $0x28] sm:$0xff] }
 0x300   : > { %1617 = vst.msk [vmem:[#allocation5 + $0xb8] sm:$0xff] %vm1523_vm7, %v1615_v16  ;;  %1897 = vst.msk [vmem:[#allocation5 + $0x90] sm:$0xff] %vm1523_vm7, %v1895_v58  ;;  %v5466_v61 = vpack.c.bf16 %v1663_v10, %v1662_v20 }
 0x301   : > { %2118 = vrot.lane.b32.xlu0 %v7134_v56, %s8626_s29  ;;  %2122 = vrot.lane.b32.xlu1 %v7134_v56, %s8575_s19 }
 0x302   : > { %5467 = vmatpush3.bf16.msra.mxu0 %v5466_v61 }
 0x303   : > { %v1899_v57 = vpop.permute.xlu0 %1898  ;;  %v1547_v24 = vpop.permute.xlu1 %1546  ;;  %v1959_v49 = vld [vmem:[#allocation5 + $0x8] sm:$0xff]  ;;  %v1680_v14 = vld [vmem:[#allocation5 + $0xb0] sm:$0xff] }
 0x304   : > { %1901 = vst.msk [vmem:[#allocation5 + $0x98] sm:$0xff] %vm1523_vm7, %v1899_v57  ;;  %1549 = vst.msk [vmem:[#allocation5 + $0x30] sm:$0xff] %vm1523_vm7, %v1547_v24  ;;  %v5490_v32 = vpack.c.bf16 %v1959_v49, %v7136_v39 }
 0x305   : > { %2386 = vrot.lane.b32.xlu0 %v7220_v52, %s8623_s5  ;;  %2190 = vrot.lane.b32.xlu1 %v7134_v56, %s8607_s9  ;;  %s8629_s5 = smov 119  }
 0x306   : > { %5491 = vmatpush3.bf16.msra.mxu1 %v5490_v32 }
 0x307   : > { %v1551_v35 = vpop.permute.xlu0 %1550  ;;  %v1831_v36 = vpop.permute.xlu1 %1830  ;;  %v1681_v25 = vld [vmem:[#allocation5 + $0xb8] sm:$0xff]  ;;  %v1976_v42 = vld [vmem:[#allocation5 + $0x90] sm:$0xff] }
 0x308   : > { %1553 = vst.msk [vmem:[#allocation5 + $0x38] sm:$0xff] %vm1523_vm7, %v1551_v35  ;;  %1833 = vst.msk [vmem:[#allocation5 + $0x10] sm:$0xff] %vm1523_vm7, %v1831_v36  ;;  %v5468_v12 = vpack.c.bf16 %v1681_v25, %v1680_v14 }
 0x309   : > { %2194 = vrot.lane.b32.xlu0 %v7134_v56, %s8610_s8  ;;  %2454 = vrot.lane.b32.xlu1 %v7220_v52, %s8597_s30 }
 0x30a   : > { %5469 = vmatprep.subr.bf16.mxu0 %v5468_v12 }
 0x30b   : > { %v1835_v63 = vpop.permute.xlu0 %1834  ;;  %v1619_v41 = vpop.permute.xlu1 %1618  ;;  %v1977_v23 = vld [vmem:[#allocation5 + $0x98] sm:$0xff]  ;;  %v1664_v0 = vld [vmem:[#allocation5 + $0x30] sm:$0xff] }
 0x30c   : > { %1837 = vst.msk [vmem:[#allocation5 + $0x18] sm:$0xff] %vm1523_vm7, %v1835_v63  ;;  %1621 = vst.msk [vmem:[#allocation5 + $0xc0] sm:$0xff] %vm1523_vm7, %v1619_v41  ;;  %v5492_v44 = vpack.c.bf16 %v1977_v23, %v1976_v42 }
 0x30d   : > { %2458 = vrot.lane.b32.xlu0 %v7220_v52, %s8601_s12  ;;  %2126 = vrot.lane.b32.xlu1 %v7134_v56, %s8576_s24 }
 0x30e   : > { %5493 = vmatprep.subr.bf16.mxu1 %v5492_v44 }
 0x30f   : > { %v1623_v22 = vpop.permute.xlu0 %1622  ;;  %v1903_v45 = vpop.permute.xlu1 %1902  ;;  %v1665_v53 = vld [vmem:[#allocation5 + $0x38] sm:$0xff]  ;;  %v1960_v2 = vld [vmem:[#allocation5 + $0x10] sm:$0xff] }
 0x310   : > { %1625 = vst.msk [vmem:[#allocation5 + $0xc8] sm:$0xff] %vm1523_vm7, %v1623_v22  ;;  %1905 = vst.msk [vmem:[#allocation5 + $0xa0] sm:$0xff] %vm1523_vm7, %v1903_v45  ;;  %v5470_v37 = vpack.c.bf16 %v1665_v53, %v1664_v0 }
 0x311   : > { %2130 = vrot.lane.b32.xlu0 %v7134_v56, %s8577_s25  ;;  %2390 = vrot.lane.b32.xlu1 %v7220_v52, %s8624_s6 }
 0x312   : > { %5471 = vmatpush3.bf16.msra.mxu0 %v5470_v37 }
 0x313   : > { %v1907_v39 = vpop.permute.xlu0 %1906  ;;  %v1555_v40 = vpop.permute.xlu1 %1554  ;;  %v1961_v28 = vld [vmem:[#allocation5 + $0x18] sm:$0xff]  ;;  %v1682_v30 = vld [vmem:[#allocation5 + $0xc0] sm:$0xff] }
 0x314   : > { %1909 = vst.msk [vmem:[#allocation5 + $0xa8] sm:$0xff] %vm1523_vm7, %v1907_v39  ;;  %1557 = vst.msk [vmem:[#allocation5 + $0x40] sm:$0xff] %vm1523_vm7, %v1555_v40  ;;  %v5494_v51 = vpack.c.bf16 %v1961_v28, %v1960_v2 }
 0x315   : > { %2394 = vrot.lane.b32.xlu0 %v7220_v52, %s8625_s4  ;;  %2198 = vrot.lane.b32.xlu1 %v7134_v56, %s8612_s7  ;;  %s8628_s4 = smov 120  }
 0x316   : > { %5495 = vmatpush3.bf16.msra.mxu1 %v5494_v51 }
 0x317   : > { %v1559_v33 = vpop.permute.xlu0 %1558  ;;  %v1839_v34 = vpop.permute.xlu1 %1838  ;;  %v1683_v38 = vld [vmem:[#allocation5 + $0xc8] sm:$0xff]  ;;  %v1978_v27 = vld [vmem:[#allocation5 + $0xa0] sm:$0xff] }
 0x318   : > { %1561 = vst.msk [vmem:[#allocation5 + $0x48] sm:$0xff] %vm1523_vm7, %v1559_v33  ;;  %1841 = vst.msk [vmem:[#allocation5 + $0x20] sm:$0xff] %vm1523_vm7, %v1839_v34  ;;  %v5472_v6 = vpack.c.bf16 %v1683_v38, %v1682_v30 }
 0x319   : > { %2202 = vrot.lane.b32.xlu0 %v7134_v56, %s8584_s21  ;;  %2462 = vrot.lane.b32.xlu1 %v7220_v52, %s8603_s11 }
 0x31a   : > { %5473 = vmatprep.subr.bf16.mxu0 %v5472_v6 }
 0x31b   : > { %v1843_v31 = vpop.permute.xlu0 %1842  ;;  %v1627_v59 = vpop.permute.xlu1 %1626  ;;  %v1979_v60 = vld [vmem:[#allocation5 + $0xa8] sm:$0xff]  ;;  %v1666_v46 = vld [vmem:[#allocation5 + $0x40] sm:$0xff] }
 0x31c   : > { %1845 = vst.msk [vmem:[#allocation5 + $0x28] sm:$0xff] %vm1523_vm7, %v1843_v31  ;;  %1629 = vst.msk [vmem:[#allocation5 + $0xd0] sm:$0xff] %vm1523_vm7, %v1627_v59  ;;  %v5496_v21 = vpack.c.bf16 %v1979_v60, %v1978_v27 }
 0x31d   : > { %2466 = vrot.lane.b32.xlu0 %v7220_v52, %s8605_s10  ;;  %2134 = vrot.lane.b32.xlu1 %v7134_v56, %s8628_s4  ;;  %s8630_s10 = smov 102  }
 0x31e   : > { %5497 = vmatprep.subr.bf16.mxu1 %v5496_v21 }
 0x31f   : > { %v1631_v1 = vpop.permute.xlu0 %1630  ;;  %v1911_v5 = vpop.permute.xlu1 %1910  ;;  %v1667_v48 = vld [vmem:[#allocation5 + $0x48] sm:$0xff]  ;;  %v1962_v29 = vld [vmem:[#allocation5 + $0x20] sm:$0xff] }
 0x320   : > { %1633 = vst.msk [vmem:[#allocation5 + $0xd8] sm:$0xff] %vm1523_vm7, %v1631_v1  ;;  %1913 = vst.msk [vmem:[#allocation5 + $0xb0] sm:$0xff] %vm1523_vm7, %v1911_v5  ;;  %v5474_v9 = vpack.c.bf16 %v1667_v48, %v1666_v46 }
 0x321   : > { %2138 = vrot.lane.b32.xlu0 %v7134_v56, %s8629_s5  ;;  %2398 = vrot.lane.b32.xlu1 %v7220_v52, %s8626_s29 }
 0x322   : > { %5475 = vmatpush3.bf16.msra.mxu0 %v5474_v9 }
 0x323   : > { %v1915_v54 = vpop.permute.xlu0 %1914  ;;  %v1563_v18 = vpop.permute.xlu1 %1562  ;;  %v1963_v17 = vld [vmem:[#allocation5 + $0x28] sm:$0xff]  ;;  %v1684_v62 = vld [vmem:[#allocation5 + $0xd0] sm:$0xff] }
 0x324   : > { %1917 = vst.msk [vmem:[#allocation5 + $0xb8] sm:$0xff] %vm1523_vm7, %v1915_v54  ;;  %1565 = vst.msk [vmem:[#allocation5 + $0x50] sm:$0xff] %vm1523_vm7, %v1563_v18  ;;  %v5498_v4 = vpack.c.bf16 %v1963_v17, %v1962_v29 }
 0x325   : > { %2402 = vrot.lane.b32.xlu0 %v7220_v52, %s8575_s19  ;;  %2206 = vrot.lane.b32.xlu1 %v7134_v56, %s8630_s10  ;;  %s6121_s19 = smov [#allocation10]  }
 0x326   : > { %5499 = vmatpush3.bf16.msra.mxu1 %v5498_v4  ;;  %v7390_v4 = vld [vmem:[%s8449_s3] sm:$0xff] }
 0x327   : > { %v1567_v43 = vpop.permute.xlu0 %1566  ;;  %v1847_v11 = vpop.permute.xlu1 %1846  ;;  %v1685_v50 = vld [vmem:[#allocation5 + $0xd8] sm:$0xff]  ;;  %v1980_v13 = vld [vmem:[#allocation5 + $0xb0] sm:$0xff] }
 0x328   : > { %1569 = vst.msk [vmem:[#allocation5 + $0x58] sm:$0xff] %vm1523_vm7, %v1567_v43  ;;  %1849 = vst.msk [vmem:[#allocation5 + $0x30] sm:$0xff] %vm1523_vm7, %v1847_v11  ;;  %v5476_v15 = vpack.c.bf16 %v1685_v50, %v1684_v62 }
 0x329   : > { %2210 = vrot.lane.b32.xlu0 %v7134_v56, %s8588_s2  ;;  %2470 = vrot.lane.b32.xlu1 %v7220_v52, %s8607_s9 }
 0x32a   : > { %5477 = vmatprep.subr.bf16.mxu0 %v5476_v15 }
 0x32b   : > { %v1851_v19 = vpop.permute.xlu0 %1850  ;;  %v1635_v8 = vpop.permute.xlu1 %1634  ;;  %v1981_v55 = vld [vmem:[#allocation5 + $0xb8] sm:$0xff]  ;;  %v1668_v16 = vld [vmem:[#allocation5 + $0x50] sm:$0xff] }
 0x32c   : > { %1853 = vst.msk [vmem:[#allocation5 + $0x38] sm:$0xff] %vm1523_vm7, %v1851_v19  ;;  %1637 = vst.msk [vmem:[#allocation5 + $0xe0] sm:$0xff] %vm1523_vm7, %v1635_v8  ;;  %v5500_v3 = vpack.c.bf16 %v1981_v55, %v1980_v13  ;;  %v7408_v13 = vld [vmem:[%s8449_s3 + $0x10] sm:$0xff]  ;;  %v7415_v55 = vld [vmem:[%s8449_s3 + $0x28] sm:$0xff] }
 0x32d   : > { %2474 = vrot.lane.b32.xlu0 %v7220_v52, %s8610_s8  ;;  %2142 = vrot.lane.b32.xlu1 %v7134_v56, %s8580_s15  ;;  %s8636_s8 = sld [smem:[#allocation39_spill]] }
 0x32e   : > { %5501 = vmatprep.subr.bf16.mxu1 %v5500_v3 }
 0x32f   : > { %v1639_v58 = vpop.permute.xlu0 %1638  ;;  %v1919_v20 = vpop.permute.xlu1 %1918  ;;  %v1669_v10 = vld [vmem:[#allocation5 + $0x58] sm:$0xff]  ;;  %v1964_v57 = vld [vmem:[#allocation5 + $0x30] sm:$0xff] }
 0x330   : > { %1641 = vst.msk [vmem:[#allocation5 + $0xe8] sm:$0xff] %vm1523_vm7, %v1639_v58  ;;  %1921 = vst.msk [vmem:[#allocation5 + $0xc0] sm:$0xff] %vm1523_vm7, %v1919_v20  ;;  %v5478_v61 = vpack.c.bf16 %v1669_v10, %v1668_v16  ;;  %v7426_v20 = vld [vmem:[%s8449_s3 + $0x20] sm:$0xff] }
 0x331   : > { %2146 = vrot.lane.b32.xlu0 %v7134_v56, %s8581_s27  ;;  %2406 = vrot.lane.b32.xlu1 %v7220_v52, %s8576_s24 }
 0x332   : > { %5479 = vmatpush3.bf16.msra.mxu0 %v5478_v61 }
 0x333   : > { %v1923_v24 = vpop.permute.xlu0 %1922  ;;  %v1571_v49 = vpop.permute.xlu1 %1570  ;;  %v1965_v32 = vld [vmem:[#allocation5 + $0x38] sm:$0xff]  ;;  %v1686_v35 = vld [vmem:[#allocation5 + $0xe0] sm:$0xff] }
 0x334   : > { %1925 = vst.msk [vmem:[#allocation5 + $0xc8] sm:$0xff] %vm1523_vm7, %v1923_v24  ;;  %1573 = vst.msk [vmem:[#allocation5 + $0x60] sm:$0xff] %vm1523_vm7, %v1571_v49  ;;  %v5502_v14 = vpack.c.bf16 %v1965_v32, %v1964_v57  ;;  %v7433_v57 = vld [vmem:[%s8449_s3 + $0x38] sm:$0xff] }
 0x335   : > { %2410 = vrot.lane.b32.xlu0 %v7220_v52, %s8577_s25  ;;  %2214 = vrot.lane.b32.xlu1 %v7134_v56, %s8590_s0  ;;  %s6113_s25 = smov 68  }
 0x336   : > { %5503 = vmatpush3.bf16.msra.mxu1 %v5502_v14  ;;  %v7444_v14 = vld [vmem:[%s8449_s3 + $0x30] sm:$0xff] }
 0x337   : > { %v1575_v36 = vpop.permute.xlu0 %1574  ;;  %v1855_v25 = vpop.permute.xlu1 %1854  ;;  %v1687_v12 = vld [vmem:[#allocation5 + $0xe8] sm:$0xff]  ;;  %v1982_v63 = vld [vmem:[#allocation5 + $0xc0] sm:$0xff] }
 0x338   : > { %1577 = vst.msk [vmem:[#allocation5 + $0x68] sm:$0xff] %vm1523_vm7, %v1575_v36  ;;  %1857 = vst.msk [vmem:[#allocation5 + $0x40] sm:$0xff] %vm1523_vm7, %v1855_v25  ;;  %v5480_v42 = vpack.c.bf16 %v1687_v12, %v1686_v35 }
 0x339   : > { %2218 = vrot.lane.b32.xlu0 %v7134_v56, %s8593_s14  ;;  %2478 = vrot.lane.b32.xlu1 %v7220_v52, %s8612_s7 }
 0x33a   : > { %5481 = vmatprep.subr.bf16.mxu0 %v5480_v42  ;;  %v524_v42 = vld [vmem:[%s8631_s23] sm:$0xff] }
 0x33b   : > { %v1859_v41 = vpop.permute.xlu0 %1858  ;;  %v1643_v23 = vpop.permute.xlu1 %1642  ;;  %v1983_v44 = vld [vmem:[#allocation5 + $0xc8] sm:$0xff]  ;;  %v1670_v22 = vld [vmem:[#allocation5 + $0x60] sm:$0xff] }
 0x33c   : > { %1861 = vst.msk [vmem:[#allocation5 + $0x48] sm:$0xff] %vm1523_vm7, %v1859_v41  ;;  %1645 = vst.msk [vmem:[#allocation5 + $0xf0] sm:$0xff] %vm1523_vm7, %v1643_v23  ;;  %v5504_v0 = vpack.c.bf16 %v1983_v44, %v1982_v63 }
 0x33d   : > { %2482 = vrot.lane.b32.xlu0 %v7220_v52, %s8584_s21  ;;  %2150 = vrot.lane.b32.xlu1 %v7134_v56, %s8582_s28  ;;  %s8635_s21 = smov 15  }
 0x33e   : > { %5505 = vmatprep.subr.bf16.mxu1 %v5504_v0  ;;  %v525_v0 = vld [vmem:[%s8631_s23 + $0x8] sm:$0xff] }
 0x33f   : > { %v1647_v45 = vpop.permute.xlu0 %1646  ;;  %v1927_v53 = vpop.permute.xlu1 %1926  ;;  %v1671_v37 = vld [vmem:[#allocation5 + $0x68] sm:$0xff]  ;;  %v1966_v39 = vld [vmem:[#allocation5 + $0x40] sm:$0xff] }
 0x340   : > { %1649 = vst.msk [vmem:[#allocation5 + $0xf8] sm:$0xff] %vm1523_vm7, %v1647_v45  ;;  %1929 = vst.msk [vmem:[#allocation5 + $0xd0] sm:$0xff] %vm1523_vm7, %v1927_v53  ;;  %v5482_v2 = vpack.c.bf16 %v1671_v37, %v1670_v22  ;;  %v526_v22 = vld [vmem:[%s8631_s23 + $0x10] sm:$0xff] }
 0x341   : > { %2154 = vrot.lane.b32.xlu0 %v7134_v56, %s8585_s20  ;;  %2414 = vrot.lane.b32.xlu1 %v7220_v52, %s8628_s4 }
 0x342   : > { %5483 = vmatpush3.bf16.msra.mxu0 %v5482_v2 }
 0x343   : > { %v1931_v40 = vpop.permute.xlu0 %1930  ;;  %v1579_v28 = vpop.permute.xlu1 %1578  ;;  %v1967_v51 = vld [vmem:[#allocation5 + $0x48] sm:$0xff]  ;;  %v1688_v33 = vld [vmem:[#allocation5 + $0xf0] sm:$0xff] }
 0x344   : > { %1933 = vst.msk [vmem:[#allocation5 + $0xd8] sm:$0xff] %vm1523_vm7, %v1931_v40  ;;  %1581 = vst.msk [vmem:[#allocation5 + $0x70] sm:$0xff] %vm1523_vm7, %v1579_v28  ;;  %v5506_v30 = vpack.c.bf16 %v1967_v51, %v1966_v39 }
 0x345   : > { %2418 = vrot.lane.b32.xlu0 %v7220_v52, %s8629_s5  ;;  %2222 = vrot.lane.b32.xlu1 %v7134_v56, %s8596_s17  ;;  %s6117_s5 = smov 16  }
 0x346   : > { %5507 = vmatpush3.bf16.msra.mxu1 %v5506_v30 }
 0x347   : > { %v1583_v34 = vpop.permute.xlu0 %1582  ;;  %v1863_v38 = vpop.permute.xlu1 %1862  ;;  %v1689_v6 = vld [vmem:[#allocation5 + $0xf8] sm:$0xff]  ;;  %v1984_v31 = vld [vmem:[#allocation5 + $0xd0] sm:$0xff] }
 0x348   : > { %1585 = vst.msk [vmem:[#allocation5 + $0x78] sm:$0xff] %vm1523_vm7, %v1583_v34  ;;  %1865 = vst.msk [vmem:[#allocation5 + $0x50] sm:$0xff] %vm1523_vm7, %v1863_v38  ;;  %v5484_v27 = vpack.c.bf16 %v1689_v6, %v1688_v33 }
 0x349   : > { %2226 = vrot.lane.b32.xlu0 %v7134_v56, %s8599_s13  ;;  %2486 = vrot.lane.b32.xlu1 %v7220_v52, %s8630_s10 }
 0x34a   : > { %5485 = vmatprep.subr.bf16.mxu0 %v5484_v27 }
 0x34b   : > { %v1867_v59 = vpop.permute.xlu0 %1866  ;;  %v1935_v60 = vpop.permute.xlu1 %1934  ;;  %v1985_v21 = vld [vmem:[#allocation5 + $0xd8] sm:$0xff]  ;;  %v1672_v1 = vld [vmem:[#allocation5 + $0x70] sm:$0xff] }
 0x34c   : > { %1869 = vst.msk [vmem:[#allocation5 + $0x58] sm:$0xff] %vm1523_vm7, %v1867_v59  ;;  %1937 = vst.msk [vmem:[#allocation5 + $0xe0] sm:$0xff] %vm1523_vm7, %v1935_v60  ;;  %v5508_v46 = vpack.c.bf16 %v1985_v21, %v1984_v31 }
 0x34d   : > { %2490 = vrot.lane.b32.xlu0 %v7220_v52, %s8588_s2  ;;  %2158 = vrot.lane.b32.xlu1 %v7134_v56, %s8587_s1  ;;  %s6120_s2 = smov 48  }
 0x34e   : > { %5509 = vmatprep.subr.bf16.mxu1 %v5508_v46 }
 0x34f   : > { %v1939_v5 = vpop.permute.xlu0 %1938  ;;  %v2167_v48 = vpop.permute.xlu1 %2166  ;;  %v1673_v9 = vld [vmem:[#allocation5 + $0x78] sm:$0xff]  ;;  %v1968_v54 = vld [vmem:[#allocation5 + $0x50] sm:$0xff] }
 0x350   : > { %1941 = vst.msk [vmem:[#allocation5 + $0xe8] sm:$0xff] %vm1523_vm7, %v1939_v5  ;;  %2169 = vst.msk [vmem:[#allocation5 + $0x80] sm:$0xff] %vm1523_vm7, %v2167_v48  ;;  %v5486_v29 = vpack.c.bf16 %v1673_v9, %v1672_v1 }
 0x351   : > { %2162 = vrot.lane.b32.xlu0 %v7134_v56, %s8627_s22  ;;  %2422 = vrot.lane.b32.xlu1 %v7220_v52, %s8580_s15  ;;  %v7397_v56 = vld [vmem:[%s8449_s3 + $0x18] sm:$0xff] }
 0x352   : > { %5487 = vmatpush3.bf16.msra.mxu0 %v5486_v29 }
 0x353   : > { %v2171_v18 = vpop.permute.xlu0 %2170  ;;  %v1871_v17 = vpop.permute.xlu1 %1870  ;;  %v1969_v62 = vld [vmem:[#allocation5 + $0x58] sm:$0xff]  ;;  %v1986_v11 = vld [vmem:[#allocation5 + $0xe0] sm:$0xff] }
 0x354   : > { %2173 = vst.msk [vmem:[#allocation5 + $0x88] sm:$0xff] %vm1523_vm7, %v2171_v18  ;;  %1873 = vst.msk [vmem:[#allocation5 + $0x60] sm:$0xff] %vm1523_vm7, %v1871_v17  ;;  %v5510_v43 = vpack.c.bf16 %v1969_v62, %v1968_v54 }
 0x355   : > { %2426 = vrot.lane.b32.xlu0 %v7220_v52, %s8581_s27  ;;  %2494 = vrot.lane.b32.xlu1 %v7220_v52, %s8590_s0  ;;  %s8641_s27 = sld [smem:[#allocation42_spill]] }
 0x356   : > { %1775 = vmatmul.mubr.f32.vlgmr.msra.gmra.mrb[0].mxu0 %v7390_v4  ;;  %5511 = vmatpush3.bf16.msra.mxu1 %v5510_v43 }
 0x357   : > { %v1875_v50 = vpop.permute.xlu0 %1874  ;;  %v2107_v15 = vpop.permute.xlu1 %2106  ;;  %1779 = vmatprep.mubr.f32.mxu0 %v7397_v56  ;;  %v1987_v19 = vld [vmem:[#allocation5 + $0xe8] sm:$0xff]  ;;  %v2254_v3 = vld [vmem:[#allocation5 + $0x80] sm:$0xff] }
 0x358   : > { %1877 = vst.msk [vmem:[#allocation5 + $0x68] sm:$0xff] %vm1523_vm7, %v1875_v50  ;;  %2109 = vst.msk [vmem:[#allocation5 + $0x8] sm:$0xff] %vm1523_vm7, %v2107_v15  ;;  %v5512_v8 = vpack.c.bf16 %v1987_v19, %v1986_v11 }
 0x359   : > { %2498 = vrot.lane.b32.xlu0 %v7220_v52, %s8593_s14  ;;  %2430 = vrot.lane.b32.xlu1 %v7220_v52, %s8582_s28  ;;  %s8632_s14 = sld [smem:[#allocation37_spill]] }
 0x35a   : > { %1780 = vmatmul.mubr.f32.gmra.mrb[2].mxu0 %v7408_v13  ;;  %5513 = vmatprep.subr.bf16.mxu1 %v5512_v8 }
 0x35b   : > { %v1943_v16 = vpop.permute.xlu0 %1942  ;;  %v1947_v58 = vpop.permute.xlu1 %1946  ;;  %1784 = vmatprep.mubr.f32.mxu0 %v7415_v55  ;;  %v2255_v10 = vld [vmem:[#allocation5 + $0x88] sm:$0xff]  ;;  %v1970_v24 = vld [vmem:[#allocation5 + $0x60] sm:$0xff] }
 0x35c   : > { %1945 = vst.msk [vmem:[#allocation5 + $0xf0] sm:$0xff] %vm1523_vm7, %v1943_v16  ;;  %1949 = vst.msk [vmem:[#allocation5 + $0xf8] sm:$0xff] %vm1523_vm7, %v1947_v58  ;;  %v5520_v61 = vpack.c.bf16 %v2255_v10, %v2254_v3 }
 0x35d   : > { %2434 = vrot.lane.b32.xlu0 %v7220_v52, %s8585_s20  ;;  %2502 = vrot.lane.b32.xlu1 %v7220_v52, %s8596_s17  ;;  %s8633_s20 = sld [smem:[#allocation36_spill]] }
 0x35e   : > { %1785 = vmatmul.mubr.f32.gmra.mrb[4].mxu0 %v7426_v20  ;;  %5521 = vmatprep.subr.bf16.mxu0 %v5520_v61  ;;  %v2518_v61 = vld [vmem:[#allocation5] sm:$0xff] }
 0x35f   : > { %v2175_v49 = vpop.permute.xlu0 %2174  ;;  %v2179_v32 = vpop.permute.xlu1 %2178  ;;  %1789 = vmatprep.mubr.f32.mxu0 %v7433_v57  ;;  %v1971_v35 = vld [vmem:[#allocation5 + $0x68] sm:$0xff]  ;;  %v2687_v40 = vld [vmem:[%s8632_s14] sm:$0xff]  ;;  %v2689_v6 = vld [vmem:[%s8632_s14 + $0x10] sm:$0xff] }
 0x360   : > { %v2239_v36 = vld [vmem:[#allocation5 + $0x8] sm:$0xff]  ;;  %2177 = vst.msk [vmem:[#allocation5 + $0x90] sm:$0xff] %vm1523_vm7, %v2175_v49  ;;  %2181 = vst.msk [vmem:[#allocation5 + $0x98] sm:$0xff] %vm1523_vm7, %v2179_v32  ;;  %v5514_v25 = vpack.c.bf16 %v1971_v35, %v1970_v24  ;;  %v2690_v46 = vld [vmem:[%s8632_s14 + $0x18] sm:$0xff] }
 0x361   : > { %v5522_v12 = vpack.c.bf16 %v2239_v36, %v7222_v7  ;;  %2506 = vrot.lane.b32.xlu0 %v7220_v52, %s8599_s13  ;;  %2438 = vrot.lane.b32.xlu1 %v7220_v52, %s8587_s1  ;;  %v2688_v38 = vld [vmem:[%s8632_s14 + $0x8] sm:$0xff]  ;;  %v2691_v1 = vld [vmem:[%s8632_s14 + $0x20] sm:$0xff]  ;;  %s6109_s13 = smov 76  }
 0x362   : > { %1790 = vmatmul.mubr.f32.gmra.mrb[6].mxu0 %v7444_v14  ;;  %5515 = vmatpush3.bf16.msra.mxu1 %v5514_v25  ;;  %v2692_v18 = vld [vmem:[%s8632_s14 + $0x28] sm:$0xff]  ;;  %v2693_v17 = vld [vmem:[%s8632_s14 + $0x30] sm:$0xff]  ;;  %v2694_v19 = vld [vmem:[%s8632_s14 + $0x38] sm:$0xff] }
 0x363   : > { %v1879_v63 = vpop.permute.xlu0 %1878  ;;  %v1883_v41 = vpop.permute.xlu1 %1882  ;;  %v1988_v23 = vld [vmem:[#allocation5 + $0xf0] sm:$0xff]  ;;  %v1989_v44 = vld [vmem:[#allocation5 + $0xf8] sm:$0xff]  ;;  %5523 = vmatpush3.bf16.msra.mxu0 %v5522_v12  ;;  %2334 = vmatprep.mubr.f32.mxu0 %v7194_v47 }
 0x364   : > { %1881 = vst.msk [vmem:[#allocation5 + $0x70] sm:$0xff] %vm1523_vm7, %v1879_v63  ;;  %1885 = vst.msk [vmem:[#allocation5 + $0x78] sm:$0xff] %vm1523_vm7, %v1883_v41  ;;  %v5516_v7 = vpack.c.bf16 %v1989_v44, %v1988_v23 }
 0x365   : > { %2442 = vrot.lane.b32.xlu0 %v7220_v52, %s8627_s22  ;;  %1692 = vperm.xlu1 %5937, %v524_v42   ;;  %v527_v52 = vld [vmem:[%s8631_s23 + $0x18] sm:$0xff]  ;;  %s6114_s22 = smov 84  }
 0x366   : > { %5517 = vmatprep.subr.bf16.mxu1 %v5516_v7 }
 0x367   : > { %v2111_v45 = vpop.permute.xlu0 %2110  ;;  %v2115_v53 = vpop.permute.xlu1 %2114  ;;  %v2256_v37 = vld [vmem:[#allocation5 + $0x90] sm:$0xff]  ;;  %v2257_v2 = vld [vmem:[#allocation5 + $0x98] sm:$0xff] }
 0x368   : > { %2113 = vst.msk [vmem:[#allocation5 + $0x10] sm:$0xff] %vm1523_vm7, %v2111_v45  ;;  %2117 = vst.msk [vmem:[#allocation5 + $0x18] sm:$0xff] %vm1523_vm7, %v2115_v53  ;;  %v5524_v39 = vpack.c.bf16 %v2257_v2, %v2256_v37 }
 0x369   : > { %1697 = vperm.xlu0 %5936, %v525_v0   ;;  %1702 = vperm.xlu1 %5937, %v526_v22  }
 0x36a   : > { %5525 = vmatprep.subr.bf16.mxu0 %v5524_v39 }
 0x36b   : > { %v2183_v28 = vpop.permute.xlu0 %2182  ;;  %v2187_v51 = vpop.permute.xlu1 %2186  ;;  %v1972_v30 = vld [vmem:[#allocation5 + $0x70] sm:$0xff]  ;;  %v1973_v33 = vld [vmem:[#allocation5 + $0x78] sm:$0xff] }
 0x36c   : > { %2185 = vst.msk [vmem:[#allocation5 + $0xa0] sm:$0xff] %vm1523_vm7, %v2183_v28  ;;  %2189 = vst.msk [vmem:[#allocation5 + $0xa8] sm:$0xff] %vm1523_vm7, %v2187_v51  ;;  %v5518_v34 = vpack.c.bf16 %v1973_v33, %v1972_v30 }
 0x36d   : > { %1707 = vperm.xlu0 %5936, %v527_v52   ;;  %2697 = vperm.xlu1 %5937, %v2687_v40  }
 0x36e   : > { %5519 = vmatpush3.bf16.msra.mxu1 %v5518_v34 }
 0x36f   : > { %v2447_v27 = vpop.permute.xlu0 %2446  ;;  %v2451_v31 = vpop.permute.xlu1 %2450  ;;  %v2240_v59 = vld [vmem:[#allocation5 + $0x10] sm:$0xff]  ;;  %v2241_v60 = vld [vmem:[#allocation5 + $0x18] sm:$0xff] }
 0x370   : > { %2449 = vst.msk [vmem:[#allocation5 + $0x80] sm:$0xff] %vm1523_vm7, %v2447_v27  ;;  %2453 = vst.msk [vmem:[#allocation5 + $0x88] sm:$0xff] %vm1523_vm7, %v2451_v31  ;;  %v5526_v21 = vpack.c.bf16 %v2241_v60, %v2240_v59 }
 0x371   : > { %2702 = vperm.xlu0 %5936, %v2688_v38   ;;  %2707 = vperm.xlu1 %5937, %v2689_v6  }
 0x372   : > { %2055 = vmatmul.mubr.f32.vlgmr.msra.gmra.mrb[0].mxu1 %v7390_v4  ;;  %5527 = vmatpush3.bf16.msra.mxu0 %v5526_v21 }
 0x373   : > { %v2119_v5 = vpop.permute.xlu0 %2118  ;;  %v2123_v48 = vpop.permute.xlu1 %2122  ;;  %2059 = vmatprep.mubr.f32.mxu1 %v7397_v56  ;;  %v2258_v9 = vld [vmem:[#allocation5 + $0xa0] sm:$0xff]  ;;  %v2259_v29 = vld [vmem:[#allocation5 + $0xa8] sm:$0xff] }
 0x374   : > { %2121 = vst.msk [vmem:[#allocation5 + $0x20] sm:$0xff] %vm1523_vm7, %v2119_v5  ;;  %2125 = vst.msk [vmem:[#allocation5 + $0x28] sm:$0xff] %vm1523_vm7, %v2123_v48  ;;  %v5528_v54 = vpack.c.bf16 %v2259_v29, %v2258_v9 }
 0x375   : > { %2712 = vperm.xlu0 %5936, %v2690_v46   ;;  %2717 = vperm.xlu1 %5937, %v2691_v1  }
 0x376   : > { %2060 = vmatmul.mubr.f32.gmra.mrb[2].mxu1 %v7408_v13  ;;  %5529 = vmatprep.subr.bf16.mxu0 %v5528_v54 }
 0x377   : > { %v2387_v62 = vpop.permute.xlu0 %2386  ;;  %2064 = vmatprep.mubr.f32.mxu1 %v7415_v55  ;;  %v2534_v43 = vld [vmem:[#allocation5 + $0x80] sm:$0xff]  ;;  %v2535_v11 = vld [vmem:[#allocation5 + $0x88] sm:$0xff]  ;;  %v2191_v50 = vpop.permute.xlu1 %2190 }
 0x378   : > { %2389 = vst.msk [vmem:[#allocation5 + $0x8] sm:$0xff] %vm1523_vm7, %v2387_v62  ;;  %v5552_v15 = vpack.c.bf16 %v2535_v11, %v2534_v43  ;;  %2193 = vst.msk [vmem:[#allocation5 + $0xb0] sm:$0xff] %vm1523_vm7, %v2191_v50 }
 0x379   : > { %2722 = vperm.xlu0 %5936, %v2692_v18   ;;  %2727 = vperm.xlu1 %5937, %v2693_v17  }
 0x37a   : > { %2065 = vmatmul.mubr.f32.gmra.mrb[4].mxu1 %v7426_v20  ;;  %5553 = vmatprep.subr.bf16.mxu1 %v5552_v15 }
 0x37b   : > { %v2195_v8 = vpop.permute.xlu0 %2194  ;;  %2069 = vmatprep.mubr.f32.mxu1 %v7433_v57  ;;  %v2242_v3 = vld [vmem:[#allocation5 + $0x20] sm:$0xff]  ;;  %v2243_v16 = vld [vmem:[#allocation5 + $0x28] sm:$0xff]  ;;  %v2455_v58 = vpop.permute.xlu1 %2454 }
 0x37c   : > { %2197 = vst.msk [vmem:[#allocation5 + $0xb8] sm:$0xff] %vm1523_vm7, %v2195_v8  ;;  %v5530_v10 = vpack.c.bf16 %v2243_v16, %v2242_v3  ;;  %2457 = vst.msk [vmem:[#allocation5 + $0x90] sm:$0xff] %vm1523_vm7, %v2455_v58 }
 0x37d   : > { %2732 = vperm.xlu0 %5936, %v2694_v19  }
 0x37e   : > { %2070 = vmatmul.mubr.f32.gmra.mrb[6].mxu1 %v7444_v14  ;;  %5531 = vmatpush3.bf16.msra.mxu0 %v5530_v10 }
 0x37f   : > { %v2459_v24 = vpop.permute.xlu0 %2458  ;;  %v2519_v49 = vld [vmem:[#allocation5 + $0x8] sm:$0xff]  ;;  %v2127_v32 = vpop.permute.xlu1 %2126  ;;  %2614 = vmatprep.mubr.f32.mxu1 %v7194_v47  ;;  %v2260_v36 = vld [vmem:[#allocation5 + $0xb0] sm:$0xff] }
 0x380   : > { %2461 = vst.msk [vmem:[#allocation5 + $0x98] sm:$0xff] %vm1523_vm7, %v2459_v24  ;;  %v5554_v35 = vpack.c.bf16 %v2519_v49, %v2518_v61  ;;  %2129 = vst.msk [vmem:[#allocation5 + $0x30] sm:$0xff] %vm1523_vm7, %v2127_v32 }
 0x382   : > { %5555 = vmatpush3.bf16.msra.mxu1 %v5554_v35 }
 0x383   : > { %v2131_v25 = vpop.permute.xlu0 %2130  ;;  %v2261_v12 = vld [vmem:[#allocation5 + $0xb8] sm:$0xff]  ;;  %v2391_v42 = vpop.permute.xlu1 %2390  ;;  %v2536_v41 = vld [vmem:[#allocation5 + $0x90] sm:$0xff] }
 0x384   : > { %2133 = vst.msk [vmem:[#allocation5 + $0x38] sm:$0xff] %vm1523_vm7, %v2131_v25  ;;  %v5532_v63 = vpack.c.bf16 %v2261_v12, %v2260_v36  ;;  %2393 = vst.msk [vmem:[#allocation5 + $0x10] sm:$0xff] %vm1523_vm7, %v2391_v42 }
 0x386   : > { %5533 = vmatprep.subr.bf16.mxu0 %v5532_v63 }
 0x387   : > { %v2395_v23 = vpop.permute.xlu0 %2394  ;;  %v2537_v44 = vld [vmem:[#allocation5 + $0x98] sm:$0xff]  ;;  %v2199_v47 = vpop.permute.xlu1 %2198  ;;  %v2244_v0 = vld [vmem:[#allocation5 + $0x30] sm:$0xff] }
 0x388   : > { %2397 = vst.msk [vmem:[#allocation5 + $0x18] sm:$0xff] %vm1523_vm7, %v2395_v23  ;;  %v5556_v7 = vpack.c.bf16 %v2537_v44, %v2536_v41  ;;  %2201 = vst.msk [vmem:[#allocation5 + $0xc0] sm:$0xff] %vm1523_vm7, %v2199_v47 }
 0x38a   : > { %5557 = vmatprep.subr.bf16.mxu1 %v5556_v7 }
 0x38b   : > { %v2203_v22 = vpop.permute.xlu0 %2202  ;;  %v2245_v45 = vld [vmem:[#allocation5 + $0x38] sm:$0xff]  ;;  %v2463_v53 = vpop.permute.xlu1 %2462  ;;  %v2520_v2 = vld [vmem:[#allocation5 + $0x10] sm:$0xff] }
 0x38c   : > { %2205 = vst.msk [vmem:[#allocation5 + $0xc8] sm:$0xff] %vm1523_vm7, %v2203_v22  ;;  %v5534_v37 = vpack.c.bf16 %v2245_v45, %v2244_v0  ;;  %2465 = vst.msk [vmem:[#allocation5 + $0xa0] sm:$0xff] %vm1523_vm7, %v2463_v53 }
 0x38e   : > { %5535 = vmatpush3.bf16.msra.mxu0 %v5534_v37 }
 0x38f   : > { %v2467_v39 = vpop.permute.xlu0 %2466  ;;  %v2521_v52 = vld [vmem:[#allocation5 + $0x18] sm:$0xff]  ;;  %v2135_v40 = vpop.permute.xlu1 %2134  ;;  %v2262_v51 = vld [vmem:[#allocation5 + $0xc0] sm:$0xff] }
 0x390   : > { %2469 = vst.msk [vmem:[#allocation5 + $0xa8] sm:$0xff] %vm1523_vm7, %v2467_v39  ;;  %v5558_v28 = vpack.c.bf16 %v2521_v52, %v2520_v2  ;;  %2137 = vst.msk [vmem:[#allocation5 + $0x40] sm:$0xff] %vm1523_vm7, %v2135_v40 }
 0x392   : > { %5559 = vmatpush3.bf16.msra.mxu1 %v5558_v28 }
 0x393   : > { %v2139_v30 = vpop.permute.xlu0 %2138  ;;  %v2263_v33 = vld [vmem:[#allocation5 + $0xc8] sm:$0xff]  ;;  %v2399_v34 = vpop.permute.xlu1 %2398  ;;  %v2538_v6 = vld [vmem:[#allocation5 + $0xa0] sm:$0xff] }
 0x394   : > { %2141 = vst.msk [vmem:[#allocation5 + $0x48] sm:$0xff] %vm1523_vm7, %v2139_v30  ;;  %v5536_v38 = vpack.c.bf16 %v2263_v33, %v2262_v51  ;;  %2401 = vst.msk [vmem:[#allocation5 + $0x20] sm:$0xff] %vm1523_vm7, %v2399_v34 }
 0x396   : > { %5537 = vmatprep.subr.bf16.mxu0 %v5536_v38 }
 0x397   : > { %v2403_v27 = vpop.permute.xlu0 %2402  ;;  %v2539_v31 = vld [vmem:[#allocation5 + $0xa8] sm:$0xff]  ;;  %v2207_v59 = vpop.permute.xlu1 %2206  ;;  %v2246_v21 = vld [vmem:[#allocation5 + $0x40] sm:$0xff] }
 0x398   : > { %2405 = vst.msk [vmem:[#allocation5 + $0x28] sm:$0xff] %vm1523_vm7, %v2403_v27  ;;  %v5560_v60 = vpack.c.bf16 %v2539_v31, %v2538_v6  ;;  %2209 = vst.msk [vmem:[#allocation5 + $0xd0] sm:$0xff] %vm1523_vm7, %v2207_v59 }
 0x39a   : > { %5561 = vmatprep.subr.bf16.mxu1 %v5560_v60 }
 0x39b   : > { %v2211_v46 = vpop.permute.xlu0 %2210  ;;  %v2247_v1 = vld [vmem:[#allocation5 + $0x48] sm:$0xff]  ;;  %v2471_v5 = vpop.permute.xlu1 %2470  ;;  %v2522_v9 = vld [vmem:[#allocation5 + $0x20] sm:$0xff] }
 0x39c   : > { %2213 = vst.msk [vmem:[#allocation5 + $0xd8] sm:$0xff] %vm1523_vm7, %v2211_v46  ;;  %v5538_v48 = vpack.c.bf16 %v2247_v1, %v2246_v21  ;;  %2473 = vst.msk [vmem:[#allocation5 + $0xb0] sm:$0xff] %vm1523_vm7, %v2471_v5 }
 0x39e   : > { %5539 = vmatpush3.bf16.msra.mxu0 %v5538_v48 }
 0x39f   : > { %v2475_v29 = vpop.permute.xlu0 %2474  ;;  %v2523_v54 = vld [vmem:[#allocation5 + $0x28] sm:$0xff]  ;;  %v2143_v18 = vpop.permute.xlu1 %2142  ;;  %v2264_v62 = vld [vmem:[#allocation5 + $0xd0] sm:$0xff] }
 0x3a0   : > { %2477 = vst.msk [vmem:[#allocation5 + $0xb8] sm:$0xff] %vm1523_vm7, %v2475_v29  ;;  %v5562_v17 = vpack.c.bf16 %v2523_v54, %v2522_v9  ;;  %2145 = vst.msk [vmem:[#allocation5 + $0x50] sm:$0xff] %vm1523_vm7, %v2143_v18 }
 0x3a2   : > { %5563 = vmatpush3.bf16.msra.mxu1 %v5562_v17 }
 0x3a3   : > { %v2147_v43 = vpop.permute.xlu0 %2146  ;;  %v2265_v11 = vld [vmem:[#allocation5 + $0xd8] sm:$0xff]  ;;  %v2407_v50 = vpop.permute.xlu1 %2406  ;;  %v2540_v19 = vld [vmem:[#allocation5 + $0xb0] sm:$0xff] }
 0x3a4   : > { %2149 = vst.msk [vmem:[#allocation5 + $0x58] sm:$0xff] %vm1523_vm7, %v2147_v43  ;;  %v5540_v15 = vpack.c.bf16 %v2265_v11, %v2264_v62  ;;  %2409 = vst.msk [vmem:[#allocation5 + $0x30] sm:$0xff] %vm1523_vm7, %v2407_v50 }
 0x3a6   : > { %5541 = vmatprep.subr.bf16.mxu0 %v5540_v15 }
 0x3a7   : > { %v2411_v8 = vpop.permute.xlu0 %2410  ;;  %v2541_v3 = vld [vmem:[#allocation5 + $0xb8] sm:$0xff]  ;;  %v2215_v16 = vpop.permute.xlu1 %2214  ;;  %v2248_v10 = vld [vmem:[#allocation5 + $0x50] sm:$0xff] }
 0x3a8   : > { %2413 = vst.msk [vmem:[#allocation5 + $0x38] sm:$0xff] %vm1523_vm7, %v2411_v8  ;;  %v5564_v58 = vpack.c.bf16 %v2541_v3, %v2540_v19  ;;  %2217 = vst.msk [vmem:[#allocation5 + $0xe0] sm:$0xff] %vm1523_vm7, %v2215_v16 }
 0x3aa   : > { %5565 = vmatprep.subr.bf16.mxu1 %v5564_v58 }
 0x3ab   : > { %v2219_v61 = vpop.permute.xlu0 %2218  ;;  %v2249_v24 = vld [vmem:[#allocation5 + $0x58] sm:$0xff]  ;;  %v2479_v49 = vpop.permute.xlu1 %2478  ;;  %v2524_v35 = vld [vmem:[#allocation5 + $0x30] sm:$0xff] }
 0x3ac   : > { %2221 = vst.msk [vmem:[#allocation5 + $0xe8] sm:$0xff] %vm1523_vm7, %v2219_v61  ;;  %v5542_v32 = vpack.c.bf16 %v2249_v24, %v2248_v10  ;;  %2481 = vst.msk [vmem:[#allocation5 + $0xc0] sm:$0xff] %vm1523_vm7, %v2479_v49 }
 0x3ae   : > { %5543 = vmatpush3.bf16.msra.mxu0 %v5542_v32 }
 0x3af   : > { %v2483_v36 = vpop.permute.xlu0 %2482  ;;  %v2525_v25 = vld [vmem:[#allocation5 + $0x38] sm:$0xff]  ;;  %v2151_v12 = vpop.permute.xlu1 %2150  ;;  %v2266_v63 = vld [vmem:[#allocation5 + $0xe0] sm:$0xff] }
 0x3b0   : > { %2485 = vst.msk [vmem:[#allocation5 + $0xc8] sm:$0xff] %vm1523_vm7, %v2483_v36  ;;  %v5566_v42 = vpack.c.bf16 %v2525_v25, %v2524_v35  ;;  %2153 = vst.msk [vmem:[#allocation5 + $0x60] sm:$0xff] %vm1523_vm7, %v2151_v12 }
 0x3b2   : > { %5567 = vmatpush3.bf16.msra.mxu1 %v5566_v42 }
 0x3b3   : > { %v2155_v41 = vpop.permute.xlu0 %2154  ;;  %v2267_v23 = vld [vmem:[#allocation5 + $0xe8] sm:$0xff]  ;;  %v2415_v44 = vpop.permute.xlu1 %2414  ;;  %v2542_v7 = vld [vmem:[#allocation5 + $0xc0] sm:$0xff] }
 0x3b4   : > { %2157 = vst.msk [vmem:[#allocation5 + $0x68] sm:$0xff] %vm1523_vm7, %v2155_v41  ;;  %v5544_v47 = vpack.c.bf16 %v2267_v23, %v2266_v63  ;;  %2417 = vst.msk [vmem:[#allocation5 + $0x40] sm:$0xff] %vm1523_vm7, %v2415_v44 }
 0x3b6   : > { %5545 = vmatprep.subr.bf16.mxu0 %v5544_v47 }
 0x3b7   : > { %v2419_v0 = vpop.permute.xlu0 %2418  ;;  %v2543_v22 = vld [vmem:[#allocation5 + $0xc8] sm:$0xff]  ;;  %v2223_v45 = vpop.permute.xlu1 %2222  ;;  %v2250_v37 = vld [vmem:[#allocation5 + $0x60] sm:$0xff] }
 0x3b8   : > { %2421 = vst.msk [vmem:[#allocation5 + $0x48] sm:$0xff] %vm1523_vm7, %v2419_v0  ;;  %v5568_v53 = vpack.c.bf16 %v2543_v22, %v2542_v7  ;;  %2225 = vst.msk [vmem:[#allocation5 + $0xf0] sm:$0xff] %vm1523_vm7, %v2223_v45 }
 0x3ba   : > { %5569 = vmatprep.subr.bf16.mxu1 %v5568_v53 }
 0x3bb   : > { %v2227_v2 = vpop.permute.xlu0 %2226  ;;  %v2251_v39 = vld [vmem:[#allocation5 + $0x68] sm:$0xff]  ;;  %v2487_v52 = vpop.permute.xlu1 %2486  ;;  %v2526_v28 = vld [vmem:[#allocation5 + $0x40] sm:$0xff] }
 0x3bc   : > { %2229 = vst.msk [vmem:[#allocation5 + $0xf8] sm:$0xff] %vm1523_vm7, %v2227_v2  ;;  %v5546_v40 = vpack.c.bf16 %v2251_v39, %v2250_v37  ;;  %2489 = vst.msk [vmem:[#allocation5 + $0xd0] sm:$0xff] %vm1523_vm7, %v2487_v52 }
 0x3be   : > { %5547 = vmatpush3.bf16.msra.mxu0 %v5546_v40 }
 0x3bf   : > { %v2491_v51 = vpop.permute.xlu0 %2490  ;;  %v2527_v30 = vld [vmem:[#allocation5 + $0x48] sm:$0xff]  ;;  %v2159_v33 = vpop.permute.xlu1 %2158  ;;  %v2268_v38 = vld [vmem:[#allocation5 + $0xf0] sm:$0xff] }
 0x3c0   : > { %2493 = vst.msk [vmem:[#allocation5 + $0xd8] sm:$0xff] %vm1523_vm7, %v2491_v51  ;;  %v5570_v34 = vpack.c.bf16 %v2527_v30, %v2526_v28  ;;  %2161 = vst.msk [vmem:[#allocation5 + $0x70] sm:$0xff] %vm1523_vm7, %v2159_v33 }
 0x3c2   : > { %5571 = vmatpush3.bf16.msra.mxu1 %v5570_v34 }
 0x3c3   : > { %v2163_v6 = vpop.permute.xlu0 %2162  ;;  %v2269_v27 = vld [vmem:[#allocation5 + $0xf8] sm:$0xff]  ;;  %v2423_v31 = vpop.permute.xlu1 %2422  ;;  %v2544_v60 = vld [vmem:[#allocation5 + $0xd0] sm:$0xff] }
 0x3c4   : > { %2165 = vst.msk [vmem:[#allocation5 + $0x78] sm:$0xff] %vm1523_vm7, %v2163_v6  ;;  %v5548_v59 = vpack.c.bf16 %v2269_v27, %v2268_v38  ;;  %2425 = vst.msk [vmem:[#allocation5 + $0x50] sm:$0xff] %vm1523_vm7, %v2423_v31 }
 0x3c6   : > { %5549 = vmatprep.subr.bf16.mxu0 %v5548_v59 }
 0x3c7   : > { %v2427_v21 = vpop.permute.xlu0 %2426  ;;  %v2545_v46 = vld [vmem:[#allocation5 + $0xd8] sm:$0xff]  ;;  %v2495_v1 = vpop.permute.xlu1 %2494  ;;  %v2252_v48 = vld [vmem:[#allocation5 + $0x70] sm:$0xff] }
 0x3c8   : > { %2429 = vst.msk [vmem:[#allocation5 + $0x58] sm:$0xff] %vm1523_vm7, %v2427_v21  ;;  %v5572_v5 = vpack.c.bf16 %v2545_v46, %v2544_v60  ;;  %2497 = vst.msk [vmem:[#allocation5 + $0xe0] sm:$0xff] %vm1523_vm7, %v2495_v1 }
 0x3ca   : > { %5573 = vmatprep.subr.bf16.mxu1 %v5572_v5 }
 0x3cb   : > { %v2499_v9 = vpop.permute.xlu0 %2498  ;;  %v2253_v29 = vld [vmem:[#allocation5 + $0x78] sm:$0xff]  ;;  %v2431_v54 = vpop.permute.xlu1 %2430  ;;  %v2528_v17 = vld [vmem:[#allocation5 + $0x50] sm:$0xff] }
 0x3cc   : > { %2501 = vst.msk [vmem:[#allocation5 + $0xe8] sm:$0xff] %vm1523_vm7, %v2499_v9  ;;  %v5550_v18 = vpack.c.bf16 %v2253_v29, %v2252_v48  ;;  %2433 = vst.msk [vmem:[#allocation5 + $0x60] sm:$0xff] %vm1523_vm7, %v2431_v54 }
 0x3ce   : > { %5551 = vmatpush3.bf16.msra.mxu0 %v5550_v18 }
 0x3cf   : > { %v2435_v62 = vpop.permute.xlu0 %2434  ;;  %v2529_v43 = vld [vmem:[#allocation5 + $0x58] sm:$0xff]  ;;  %v2503_v11 = vpop.permute.xlu1 %2502  ;;  %v2546_v15 = vld [vmem:[#allocation5 + $0xe0] sm:$0xff] }
 0x3d0   : > { %2437 = vst.msk [vmem:[#allocation5 + $0x68] sm:$0xff] %vm1523_vm7, %v2435_v62  ;;  %v5574_v50 = vpack.c.bf16 %v2529_v43, %v2528_v17  ;;  %2505 = vst.msk [vmem:[#allocation5 + $0xf0] sm:$0xff] %vm1523_vm7, %v2503_v11 }
 0x3d1   : > { %2335 = vmatmul.mubr.f32.vlgmr.msra.gmra.mrb[8].mxu0 %v7390_v4 }
 0x3d2   : > { %5575 = vmatpush3.bf16.msra.mxu1 %v5574_v50  ;;  %2339 = vmatprep.mubr.f32.mxu0 %v7397_v56 }
 0x3d3   : > { %v2507_v19 = vpop.permute.xlu0 %2506  ;;  %v2547_v8 = vld [vmem:[#allocation5 + $0xe8] sm:$0xff]  ;;  %v2439_v3 = vpop.permute.xlu1 %2438  ;;  %v2530_v58 = vld [vmem:[#allocation5 + $0x60] sm:$0xff] }
 0x3d4   : > { %2509 = vst.msk [vmem:[#allocation5 + $0xf8] sm:$0xff] %vm1523_vm7, %v2507_v19  ;;  %v5576_v16 = vpack.c.bf16 %v2547_v8, %v2546_v15  ;;  %2441 = vst.msk [vmem:[#allocation5 + $0x70] sm:$0xff] %vm1523_vm7, %v2439_v3 }
 0x3d5   : > { %2340 = vmatmul.mubr.f32.gmra.mrb[10].mxu0 %v7408_v13 }
 0x3d6   : > { %5577 = vmatprep.subr.bf16.mxu1 %v5576_v16  ;;  %2344 = vmatprep.mubr.f32.mxu0 %v7415_v55 }
 0x3d7   : > { %v2443_v10 = vpop.permute.xlu0 %2442  ;;  %v2531_v61 = vld [vmem:[#allocation5 + $0x68] sm:$0xff]  ;;  %v2548_v49 = vld [vmem:[#allocation5 + $0xf0] sm:$0xff] }
 0x3d8   : > { %2445 = vst.msk [vmem:[#allocation5 + $0x78] sm:$0xff] %vm1523_vm7, %v2443_v10  ;;  %v5578_v24 = vpack.c.bf16 %v2531_v61, %v2530_v58 }
 0x3d9   : > { %2345 = vmatmul.mubr.f32.gmra.mrb[12].mxu0 %v7426_v20 }
 0x3da   : > { %5579 = vmatpush3.bf16.msra.mxu1 %v5578_v24  ;;  %2349 = vmatprep.mubr.f32.mxu0 %v7433_v57 }
 0x3db   : > { %v2549_v32 = vld [vmem:[#allocation5 + $0xf8] sm:$0xff]  ;;  %v2532_v36 = vld [vmem:[#allocation5 + $0x70] sm:$0xff] }
 0x3dc   : > { %v5580_v35 = vpack.c.bf16 %v2549_v32, %v2548_v49 }
 0x3dd   : > { %2350 = vmatmul.mubr.f32.gmra.mrb[14].mxu0 %v7444_v14 }
 0x3de   : > { %5581 = vmatprep.subr.bf16.mxu1 %v5580_v35 }
 0x3df   : > { %v2533_v25 = vld [vmem:[#allocation5 + $0x78] sm:$0xff] }
 0x3e0   : > { %v5582_v12 = vpack.c.bf16 %v2533_v25, %v2532_v36 }
 0x3e2   : > { %5583 = vmatpush3.bf16.msra.mxu1 %v5582_v12 }
 0x3e4   : > { %v7574_v23 = vpop.permute.xlu1 %1692 }
 0x3e5   : > { %2615 = vmatmul.mubr.f32.vlgmr.msra.gmra.mrb[8].mxu1 %v7390_v4 }
 0x3e6   : > { %2619 = vmatprep.mubr.f32.mxu1 %v7397_v56 }
 0x3e8   : > { %v7580_v45 = vpop.permute.xlu1 %1702 }
 0x3e9   : > { %2620 = vmatmul.mubr.f32.gmra.mrb[10].mxu1 %v7408_v13  ;;  %v7577_v13 = vpop.permute.xlu0 %1697 }
 0x3ea   : > { %2624 = vmatprep.mubr.f32.mxu1 %v7415_v55 }
 0x3ed   : > { %2625 = vmatmul.mubr.f32.gmra.mrb[12].mxu1 %v7426_v20  ;;  %v7583_v28 = vpop.permute.xlu0 %1707 }
 0x3ee   : > { %2629 = vmatprep.mubr.f32.mxu1 %v7433_v57 }
 0x3f1   : > { %2630 = vmatmul.mubr.f32.gmra.mrb[14].mxu1 %v7444_v14 }
 0x429   : > { %v4902_v42 = vpop.f32.mrb[0].mxu0 }
 0x42a   : > { %v4903_v63 = vpop.f32.mrb[1].mxu0 }
 0x42b   : > { %v4904_v41 = vadd.f32 %v4903_v63, %v4902_v42 }
 0x42d   : > { %v1777_v44 = vadd.f32 %v4904_v41, %v7574_v23  ;;  %v4905_v4 = vpop.f32.mrb[2].mxu0 }
 0x42e   : > { %v4906_v47 = vpop.f32.mrb[3].mxu0 }
 0x42f   : > { %v1799_v56 = vmin.f32 %v1777_v44, 0.0  ;;  %v4907_v7 = vadd.f32 %v4906_v47, %v4905_v4  ;;  %vm1795_vm8 = vcmp.gt.f32.partialorder %v1777_v44, 0.0 }
 0x431   : > { %v1803_v55 = vmul.f32 1.442695, %v1799_v56  ;;  %v1782_v20 = vadd.f32 %v4907_v7, %v7577_v13  ;;  %v4908_v0 = vpop.f32.mrb[4].mxu0 }
 0x432   : > { %v4909_v57 = vpop.f32.mrb[5].mxu0 }
 0x433   : > { %5946 = vpow2.f32 %v1803_v55  ;;  %v1800_v14 = vmin.f32 %v1782_v20, 0.0  ;;  %v4910_v22 = vadd.f32 %v4909_v57, %v4908_v0  ;;  %vm1796_vm9 = vcmp.gt.f32.partialorder %v1782_v20, 0.0 }
 0x435   : > { %v1805_v53 = vmul.f32 1.442695, %v1800_v14  ;;  %v1787_v37 = vadd.f32 %v4910_v22, %v7580_v45  ;;  %v4911_v2 = vpop.f32.mrb[6].mxu0 }
 0x436   : > { %v4912_v39 = vpop.f32.mrb[7].mxu0 }
 0x437   : > { %5948 = vpow2.f32 %v1805_v53  ;;  %v1801_v52 = vmin.f32 %v1787_v37, 0.0  ;;  %v4913_v40 = vadd.f32 %v4912_v39, %v4911_v2  ;;  %vm1797_vm10 = vcmp.gt.f32.partialorder %v1787_v37, 0.0 }
 0x439   : > { %v1807_v51 = vmul.f32 1.442695, %v1801_v52  ;;  %v1792_v30 = vadd.f32 %v4913_v40, %v7583_v28  ;;  %v2663_v52 = vld [vmem:[%s8633_s20] sm:$0xff] }
 0x43a   : > { %5381 = vmatprep.mubr.f32.mxu0 %v2663_v52 }
 0x43b   : > { %5950 = vpow2.f32 %v1807_v51  ;;  %v1802_v33 = vmin.f32 %v1792_v30, 0.0  ;;  %vm1798_vm11 = vcmp.gt.f32.partialorder %v1792_v30, 0.0 }
 0x43d   : > { %v5947_v34 = vpop.eup %5946  ;;  %v1809_v38 = vmul.f32 1.442695, %v1802_v33 }
 0x43e   : > { %v4830_v6 = vadd.f32 -1.0, %v5947_v34 }
 0x43f   : > { %5952 = vpow2.f32 %v1809_v38 }
 0x440   : > { %v1815_v27 = vsel %vm1795_vm8, %v1777_v44, %v4830_v6 }
 0x441   : > { %v5949_v31 = vpop.eup %5948  ;;  %1819 = vst.msk [vmem:[#allocation6] sm:$0xff] %vm1523_vm7, %v1815_v27 }
 0x442   : > { %v4831_v59 = vadd.f32 -1.0, %v5949_v31 }
 0x444   : > { %v1816_v60 = vsel %vm1796_vm9, %v1782_v20, %v4831_v59 }
 0x445   : > { %v5951_v21 = vpop.eup %5950  ;;  %1820 = vst.msk [vmem:[#allocation6 + $0x8] sm:$0xff] %vm1523_vm7, %v1816_v60  ;;  %v4946_v46 = vpop.f32.mrb[0].mxu1 }
 0x446   : > { %v4832_v1 = vadd.f32 -1.0, %v5951_v21  ;;  %v4947_v5 = vpop.f32.mrb[1].mxu1 }
 0x447   : > { %v4948_v48 = vadd.f32 %v4947_v5, %v4946_v46 }
 0x448   : > { %v1817_v9 = vsel %vm1797_vm10, %v1787_v37, %v4832_v1  ;;  %v2671_v15 = vld [vmem:[#allocation6] sm:$0xff] }
 0x449   : > { %v5953_v29 = vpop.eup %5952  ;;  %1821 = vst.msk [vmem:[#allocation6 + $0x10] sm:$0xff] %vm1523_vm7, %v1817_v9  ;;  %v2057_v54 = vadd.f32 %v4948_v48, %v7574_v23  ;;  %v4949_v18 = vpop.f32.mrb[2].mxu1 }
 0x44a   : > { %v4833_v17 = vadd.f32 -1.0, %v5953_v29  ;;  %v4950_v62 = vpop.f32.mrb[3].mxu1 }
 0x44b   : > { %v2079_v43 = vmin.f32 %v2057_v54, 0.0  ;;  %v4951_v11 = vadd.f32 %v4950_v62, %v4949_v18  ;;  %vm2075_vm12 = vcmp.gt.f32.partialorder %v2057_v54, 0.0 }
 0x44c   : > { %v1818_v50 = vsel %vm1798_vm11, %v1792_v30, %v4833_v17  ;;  %v2672_v19 = vld [vmem:[#allocation6 + $0x8] sm:$0xff] }
 0x44d   : > { %1822 = vst.msk [vmem:[#allocation6 + $0x18] sm:$0xff] %vm1523_vm7, %v1818_v50  ;;  %v2083_v8 = vmul.f32 1.442695, %v2079_v43  ;;  %v2062_v3 = vadd.f32 %v4951_v11, %v7577_v13  ;;  %v4952_v16 = vpop.f32.mrb[4].mxu1  ;;  %v5584_v58 = vpack.c.bf16 %v2672_v19, %v2671_v15 }
 0x44e   : > { %v4953_v10 = vpop.f32.mrb[5].mxu1 }
 0x44f   : > { %5954 = vpow2.f32 %v2083_v8  ;;  %v2080_v61 = vmin.f32 %v2062_v3, 0.0  ;;  %v4954_v24 = vadd.f32 %v4953_v10, %v4952_v16  ;;  %5585 = vmatprep.subr.bf16.mxu0 %v5584_v58  ;;  %vm2076_vm13 = vcmp.gt.f32.partialorder %v2062_v3, 0.0 }
 0x450   : > { %5587 = vmatpush3.bf16.msra.mxu0 %v5584_v58  ;;  %v2673_v42 = vld [vmem:[#allocation6 + $0x10] sm:$0xff] }
 0x451   : > { %v2085_v49 = vmul.f32 1.442695, %v2080_v61  ;;  %v2067_v32 = vadd.f32 %v4954_v24, %v7580_v45  ;;  %v4955_v35 = vpop.f32.mrb[6].mxu1 }
 0x452   : > { %v4956_v36 = vpop.f32.mrb[7].mxu1 }
 0x453   : > { %5956 = vpow2.f32 %v2085_v49  ;;  %v2081_v25 = vmin.f32 %v2067_v32, 0.0  ;;  %v4957_v12 = vadd.f32 %v4956_v36, %v4955_v35  ;;  %vm2077_vm14 = vcmp.gt.f32.partialorder %v2067_v32, 0.0 }
 0x454   : > { %v2674_v63 = vld [vmem:[#allocation6 + $0x18] sm:$0xff] }
 0x455   : > { %v2087_v41 = vmul.f32 1.442695, %v2081_v25  ;;  %v2072_v44 = vadd.f32 %v4957_v12, %v7583_v28  ;;  %v5588_v4 = vpack.c.bf16 %v2674_v63, %v2673_v42 }
 0x457   : > { %5958 = vpow2.f32 %v2087_v41  ;;  %v2082_v47 = vmin.f32 %v2072_v44, 0.0  ;;  %5589 = vmatprep.subr.bf16.mxu0 %v5588_v4  ;;  %vm2078_vm15 = vcmp.gt.f32.partialorder %v2072_v44, 0.0 }
 0x458   : > { %5591 = vmatpush3.bf16.msra.mxu0 %v5588_v4 }
 0x459   : > { %v5955_v56 = vpop.eup %5954  ;;  %v2089_v7 = vmul.f32 1.442695, %v2082_v47 }
 0x45a   : > { %v4834_v55 = vadd.f32 -1.0, %v5955_v56 }
 0x45b   : > { %5960 = vpow2.f32 %v2089_v7 }
 0x45c   : > { %v2095_v20 = vsel %vm2075_vm12, %v2057_v54, %v4834_v55 }
 0x45d   : > { %v5957_v0 = vpop.eup %5956  ;;  %2099 = vst.msk [vmem:[#allocation6 + $0x20] sm:$0xff] %vm1523_vm7, %v2095_v20 }
 0x45e   : > { %v4835_v57 = vadd.f32 -1.0, %v5957_v0 }
 0x460   : > { %v2096_v14 = vsel %vm2076_vm13, %v2062_v3, %v4835_v57 }
 0x461   : > { %v5959_v22 = vpop.eup %5958  ;;  %2100 = vst.msk [vmem:[#allocation6 + $0x28] sm:$0xff] %vm1523_vm7, %v2096_v14 }
 0x462   : > { %v4836_v53 = vadd.f32 -1.0, %v5959_v22 }
 0x464   : > { %v2097_v37 = vsel %vm2077_vm14, %v2067_v32, %v4836_v53  ;;  %v2675_v51 = vld [vmem:[#allocation6 + $0x20] sm:$0xff] }
 0x465   : > { %v5961_v2 = vpop.eup %5960  ;;  %2101 = vst.msk [vmem:[#allocation6 + $0x30] sm:$0xff] %vm1523_vm7, %v2097_v37 }
 0x466   : > { %v4837_v39 = vadd.f32 -1.0, %v5961_v2 }
 0x468   : > { %v2098_v40 = vsel %vm2078_vm15, %v2072_v44, %v4837_v39  ;;  %v2676_v30 = vld [vmem:[#allocation6 + $0x28] sm:$0xff] }
 0x469   : > { %2102 = vst.msk [vmem:[#allocation6 + $0x38] sm:$0xff] %vm1523_vm7, %v2098_v40  ;;  %v5592_v33 = vpack.c.bf16 %v2676_v30, %v2675_v51 }
 0x46b   : > { %5593 = vmatprep.subr.bf16.mxu0 %v5592_v33 }
 0x46c   : > { %5595 = vmatpush3.bf16.msra.mxu0 %v5592_v33  ;;  %v2677_v34 = vld [vmem:[#allocation6 + $0x30] sm:$0xff] }
 0x470   : > { %v2678_v38 = vld [vmem:[#allocation6 + $0x38] sm:$0xff] }
 0x471   : > { %v5596_v6 = vpack.c.bf16 %v2678_v38, %v2677_v34 }
 0x473   : > { %5597 = vmatprep.subr.bf16.mxu0 %v5596_v6 }
 0x474   : > { %5599 = vmatpush3.bf16.msra.mxu0 %v5596_v6 }
 0x4a4   : > { %v4990_v27 = vpop.f32.mrb[8].mxu0 }
 0x4a5   : > { %v4991_v31 = vpop.f32.mrb[9].mxu0 }
 0x4a6   : > { %v4992_v59 = vadd.f32 %v4991_v31, %v4990_v27 }
 0x4a8   : > { %v2337_v60 = vadd.f32 %v4992_v59, %v7574_v23  ;;  %v4993_v21 = vpop.f32.mrb[10].mxu0 }
 0x4a9   : > { %v4994_v46 = vpop.f32.mrb[11].mxu0 }
 0x4aa   : > { %v2359_v1 = vmin.f32 %v2337_v60, 0.0  ;;  %v4995_v5 = vadd.f32 %v4994_v46, %v4993_v21  ;;  %vm2355_vm0 = vcmp.gt.f32.partialorder %v2337_v60, 0.0 }
 0x4ac   : > { %v2363_v48 = vmul.f32 1.442695, %v2359_v1  ;;  %v2342_v9 = vadd.f32 %v4995_v5, %v7577_v13  ;;  %v4996_v29 = vpop.f32.mrb[12].mxu0 }
 0x4ad   : > { %v4997_v54 = vpop.f32.mrb[13].mxu0 }
 0x4ae   : > { %5962 = vpow2.f32 %v2363_v48  ;;  %v2360_v18 = vmin.f32 %v2342_v9, 0.0  ;;  %v4998_v17 = vadd.f32 %v4997_v54, %v4996_v29  ;;  %vm2356_vm1 = vcmp.gt.f32.partialorder %v2342_v9, 0.0 }
 0x4b0   : > { %v2365_v62 = vmul.f32 1.442695, %v2360_v18  ;;  %v2347_v43 = vadd.f32 %v4998_v17, %v7580_v45  ;;  %v4999_v11 = vpop.f32.mrb[14].mxu0 }
 0x4b1   : > { %v5000_v50 = vpop.f32.mrb[15].mxu0 }
 0x4b2   : > { %5964 = vpow2.f32 %v2365_v62  ;;  %v2361_v15 = vmin.f32 %v2347_v43, 0.0  ;;  %v5001_v19 = vadd.f32 %v5000_v50, %v4999_v11  ;;  %vm2357_vm2 = vcmp.gt.f32.partialorder %v2347_v43, 0.0 }
 0x4b4   : > { %v2367_v8 = vmul.f32 1.442695, %v2361_v15  ;;  %v2352_v3 = vadd.f32 %v5001_v19, %v7583_v28 }
 0x4b6   : > { %5966 = vpow2.f32 %v2367_v8  ;;  %v2362_v16 = vmin.f32 %v2352_v3, 0.0  ;;  %vm2358_vm3 = vcmp.gt.f32.partialorder %v2352_v3, 0.0 }
 0x4b8   : > { %v5963_v58 = vpop.eup %5962  ;;  %v2369_v10 = vmul.f32 1.442695, %v2362_v16  ;;  %v5034_v61 = vpop.f32.mrb[8].mxu1  ;;  %v2665_v16 = vld [vmem:[%s8633_s20 + $0x10] sm:$0xff] }
 0x4b9   : > { %v4838_v24 = vadd.f32 -1.0, %v5963_v58  ;;  %v5035_v49 = vpop.f32.mrb[9].mxu1  ;;  %v2666_v58 = vld [vmem:[%s8633_s20 + $0x18] sm:$0xff] }
 0x4ba   : > { %5968 = vpow2.f32 %v2369_v10  ;;  %v5036_v32 = vadd.f32 %v5035_v49, %v5034_v61  ;;  %v2667_v10 = vld [vmem:[%s8633_s20 + $0x20] sm:$0xff]  ;;  %v2668_v61 = vld [vmem:[%s8633_s20 + $0x28] sm:$0xff]  ;;  %v2670_v49 = vld [vmem:[%s8633_s20 + $0x38] sm:$0xff] }
 0x4bb   : > { %v2375_v35 = vsel %vm2355_vm0, %v2337_v60, %v4838_v24  ;;  %v2669_v24 = vld [vmem:[%s8633_s20 + $0x30] sm:$0xff] }
 0x4bc   : > { %v5965_v36 = vpop.eup %5964  ;;  %2379 = vst.msk [vmem:[#allocation6 + $0x40] sm:$0xff] %vm1523_vm7, %v2375_v35  ;;  %v2617_v25 = vadd.f32 %v5036_v32, %v7574_v23  ;;  %v5037_v12 = vpop.f32.mrb[10].mxu1  ;;  %v2888_v32 = vld [vmem:[%s8634_s26] sm:$0xff]  ;;  %v2889_v35 = vld [vmem:[%s8634_s26 + $0x8] sm:$0xff] }
 0x4bd   : > { %v4839_v42 = vadd.f32 -1.0, %v5965_v36  ;;  %v5038_v63 = vpop.f32.mrb[11].mxu1  ;;  %v5616_v36 = vpack.c.bf16 %v2889_v35, %v2888_v32 }
 0x4be   : > { %v2639_v41 = vmin.f32 %v2617_v25, 0.0  ;;  %v5039_v44 = vadd.f32 %v5038_v63, %v5037_v12  ;;  %vm2635_vm4 = vcmp.gt.f32.partialorder %v2617_v25, 0.0  ;;  %v2891_v12 = vld [vmem:[%s8634_s26 + $0x18] sm:$0xff]  ;;  %v2892_v63 = vld [vmem:[%s8634_s26 + $0x20] sm:$0xff] }
 0x4bf   : > { %v2376_v4 = vsel %vm2356_vm1, %v2342_v9, %v4839_v42  ;;  %5617 = vmatprep.subr.bf16.mxu1 %v5616_v36  ;;  %vm471_vm1 = vcmask 376056  }
 0x4c0   : > { %v5967_v47 = vpop.eup %5966  ;;  %2380 = vst.msk [vmem:[#allocation6 + $0x48] sm:$0xff] %vm1523_vm7, %v2376_v4  ;;  %v2643_v56 = vmul.f32 1.442695, %v2639_v41  ;;  %v2622_v7 = vadd.f32 %v5039_v44, %v7577_v13  ;;  %v5040_v55 = vpop.f32.mrb[12].mxu1  ;;  %5619 = vmatpush3.bf16.msra.mxu1 %v5616_v36  ;;  %v2893_v41 = vld [vmem:[%s8634_s26 + $0x28] sm:$0xff]  ;;  %v2894_v4 = vld [vmem:[%s8634_s26 + $0x30] sm:$0xff] }
 0x4c1   : > { %v4840_v20 = vadd.f32 -1.0, %v5967_v47  ;;  %v5041_v0 = vpop.f32.mrb[13].mxu1  ;;  %v5624_v44 = vpack.c.bf16 %v2893_v41, %v2892_v63  ;;  %v2895_v47 = vld [vmem:[%s8634_s26 + $0x38] sm:$0xff]  ;;  %473 = vst.msk [vmem:[#allocation3 + $0x8] sm:$0xff] %vm471_vm1, %v6104_v26  ;;  %472 = vst.msk [vmem:[#allocation3] sm:$0xff] %vm471_vm1, %v6104_v26 }
 0x4c2   : > { %5970 = vpow2.f32 %v2643_v56  ;;  %v2640_v57 = vmin.f32 %v2622_v7, 0.0  ;;  %v5042_v23 = vadd.f32 %v5041_v0, %v5040_v55  ;;  %vm2636_vm5 = vcmp.gt.f32.partialorder %v2622_v7, 0.0  ;;  %v2698_v55 = vpop.permute.xlu1 %2697  ;;  %474 = vst.msk [vmem:[#allocation3 + $0x10] sm:$0xff] %vm471_vm1, %v6104_v26  ;;  %475 = vst.msk [vmem:[#allocation3 + $0x18] sm:$0xff] %vm471_vm1, %v6104_v26 }
 0x4c3   : > { %v2377_v14 = vsel %vm2357_vm2, %v2347_v43, %v4840_v20  ;;  %v2679_v30 = vld [vmem:[#allocation6 + $0x40] sm:$0xff]  ;;  %v5628_v56 = vpack.c.bf16 %v2895_v47, %v2894_v4  ;;  %476 = vst.msk [vmem:[#allocation3 + $0x20] sm:$0xff] %vm471_vm1, %v6104_v26  ;;  %477 = vst.msk [vmem:[#allocation3 + $0x28] sm:$0xff] %vm471_vm1, %v6104_v26  ;;  %vm3074_vm2 = vcmask 130048  }
 0x4c4   : > { %v5969_v22 = vpop.eup %5968  ;;  %2381 = vst.msk [vmem:[#allocation6 + $0x50] sm:$0xff] %vm1523_vm7, %v2377_v14  ;;  %v2645_v53 = vmul.f32 1.442695, %v2640_v57  ;;  %v2627_v37 = vadd.f32 %v5042_v23, %v7580_v45  ;;  %v5043_v2 = vpop.f32.mrb[14].mxu1 }
 0x4c5   : > { %v4841_v39 = vadd.f32 -1.0, %v5969_v22  ;;  %v5044_v52 = vpop.f32.mrb[15].mxu1  ;;  %478 = vst.msk [vmem:[#allocation3 + $0x30] sm:$0xff] %vm471_vm1, %v6104_v26  ;;  %479 = vst.msk [vmem:[#allocation3 + $0x38] sm:$0xff] %vm471_vm1, %v6104_v26  ;;  %vm4633_vm1 = vcmask 651780  }
 0x4c6   : > { %5972 = vpow2.f32 %v2645_v53  ;;  %v2641_v13 = vmin.f32 %v2627_v37, 0.0  ;;  %v5045_v40 = vadd.f32 %v5044_v52, %v5043_v2  ;;  %vm2637_vm6 = vcmp.gt.f32.partialorder %v2627_v37, 0.0  ;;  %v2708_v57 = vpop.permute.xlu1 %2707 }
 0x4c7   : > { %v2378_v51 = vsel %vm2358_vm3, %v2352_v3, %v4841_v39  ;;  %v2680_v33 = vld [vmem:[#allocation6 + $0x48] sm:$0xff]  ;;  %vm480_vm3 = vcmask 244736  }
 0x4c8   : > { %2382 = vst.msk [vmem:[#allocation6 + $0x58] sm:$0xff] %vm1523_vm7, %v2378_v51  ;;  %v2647_v34 = vmul.f32 1.442695, %v2641_v13  ;;  %v2632_v38 = vadd.f32 %v5045_v40, %v7583_v28  ;;  %v5600_v6 = vpack.c.bf16 %v2680_v33, %v2679_v30  ;;  %v2664_v3 = vld [vmem:[%s8633_s20 + $0x8] sm:$0xff] }
 0x4c9   : > { %481 = vst.msk [vmem:[#allocation4] sm:$0xff] %vm480_vm3, %v6104_v26  ;;  %482 = vst.msk [vmem:[#allocation4 + $0x8] sm:$0xff] %vm480_vm3, %v6104_v26 }
 0x4ca   : > { %5974 = vpow2.f32 %v2647_v34  ;;  %v2642_v27 = vmin.f32 %v2632_v38, 0.0  ;;  %5601 = vmatprep.subr.bf16.mxu0 %v5600_v6  ;;  %vm2638_vm8 = vcmp.gt.f32.partialorder %v2632_v38, 0.0  ;;  %v2718_v33 = vpop.permute.xlu1 %2717  ;;  %483 = vst.msk [vmem:[#allocation4 + $0x10] sm:$0xff] %vm480_vm3, %v6104_v26  ;;  %484 = vst.msk [vmem:[#allocation4 + $0x18] sm:$0xff] %vm480_vm3, %v6104_v26  ;;  %vm4648_vm3 = vcmask 1048455  }
 0x4cb   : > { %5603 = vmatpush3.bf16.msra.mxu0 %v5600_v6  ;;  %v2681_v21 = vld [vmem:[#allocation6 + $0x50] sm:$0xff] }
 0x4cc   : > { %v5971_v45 = vpop.eup %5970  ;;  %v2649_v31 = vmul.f32 1.442695, %v2642_v27 }
 0x4cd   : > { %v4842_v59 = vadd.f32 -1.0, %v5971_v45 }
 0x4ce   : > { %5976 = vpow2.f32 %v2649_v31 }
 0x4cf   : > { %v2655_v60 = vsel %vm2635_vm4, %v2617_v25, %v4842_v59  ;;  %v2682_v46 = vld [vmem:[#allocation6 + $0x58] sm:$0xff]  ;;  %v2890_v25 = vld [vmem:[%s8634_s26 + $0x10] sm:$0xff]  ;;  %vm485_vm4 = vcmask 621936  }
 0x4d0   : > { %v5973_v1 = vpop.eup %5972  ;;  %2659 = vst.msk [vmem:[#allocation6 + $0x60] sm:$0xff] %vm1523_vm7, %v2655_v60  ;;  %v5604_v5 = vpack.c.bf16 %v2682_v46, %v2681_v21  ;;  %v5620_v42 = vpack.c.bf16 %v2891_v12, %v2890_v25 }
 0x4d1   : > { %v4843_v48 = vadd.f32 -1.0, %v5973_v1  ;;  %486 = vst.msk [vmem:[#allocation4] sm:$0xff] %vm485_vm4, %v6104_v26  ;;  %487 = vst.msk [vmem:[#allocation4 + $0x8] sm:$0xff] %vm485_vm4, %v6104_v26 }
 0x4d2   : > { %5605 = vmatprep.subr.bf16.mxu0 %v5604_v5  ;;  %5621 = vmatprep.subr.bf16.mxu1 %v5620_v42  ;;  %488 = vst.msk [vmem:[#allocation4 + $0x10] sm:$0xff] %vm485_vm4, %v6104_v26  ;;  %489 = vst.msk [vmem:[#allocation4 + $0x18] sm:$0xff] %vm485_vm4, %v6104_v26  ;;  %vm4738_vm4 = vcmask 24576  }
 0x4d3   : > { %v2656_v28 = vsel %vm2636_vm5, %v2622_v7, %v4843_v48  ;;  %5607 = vmatpush3.bf16.msra.mxu0 %v5604_v5  ;;  %5623 = vmatpush3.bf16.msra.mxu1 %v5620_v42  ;;  %v2703_v7 = vpop.permute.xlu0 %2702  ;;  %v2728_v48 = vpop.permute.xlu1 %2727 }
 0x4d4   : > { %v5975_v9 = vpop.eup %5974  ;;  %2660 = vst.msk [vmem:[#allocation6 + $0x68] sm:$0xff] %vm1523_vm7, %v2656_v28  ;;  %5625 = vmatprep.subr.bf16.mxu1 %v5624_v44 }
 0x4d5   : > { %v4844_v29 = vadd.f32 -1.0, %v5975_v9 }
 0x4d7   : > { %v2657_v54 = vsel %vm2637_vm6, %v2627_v37, %v4844_v29  ;;  %v2683_v43 = vld [vmem:[#allocation6 + $0x60] sm:$0xff]  ;;  %5627 = vmatpush3.bf16.msra.mxu1 %v5624_v44  ;;  %v2713_v20 = vpop.permute.xlu0 %2712 }
 0x4d8   : > { %v5977_v18 = vpop.eup %5976  ;;  %2661 = vst.msk [vmem:[#allocation6 + $0x70] sm:$0xff] %vm1523_vm7, %v2657_v54  ;;  %5629 = vmatprep.subr.bf16.mxu1 %v5628_v56 }
 0x4d9   : > { %v4845_v17 = vadd.f32 -1.0, %v5977_v18 }
 0x4db   : > { %v2658_v62 = vsel %vm2638_vm8, %v2632_v38, %v4845_v17  ;;  %v2684_v11 = vld [vmem:[#allocation6 + $0x68] sm:$0xff]  ;;  %5631 = vmatpush3.bf16.msra.mxu1 %v5628_v56  ;;  %v2723_v40 = vpop.permute.xlu0 %2722 }
 0x4dc   : > { %2662 = vst.msk [vmem:[#allocation6 + $0x78] sm:$0xff] %vm1523_vm7, %v2658_v62  ;;  %v5608_v50 = vpack.c.bf16 %v2684_v11, %v2683_v43 }
 0x4de   : > { %5609 = vmatprep.subr.bf16.mxu0 %v5608_v50 }
 0x4df   : > { %5611 = vmatpush3.bf16.msra.mxu0 %v5608_v50  ;;  %v2685_v15 = vld [vmem:[#allocation6 + $0x70] sm:$0xff]  ;;  %v2733_v46 = vpop.permute.xlu0 %2732 }
 0x4e3   : > { %v2686_v19 = vld [vmem:[#allocation6 + $0x78] sm:$0xff] }
 0x4e4   : > { %v5612_v8 = vpack.c.bf16 %v2686_v19, %v2685_v15 }
 0x4e6   : > { %5613 = vmatprep.subr.bf16.mxu0 %v5612_v8 }
 0x4e7   : > { %5615 = vmatpush3.bf16.msra.mxu0 %v5612_v8 }
 0x4ea   : > { %5382 = vmatmul.mubr.f32.vlgmr.msra.gmra.mrb[16].mxu0 %v2664_v3 }
 0x4eb   : > { %5384 = vmatprep.mubr.f32.mxu0 %v2665_v16 }
 0x4ee   : > { %5385 = vmatmul.mubr.f32.gmra.mrb[18].mxu0 %v2666_v58 }
 0x4ef   : > { %5387 = vmatprep.mubr.f32.mxu0 %v2667_v10 }
 0x4f2   : > { %5388 = vmatmul.mubr.f32.gmra.mrb[20].mxu0 %v2668_v61 }
 0x4f3   : > { %5390 = vmatprep.mubr.f32.mxu0 %v2669_v24 }
 0x4f6   : > { %5391 = vmatmul.mubr.f32.gmra.mrb[22].mxu0 %v2670_v49 }
 0x5bd   : > { %v5383_v0 = vpop.f32.mrb[16].mxu0 }
 0x5be   : > { %v2807_v23 = vadd.f32 %v5383_v0, %v2703_v7  ;;  %v2801_v14 = vpop.f32.mrb[17].mxu0 }
 0x5bf   : > { %v2802_v22 = vadd.f32 %v2801_v14, %v2698_v55 }
 0x5c0   : > { %v2849_v53 = vmin.f32 %v2807_v23, 0.0  ;;  %vm2841_vm10 = vcmp.gt.f32.partialorder %v2807_v23, 0.0 }
 0x5c1   : > { %v2848_v37 = vmin.f32 %v2802_v22, 0.0  ;;  %v5386_v2 = vpop.f32.mrb[18].mxu0  ;;  %vm2840_vm9 = vcmp.gt.f32.partialorder %v2802_v22, 0.0 }
 0x5c2   : > { %v2858_v39 = vmul.f32 1.442695, %v2849_v53  ;;  %v2817_v52 = vadd.f32 %v5386_v2, %v2713_v20  ;;  %v2811_v13 = vpop.f32.mrb[19].mxu0 }
 0x5c3   : > { %v2856_v51 = vmul.f32 1.442695, %v2848_v37  ;;  %v2812_v30 = vadd.f32 %v2811_v13, %v2708_v57 }
 0x5c4   : > { %5978 = vpow2.f32 %v2858_v39  ;;  %v2851_v34 = vmin.f32 %v2817_v52, 0.0  ;;  %vm2843_vm12 = vcmp.gt.f32.partialorder %v2817_v52, 0.0 }
 0x5c5   : > { %5980 = vpow2.f32 %v2856_v51  ;;  %v2850_v38 = vmin.f32 %v2812_v30, 0.0  ;;  %v5389_v6 = vpop.f32.mrb[20].mxu0  ;;  %vm2842_vm11 = vcmp.gt.f32.partialorder %v2812_v30, 0.0 }
 0x5c6   : > { %v2862_v27 = vmul.f32 1.442695, %v2851_v34  ;;  %v2827_v45 = vadd.f32 %v5389_v6, %v2723_v40  ;;  %v2821_v31 = vpop.f32.mrb[21].mxu0 }
 0x5c7   : > { %v2860_v59 = vmul.f32 1.442695, %v2850_v38  ;;  %v2822_v60 = vadd.f32 %v2821_v31, %v2718_v33 }
 0x5c8   : > { %5982 = vpow2.f32 %v2862_v27  ;;  %v2853_v21 = vmin.f32 %v2827_v45, 0.0  ;;  %vm2845_vm14 = vcmp.gt.f32.partialorder %v2827_v45, 0.0 }
 0x5c9   : > { %5984 = vpow2.f32 %v2860_v59  ;;  %v2852_v1 = vmin.f32 %v2822_v60, 0.0  ;;  %v5392_v5 = vpop.f32.mrb[22].mxu0  ;;  %vm2844_vm13 = vcmp.gt.f32.partialorder %v2822_v60, 0.0 }
 0x5ca   : > { %v2866_v28 = vmul.f32 1.442695, %v2853_v21  ;;  %v2837_v9 = vadd.f32 %v5392_v5, %v2733_v46  ;;  %v2831_v29 = vpop.f32.mrb[23].mxu0 }
 0x5cb   : > { %v2864_v54 = vmul.f32 1.442695, %v2852_v1  ;;  %v2832_v18 = vadd.f32 %v2831_v29, %v2728_v48 }
 0x5cc   : > { %5986 = vpow2.f32 %v2866_v28  ;;  %v2855_v17 = vmin.f32 %v2837_v9, 0.0  ;;  %vm2847_vm0 = vcmp.gt.f32.partialorder %v2837_v9, 0.0 }
 0x5cd   : > { %5988 = vpow2.f32 %v2864_v54  ;;  %v2854_v62 = vmin.f32 %v2832_v18, 0.0  ;;  %vm2846_vm15 = vcmp.gt.f32.partialorder %v2832_v18, 0.0 }
 0x5ce   : > { %v5979_v43 = vpop.eup %5978  ;;  %v2870_v11 = vmul.f32 1.442695, %v2855_v17 }
 0x5cf   : > { %v5981_v50 = vpop.eup %5980  ;;  %v4847_v15 = vadd.f32 -1.0, %v5979_v43  ;;  %v2868_v19 = vmul.f32 1.442695, %v2854_v62 }
 0x5d0   : > { %5990 = vpow2.f32 %v2870_v11  ;;  %v4846_v8 = vadd.f32 -1.0, %v5981_v50 }
 0x5d1   : > { %5992 = vpow2.f32 %v2868_v19  ;;  %v2881_v10 = vsel %vm2841_vm10, %v2807_v23, %v4847_v15  ;;  %vm4135_vm10 = vcmask 376048  }
 0x5d2   : > { %v5983_v3 = vpop.eup %5982  ;;  %v2880_v16 = vsel %vm2840_vm9, %v2802_v22, %v4846_v8 }
 0x5d3   : > { %v5985_v58 = vpop.eup %5984  ;;  %5409 = vmatprep.mubr.msk.f32.mxu1 %vm1523_vm7, %v2880_v16  ;;  %v4849_v61 = vadd.f32 -1.0, %v5983_v3 }
 0x5d4   : > { %5410 = vmatmul.mubr.msk.f32.vlgmr.msra.gmra.mrb[16].mxu1 %vm1523_vm7, %v2881_v10  ;;  %v4848_v24 = vadd.f32 -1.0, %v5985_v58 }
 0x5d5   : > { %v2883_v36 = vsel %vm2843_vm12, %v2817_v52, %v4849_v61 }
 0x5d6   : > { %v5987_v49 = vpop.eup %5986  ;;  %v2882_v32 = vsel %vm2842_vm11, %v2812_v30, %v4848_v24  ;;  %vm4612_vm11 = vcmask 122880  }
 0x5d7   : > { %v5989_v35 = vpop.eup %5988  ;;  %5412 = vmatprep.mubr.msk.f32.mxu1 %vm1523_vm7, %v2882_v32  ;;  %v4851_v25 = vadd.f32 -1.0, %v5987_v49 }
 0x5d8   : > { %5413 = vmatmul.mubr.msk.f32.gmra.mrb[18].mxu1 %vm1523_vm7, %v2883_v36  ;;  %v4850_v12 = vadd.f32 -1.0, %v5989_v35 }
 0x5d9   : > { %v2885_v44 = vsel %vm2845_vm14, %v2827_v45, %v4851_v25  ;;  %vm4618_vm14 = vcmask 255105  }
 0x5da   : > { %v5991_v42 = vpop.eup %5990  ;;  %v2884_v63 = vsel %vm2844_vm13, %v2822_v60, %v4850_v12  ;;  %vm6118_vm13 = vmmov 0  }
 0x5db   : > { %v5993_v41 = vpop.eup %5992  ;;  %5415 = vmatprep.mubr.msk.f32.mxu1 %vm1523_vm7, %v2884_v63  ;;  %v4853_v4 = vadd.f32 -1.0, %v5991_v42 }
 0x5dc   : > { %5416 = vmatmul.mubr.msk.f32.gmra.mrb[20].mxu1 %vm1523_vm7, %v2885_v44  ;;  %v4852_v47 = vadd.f32 -1.0, %v5993_v41 }
 0x5dd   : > { %v2887_v7 = vsel %vm2847_vm0, %v2837_v9, %v4853_v4  ;;  %vm4628_vm0 = vcmask 519555  }
 0x5de   : > { %v2886_v56 = vsel %vm2846_vm15, %v2832_v18, %v4852_v47  ;;  %vm4623_vm15 = vcmask 387330  }
 0x5df   : > { %5418 = vmatprep.mubr.msk.f32.mxu1 %vm1523_vm7, %v2886_v56 }
 0x5e0   : > { %5419 = vmatmul.mubr.msk.f32.gmra.mrb[22].mxu1 %vm1523_vm7, %v2887_v7  ;;  %vm3057_vm7 = vcmask 253048  }
 0x6a7   : > { %v5411_v55 = vpop.f32.mrb[16].mxu1 }
 0x6a8   : > { %3035 = vrot.lane.b32.xlu0 %v5411_v55, %s8635_s21  ;;  %v2986_v20 = vpop.f32.mrb[17].mxu1 }
 0x6a9   : > { %3033 = vrot.lane.b32.xlu1 %v2986_v20, %s8635_s21 }
 0x6ab   : > { %v5414_v0 = vpop.f32.mrb[18].mxu1 }
 0x6ac   : > { %3039 = vrot.lane.b32.xlu0 %v5414_v0, %s8635_s21  ;;  %v2996_v57 = vpop.f32.mrb[19].mxu1 }
 0x6ad   : > { %3037 = vrot.lane.b32.xlu1 %v2996_v57, %s8635_s21 }
 0x6af   : > { %v5417_v23 = vpop.f32.mrb[20].mxu1 }
 0x6b0   : > { %3043 = vrot.lane.b32.xlu0 %v5417_v23, %s8635_s21  ;;  %v3006_v14 = vpop.f32.mrb[21].mxu1 }
 0x6b1   : > { %3041 = vrot.lane.b32.xlu1 %v3006_v14, %s8635_s21 }
 0x6b3   : > { %v5420_v22 = vpop.f32.mrb[22].mxu1 }
 0x6b4   : > { %3047 = vrot.lane.b32.xlu0 %v5420_v22, %s8635_s21  ;;  %v3016_v53 = vpop.f32.mrb[23].mxu1 }
 0x6b5   : > { %3045 = vrot.lane.b32.xlu1 %v3016_v53, %s8635_s21  ;;  %s6116_s21 = smov 32  }
 0x71a   : > { %v3036_v37 = vpop.permute.xlu0 %3035 }
 0x71b   : > { %3059 = vst.msk [vmem:[#allocation3 + $0x8] sm:$0xff] %vm3057_vm7, %v3036_v37  ;;  %v3034_v2 = vpop.permute.xlu1 %3033 }
 0x71c   : > { %3058 = vst.msk [vmem:[#allocation3] sm:$0xff] %vm3057_vm7, %v3034_v2 }
 0x71e   : > { %v3040_v39 = vpop.permute.xlu0 %3039 }
 0x71f   : > { %3061 = vst.msk [vmem:[#allocation3 + $0x18] sm:$0xff] %vm3057_vm7, %v3040_v39  ;;  %v3038_v52 = vpop.permute.xlu1 %3037 }
 0x720   : > { %3060 = vst.msk [vmem:[#allocation3 + $0x10] sm:$0xff] %vm3057_vm7, %v3038_v52 }
 0x722   : > { %v3067_v13 = vld [vmem:[#allocation3 + $0x8] sm:$0xff]  ;;  %v3044_v40 = vpop.permute.xlu0 %3043 }
 0x723   : > { %v3066_v51 = vld [vmem:[#allocation3] sm:$0xff]  ;;  %3063 = vst.msk [vmem:[#allocation3 + $0x28] sm:$0xff] %vm3057_vm7, %v3044_v40  ;;  %3125 = vrot.lane.b32.xlu0 %v3067_v13, %s8626_s29  ;;  %v3042_v30 = vpop.permute.xlu1 %3041 }
 0x724   : > { %3076 = vst.msk [vmem:[#allocation7 + $0x8] sm:$0xff] %vm3074_vm2, %v3067_v13  ;;  %3123 = vrot.lane.b32.xlu1 %v3066_v51, %s8626_s29  ;;  %3075 = vst.msk [vmem:[#allocation7] sm:$0xff] %vm3074_vm2, %v3066_v51 }
 0x725   : > { %3062 = vst.msk [vmem:[#allocation3 + $0x20] sm:$0xff] %vm3057_vm7, %v3042_v30 }
 0x726   : > { %v7696_v33 = vld [vmem:[#allocation3 + $0x18] sm:$0xff]  ;;  %v3048_v34 = vpop.permute.xlu0 %3047 }
 0x727   : > { %v7698_v38 = vld [vmem:[#allocation3 + $0x10] sm:$0xff]  ;;  %3065 = vst.msk [vmem:[#allocation3 + $0x38] sm:$0xff] %vm3057_vm7, %v3048_v34  ;;  %3253 = vrot.lane.b32.xlu0 %v3067_v13, %s8582_s28  ;;  %v3046_v6 = vpop.permute.xlu1 %3045 }
 0x728   : > { %3078 = vst.msk [vmem:[#allocation7 + $0x18] sm:$0xff] %vm3074_vm2, %v7696_v33  ;;  %3251 = vrot.lane.b32.xlu1 %v3066_v51, %s8582_s28  ;;  %3077 = vst.msk [vmem:[#allocation7 + $0x10] sm:$0xff] %vm3074_vm2, %v7698_v38 }
 0x729   : > { %3064 = vst.msk [vmem:[#allocation3 + $0x30] sm:$0xff] %vm3057_vm7, %v3046_v6  ;;  %vm4638_vm7 = vcmask 784005  }
 0x72a   : > { %v7708_v27 = vld [vmem:[#allocation3 + $0x28] sm:$0xff] }
 0x72b   : > { %3189 = vrot.lane.b32.xlu0 %v3067_v13, %s8628_s4  ;;  %3080 = vst.msk [vmem:[#allocation7 + $0x28] sm:$0xff] %vm3074_vm2, %v7708_v27  ;;  %v3603_v28 = vld [vmem:[#allocation7] sm:$0xff]  ;;  %v3604_v9 = vld [vmem:[#allocation7 + $0x8] sm:$0xff] }
 0x72c   : > { %v7710_v45 = vld [vmem:[#allocation3 + $0x20] sm:$0xff]  ;;  %3187 = vrot.lane.b32.xlu1 %v3066_v51, %s8628_s4  ;;  %v5634_v17 = vpack.c.bf16 %v3604_v9, %v3603_v28 }
 0x72d   : > { %3079 = vst.msk [vmem:[#allocation7 + $0x20] sm:$0xff] %vm3074_vm2, %v7710_v45 }
 0x72e   : > { %v7718_v31 = vld [vmem:[#allocation3 + $0x38] sm:$0xff] }
 0x72f   : > { %3157 = vrot.lane.b32.xlu0 %v3067_v13, %s8576_s24  ;;  %3082 = vst.msk [vmem:[#allocation7 + $0x38] sm:$0xff] %vm3074_vm2, %v7718_v31  ;;  %v3605_v2 = vld [vmem:[#allocation7 + $0x10] sm:$0xff]  ;;  %v3606_v39 = vld [vmem:[#allocation7 + $0x18] sm:$0xff] }
 0x730   : > { %v7720_v59 = vld [vmem:[#allocation3 + $0x30] sm:$0xff]  ;;  %3155 = vrot.lane.b32.xlu1 %v3066_v51, %s8576_s24 }
 0x731   : > { %3081 = vst.msk [vmem:[#allocation7 + $0x30] sm:$0xff] %vm3074_vm2, %v7720_v59 }
 0x733   : > { %3093 = vrot.lane.b32.xlu0 %v3067_v13, %s8624_s6 }
 0x734   : > { %3091 = vrot.lane.b32.xlu1 %v3066_v51, %s8624_s6 }
 0x737   : > { %3285 = vrot.lane.b32.xlu0 %v3067_v13, %s8587_s1 }
 0x738   : > { %3283 = vrot.lane.b32.xlu1 %v3066_v51, %s8587_s1 }
 0x73b   : > { %3221 = vrot.lane.b32.xlu0 %v3067_v13, %s8580_s15 }
 0x73c   : > { %3219 = vrot.lane.b32.xlu1 %v3066_v51, %s8580_s15 }
 0x73f   : > { %3381 = vrot.lane.b32.xlu0 %v3067_v13, %s8603_s11 }
 0x740   : > { %3379 = vrot.lane.b32.xlu1 %v3066_v51, %s8603_s11 }
 0x743   : > { %3317 = vrot.lane.b32.xlu0 %v3067_v13, %s8591_s16 }
 0x744   : > { %3315 = vrot.lane.b32.xlu1 %v3066_v51, %s8591_s16 }
 0x747   : > { %3509 = vrot.lane.b32.xlu0 %v3067_v13, %s8590_s0 }
 0x748   : > { %3507 = vrot.lane.b32.xlu1 %v3066_v51, %s8590_s0 }
 0x74b   : > { %3445 = vrot.lane.b32.xlu0 %v3067_v13, %s8612_s7 }
 0x74c   : > { %3443 = vrot.lane.b32.xlu1 %v3066_v51, %s8612_s7 }
 0x74f   : > { %3413 = vrot.lane.b32.xlu0 %v3067_v13, %s8607_s9 }
 0x750   : > { %3411 = vrot.lane.b32.xlu1 %v3066_v51, %s8607_s9 }
 0x753   : > { %3349 = vrot.lane.b32.xlu0 %v3067_v13, %s8597_s30 }
 0x754   : > { %3347 = vrot.lane.b32.xlu1 %v3066_v51, %s8597_s30 }
 0x757   : > { %3541 = vrot.lane.b32.xlu0 %v3067_v13, %s8596_s17 }
 0x758   : > { %3539 = vrot.lane.b32.xlu1 %v3066_v51, %s8596_s17 }
 0x75b   : > { %3477 = vrot.lane.b32.xlu0 %v3067_v13, %s8630_s10 }
 0x75c   : > { %3475 = vrot.lane.b32.xlu1 %v3066_v51, %s8630_s10  ;;  %v5638_v51 = vpack.c.bf16 %v3606_v39, %v3605_v2 }
 0x75f   : > { %3129 = vrot.lane.b32.xlu0 %v7696_v33, %s8626_s29 }
 0x760   : > { %3127 = vrot.lane.b32.xlu1 %v7698_v38, %s8626_s29 }
 0x763   : > { %3257 = vrot.lane.b32.xlu0 %v7696_v33, %s8582_s28 }
 0x764   : > { %3255 = vrot.lane.b32.xlu1 %v7698_v38, %s8582_s28 }
 0x767   : > { %3193 = vrot.lane.b32.xlu0 %v7696_v33, %s8628_s4 }
 0x768   : > { %3191 = vrot.lane.b32.xlu1 %v7698_v38, %s8628_s4 }
 0x76b   : > { %3161 = vrot.lane.b32.xlu0 %v7696_v33, %s8576_s24 }
 0x76c   : > { %3159 = vrot.lane.b32.xlu1 %v7698_v38, %s8576_s24 }
 0x76f   : > { %3097 = vrot.lane.b32.xlu0 %v7696_v33, %s8624_s6 }
 0x770   : > { %3095 = vrot.lane.b32.xlu1 %v7698_v38, %s8624_s6 }
 0x773   : > { %3289 = vrot.lane.b32.xlu0 %v7696_v33, %s8587_s1 }
 0x774   : > { %3287 = vrot.lane.b32.xlu1 %v7698_v38, %s8587_s1 }
 0x777   : > { %3225 = vrot.lane.b32.xlu0 %v7696_v33, %s8580_s15 }
 0x778   : > { %3223 = vrot.lane.b32.xlu1 %v7698_v38, %s8580_s15 }
 0x77b   : > { %3385 = vrot.lane.b32.xlu0 %v7696_v33, %s8603_s11 }
 0x77c   : > { %3383 = vrot.lane.b32.xlu1 %v7698_v38, %s8603_s11 }
 0x77f   : > { %3321 = vrot.lane.b32.xlu0 %v7696_v33, %s8591_s16 }
 0x780   : > { %3319 = vrot.lane.b32.xlu1 %v7698_v38, %s8591_s16 }
 0x783   : > { %3513 = vrot.lane.b32.xlu0 %v7696_v33, %s8590_s0 }
 0x784   : > { %3511 = vrot.lane.b32.xlu1 %v7698_v38, %s8590_s0 }
 0x787   : > { %3449 = vrot.lane.b32.xlu0 %v7696_v33, %s8612_s7 }
 0x788   : > { %3447 = vrot.lane.b32.xlu1 %v7698_v38, %s8612_s7 }
 0x78b   : > { %3417 = vrot.lane.b32.xlu0 %v7696_v33, %s8607_s9 }
 0x78c   : > { %3415 = vrot.lane.b32.xlu1 %v7698_v38, %s8607_s9 }
 0x78f   : > { %3353 = vrot.lane.b32.xlu0 %v7696_v33, %s8597_s30 }
 0x790   : > { %3351 = vrot.lane.b32.xlu1 %v7698_v38, %s8597_s30 }
 0x793   : > { %3545 = vrot.lane.b32.xlu0 %v7696_v33, %s8596_s17 }
 0x794   : > { %3543 = vrot.lane.b32.xlu1 %v7698_v38, %s8596_s17 }
 0x795   : > { %v3126_v60 = vpop.permute.xlu0 %3125 }
 0x796   : > { %3148 = vst.msk [vmem:[#allocation7 + $0x88] sm:$0xff] %vm3074_vm2, %v3126_v60  ;;  %v3124_v21 = vpop.permute.xlu1 %3123 }
 0x797   : > { %3147 = vst.msk [vmem:[#allocation7 + $0x80] sm:$0xff] %vm3074_vm2, %v3124_v21  ;;  %3481 = vrot.lane.b32.xlu0 %v7696_v33, %s8630_s10 }
 0x798   : > { %3479 = vrot.lane.b32.xlu1 %v7698_v38, %s8630_s10 }
 0x799   : > { %v3254_v46 = vpop.permute.xlu0 %3253 }
 0x79a   : > { %3276 = vst.msk [vmem:[#allocation7 + $0x188] sm:$0xff] %vm3074_vm2, %v3254_v46  ;;  %v3252_v1 = vpop.permute.xlu1 %3251 }
 0x79b   : > { %3275 = vst.msk [vmem:[#allocation7 + $0x180] sm:$0xff] %vm3074_vm2, %v3252_v1  ;;  %3133 = vrot.lane.b32.xlu0 %v7708_v27, %s8626_s29 }
 0x79c   : > { %3131 = vrot.lane.b32.xlu1 %v7710_v45, %s8626_s29 }
 0x79d   : > { %v3190_v5 = vpop.permute.xlu0 %3189  ;;  %v3620_v48 = vld [vmem:[#allocation7 + $0x88] sm:$0xff] }
 0x79e   : > { %3212 = vst.msk [vmem:[#allocation7 + $0x108] sm:$0xff] %vm3074_vm2, %v3190_v5  ;;  %v3188_v29 = vpop.permute.xlu1 %3187  ;;  %v3619_v54 = vld [vmem:[#allocation7 + $0x80] sm:$0xff] }
 0x79f   : > { %3211 = vst.msk [vmem:[#allocation7 + $0x100] sm:$0xff] %vm3074_vm2, %v3188_v29  ;;  %3261 = vrot.lane.b32.xlu0 %v7708_v27, %s8582_s28  ;;  %v5632_v18 = vpack.c.bf16 %v3620_v48, %v3619_v54  ;;  %v3572_v48 = vld [vmem:[%s8636_s8 + $0x8] sm:$0xff] }
 0x7a0   : > { %3259 = vrot.lane.b32.xlu1 %v7710_v45, %s8582_s28  ;;  %3819 = vmatprep.mubr.f32.mxu1 %v3572_v48 }
 0x7a1   : > { %v3158_v62 = vpop.permute.xlu0 %3157  ;;  %5633 = vmatprep.subr.bf16.mxu1 %v5632_v18  ;;  %v3652_v43 = vld [vmem:[#allocation7 + $0x188] sm:$0xff]  ;;  %v3574_v18 = vld [vmem:[%s8636_s8 + $0x18] sm:$0xff] }
 0x7a2   : > { %3180 = vst.msk [vmem:[#allocation7 + $0xc8] sm:$0xff] %vm3074_vm2, %v3158_v62  ;;  %5635 = vmatpush3.bf16.msra.mxu1 %v5634_v17  ;;  %v3156_v11 = vpop.permute.xlu1 %3155  ;;  %v3651_v50 = vld [vmem:[#allocation7 + $0x180] sm:$0xff]  ;;  %3904 = vmatprep.mubr.f32.mxu0 %v3574_v18 }
 0x7a3   : > { %3179 = vst.msk [vmem:[#allocation7 + $0xc0] sm:$0xff] %vm3074_vm2, %v3156_v11  ;;  %3197 = vrot.lane.b32.xlu0 %v7708_v27, %s8628_s4  ;;  %v5664_v15 = vpack.c.bf16 %v3652_v43, %v3651_v50 }
 0x7a4   : > { %3195 = vrot.lane.b32.xlu1 %v7710_v45, %s8628_s4 }
 0x7a5   : > { %v3094_v19 = vpop.permute.xlu0 %3093  ;;  %5665 = vmatprep.subr.bf16.mxu0 %v5664_v15  ;;  %v3636_v8 = vld [vmem:[#allocation7 + $0x108] sm:$0xff] }
 0x7a6   : > { %3116 = vst.msk [vmem:[#allocation7 + $0x48] sm:$0xff] %vm3074_vm2, %v3094_v19  ;;  %v3092_v3 = vpop.permute.xlu1 %3091  ;;  %v3635_v16 = vld [vmem:[#allocation7 + $0x100] sm:$0xff] }
 0x7a7   : > { %3115 = vst.msk [vmem:[#allocation7 + $0x40] sm:$0xff] %vm3074_vm2, %v3092_v3  ;;  %3165 = vrot.lane.b32.xlu0 %v7708_v27, %s8576_s24  ;;  %v5666_v58 = vpack.c.bf16 %v3636_v8, %v3635_v16 }
 0x7a8   : > { %3163 = vrot.lane.b32.xlu1 %v7710_v45, %s8576_s24 }
 0x7a9   : > { %v3286_v10 = vpop.permute.xlu0 %3285  ;;  %5667 = vmatpush3.bf16.msra.mxu0 %v5666_v58 }
 0x7aa   : > { %3308 = vst.msk [vmem:[#allocation7 + $0x1c8] sm:$0xff] %vm3074_vm2, %v3286_v10  ;;  %v3284_v61 = vpop.permute.xlu1 %3283 }
 0x7ab   : > { %3307 = vst.msk [vmem:[#allocation7 + $0x1c0] sm:$0xff] %vm3074_vm2, %v3284_v61  ;;  %3101 = vrot.lane.b32.xlu0 %v7708_v27, %s8624_s6 }
 0x7ac   : > { %3099 = vrot.lane.b32.xlu1 %v7710_v45, %s8624_s6 }
 0x7ad   : > { %v3222_v24 = vpop.permute.xlu0 %3221 }
 0x7ae   : > { %3244 = vst.msk [vmem:[#allocation7 + $0x148] sm:$0xff] %vm3074_vm2, %v3222_v24  ;;  %v3220_v49 = vpop.permute.xlu1 %3219 }
 0x7af   : > { %3243 = vst.msk [vmem:[#allocation7 + $0x140] sm:$0xff] %vm3074_vm2, %v3220_v49  ;;  %3293 = vrot.lane.b32.xlu0 %v7708_v27, %s8587_s1 }
 0x7b0   : > { %3291 = vrot.lane.b32.xlu1 %v7710_v45, %s8587_s1 }
 0x7b1   : > { %v3382_v32 = vpop.permute.xlu0 %3381 }
 0x7b2   : > { %3404 = vst.msk [vmem:[#allocation7 + $0x288] sm:$0xff] %vm3074_vm2, %v3382_v32  ;;  %v3380_v35 = vpop.permute.xlu1 %3379 }
 0x7b3   : > { %3403 = vst.msk [vmem:[#allocation7 + $0x280] sm:$0xff] %vm3074_vm2, %v3380_v35  ;;  %3229 = vrot.lane.b32.xlu0 %v7708_v27, %s8580_s15 }
 0x7b4   : > { %3227 = vrot.lane.b32.xlu1 %v7710_v45, %s8580_s15 }
 0x7b5   : > { %v3318_v36 = vpop.permute.xlu0 %3317 }
 0x7b6   : > { %3340 = vst.msk [vmem:[#allocation7 + $0x208] sm:$0xff] %vm3074_vm2, %v3318_v36  ;;  %v3316_v25 = vpop.permute.xlu1 %3315 }
 0x7b7   : > { %3339 = vst.msk [vmem:[#allocation7 + $0x200] sm:$0xff] %vm3074_vm2, %v3316_v25  ;;  %3389 = vrot.lane.b32.xlu0 %v7708_v27, %s8603_s11 }
 0x7b8   : > { %3387 = vrot.lane.b32.xlu1 %v7710_v45, %s8603_s11 }
 0x7b9   : > { %v3510_v12 = vpop.permute.xlu0 %3509 }
 0x7ba   : > { %3532 = vst.msk [vmem:[#allocation7 + $0x388] sm:$0xff] %vm3074_vm2, %v3510_v12  ;;  %v3508_v42 = vpop.permute.xlu1 %3507 }
 0x7bb   : > { %3531 = vst.msk [vmem:[#allocation7 + $0x380] sm:$0xff] %vm3074_vm2, %v3508_v42  ;;  %3325 = vrot.lane.b32.xlu0 %v7708_v27, %s8591_s16 }
 0x7bc   : > { %3323 = vrot.lane.b32.xlu1 %v7710_v45, %s8591_s16 }
 0x7bd   : > { %v3446_v63 = vpop.permute.xlu0 %3445 }
 0x7be   : > { %3468 = vst.msk [vmem:[#allocation7 + $0x308] sm:$0xff] %vm3074_vm2, %v3446_v63  ;;  %v3444_v41 = vpop.permute.xlu1 %3443 }
 0x7bf   : > { %3467 = vst.msk [vmem:[#allocation7 + $0x300] sm:$0xff] %vm3074_vm2, %v3444_v41  ;;  %3517 = vrot.lane.b32.xlu0 %v7708_v27, %s8590_s0 }
 0x7c0   : > { %3515 = vrot.lane.b32.xlu1 %v7710_v45, %s8590_s0 }
 0x7c1   : > { %v3414_v44 = vpop.permute.xlu0 %3413 }
 0x7c2   : > { %3436 = vst.msk [vmem:[#allocation7 + $0x2c8] sm:$0xff] %vm3074_vm2, %v3414_v44  ;;  %v3412_v4 = vpop.permute.xlu1 %3411  ;;  %v3607_v44 = vld [vmem:[#allocation7 + $0x20] sm:$0xff] }
 0x7c3   : > { %3435 = vst.msk [vmem:[#allocation7 + $0x2c0] sm:$0xff] %vm3074_vm2, %v3412_v4  ;;  %3453 = vrot.lane.b32.xlu0 %v7708_v27, %s8612_s7 }
 0x7c4   : > { %3451 = vrot.lane.b32.xlu1 %v7710_v45, %s8612_s7 }
 0x7c5   : > { %v3350_v47 = vpop.permute.xlu0 %3349 }
 0x7c6   : > { %3372 = vst.msk [vmem:[#allocation7 + $0x248] sm:$0xff] %vm3074_vm2, %v3350_v47  ;;  %v3348_v56 = vpop.permute.xlu1 %3347 }
 0x7c7   : > { %3371 = vst.msk [vmem:[#allocation7 + $0x240] sm:$0xff] %vm3074_vm2, %v3348_v56  ;;  %3421 = vrot.lane.b32.xlu0 %v7708_v27, %s8607_s9 }
 0x7c8   : > { %3419 = vrot.lane.b32.xlu1 %v7710_v45, %s8607_s9 }
 0x7c9   : > { %v3542_v7 = vpop.permute.xlu0 %3541 }
 0x7ca   : > { %3564 = vst.msk [vmem:[#allocation7 + $0x3c8] sm:$0xff] %vm3074_vm2, %v3542_v7  ;;  %v3540_v55 = vpop.permute.xlu1 %3539 }
 0x7cb   : > { %3563 = vst.msk [vmem:[#allocation7 + $0x3c0] sm:$0xff] %vm3074_vm2, %v3540_v55  ;;  %3357 = vrot.lane.b32.xlu0 %v7708_v27, %s8597_s30 }
 0x7cc   : > { %3355 = vrot.lane.b32.xlu1 %v7710_v45, %s8597_s30 }
 0x7cd   : > { %v3478_v20 = vpop.permute.xlu0 %3477 }
 0x7ce   : > { %3500 = vst.msk [vmem:[#allocation7 + $0x348] sm:$0xff] %vm3074_vm2, %v3478_v20  ;;  %v3476_v0 = vpop.permute.xlu1 %3475 }
 0x7cf   : > { %3499 = vst.msk [vmem:[#allocation7 + $0x340] sm:$0xff] %vm3074_vm2, %v3476_v0  ;;  %3549 = vrot.lane.b32.xlu0 %v7708_v27, %s8596_s17 }
 0x7d0   : > { %3547 = vrot.lane.b32.xlu1 %v7710_v45, %s8596_s17 }
 0x7d1   : > { %v3130_v57 = vpop.permute.xlu0 %3129 }
 0x7d2   : > { %3150 = vst.msk [vmem:[#allocation7 + $0x98] sm:$0xff] %vm3074_vm2, %v3130_v57  ;;  %v3128_v23 = vpop.permute.xlu1 %3127 }
 0x7d3   : > { %3149 = vst.msk [vmem:[#allocation7 + $0x90] sm:$0xff] %vm3074_vm2, %v3128_v23  ;;  %3485 = vrot.lane.b32.xlu0 %v7708_v27, %s8630_s10 }
 0x7d4   : > { %3483 = vrot.lane.b32.xlu1 %v7710_v45, %s8630_s10 }
 0x7d5   : > { %v3258_v14 = vpop.permute.xlu0 %3257 }
 0x7d6   : > { %3278 = vst.msk [vmem:[#allocation7 + $0x198] sm:$0xff] %vm3074_vm2, %v3258_v14  ;;  %v3256_v22 = vpop.permute.xlu1 %3255 }
 0x7d7   : > { %3277 = vst.msk [vmem:[#allocation7 + $0x190] sm:$0xff] %vm3074_vm2, %v3256_v22  ;;  %3137 = vrot.lane.b32.xlu0 %v7718_v31, %s8626_s29 }
 0x7d8   : > { %3135 = vrot.lane.b32.xlu1 %v7720_v59, %s8626_s29 }
 0x7d9   : > { %v3194_v53 = vpop.permute.xlu0 %3193  ;;  %v3622_v37 = vld [vmem:[#allocation7 + $0x98] sm:$0xff] }
 0x7da   : > { %3214 = vst.msk [vmem:[#allocation7 + $0x118] sm:$0xff] %vm3074_vm2, %v3194_v53  ;;  %v3192_v52 = vpop.permute.xlu1 %3191  ;;  %v3621_v13 = vld [vmem:[#allocation7 + $0x90] sm:$0xff] }
 0x7db   : > { %3213 = vst.msk [vmem:[#allocation7 + $0x110] sm:$0xff] %vm3074_vm2, %v3192_v52  ;;  %3265 = vrot.lane.b32.xlu0 %v7718_v31, %s8582_s28  ;;  %v5636_v40 = vpack.c.bf16 %v3622_v37, %v3621_v13 }
 0x7dc   : > { %3263 = vrot.lane.b32.xlu1 %v7720_v59, %s8582_s28 }
 0x7dd   : > { %v3162_v30 = vpop.permute.xlu0 %3161  ;;  %5637 = vmatprep.subr.bf16.mxu1 %v5636_v40  ;;  %v3654_v33 = vld [vmem:[#allocation7 + $0x198] sm:$0xff] }
 0x7de   : > { %3182 = vst.msk [vmem:[#allocation7 + $0xd8] sm:$0xff] %vm3074_vm2, %v3162_v30  ;;  %5639 = vmatpush3.bf16.msra.mxu1 %v5638_v51  ;;  %v3160_v34 = vpop.permute.xlu1 %3159  ;;  %v3653_v38 = vld [vmem:[#allocation7 + $0x190] sm:$0xff] }
 0x7df   : > { %3181 = vst.msk [vmem:[#allocation7 + $0xd0] sm:$0xff] %vm3074_vm2, %v3160_v34  ;;  %3201 = vrot.lane.b32.xlu0 %v7718_v31, %s8628_s4  ;;  %v5668_v6 = vpack.c.bf16 %v3654_v33, %v3653_v38 }
 0x7e0   : > { %3199 = vrot.lane.b32.xlu1 %v7720_v59, %s8628_s4 }
 0x7e1   : > { %v3098_v27 = vpop.permute.xlu0 %3097  ;;  %5669 = vmatprep.subr.bf16.mxu0 %v5668_v6  ;;  %v3638_v45 = vld [vmem:[#allocation7 + $0x118] sm:$0xff] }
 0x7e2   : > { %3118 = vst.msk [vmem:[#allocation7 + $0x58] sm:$0xff] %vm3074_vm2, %v3098_v27  ;;  %v3096_v60 = vpop.permute.xlu1 %3095  ;;  %v3637_v21 = vld [vmem:[#allocation7 + $0x110] sm:$0xff] }
 0x7e3   : > { %3117 = vst.msk [vmem:[#allocation7 + $0x50] sm:$0xff] %vm3074_vm2, %v3096_v60  ;;  %3169 = vrot.lane.b32.xlu0 %v7718_v31, %s8576_s24  ;;  %v5670_v46 = vpack.c.bf16 %v3638_v45, %v3637_v21 }
 0x7e4   : > { %3167 = vrot.lane.b32.xlu1 %v7720_v59, %s8576_s24  ;;  %s8645_s24 = sld [smem:[#allocation17_spill]] }
 0x7e5   : > { %v3290_v1 = vpop.permute.xlu0 %3289  ;;  %5671 = vmatpush3.bf16.msra.mxu0 %v5670_v46 }
 0x7e6   : > { %3310 = vst.msk [vmem:[#allocation7 + $0x1d8] sm:$0xff] %vm3074_vm2, %v3290_v1  ;;  %v3288_v5 = vpop.permute.xlu1 %3287 }
 0x7e7   : > { %3309 = vst.msk [vmem:[#allocation7 + $0x1d0] sm:$0xff] %vm3074_vm2, %v3288_v5  ;;  %3105 = vrot.lane.b32.xlu0 %v7718_v31, %s8624_s6 }
 0x7e8   : > { %3103 = vrot.lane.b32.xlu1 %v7720_v59, %s8624_s6  ;;  %s8644_s6 = sld [smem:[#allocation14_spill]] }
 0x7e9   : > { %v3226_v28 = vpop.permute.xlu0 %3225 }
 0x7ea   : > { %3246 = vst.msk [vmem:[#allocation7 + $0x158] sm:$0xff] %vm3074_vm2, %v3226_v28  ;;  %v3224_v9 = vpop.permute.xlu1 %3223 }
 0x7eb   : > { %3245 = vst.msk [vmem:[#allocation7 + $0x150] sm:$0xff] %vm3074_vm2, %v3224_v9  ;;  %3297 = vrot.lane.b32.xlu0 %v7718_v31, %s8587_s1 }
 0x7ec   : > { %3295 = vrot.lane.b32.xlu1 %v7720_v59, %s8587_s1 }
 0x7ed   : > { %v3386_v29 = vpop.permute.xlu0 %3385 }
 0x7ee   : > { %3406 = vst.msk [vmem:[#allocation7 + $0x298] sm:$0xff] %vm3074_vm2, %v3386_v29  ;;  %v3384_v54 = vpop.permute.xlu1 %3383 }
 0x7ef   : > { %3405 = vst.msk [vmem:[#allocation7 + $0x290] sm:$0xff] %vm3074_vm2, %v3384_v54  ;;  %3233 = vrot.lane.b32.xlu0 %v7718_v31, %s8580_s15 }
 0x7f0   : > { %3231 = vrot.lane.b32.xlu1 %v7720_v59, %s8580_s15  ;;  %s6108_s15 = smov 96  }
 0x7f1   : > { %v3322_v17 = vpop.permute.xlu0 %3321 }
 0x7f2   : > { %3342 = vst.msk [vmem:[#allocation7 + $0x218] sm:$0xff] %vm3074_vm2, %v3322_v17  ;;  %v3320_v62 = vpop.permute.xlu1 %3319 }
 0x7f3   : > { %3341 = vst.msk [vmem:[#allocation7 + $0x210] sm:$0xff] %vm3074_vm2, %v3320_v62  ;;  %3393 = vrot.lane.b32.xlu0 %v7718_v31, %s8603_s11 }
 0x7f4   : > { %3391 = vrot.lane.b32.xlu1 %v7720_v59, %s8603_s11 }
 0x7f5   : > { %v3514_v43 = vpop.permute.xlu0 %3513 }
 0x7f6   : > { %3534 = vst.msk [vmem:[#allocation7 + $0x398] sm:$0xff] %vm3074_vm2, %v3514_v43  ;;  %v3512_v11 = vpop.permute.xlu1 %3511 }
 0x7f7   : > { %3533 = vst.msk [vmem:[#allocation7 + $0x390] sm:$0xff] %vm3074_vm2, %v3512_v11  ;;  %3329 = vrot.lane.b32.xlu0 %v7718_v31, %s8591_s16  ;;  %v3609_v11 = vld [vmem:[#allocation7 + $0x30] sm:$0xff] }
 0x7f8   : > { %3327 = vrot.lane.b32.xlu1 %v7720_v59, %s8591_s16 }
 0x7f9   : > { %v3450_v50 = vpop.permute.xlu0 %3449 }
 0x7fa   : > { %3470 = vst.msk [vmem:[#allocation7 + $0x318] sm:$0xff] %vm3074_vm2, %v3450_v50  ;;  %v3448_v15 = vpop.permute.xlu1 %3447  ;;  %v3610_v50 = vld [vmem:[#allocation7 + $0x38] sm:$0xff] }
 0x7fb   : > { %3469 = vst.msk [vmem:[#allocation7 + $0x310] sm:$0xff] %vm3074_vm2, %v3448_v15  ;;  %3521 = vrot.lane.b32.xlu0 %v7718_v31, %s8590_s0 }
 0x7fc   : > { %3519 = vrot.lane.b32.xlu1 %v7720_v59, %s8590_s0 }
 0x7fd   : > { %v3418_v19 = vpop.permute.xlu0 %3417 }
 0x7fe   : > { %3438 = vst.msk [vmem:[#allocation7 + $0x2d8] sm:$0xff] %vm3074_vm2, %v3418_v19  ;;  %v3416_v8 = vpop.permute.xlu1 %3415 }
 0x7ff   : > { %3437 = vst.msk [vmem:[#allocation7 + $0x2d0] sm:$0xff] %vm3074_vm2, %v3416_v8  ;;  %3457 = vrot.lane.b32.xlu0 %v7718_v31, %s8612_s7  ;;  %v3627_v8 = vld [vmem:[#allocation7 + $0xc0] sm:$0xff] }
 0x800   : > { %3455 = vrot.lane.b32.xlu1 %v7720_v59, %s8612_s7 }
 0x801   : > { %v3354_v3 = vpop.permute.xlu0 %3353 }
 0x802   : > { %3374 = vst.msk [vmem:[#allocation7 + $0x258] sm:$0xff] %vm3074_vm2, %v3354_v3  ;;  %v3352_v16 = vpop.permute.xlu1 %3351  ;;  %v3628_v3 = vld [vmem:[#allocation7 + $0xc8] sm:$0xff] }
 0x803   : > { %3373 = vst.msk [vmem:[#allocation7 + $0x250] sm:$0xff] %vm3074_vm2, %v3352_v16  ;;  %3425 = vrot.lane.b32.xlu0 %v7718_v31, %s8607_s9 }
 0x804   : > { %3423 = vrot.lane.b32.xlu1 %v7720_v59, %s8607_s9  ;;  %s6106_s9 = smov 30  }
 0x805   : > { %v3546_v58 = vpop.permute.xlu0 %3545 }
 0x806   : > { %3566 = vst.msk [vmem:[#allocation7 + $0x3d8] sm:$0xff] %vm3074_vm2, %v3546_v58  ;;  %v3544_v10 = vpop.permute.xlu1 %3543  ;;  %v5646_v58 = vpack.c.bf16 %v3610_v50, %v3609_v11  ;;  %v3668_v11 = vld [vmem:[#allocation7 + $0x208] sm:$0xff] }
 0x807   : > { %3565 = vst.msk [vmem:[#allocation7 + $0x3d0] sm:$0xff] %vm3074_vm2, %v3544_v10  ;;  %3361 = vrot.lane.b32.xlu0 %v7718_v31, %s8597_s30 }
 0x808   : > { %3359 = vrot.lane.b32.xlu1 %v7720_v59, %s8597_s30  ;;  %s8637_s30 = sld [smem:[#allocation40_spill]] }
 0x809   : > { %v3482_v61 = vpop.permute.xlu0 %3481 }
 0x80a   : > { %3502 = vst.msk [vmem:[#allocation7 + $0x358] sm:$0xff] %vm3074_vm2, %v3482_v61  ;;  %v3480_v24 = vpop.permute.xlu1 %3479  ;;  %v5648_v61 = vpack.c.bf16 %v3628_v3, %v3627_v8  ;;  %v3667_v3 = vld [vmem:[#allocation7 + $0x200] sm:$0xff] }
 0x80b   : > { %3501 = vst.msk [vmem:[#allocation7 + $0x350] sm:$0xff] %vm3074_vm2, %v3480_v24  ;;  %3553 = vrot.lane.b32.xlu0 %v7718_v31, %s8596_s17 }
 0x80c   : > { %3551 = vrot.lane.b32.xlu1 %v7720_v59, %s8596_s17  ;;  %s6110_s17 = smov 92  }
 0x80d   : > { %v3134_v49 = vpop.permute.xlu0 %3133 }
 0x80e   : > { %3152 = vst.msk [vmem:[#allocation7 + $0xa8] sm:$0xff] %vm3074_vm2, %v3134_v49  ;;  %v3132_v32 = vpop.permute.xlu1 %3131  ;;  %s8638_s12 = smov %s8637_s30  ;;  %v3732_v35 = vld [vmem:[%s8637_s30 + $0x8] sm:$0xff]  ;;  %v3611_v49 = vld [vmem:[#allocation7 + $0x40] sm:$0xff]  ;;  %s6107_s30 = smov 80  }
 0x80f   : > { %3151 = vst.msk [vmem:[#allocation7 + $0xa0] sm:$0xff] %vm3074_vm2, %v3132_v32  ;;  %3489 = vrot.lane.b32.xlu0 %v7718_v31, %s8630_s10  ;;  %v3731_v25 = vld [vmem:[%s8638_s12] sm:$0xff]  ;;  %v3734_v31 = vld [vmem:[%s8638_s12 + $0x18] sm:$0xff]  ;;  %v3733_v63 = vld [vmem:[%s8638_s12 + $0x10] sm:$0xff] }
 0x810   : > { %3487 = vrot.lane.b32.xlu1 %v7720_v59, %s8630_s10  ;;  %v3608_v59 = vld [vmem:[#allocation7 + $0x28] sm:$0xff]  ;;  %s6112_s10 = smov 88  }
 0x811   : > { %v3262_v36 = vpop.permute.xlu0 %3261  ;;  %v5642_v7 = vpack.c.bf16 %v3608_v59, %v3607_v44  ;;  %v3612_v32 = vld [vmem:[#allocation7 + $0x48] sm:$0xff] }
 0x812   : > { %3280 = vst.msk [vmem:[#allocation7 + $0x1a8] sm:$0xff] %vm3074_vm2, %v3262_v36  ;;  %v3260_v12 = vpop.permute.xlu1 %3259  ;;  %v5650_v59 = vpack.c.bf16 %v3612_v32, %v3611_v49  ;;  %v3716_v32 = vld [vmem:[#allocation7 + $0x388] sm:$0xff] }
 0x813   : > { %3279 = vst.msk [vmem:[#allocation7 + $0x1a0] sm:$0xff] %vm3074_vm2, %v3260_v12  ;;  %3742 = vperm.xlu0 %5936, %v3732_v35   ;;  %v3630_v12 = vld [vmem:[#allocation7 + $0xd8] sm:$0xff] }
 0x814   : > { %3737 = vperm.xlu1 %5937, %v3731_v25   ;;  %v3629_v25 = vld [vmem:[#allocation7 + $0xd0] sm:$0xff] }
 0x815   : > { %v3198_v42 = vpop.permute.xlu0 %3197  ;;  %v3624_v41 = vld [vmem:[#allocation7 + $0xa8] sm:$0xff]  ;;  %v5652_v44 = vpack.c.bf16 %v3630_v12, %v3629_v25  ;;  %v3579_v25 = vld [vmem:[%s8636_s8 + $0x40] sm:$0xff] }
 0x816   : > { %3216 = vst.msk [vmem:[#allocation7 + $0x128] sm:$0xff] %vm3074_vm2, %v3198_v42  ;;  %v3196_v4 = vpop.permute.xlu1 %3195  ;;  %v3623_v47 = vld [vmem:[#allocation7 + $0xa0] sm:$0xff] }
 0x817   : > { %3215 = vst.msk [vmem:[#allocation7 + $0x120] sm:$0xff] %vm3074_vm2, %v3196_v4  ;;  %3752 = vperm.xlu0 %5936, %v3734_v31   ;;  %v5640_v56 = vpack.c.bf16 %v3624_v41, %v3623_v47  ;;  %v3659_v42 = vld [vmem:[#allocation7 + $0x1c0] sm:$0xff]  ;;  %v3613_v47 = vld [vmem:[#allocation7 + $0x50] sm:$0xff] }
 0x818   : > { %3747 = vperm.xlu1 %5937, %v3733_v63   ;;  %v3660_v63 = vld [vmem:[#allocation7 + $0x1c8] sm:$0xff]  ;;  %v3715_v12 = vld [vmem:[#allocation7 + $0x380] sm:$0xff] }
 0x819   : > { %v3166_v55 = vpop.permute.xlu0 %3165  ;;  %5641 = vmatprep.subr.bf16.mxu1 %v5640_v56  ;;  %v3656_v20 = vld [vmem:[#allocation7 + $0x1a8] sm:$0xff]  ;;  %v3614_v56 = vld [vmem:[#allocation7 + $0x58] sm:$0xff] }
 0x81a   : > { %3184 = vst.msk [vmem:[#allocation7 + $0xe8] sm:$0xff] %vm3074_vm2, %v3166_v55  ;;  %5643 = vmatpush3.bf16.msra.mxu1 %v5642_v7  ;;  %v3164_v0 = vpop.permute.xlu1 %3163  ;;  %v3655_v57 = vld [vmem:[#allocation7 + $0x1a0] sm:$0xff] }
 0x81b   : > { %3183 = vst.msk [vmem:[#allocation7 + $0xe0] sm:$0xff] %vm3074_vm2, %v3164_v0  ;;  %v5672_v23 = vpack.c.bf16 %v3656_v20, %v3655_v57 }
 0x81d   : > { %v3102_v14 = vpop.permute.xlu0 %3101  ;;  %5673 = vmatprep.subr.bf16.mxu0 %v5672_v23  ;;  %v3640_v22 = vld [vmem:[#allocation7 + $0x128] sm:$0xff]  ;;  %v5654_v23 = vpack.c.bf16 %v3614_v56, %v3613_v47 }
 0x81e   : > { %3120 = vst.msk [vmem:[#allocation7 + $0x68] sm:$0xff] %vm3074_vm2, %v3102_v14  ;;  %v3100_v53 = vpop.permute.xlu1 %3099  ;;  %v3639_v37 = vld [vmem:[#allocation7 + $0x120] sm:$0xff]  ;;  %v5680_v14 = vpack.c.bf16 %v3660_v63, %v3659_v42  ;;  %v3669_v63 = vld [vmem:[#allocation7 + $0x210] sm:$0xff] }
 0x81f   : > { %3119 = vst.msk [vmem:[#allocation7 + $0x60] sm:$0xff] %vm3074_vm2, %v3100_v53  ;;  %v5674_v2 = vpack.c.bf16 %v3640_v22, %v3639_v37  ;;  %v3643_v22 = vld [vmem:[#allocation7 + $0x140] sm:$0xff]  ;;  %v3644_v53 = vld [vmem:[#allocation7 + $0x148] sm:$0xff]  ;;  %v3662_v37 = vld [vmem:[#allocation7 + $0x1d8] sm:$0xff] }
 0x821   : > { %v3294_v39 = vpop.permute.xlu0 %3293  ;;  %5675 = vmatpush3.bf16.msra.mxu0 %v5674_v2  ;;  %v3632_v0 = vld [vmem:[#allocation7 + $0xe8] sm:$0xff] }
 0x822   : > { %3312 = vst.msk [vmem:[#allocation7 + $0x1e8] sm:$0xff] %vm3074_vm2, %v3294_v39  ;;  %v3292_v52 = vpop.permute.xlu1 %3291  ;;  %v3631_v20 = vld [vmem:[#allocation7 + $0xe0] sm:$0xff] }
 0x823   : > { %3311 = vst.msk [vmem:[#allocation7 + $0x1e0] sm:$0xff] %vm3074_vm2, %v3292_v52  ;;  %v5656_v39 = vpack.c.bf16 %v3632_v0, %v3631_v20  ;;  %v3700_v20 = vld [vmem:[#allocation7 + $0x308] sm:$0xff] }
 0x825   : > { %v3230_v13 = vpop.permute.xlu0 %3229 }
 0x826   : > { %3248 = vst.msk [vmem:[#allocation7 + $0x168] sm:$0xff] %vm3074_vm2, %v3230_v13  ;;  %v3228_v40 = vpop.permute.xlu1 %3227  ;;  %v3615_v52 = vld [vmem:[#allocation7 + $0x60] sm:$0xff]  ;;  %v3616_v13 = vld [vmem:[#allocation7 + $0x68] sm:$0xff] }
 0x827   : > { %3247 = vst.msk [vmem:[#allocation7 + $0x160] sm:$0xff] %vm3074_vm2, %v3228_v40  ;;  %v3661_v40 = vld [vmem:[#allocation7 + $0x1d0] sm:$0xff] }
 0x829   : > { %v3390_v51 = vpop.permute.xlu0 %3389 }
 0x82a   : > { %3408 = vst.msk [vmem:[#allocation7 + $0x2a8] sm:$0xff] %vm3074_vm2, %v3390_v51  ;;  %v3388_v30 = vpop.permute.xlu1 %3387 }
 0x82b   : > { %3407 = vst.msk [vmem:[#allocation7 + $0x2a0] sm:$0xff] %vm3074_vm2, %v3388_v30 }
 0x82d   : > { %v3326_v33 = vpop.permute.xlu0 %3325 }
 0x82e   : > { %3344 = vst.msk [vmem:[#allocation7 + $0x228] sm:$0xff] %vm3074_vm2, %v3326_v33  ;;  %v3324_v34 = vpop.permute.xlu1 %3323 }
 0x82f   : > { %3343 = vst.msk [vmem:[#allocation7 + $0x220] sm:$0xff] %vm3074_vm2, %v3324_v34  ;;  %v5682_v34 = vpack.c.bf16 %v3644_v53, %v3643_v22  ;;  %v3718_v22 = vld [vmem:[#allocation7 + $0x398] sm:$0xff] }
 0x831   : > { %v3518_v38 = vpop.permute.xlu0 %3517  ;;  %v3688_v56 = vld [vmem:[#allocation7 + $0x2a8] sm:$0xff] }
 0x832   : > { %3536 = vst.msk [vmem:[#allocation7 + $0x3a8] sm:$0xff] %vm3074_vm2, %v3518_v38  ;;  %v3516_v6 = vpop.permute.xlu1 %3515  ;;  %v5658_v38 = vpack.c.bf16 %v3616_v13, %v3615_v52  ;;  %v3687_v47 = vld [vmem:[#allocation7 + $0x2a0] sm:$0xff]  ;;  %v3717_v52 = vld [vmem:[#allocation7 + $0x390] sm:$0xff] }
 0x833   : > { %3535 = vst.msk [vmem:[#allocation7 + $0x3a0] sm:$0xff] %vm3074_vm2, %v3516_v6  ;;  %v5684_v6 = vpack.c.bf16 %v3662_v37, %v3661_v40  ;;  %v5704_v37 = vpack.c.bf16 %v3688_v56, %v3687_v47  ;;  %v3587_v40 = vld [vmem:[%s8636_s8 + $0x80] sm:$0xff] }
 0x835   : > { %v3454_v27 = vpop.permute.xlu0 %3453 }
 0x836   : > { %3472 = vst.msk [vmem:[#allocation7 + $0x328] sm:$0xff] %vm3074_vm2, %v3454_v27  ;;  %v3452_v45 = vpop.permute.xlu1 %3451  ;;  %v3645_v27 = vld [vmem:[#allocation7 + $0x150] sm:$0xff] }
 0x837   : > { %3471 = vst.msk [vmem:[#allocation7 + $0x320] sm:$0xff] %vm3074_vm2, %v3452_v45  ;;  %v3646_v45 = vld [vmem:[#allocation7 + $0x158] sm:$0xff] }
 0x839   : > { %v3422_v60 = vpop.permute.xlu0 %3421 }
 0x83a   : > { %3440 = vst.msk [vmem:[#allocation7 + $0x2e8] sm:$0xff] %vm3074_vm2, %v3422_v60  ;;  %v3420_v21 = vpop.permute.xlu1 %3419 }
 0x83b   : > { %3439 = vst.msk [vmem:[#allocation7 + $0x2e0] sm:$0xff] %vm3074_vm2, %v3420_v21 }
 0x83d   : > { %v3358_v46 = vpop.permute.xlu0 %3357 }
 0x83e   : > { %3376 = vst.msk [vmem:[#allocation7 + $0x268] sm:$0xff] %vm3074_vm2, %v3358_v46  ;;  %v3356_v1 = vpop.permute.xlu1 %3355 }
 0x83f   : > { %3375 = vst.msk [vmem:[#allocation7 + $0x260] sm:$0xff] %vm3074_vm2, %v3356_v1  ;;  %v3663_v1 = vld [vmem:[#allocation7 + $0x1e0] sm:$0xff] }
 0x841   : > { %v3550_v5 = vpop.permute.xlu0 %3549 }
 0x842   : > { %3568 = vst.msk [vmem:[#allocation7 + $0x3e8] sm:$0xff] %vm3074_vm2, %v3550_v5  ;;  %v3548_v48 = vpop.permute.xlu1 %3547  ;;  %v3664_v5 = vld [vmem:[#allocation7 + $0x1e8] sm:$0xff] }
 0x843   : > { %3567 = vst.msk [vmem:[#allocation7 + $0x3e0] sm:$0xff] %vm3074_vm2, %v3548_v48 }
 0x845   : > { %v3486_v28 = vpop.permute.xlu0 %3485 }
 0x846   : > { %3504 = vst.msk [vmem:[#allocation7 + $0x368] sm:$0xff] %vm3074_vm2, %v3486_v28  ;;  %v3484_v9 = vpop.permute.xlu1 %3483 }
 0x847   : > { %3503 = vst.msk [vmem:[#allocation7 + $0x360] sm:$0xff] %vm3074_vm2, %v3484_v9  ;;  %v3683_v9 = vld [vmem:[#allocation7 + $0x280] sm:$0xff] }
 0x849   : > { %v3138_v29 = vpop.permute.xlu0 %3137 }
 0x84a   : > { %3154 = vst.msk [vmem:[#allocation7 + $0xb8] sm:$0xff] %vm3074_vm2, %v3138_v29  ;;  %v3136_v54 = vpop.permute.xlu1 %3135  ;;  %v3684_v29 = vld [vmem:[#allocation7 + $0x288] sm:$0xff] }
 0x84b   : > { %3153 = vst.msk [vmem:[#allocation7 + $0xb0] sm:$0xff] %vm3074_vm2, %v3136_v54  ;;  %v5686_v54 = vpack.c.bf16 %v3646_v45, %v3645_v27  ;;  %v5732_v27 = vpack.c.bf16 %v3718_v22, %v3717_v52  ;;  %v3581_v45 = vld [vmem:[%s8636_s8 + $0x50] sm:$0xff] }
 0x84d   : > { %v3266_v18 = vpop.permute.xlu0 %3265 }
 0x84e   : > { %3282 = vst.msk [vmem:[#allocation7 + $0x1b8] sm:$0xff] %vm3074_vm2, %v3266_v18  ;;  %v3264_v17 = vpop.permute.xlu1 %3263 }
 0x84f   : > { %3281 = vst.msk [vmem:[#allocation7 + $0x1b0] sm:$0xff] %vm3074_vm2, %v3264_v17  ;;  %v5688_v17 = vpack.c.bf16 %v3664_v5, %v3663_v1 }
 0x851   : > { %v3202_v62 = vpop.permute.xlu0 %3201  ;;  %v3626_v43 = vld [vmem:[#allocation7 + $0xb8] sm:$0xff] }
 0x852   : > { %3218 = vst.msk [vmem:[#allocation7 + $0x138] sm:$0xff] %vm3074_vm2, %v3202_v62  ;;  %v3200_v15 = vpop.permute.xlu1 %3199  ;;  %v3625_v19 = vld [vmem:[#allocation7 + $0xb0] sm:$0xff]  ;;  %v3647_v62 = vld [vmem:[#allocation7 + $0x160] sm:$0xff] }
 0x853   : > { %3217 = vst.msk [vmem:[#allocation7 + $0x130] sm:$0xff] %vm3074_vm2, %v3200_v15  ;;  %v5644_v16 = vpack.c.bf16 %v3626_v43, %v3625_v19  ;;  %v3648_v43 = vld [vmem:[#allocation7 + $0x168] sm:$0xff]  ;;  %v5696_v15 = vpack.c.bf16 %v3684_v29, %v3683_v9  ;;  %v3571_v19 = vld [vmem:[%s8636_s8] sm:$0xff] }
 0x854   : > { %v3720_v9 = vld [vmem:[#allocation7 + $0x3a8] sm:$0xff] }
 0x855   : > { %v3170_v10 = vpop.permute.xlu0 %3169  ;;  %5645 = vmatprep.subr.bf16.mxu1 %v5644_v16  ;;  %v3658_v24 = vld [vmem:[#allocation7 + $0x1b8] sm:$0xff] }
 0x856   : > { %3186 = vst.msk [vmem:[#allocation7 + $0xf8] sm:$0xff] %vm3074_vm2, %v3170_v10  ;;  %5647 = vmatpush3.bf16.msra.mxu1 %v5646_v58  ;;  %v3168_v35 = vpop.permute.xlu1 %3167  ;;  %v3657_v36 = vld [vmem:[#allocation7 + $0x1b0] sm:$0xff] }
 0x857   : > { %3185 = vst.msk [vmem:[#allocation7 + $0xf0] sm:$0xff] %vm3074_vm2, %v3168_v35  ;;  %5649 = vmatprep.subr.bf16.mxu1 %v5648_v61  ;;  %v5676_v31 = vpack.c.bf16 %v3658_v24, %v3657_v36  ;;  %v3685_v10 = vld [vmem:[#allocation7 + $0x290] sm:$0xff]  ;;  %v3686_v61 = vld [vmem:[#allocation7 + $0x298] sm:$0xff]  ;;  %v5690_v24 = vpack.c.bf16 %v3648_v43, %v3647_v62  ;;  %v5698_v35 = vpack.c.bf16 %v3668_v11, %v3667_v3  ;;  %v3580_v36 = vld [vmem:[%s8636_s8 + $0x48] sm:$0xff] }
 0x858   : > { %v3590_v11 = vld [vmem:[%s8636_s8 + $0x98] sm:$0xff]  ;;  %v3703_v3 = vld [vmem:[#allocation7 + $0x320] sm:$0xff] }
 0x859   : > { %v3106_v41 = vpop.permute.xlu0 %3105  ;;  %5677 = vmatprep.subr.bf16.mxu0 %v5676_v31  ;;  %v3642_v4 = vld [vmem:[#allocation7 + $0x138] sm:$0xff] }
 0x85a   : > { %3122 = vst.msk [vmem:[#allocation7 + $0x78] sm:$0xff] %vm3074_vm2, %v3106_v41  ;;  %5651 = vmatpush3.bf16.msra.mxu1 %v5650_v59  ;;  %v3104_v7 = vpop.permute.xlu1 %3103  ;;  %v3641_v55 = vld [vmem:[#allocation7 + $0x130] sm:$0xff]  ;;  %v5700_v59 = vpack.c.bf16 %v3686_v61, %v3685_v10  ;;  %v3670_v41 = vld [vmem:[#allocation7 + $0x218] sm:$0xff] }
 0x85b   : > { %3121 = vst.msk [vmem:[#allocation7 + $0x70] sm:$0xff] %vm3074_vm2, %v3104_v7  ;;  %5653 = vmatprep.subr.bf16.mxu1 %v5652_v44  ;;  %v5678_v57 = vpack.c.bf16 %v3642_v4, %v3641_v55  ;;  %v3699_v55 = vld [vmem:[#allocation7 + $0x300] sm:$0xff]  ;;  %v5702_v0 = vpack.c.bf16 %v3670_v41, %v3669_v63  ;;  %v3597_v63 = vld [vmem:[%s8636_s8 + $0xd0] sm:$0xff]  ;;  %v3678_v41 = vld [vmem:[#allocation7 + $0x258] sm:$0xff] }
 0x85d   : > { %v3298_v2 = vpop.permute.xlu0 %3297  ;;  %5679 = vmatpush3.bf16.msra.mxu0 %v5678_v57  ;;  %v3634_v33 = vld [vmem:[#allocation7 + $0xf8] sm:$0xff]  ;;  %v5728_v57 = vpack.c.bf16 %v3716_v32, %v3715_v12 }
 0x85e   : > { %3314 = vst.msk [vmem:[#allocation7 + $0x1f8] sm:$0xff] %vm3074_vm2, %v3298_v2  ;;  %5655 = vmatpush3.bf16.msra.mxu1 %v5654_v23  ;;  %5681 = vmatprep.subr.bf16.mxu0 %v5680_v14  ;;  %v3296_v51 = vpop.permute.xlu1 %3295  ;;  %v3633_v30 = vld [vmem:[#allocation7 + $0xf0] sm:$0xff]  ;;  %v3588_v23 = vld [vmem:[%s8636_s8 + $0x88] sm:$0xff]  ;;  %v3671_v2 = vld [vmem:[#allocation7 + $0x220] sm:$0xff] }
 0x85f   : > { %3313 = vst.msk [vmem:[#allocation7 + $0x1f0] sm:$0xff] %vm3074_vm2, %v3296_v51  ;;  %5657 = vmatprep.subr.bf16.mxu1 %v5656_v39  ;;  %v5660_v21 = vpack.c.bf16 %v3634_v33, %v3633_v30  ;;  %v3573_v14 = vld [vmem:[%s8636_s8 + $0x10] sm:$0xff]  ;;  %v3672_v39 = vld [vmem:[#allocation7 + $0x228] sm:$0xff]  ;;  %v5730_v33 = vpack.c.bf16 %v3700_v20, %v3699_v55  ;;  %v3578_v55 = vld [vmem:[%s8636_s8 + $0x38] sm:$0xff] }
 0x861   : > { %v3234_v60 = vpop.permute.xlu0 %3233  ;;  %5683 = vmatpush3.bf16.msra.mxu0 %v5682_v34  ;;  %v3618_v46 = vld [vmem:[#allocation7 + $0x78] sm:$0xff] }
 0x862   : > { %3250 = vst.msk [vmem:[#allocation7 + $0x178] sm:$0xff] %vm3074_vm2, %v3234_v60  ;;  %5659 = vmatpush3.bf16.msra.mxu1 %v5658_v38  ;;  %5685 = vmatprep.subr.bf16.mxu0 %v5684_v6  ;;  %v3232_v48 = vpop.permute.xlu1 %3231  ;;  %v3617_v28 = vld [vmem:[#allocation7 + $0x70] sm:$0xff]  ;;  %v3582_v34 = vld [vmem:[%s8636_s8 + $0x58] sm:$0xff]  ;;  %v3596_v38 = vld [vmem:[%s8636_s8 + $0xc8] sm:$0xff]  ;;  %v5706_v6 = vpack.c.bf16 %v3672_v39, %v3671_v2 }
 0x863   : > { %3249 = vst.msk [vmem:[#allocation7 + $0x170] sm:$0xff] %vm3074_vm2, %v3232_v48  ;;  %5661 = vmatprep.subr.bf16.mxu1 %v5660_v21  ;;  %v5662_v18 = vpack.c.bf16 %v3618_v46, %v3617_v28  ;;  %v3701_v60 = vld [vmem:[#allocation7 + $0x310] sm:$0xff]  ;;  %v3702_v21 = vld [vmem:[#allocation7 + $0x318] sm:$0xff]  ;;  %v3692_v46 = vld [vmem:[#allocation7 + $0x2c8] sm:$0xff] }
 0x864   : > { %v3719_v28 = vld [vmem:[#allocation7 + $0x3a0] sm:$0xff]  ;;  %v5734_v62 = vpack.c.bf16 %v3702_v21, %v3701_v60  ;;  %v3708_v2 = vld [vmem:[#allocation7 + $0x348] sm:$0xff]  ;;  %v3726_v39 = vld [vmem:[#allocation7 + $0x3d8] sm:$0xff] }
 0x865   : > { %v3394_v50 = vpop.permute.xlu0 %3393  ;;  %5687 = vmatpush3.bf16.msra.mxu0 %v5686_v54  ;;  %v3666_v8 = vld [vmem:[#allocation7 + $0x1f8] sm:$0xff]  ;;  %v3595_v54 = vld [vmem:[%s8636_s8 + $0xc0] sm:$0xff]  ;;  %v3709_v60 = vld [vmem:[#allocation7 + $0x350] sm:$0xff] }
 0x866   : > { %3410 = vst.msk [vmem:[#allocation7 + $0x2b8] sm:$0xff] %vm3074_vm2, %v3394_v50  ;;  %5663 = vmatpush3.bf16.msra.mxu1 %v5662_v18  ;;  %5689 = vmatprep.subr.bf16.mxu0 %v5688_v17  ;;  %v3392_v16 = vpop.permute.xlu1 %3391  ;;  %v3665_v58 = vld [vmem:[#allocation7 + $0x1f0] sm:$0xff]  ;;  %v3691_v17 = vld [vmem:[#allocation7 + $0x2c0] sm:$0xff]  ;;  %v3710_v21 = vld [vmem:[#allocation7 + $0x358] sm:$0xff] }
 0x867   : > { %3409 = vst.msk [vmem:[#allocation7 + $0x2b0] sm:$0xff] %vm3074_vm2, %v3392_v16  ;;  %5697 = vmatprep.subr.bf16.mxu1 %v5696_v15  ;;  %v5692_v49 = vpack.c.bf16 %v3666_v8, %v3665_v58  ;;  %v3675_v50 = vld [vmem:[#allocation7 + $0x240] sm:$0xff]  ;;  %v3676_v15 = vld [vmem:[#allocation7 + $0x248] sm:$0xff]  ;;  %v3589_v8 = vld [vmem:[%s8636_s8 + $0x90] sm:$0xff]  ;;  %v5712_v10 = vpack.c.bf16 %v3692_v46, %v3691_v17 }
 0x868   : > { %v3704_v16 = vld [vmem:[#allocation7 + $0x328] sm:$0xff] }
 0x869   : > { %v3330_v31 = vpop.permute.xlu0 %3329  ;;  %3820 = vmatmul.mubr.f32.vlgmr.msra.gmra.mrb[24].mxu1 %v3571_v19  ;;  %5691 = vmatpush3.bf16.msra.mxu0 %v5690_v24  ;;  %v3650_v42 = vld [vmem:[#allocation7 + $0x178] sm:$0xff]  ;;  %v5736_v19 = vpack.c.bf16 %v3720_v9, %v3719_v28  ;;  %v5738_v12 = vpack.c.bf16 %v3704_v16, %v3703_v3  ;;  %v3728_v28 = vld [vmem:[#allocation7 + $0x3e8] sm:$0xff] }
 0x86a   : > { %3346 = vst.msk [vmem:[#allocation7 + $0x238] sm:$0xff] %vm3074_vm2, %v3330_v31  ;;  %5693 = vmatprep.subr.bf16.mxu0 %v5692_v49  ;;  %5699 = vmatpush3.bf16.msra.mxu1 %v5698_v35  ;;  %v3328_v44 = vpop.permute.xlu1 %3327  ;;  %v3649_v4 = vld [vmem:[#allocation7 + $0x170] sm:$0xff]  ;;  %v3598_v24 = vld [vmem:[%s8636_s8 + $0xd8] sm:$0xff]  ;;  %v3576_v49 = vld [vmem:[%s8636_s8 + $0x28] sm:$0xff] }
 0x86b   : > { %3345 = vst.msk [vmem:[#allocation7 + $0x230] sm:$0xff] %vm3074_vm2, %v3328_v44  ;;  %5701 = vmatprep.subr.bf16.mxu1 %v5700_v59  ;;  %3824 = vmatprep.mubr.f32.mxu1 %v3580_v36  ;;  %v5694_v7 = vpack.c.bf16 %v3650_v42, %v3649_v4  ;;  %v3693_v36 = vld [vmem:[#allocation7 + $0x2d0] sm:$0xff]  ;;  %v3724_v59 = vld [vmem:[#allocation7 + $0x3c8] sm:$0xff]  ;;  %v5714_v42 = vpack.c.bf16 %v3676_v15, %v3675_v50  ;;  %v3723_v44 = vld [vmem:[#allocation7 + $0x3c0] sm:$0xff] }
 0x86c   : > { %v3575_v50 = vld [vmem:[%s8636_s8 + $0x20] sm:$0xff]  ;;  %v3584_v3 = vld [vmem:[%s8636_s8 + $0x68] sm:$0xff] }
 0x86d   : > { %v3522_v53 = vpop.permute.xlu0 %3521  ;;  %3825 = vmatmul.mubr.f32.gmra.mrb[26].mxu1 %v3579_v25  ;;  %5695 = vmatpush3.bf16.msra.mxu0 %v5694_v7  ;;  %v3690_v30 = vld [vmem:[#allocation7 + $0x2b8] sm:$0xff]  ;;  %v3677_v7 = vld [vmem:[#allocation7 + $0x250] sm:$0xff] }
 0x86e   : > { %3538 = vst.msk [vmem:[#allocation7 + $0x3b8] sm:$0xff] %vm3074_vm2, %v3522_v53  ;;  %5703 = vmatpush3.bf16.msra.mxu1 %v5702_v0  ;;  %5729 = vmatprep.subr.bf16.mxu0 %v5728_v57  ;;  %v3520_v13 = vpop.permute.xlu1 %3519  ;;  %v3689_v51 = vld [vmem:[#allocation7 + $0x2b0] sm:$0xff]  ;;  %v3694_v25 = vld [vmem:[#allocation7 + $0x2d8] sm:$0xff]  ;;  %v3695_v57 = vld [vmem:[#allocation7 + $0x2e0] sm:$0xff]  ;;  %v5718_v22 = vpack.c.bf16 %v3678_v41, %v3677_v7  ;;  %v5744_v53 = vpack.c.bf16 %v3724_v59, %v3723_v44 }
 0x86f   : > { %3537 = vst.msk [vmem:[#allocation7 + $0x3b0] sm:$0xff] %vm3074_vm2, %v3520_v13  ;;  %5705 = vmatprep.subr.bf16.mxu1 %v5704_v37  ;;  %3829 = vmatprep.mubr.f32.mxu1 %v3588_v23  ;;  %v5708_v5 = vpack.c.bf16 %v3690_v30, %v3689_v51  ;;  %v5716_v47 = vpack.c.bf16 %v3694_v25, %v3693_v36  ;;  %v3696_v23 = vld [vmem:[#allocation7 + $0x2e8] sm:$0xff]  ;;  %v3707_v37 = vld [vmem:[#allocation7 + $0x340] sm:$0xff]  ;;  %v3725_v30 = vld [vmem:[#allocation7 + $0x3d0] sm:$0xff] }
 0x870   : > { %3905 = vmatmul.mubr.f32.vlgmr.msra.gmra.mrb[24].mxu0 %v3573_v14  ;;  %v5720_v13 = vpack.c.bf16 %v3696_v23, %v3695_v57  ;;  %v3680_v51 = vld [vmem:[#allocation7 + $0x268] sm:$0xff]  ;;  %v3585_v25 = vld [vmem:[%s8636_s8 + $0x70] sm:$0xff] }
 0x871   : > { %v3458_v1 = vpop.permute.xlu0 %3457  ;;  %3830 = vmatmul.mubr.f32.gmra.mrb[28].mxu1 %v3587_v40  ;;  %5731 = vmatpush3.bf16.msra.mxu0 %v5730_v33  ;;  %v3674_v48 = vld [vmem:[#allocation7 + $0x238] sm:$0xff]  ;;  %v3679_v40 = vld [vmem:[#allocation7 + $0x260] sm:$0xff]  ;;  %v3600_v36 = vld [vmem:[%s8636_s8 + $0xe8] sm:$0xff] }
 0x872   : > { %3474 = vst.msk [vmem:[#allocation7 + $0x338] sm:$0xff] %vm3074_vm2, %v3458_v1  ;;  %5707 = vmatpush3.bf16.msra.mxu1 %v5706_v6  ;;  %5733 = vmatprep.subr.bf16.mxu0 %v5732_v27  ;;  %v3456_v29 = vpop.permute.xlu1 %3455  ;;  %v3673_v18 = vld [vmem:[#allocation7 + $0x230] sm:$0xff]  ;;  %v5746_v6 = vpack.c.bf16 %v3708_v2, %v3707_v37  ;;  %v5722_v27 = vpack.c.bf16 %v3680_v51, %v3679_v40 }
 0x873   : > { %3473 = vst.msk [vmem:[#allocation7 + $0x330] sm:$0xff] %vm3074_vm2, %v3456_v29  ;;  %3909 = vmatprep.mubr.f32.mxu0 %v3582_v34  ;;  %5709 = vmatprep.subr.bf16.mxu1 %v5708_v5  ;;  %v5710_v43 = vpack.c.bf16 %v3674_v48, %v3673_v18  ;;  %v3727_v48 = vld [vmem:[#allocation7 + $0x3e0] sm:$0xff]  ;;  %v3593_v59 = vld [vmem:[%s8636_s8 + $0xb0] sm:$0xff] }
 0x874   : > { %3834 = vmatprep.mubr.f32.mxu1 %v3596_v38  ;;  %3910 = vmatmul.mubr.f32.gmra.mrb[26].mxu0 %v3581_v45  ;;  %v5748_v45 = vpack.c.bf16 %v3726_v39, %v3725_v30  ;;  %v5752_v17 = vpack.c.bf16 %v3728_v28, %v3727_v48 }
 0x875   : > { %v3426_v58 = vpop.permute.xlu0 %3425  ;;  %3835 = vmatmul.mubr.f32.gmra.mrb[30].mxu1 %v3595_v54  ;;  %5735 = vmatpush3.bf16.msra.mxu0 %v5734_v62  ;;  %v3722_v61 = vld [vmem:[#allocation7 + $0x3b8] sm:$0xff]  ;;  %v5750_v54 = vpack.c.bf16 %v3710_v21, %v3709_v60  ;;  %v3711_v62 = vld [vmem:[#allocation7 + $0x360] sm:$0xff] }
 0x876   : > { %3442 = vst.msk [vmem:[#allocation7 + $0x2f8] sm:$0xff] %vm3074_vm2, %v3426_v58  ;;  %5711 = vmatpush3.bf16.msra.mxu1 %v5710_v43  ;;  %5737 = vmatprep.subr.bf16.mxu0 %v5736_v19  ;;  %v3424_v32 = vpop.permute.xlu1 %3423  ;;  %v3721_v35 = vld [vmem:[#allocation7 + $0x3b0] sm:$0xff]  ;;  %v3712_v43 = vld [vmem:[#allocation7 + $0x368] sm:$0xff]  ;;  %v3583_v58 = vld [vmem:[%s8636_s8 + $0x60] sm:$0xff] }
 0x877   : > { %3441 = vst.msk [vmem:[#allocation7 + $0x2f0] sm:$0xff] %vm3074_vm2, %v3424_v32  ;;  %3914 = vmatprep.mubr.f32.mxu0 %v3590_v11  ;;  %5713 = vmatprep.subr.bf16.mxu1 %v5712_v10  ;;  %v5740_v31 = vpack.c.bf16 %v3722_v61, %v3721_v35  ;;  %v5754_v19 = vpack.c.bf16 %v3712_v43, %v3711_v62  ;;  %v3591_v32 = vld [vmem:[%s8636_s8 + $0xa0] sm:$0xff]  ;;  %v3586_v35 = vld [vmem:[%s8636_s8 + $0x78] sm:$0xff] }
 0x878   : > { %3915 = vmatmul.mubr.f32.gmra.mrb[28].mxu0 %v3589_v8  ;;  %3989 = vmatprep.mubr.f32.mxu1 %v3576_v49  ;;  %v3577_v49 = vld [vmem:[%s8636_s8 + $0x30] sm:$0xff] }
 0x879   : > { %v3362_v4 = vpop.permute.xlu0 %3361  ;;  %5739 = vmatpush3.bf16.msra.mxu0 %v5738_v12  ;;  %3919 = vmatprep.mubr.f32.mxu0 %v3598_v24  ;;  %v3706_v56 = vld [vmem:[#allocation7 + $0x338] sm:$0xff]  ;;  %v3592_v24 = vld [vmem:[%s8636_s8 + $0xa8] sm:$0xff]  ;;  %v3599_v12 = vld [vmem:[%s8636_s8 + $0xe0] sm:$0xff] }
 0x87a   : > { %3378 = vst.msk [vmem:[#allocation7 + $0x278] sm:$0xff] %vm3074_vm2, %v3362_v4  ;;  %5715 = vmatpush3.bf16.msra.mxu1 %v5714_v42  ;;  %5741 = vmatprep.subr.bf16.mxu0 %v5740_v31  ;;  %v3360_v20 = vpop.permute.xlu1 %3359  ;;  %v3705_v0 = vld [vmem:[#allocation7 + $0x330] sm:$0xff]  ;;  %v3594_v31 = vld [vmem:[%s8636_s8 + $0xb8] sm:$0xff] }
 0x87b   : > { %3377 = vst.msk [vmem:[#allocation7 + $0x270] sm:$0xff] %vm3074_vm2, %v3360_v20  ;;  %5717 = vmatprep.subr.bf16.mxu1 %v5716_v47  ;;  %v5742_v14 = vpack.c.bf16 %v3706_v56, %v3705_v0  ;;  %v3602_v42 = vld [vmem:[%s8636_s8 + $0xf8] sm:$0xff] }
 0x87c   : > { %3920 = vmatmul.mubr.f32.gmra.mrb[30].mxu0 %v3597_v63  ;;  %v3601_v63 = vld [vmem:[%s8636_s8 + $0xf0] sm:$0xff] }
 0x87d   : > { %v3554_v52 = vpop.permute.xlu0 %3553  ;;  %5743 = vmatpush3.bf16.msra.mxu0 %v5742_v14  ;;  %4074 = vmatprep.mubr.f32.mxu0 %v3578_v55  ;;  %v3698_v38 = vld [vmem:[#allocation7 + $0x2f8] sm:$0xff] }
 0x87e   : > { %3570 = vst.msk [vmem:[#allocation7 + $0x3f8] sm:$0xff] %vm3074_vm2, %v3554_v52  ;;  %5719 = vmatpush3.bf16.msra.mxu1 %v5718_v22  ;;  %5745 = vmatprep.subr.bf16.mxu0 %v5744_v53  ;;  %v3552_v33 = vpop.permute.xlu1 %3551  ;;  %v3697_v34 = vld [vmem:[#allocation7 + $0x2f0] sm:$0xff] }
 0x87f   : > { %3569 = vst.msk [vmem:[#allocation7 + $0x3f0] sm:$0xff] %vm3074_vm2, %v3552_v33  ;;  %5721 = vmatprep.subr.bf16.mxu1 %v5720_v13  ;;  %v5724_v1 = vpack.c.bf16 %v3698_v38, %v3697_v34 }
 0x881   : > { %v3490_v46 = vpop.permute.xlu0 %3489  ;;  %5747 = vmatpush3.bf16.msra.mxu0 %v5746_v6  ;;  %v3682_v5 = vld [vmem:[#allocation7 + $0x278] sm:$0xff] }
 0x882   : > { %3506 = vst.msk [vmem:[#allocation7 + $0x378] sm:$0xff] %vm3074_vm2, %v3490_v46  ;;  %5723 = vmatpush3.bf16.msra.mxu1 %v5722_v27  ;;  %5749 = vmatprep.subr.bf16.mxu0 %v5748_v45  ;;  %v3488_v9 = vpop.permute.xlu1 %3487  ;;  %v3681_v29 = vld [vmem:[#allocation7 + $0x270] sm:$0xff] }
 0x883   : > { %3505 = vst.msk [vmem:[#allocation7 + $0x370] sm:$0xff] %vm3074_vm2, %v3488_v9  ;;  %5725 = vmatprep.subr.bf16.mxu1 %v5724_v1  ;;  %v5726_v18 = vpack.c.bf16 %v3682_v5, %v3681_v29 }
 0x885   : > { %5751 = vmatpush3.bf16.msra.mxu0 %v5750_v54  ;;  %v3730_v11 = vld [vmem:[#allocation7 + $0x3f8] sm:$0xff] }
 0x886   : > { %5727 = vmatpush3.bf16.msra.mxu1 %v5726_v18  ;;  %5753 = vmatprep.subr.bf16.mxu0 %v5752_v17  ;;  %v3729_v15 = vld [vmem:[#allocation7 + $0x3f0] sm:$0xff] }
 0x887   : > { %v5756_v8 = vpack.c.bf16 %v3730_v11, %v3729_v15 }
 0x889   : > { %3990 = vmatmul.mubr.f32.vlgmr.msra.gmra.mrb[32].mxu1 %v3575_v50  ;;  %5755 = vmatpush3.bf16.msra.mxu0 %v5754_v19  ;;  %v3714_v16 = vld [vmem:[#allocation7 + $0x378] sm:$0xff] }
 0x88a   : > { %5757 = vmatprep.subr.bf16.mxu0 %v5756_v8  ;;  %3994 = vmatprep.mubr.f32.mxu1 %v3584_v3  ;;  %v3713_v10 = vld [vmem:[#allocation7 + $0x370] sm:$0xff] }
 0x88b   : > { %v5758_v61 = vpack.c.bf16 %v3714_v16, %v3713_v10 }
 0x88d   : > { %3995 = vmatmul.mubr.f32.gmra.mrb[34].mxu1 %v3583_v58  ;;  %5759 = vmatpush3.bf16.msra.mxu0 %v5758_v61 }
 0x88e   : > { %3999 = vmatprep.mubr.f32.mxu1 %v3592_v24 }
 0x890   : > { %4075 = vmatmul.mubr.f32.vlgmr.msra.gmra.mrb[32].mxu0 %v3577_v49 }
 0x891   : > { %4000 = vmatmul.mubr.f32.gmra.mrb[36].mxu1 %v3591_v32  ;;  %4079 = vmatprep.mubr.f32.mxu0 %v3586_v35 }
 0x892   : > { %4004 = vmatprep.mubr.f32.mxu1 %v3600_v36  ;;  %v3743_v37 = vpop.permute.xlu0 %3742 }
 0x893   : > { %v3738_v55 = vpop.permute.xlu1 %3737 }
 0x894   : > { %4080 = vmatmul.mubr.f32.gmra.mrb[34].mxu0 %v3585_v25 }
 0x895   : > { %4005 = vmatmul.mubr.f32.gmra.mrb[38].mxu1 %v3599_v12  ;;  %4084 = vmatprep.mubr.f32.mxu0 %v3594_v31 }
 0x896   : > { %v3753_v1 = vpop.permute.xlu0 %3752 }
 0x897   : > { %v3748_v6 = vpop.permute.xlu1 %3747 }
 0x898   : > { %4085 = vmatmul.mubr.f32.gmra.mrb[36].mxu0 %v3593_v59 }
 0x899   : > { %4089 = vmatprep.mubr.f32.mxu0 %v3602_v42 }
 0x89c   : > { %4090 = vmatmul.mubr.f32.gmra.mrb[38].mxu0 %v3601_v63 }
 0x93c   : > { %v5118_v41 = vpop.f32.mrb[24].mxu1 }
 0x93d   : > { %v5119_v44 = vpop.f32.mrb[25].mxu1 }
 0x93e   : > { %v5120_v4 = vadd.f32 %v5119_v44, %v5118_v41 }
 0x940   : > { %v5121_v47 = vpop.f32.mrb[26].mxu1  ;;  %v3822_v23 = vadd.f32 %v5120_v4, %v3738_v55 }
 0x941   : > { %v5122_v56 = vpop.f32.mrb[27].mxu1 }
 0x942   : > { %v5123_v7 = vadd.f32 %v5122_v56, %v5121_v47 }
 0x943   : > { %v5162_v20 = vpop.f32.mrb[24].mxu0 }
 0x944   : > { %v5124_v0 = vpop.f32.mrb[28].mxu1  ;;  %v5163_v57 = vpop.f32.mrb[25].mxu0  ;;  %v3827_v40 = vadd.f32 %v5123_v7, %v3743_v37 }
 0x945   : > { %v5164_v14 = vadd.f32 %v5163_v57, %v5162_v20  ;;  %v5125_v22 = vpop.f32.mrb[29].mxu1 }
 0x946   : > { %v5126_v53 = vadd.f32 %v5125_v22, %v5124_v0 }
 0x947   : > { %v3907_v2 = vadd.f32 %v5164_v14, %v3822_v23  ;;  %v5165_v39 = vpop.f32.mrb[26].mxu0 }
 0x948   : > { %v5127_v52 = vpop.f32.mrb[30].mxu1  ;;  %v5166_v13 = vpop.f32.mrb[27].mxu0  ;;  %v3832_v45 = vadd.f32 %v5126_v53, %v3748_v6 }
 0x949   : > { %v5167_v51 = vadd.f32 %v5166_v13, %v5165_v39  ;;  %v5128_v30 = vpop.f32.mrb[31].mxu1 }
 0x94a   : > { %v5129_v33 = vadd.f32 %v5128_v30, %v5127_v52 }
 0x94b   : > { %v3912_v34 = vadd.f32 %v5167_v51, %v3827_v40  ;;  %v5168_v38 = vpop.f32.mrb[28].mxu0 }
 0x94c   : > { %v5169_v27 = vpop.f32.mrb[29].mxu0  ;;  %v3837_v48 = vadd.f32 %v5129_v33, %v3753_v1 }
 0x94d   : > { %v5170_v60 = vadd.f32 %v5169_v27, %v5168_v38 }
 0x94f   : > { %v3917_v21 = vadd.f32 %v5170_v60, %v3832_v45  ;;  %v5171_v46 = vpop.f32.mrb[30].mxu0 }
 0x950   : > { %v5172_v5 = vpop.f32.mrb[31].mxu0 }
 0x951   : > { %v5173_v28 = vadd.f32 %v5172_v5, %v5171_v46 }
 0x953   : > { %v3922_v9 = vadd.f32 %v5173_v28, %v3837_v48 }
 0x95c   : > { %v5206_v29 = vpop.f32.mrb[32].mxu1 }
 0x95d   : > { %v5207_v54 = vpop.f32.mrb[33].mxu1 }
 0x95e   : > { %v5208_v18 = vadd.f32 %v5207_v54, %v5206_v29 }
 0x960   : > { %v3992_v17 = vadd.f32 %v5208_v18, %v3907_v2  ;;  %v5209_v62 = vpop.f32.mrb[34].mxu1 }
 0x961   : > { %v5210_v43 = vpop.f32.mrb[35].mxu1 }
 0x962   : > { %v5211_v11 = vadd.f32 %v5210_v43, %v5209_v62 }
 0x963   : > { %v5250_v50 = vpop.f32.mrb[32].mxu0 }
 0x964   : > { %v3997_v15 = vadd.f32 %v5211_v11, %v3912_v34  ;;  %v5212_v19 = vpop.f32.mrb[36].mxu1  ;;  %v5251_v8 = vpop.f32.mrb[33].mxu0 }
 0x965   : > { %v5252_v3 = vadd.f32 %v5251_v8, %v5250_v50  ;;  %v5213_v16 = vpop.f32.mrb[37].mxu1 }
 0x966   : > { %v5214_v58 = vadd.f32 %v5213_v16, %v5212_v19 }
 0x967   : > { %v4077_v10 = vadd.f32 %v5252_v3, %v3992_v17  ;;  %v5253_v61 = vpop.f32.mrb[34].mxu0 }
 0x968   : > { %v4002_v24 = vadd.f32 %v5214_v58, %v3917_v21  ;;  %v5215_v49 = vpop.f32.mrb[38].mxu1  ;;  %v5254_v32 = vpop.f32.mrb[35].mxu0 }
 0x969   : > { %v4099_v35 = vmin.f32 %v4077_v10, 0.0  ;;  %v5255_v36 = vadd.f32 %v5254_v32, %v5253_v61  ;;  %v5216_v25 = vpop.f32.mrb[39].mxu1  ;;  %vm4095_vm5 = vcmp.gt.f32.partialorder %v4077_v10, 0.0 }
 0x96a   : > { %v5217_v12 = vadd.f32 %v5216_v25, %v5215_v49 }
 0x96b   : > { %v4103_v31 = vmul.f32 1.442695, %v4099_v35  ;;  %v4082_v59 = vadd.f32 %v5255_v36, %v3997_v15  ;;  %v5256_v42 = vpop.f32.mrb[36].mxu0 }
 0x96c   : > { %v4007_v63 = vadd.f32 %v5217_v12, %v3922_v9  ;;  %v5257_v41 = vpop.f32.mrb[37].mxu0  ;;  %v4460_v9 = vld [vmem:[%s8641_s27] sm:$0xff]  ;;  %s6012_s27 = sshll.u32 %s6121_s19, 4  ;;  %s6013_s27 = int_to_ptr.vmem [resolvable:$false] %s6012_s27 }
 0x96d   : > { %5994 = vpow2.f32 %v4103_v31  ;;  %v4100_v44 = vmin.f32 %v4082_v59, 0.0  ;;  %v5258_v4 = vadd.f32 %v5257_v41, %v5256_v42  ;;  %vm4096_vm6 = vcmp.gt.f32.partialorder %v4082_v59, 0.0 }
 0x96f   : > { %v4105_v47 = vmul.f32 1.442695, %v4100_v44  ;;  %v4087_v56 = vadd.f32 %v5258_v4, %v4002_v24  ;;  %v5259_v7 = vpop.f32.mrb[38].mxu0 }
 0x970   : > { %v5260_v55 = vpop.f32.mrb[39].mxu0 }
 0x971   : > { %5996 = vpow2.f32 %v4105_v47  ;;  %v4101_v20 = vmin.f32 %v4087_v56, 0.0  ;;  %v5261_v0 = vadd.f32 %v5260_v55, %v5259_v7  ;;  %vm4097_vm8 = vcmp.gt.f32.partialorder %v4087_v56, 0.0 }
 0x973   : > { %v4107_v57 = vmul.f32 1.442695, %v4101_v20  ;;  %v4092_v23 = vadd.f32 %v5261_v0, %v4007_v63 }
 0x975   : > { %5998 = vpow2.f32 %v4107_v57  ;;  %v4102_v14 = vmin.f32 %v4092_v23, 0.0  ;;  %vm4098_vm9 = vcmp.gt.f32.partialorder %v4092_v23, 0.0 }
 0x977   : > { %v5995_v22 = vpop.eup %5994  ;;  %v4109_v53 = vmul.f32 1.442695, %v4102_v14 }
 0x978   : > { %v4862_v37 = vadd.f32 -1.0, %v5995_v22 }
 0x979   : > { %6000 = vpow2.f32 %v4109_v53 }
 0x97a   : > { %v4115_v2 = vsel %vm4095_vm5, %v4077_v10, %v4862_v37 }
 0x97b   : > { %v5997_v39 = vpop.eup %5996  ;;  %4123 = vrot.lane.b32.xlu1 %v4115_v2, %s6106_s9 }
 0x97c   : > { %v4863_v52 = vadd.f32 -1.0, %v5997_v39 }
 0x97e   : > { %v4116_v13 = vsel %vm4096_vm6, %v4082_v59, %v4863_v52 }
 0x97f   : > { %v5999_v40 = vpop.eup %5998  ;;  %4125 = vrot.lane.b32.xlu0 %v4116_v13, %s6106_s9 }
 0x980   : > { %v4864_v51 = vadd.f32 -1.0, %v5999_v40 }
 0x982   : > { %v4117_v30 = vsel %vm4097_vm8, %v4087_v56, %v4864_v51 }
 0x983   : > { %v6001_v33 = vpop.eup %6000  ;;  %4127 = vrot.lane.b32.xlu1 %v4117_v30, %s6106_s9 }
 0x984   : > { %v4865_v34 = vadd.f32 -1.0, %v6001_v33 }
 0x986   : > { %v4118_v38 = vsel %vm4098_vm9, %v4092_v23, %v4865_v34 }
 0x987   : > { %4129 = vrot.lane.b32.xlu0 %v4118_v38, %s6106_s9  ;;  %s456_s9 = sand.u32 1, %s8644_s6  }
 0x9ed   : > { %v4124_v6 = vpop.permute.xlu1 %4123 }
 0x9ee   : > { %4136 = vst.msk [vmem:[#allocation4] sm:$0xff] %vm4135_vm10, %v4124_v6 }
 0x9f1   : > { %v4126_v27 = vpop.permute.xlu0 %4125 }
 0x9f2   : > { %4137 = vst.msk [vmem:[#allocation4 + $0x8] sm:$0xff] %vm4135_vm10, %v4126_v27 }
 0x9f5   : > { %v4140_v45 = vld [vmem:[#allocation4] sm:$0xff]  ;;  %v4128_v60 = vpop.permute.xlu1 %4127 }
 0x9f6   : > { %4144 = vst.msk [vmem:[#allocation8] sm:$0xff] %vm3074_vm2, %v4140_v45  ;;  %4200 = vrot.lane.b32.xlu1 %v4140_v45, %s8591_s16 }
 0x9f7   : > { %4138 = vst.msk [vmem:[#allocation4 + $0x10] sm:$0xff] %vm4135_vm10, %v4128_v60 }
 0x9f9   : > { %v4141_v21 = vld [vmem:[#allocation4 + $0x8] sm:$0xff]  ;;  %v4130_v46 = vpop.permute.xlu0 %4129 }
 0x9fa   : > { %4145 = vst.msk [vmem:[#allocation8 + $0x8] sm:$0xff] %vm3074_vm2, %v4141_v21  ;;  %4202 = vrot.lane.b32.xlu0 %v4141_v21, %s8591_s16  ;;  %4328 = vrot.lane.b32.xlu1 %v4140_v45, %s6107_s30 }
 0x9fb   : > { %4139 = vst.msk [vmem:[#allocation4 + $0x18] sm:$0xff] %vm4135_vm10, %v4130_v46 }
 0x9fd   : > { %v4396_v3 = vld [vmem:[#allocation8] sm:$0xff] }
 0x9fe   : > { %v8171_v1 = vld [vmem:[#allocation4 + $0x10] sm:$0xff]  ;;  %4330 = vrot.lane.b32.xlu0 %v4141_v21, %s6107_s30  ;;  %4264 = vrot.lane.b32.xlu1 %v4140_v45, %s6108_s15 }
 0x9ff   : > { %4146 = vst.msk [vmem:[#allocation8 + $0x10] sm:$0xff] %vm3074_vm2, %v8171_v1 }
 0xa01   : > { %v4397_v43 = vld [vmem:[#allocation8 + $0x8] sm:$0xff] }
 0xa02   : > { %v8177_v5 = vld [vmem:[#allocation4 + $0x18] sm:$0xff]  ;;  %4266 = vrot.lane.b32.xlu0 %v4141_v21, %s6108_s15  ;;  %4216 = vrot.lane.b32.xlu1 %v4140_v45, %s8603_s11  ;;  %v5762_v16 = vpack.c.bf16 %v4397_v43, %v4396_v3 }
 0xa03   : > { %4147 = vst.msk [vmem:[#allocation8 + $0x18] sm:$0xff] %vm3074_vm2, %v8177_v5 }
 0xa06   : > { %4218 = vrot.lane.b32.xlu0 %v4141_v21, %s8603_s11  ;;  %4152 = vrot.lane.b32.xlu1 %v4140_v45, %s8626_s29 }
 0xa0a   : > { %4154 = vrot.lane.b32.xlu0 %v4141_v21, %s8626_s29  ;;  %4344 = vrot.lane.b32.xlu1 %v4140_v45, %s6109_s13  ;;  %v4399_v51 = vld [vmem:[#allocation8 + $0x18] sm:$0xff] }
 0xa0e   : > { %4346 = vrot.lane.b32.xlu0 %v4141_v21, %s6109_s13  ;;  %4280 = vrot.lane.b32.xlu1 %v4140_v45, %s6110_s17 }
 0xa12   : > { %4282 = vrot.lane.b32.xlu0 %v4141_v21, %s6110_s17  ;;  %4232 = vrot.lane.b32.xlu1 %v4140_v45, %s8612_s7 }
 0xa16   : > { %4234 = vrot.lane.b32.xlu0 %v4141_v21, %s8612_s7  ;;  %4168 = vrot.lane.b32.xlu1 %v4140_v45, %s8628_s4 }
 0xa1a   : > { %4170 = vrot.lane.b32.xlu0 %v4141_v21, %s8628_s4  ;;  %4360 = vrot.lane.b32.xlu1 %v4140_v45, %s6111_s18 }
 0xa1e   : > { %4362 = vrot.lane.b32.xlu0 %v4141_v21, %s6111_s18  ;;  %4296 = vrot.lane.b32.xlu1 %v4140_v45, %s6112_s10 }
 0xa22   : > { %4298 = vrot.lane.b32.xlu0 %v4141_v21, %s6112_s10  ;;  %4248 = vrot.lane.b32.xlu1 %v4140_v45, %s8590_s0 }
 0xa26   : > { %4250 = vrot.lane.b32.xlu0 %v4141_v21, %s8590_s0  ;;  %4184 = vrot.lane.b32.xlu1 %v4140_v45, %s8582_s28 }
 0xa2a   : > { %4186 = vrot.lane.b32.xlu0 %v4141_v21, %s8582_s28  ;;  %4376 = vrot.lane.b32.xlu1 %v4140_v45, %s6113_s25 }
 0xa2e   : > { %4378 = vrot.lane.b32.xlu0 %v4141_v21, %s6113_s25  ;;  %4312 = vrot.lane.b32.xlu1 %v4140_v45, %s6114_s22  ;;  %v4398_v45 = vld [vmem:[#allocation8 + $0x10] sm:$0xff] }
 0xa2f   : > { %v5766_v60 = vpack.c.bf16 %v4399_v51, %v4398_v45 }
 0xa32   : > { %4314 = vrot.lane.b32.xlu0 %v4141_v21, %s6114_s22  ;;  %4204 = vrot.lane.b32.xlu1 %v8171_v1, %s8591_s16 }
 0xa36   : > { %4206 = vrot.lane.b32.xlu0 %v8177_v5, %s8591_s16  ;;  %4332 = vrot.lane.b32.xlu1 %v8171_v1, %s6107_s30 }
 0xa3a   : > { %4334 = vrot.lane.b32.xlu0 %v8177_v5, %s6107_s30  ;;  %4268 = vrot.lane.b32.xlu1 %v8171_v1, %s6108_s15 }
 0xa3e   : > { %4270 = vrot.lane.b32.xlu0 %v8177_v5, %s6108_s15  ;;  %4220 = vrot.lane.b32.xlu1 %v8171_v1, %s8603_s11 }
 0xa42   : > { %4222 = vrot.lane.b32.xlu0 %v8177_v5, %s8603_s11  ;;  %4156 = vrot.lane.b32.xlu1 %v8171_v1, %s8626_s29 }
 0xa46   : > { %4158 = vrot.lane.b32.xlu0 %v8177_v5, %s8626_s29  ;;  %4348 = vrot.lane.b32.xlu1 %v8171_v1, %s6109_s13  ;;  %s8639_s29 = sld [smem:[#allocation41_spill]] }
 0xa4a   : > { %4350 = vrot.lane.b32.xlu0 %v8177_v5, %s6109_s13  ;;  %4284 = vrot.lane.b32.xlu1 %v8171_v1, %s6110_s17  ;;  %s8642_s13 = sld [smem:[#allocation43_spill]] }
 0xa4c   : > { %v4393_v48 = vld [vmem:[%s8639_s29 + $0x8] sm:$0xff] }
 0xa4d   : > { %4530 = vmatprep.mubr.f32.mxu1 %v4393_v48 }
 0xa4e   : > { %4286 = vrot.lane.b32.xlu0 %v8177_v5, %s6110_s17  ;;  %4236 = vrot.lane.b32.xlu1 %v8171_v1, %s8612_s7  ;;  %s4867_s17 = sshll.u32 %s8645_s24, 4 }
 0xa52   : > { %4238 = vrot.lane.b32.xlu0 %v8177_v5, %s8612_s7  ;;  %4172 = vrot.lane.b32.xlu1 %v8171_v1, %s8628_s4  ;;  %s8647_s7 = sld [smem:[#allocation45_spill]] }
 0xa56   : > { %4174 = vrot.lane.b32.xlu0 %v8177_v5, %s8628_s4  ;;  %4364 = vrot.lane.b32.xlu1 %v8171_v1, %s6111_s18  ;;  %s8640_s4 = smov %s8639_s29  ;;  %s4754_s29 = scalar_lea.sflag [#allocation11], %s456_s9 }
 0xa57   : > { %v4395_v29 = vld [vmem:[%s8640_s4 + $0x18] sm:$0xff] }
 0xa58   : > { %4600 = vmatprep.mubr.f32.mxu0 %v4395_v29  ;;  %s8403_s11 = scalar_lea.hbm %s8647_s7, %s4867_s17 }
 0xa5a   : > { %4366 = vrot.lane.b32.xlu0 %v8177_v5, %s6111_s18  ;;  %4300 = vrot.lane.b32.xlu1 %v8171_v1, %s6112_s10  ;;  %s457_s18 = scalar_lea.vmem [#allocation10], %s456_s9 }
 0xa5e   : > { %4302 = vrot.lane.b32.xlu0 %v8177_v5, %s6112_s10  ;;  %4252 = vrot.lane.b32.xlu1 %v8171_v1, %s8590_s0  ;;  %s4766_s10 = sshll.u32 %s457_s18, 4  ;;  %s8405_s10 = int_to_ptr.vmem [resolvable:$true] %s4766_s10 }
 0xa5f   : > { %p6015_p0 = scmp.lt.s32.totalorder %s8405_s10, %s6013_s27 }
 0xa62   : > { %4254 = vrot.lane.b32.xlu0 %v8177_v5, %s8590_s0  ;;  %4188 = vrot.lane.b32.xlu1 %v8171_v1, %s8582_s28  ;;  %s6008_s0 = scalar_lea.vmem %s8405_s10, 16 }
 0xa63   : > { %p6009_p11 = scmp.ne.s32.totalorder %s8405_s10, %s6008_s0 }
 0xa65   : > { %p6010_p12 = pnand %p6009_p11, %p6235_p5 }
 0xa66   : > { %4190 = vrot.lane.b32.xlu0 %v8177_v5, %s8582_s28  ;;  %4380 = vrot.lane.b32.xlu1 %v8171_v1, %s6113_s25  ;;  %s6119_s28 = smov 64  }
 0xa67   : > { %p6011_p13 = pneg %p6010_p12 }
 0xa68   : > { %v4201_v28 = vpop.permute.xlu1 %4200 }
 0xa69   : > { %4212 = vst.msk [vmem:[#allocation8 + $0x80] sm:$0xff] %vm3074_vm2, %v4201_v28 }
 0xa6a   : > { %4382 = vrot.lane.b32.xlu0 %v8177_v5, %s6113_s25  ;;  %4316 = vrot.lane.b32.xlu1 %v8171_v1, %s6114_s22 }
 0xa6c   : > { %v4203_v54 = vpop.permute.xlu0 %4202  ;;  %v4329_v18 = vpop.permute.xlu1 %4328 }
 0xa6d   : > { %4213 = vst.msk [vmem:[#allocation8 + $0x88] sm:$0xff] %vm3074_vm2, %v4203_v54  ;;  %4340 = vst.msk [vmem:[#allocation8 + $0x180] sm:$0xff] %vm3074_vm2, %v4329_v18 }
 0xa6e   : > { %4318 = vrot.lane.b32.xlu0 %v8177_v5, %s6114_s22  ;;  %4463 = vperm.xlu1 %5937, %v4460_v9  }
 0xa70   : > { %v4331_v17 = vpop.permute.xlu0 %4330  ;;  %v4265_v62 = vpop.permute.xlu1 %4264  ;;  %v4412_v15 = vld [vmem:[#allocation8 + $0x80] sm:$0xff] }
 0xa71   : > { %4341 = vst.msk [vmem:[#allocation8 + $0x188] sm:$0xff] %vm3074_vm2, %v4331_v17  ;;  %4276 = vst.msk [vmem:[#allocation8 + $0x100] sm:$0xff] %vm3074_vm2, %v4265_v62 }
 0xa74   : > { %v4267_v11 = vpop.permute.xlu0 %4266  ;;  %v4217_v50 = vpop.permute.xlu1 %4216  ;;  %v4413_v19 = vld [vmem:[#allocation8 + $0x88] sm:$0xff]  ;;  %v4444_v61 = vld [vmem:[#allocation8 + $0x180] sm:$0xff] }
 0xa75   : > { %4277 = vst.msk [vmem:[#allocation8 + $0x108] sm:$0xff] %vm3074_vm2, %v4267_v11  ;;  %4228 = vst.msk [vmem:[#allocation8 + $0xa0] sm:$0xff] %vm3074_vm2, %v4217_v50  ;;  %v5760_v8 = vpack.c.bf16 %v4413_v19, %v4412_v15 }
 0xa77   : > { %5761 = vmatprep.subr.bf16.mxu1 %v5760_v8 }
 0xa78   : > { %v4219_v58 = vpop.permute.xlu0 %4218  ;;  %5763 = vmatpush3.bf16.msra.mxu1 %v5762_v16  ;;  %v4153_v10 = vpop.permute.xlu1 %4152  ;;  %v4445_v24 = vld [vmem:[#allocation8 + $0x188] sm:$0xff]  ;;  %v4428_v36 = vld [vmem:[#allocation8 + $0x100] sm:$0xff] }
 0xa79   : > { %4229 = vst.msk [vmem:[#allocation8 + $0xa8] sm:$0xff] %vm3074_vm2, %v4219_v58  ;;  %4164 = vst.msk [vmem:[#allocation8 + $0x20] sm:$0xff] %vm3074_vm2, %v4153_v10  ;;  %v5792_v49 = vpack.c.bf16 %v4445_v24, %v4444_v61 }
 0xa7b   : > { %5793 = vmatprep.subr.bf16.mxu0 %v5792_v49 }
 0xa7c   : > { %v4155_v32 = vpop.permute.xlu0 %4154  ;;  %v4345_v35 = vpop.permute.xlu1 %4344  ;;  %v4429_v25 = vld [vmem:[#allocation8 + $0x108] sm:$0xff]  ;;  %v4416_v21 = vld [vmem:[#allocation8 + $0xa0] sm:$0xff] }
 0xa7d   : > { %4165 = vst.msk [vmem:[#allocation8 + $0x28] sm:$0xff] %vm3074_vm2, %v4155_v32  ;;  %4356 = vst.msk [vmem:[#allocation8 + $0x1a0] sm:$0xff] %vm3074_vm2, %v4345_v35  ;;  %v5794_v12 = vpack.c.bf16 %v4429_v25, %v4428_v36 }
 0xa7f   : > { %5795 = vmatpush3.bf16.msra.mxu0 %v5794_v12 }
 0xa80   : > { %v4347_v31 = vpop.permute.xlu0 %4346  ;;  %v4281_v59 = vpop.permute.xlu1 %4280  ;;  %v4417_v6 = vld [vmem:[#allocation8 + $0xa8] sm:$0xff]  ;;  %v4400_v54 = vld [vmem:[#allocation8 + $0x20] sm:$0xff] }
 0xa81   : > { %4357 = vst.msk [vmem:[#allocation8 + $0x1a8] sm:$0xff] %vm3074_vm2, %v4347_v31  ;;  %4292 = vst.msk [vmem:[#allocation8 + $0x120] sm:$0xff] %vm3074_vm2, %v4281_v59  ;;  %v5768_v46 = vpack.c.bf16 %v4417_v6, %v4416_v21 }
 0xa84   : > { %v4283_v42 = vpop.permute.xlu0 %4282  ;;  %v4233_v63 = vpop.permute.xlu1 %4232  ;;  %v4401_v1 = vld [vmem:[#allocation8 + $0x28] sm:$0xff]  ;;  %v4448_v19 = vld [vmem:[#allocation8 + $0x1a0] sm:$0xff] }
 0xa85   : > { %4293 = vst.msk [vmem:[#allocation8 + $0x128] sm:$0xff] %vm3074_vm2, %v4283_v42  ;;  %4244 = vst.msk [vmem:[#allocation8 + $0xc0] sm:$0xff] %vm3074_vm2, %v4233_v63  ;;  %v5770_v18 = vpack.c.bf16 %v4401_v1, %v4400_v54 }
 0xa88   : > { %v4235_v41 = vpop.permute.xlu0 %4234  ;;  %v4169_v44 = vpop.permute.xlu1 %4168  ;;  %v4449_v17 = vld [vmem:[#allocation8 + $0x1a8] sm:$0xff]  ;;  %v4432_v24 = vld [vmem:[#allocation8 + $0x120] sm:$0xff] }
 0xa89   : > { %4245 = vst.msk [vmem:[#allocation8 + $0xc8] sm:$0xff] %vm3074_vm2, %v4235_v41  ;;  %4180 = vst.msk [vmem:[#allocation8 + $0x40] sm:$0xff] %vm3074_vm2, %v4169_v44  ;;  %v5800_v8 = vpack.c.bf16 %v4449_v17, %v4448_v19 }
 0xa8c   : > { %v4171_v4 = vpop.permute.xlu0 %4170  ;;  %v4361_v47 = vpop.permute.xlu1 %4360  ;;  %v4433_v3 = vld [vmem:[#allocation8 + $0x128] sm:$0xff]  ;;  %v4420_v42 = vld [vmem:[#allocation8 + $0xc0] sm:$0xff] }
 0xa8d   : > { %4181 = vst.msk [vmem:[#allocation8 + $0x48] sm:$0xff] %vm3074_vm2, %v4171_v4  ;;  %4372 = vst.msk [vmem:[#allocation8 + $0x1c0] sm:$0xff] %vm3074_vm2, %v4361_v47  ;;  %v5802_v32 = vpack.c.bf16 %v4433_v3, %v4432_v24 }
 0xa90   : > { %v4363_v56 = vpop.permute.xlu0 %4362  ;;  %v4297_v7 = vpop.permute.xlu1 %4296  ;;  %v4421_v35 = vld [vmem:[#allocation8 + $0xc8] sm:$0xff]  ;;  %v4404_v47 = vld [vmem:[#allocation8 + $0x40] sm:$0xff] }
 0xa91   : > { %4373 = vst.msk [vmem:[#allocation8 + $0x1c8] sm:$0xff] %vm3074_vm2, %v4363_v56  ;;  %4308 = vst.msk [vmem:[#allocation8 + $0x140] sm:$0xff] %vm3074_vm2, %v4297_v7  ;;  %v5776_v63 = vpack.c.bf16 %v4421_v35, %v4420_v42 }
 0xa94   : > { %v4299_v55 = vpop.permute.xlu0 %4298  ;;  %v4249_v20 = vpop.permute.xlu1 %4248  ;;  %v4405_v41 = vld [vmem:[#allocation8 + $0x48] sm:$0xff] }
 0xa95   : > { %4309 = vst.msk [vmem:[#allocation8 + $0x148] sm:$0xff] %vm3074_vm2, %v4299_v55  ;;  %4260 = vst.msk [vmem:[#allocation8 + $0xe0] sm:$0xff] %vm3074_vm2, %v4249_v20  ;;  %v5778_v55 = vpack.c.bf16 %v4405_v41, %v4404_v47 }
 0xa98   : > { %v4251_v0 = vpop.permute.xlu0 %4250  ;;  %v4185_v57 = vpop.permute.xlu1 %4184 }
 0xa99   : > { %4261 = vst.msk [vmem:[#allocation8 + $0xe8] sm:$0xff] %vm3074_vm2, %v4251_v0  ;;  %4196 = vst.msk [vmem:[#allocation8 + $0x60] sm:$0xff] %vm3074_vm2, %v4185_v57  ;;  %v4453_v0 = vld [vmem:[#allocation8 + $0x1c8] sm:$0xff] }
 0xa9c   : > { %v4187_v23 = vpop.permute.xlu0 %4186  ;;  %v4377_v14 = vpop.permute.xlu1 %4376 }
 0xa9d   : > { %4197 = vst.msk [vmem:[#allocation8 + $0x68] sm:$0xff] %vm3074_vm2, %v4187_v23  ;;  %4388 = vst.msk [vmem:[#allocation8 + $0x1e0] sm:$0xff] %vm3074_vm2, %v4377_v14 }
 0xaa0   : > { %v4379_v22 = vpop.permute.xlu0 %4378  ;;  %v4313_v53 = vpop.permute.xlu1 %4312 }
 0xaa1   : > { %4389 = vst.msk [vmem:[#allocation8 + $0x1e8] sm:$0xff] %vm3074_vm2, %v4379_v22  ;;  %4324 = vst.msk [vmem:[#allocation8 + $0x160] sm:$0xff] %vm3074_vm2, %v4313_v53 }
 0xaa4   : > { %v4315_v37 = vpop.permute.xlu0 %4314  ;;  %v4205_v2 = vpop.permute.xlu1 %4204 }
 0xaa5   : > { %4325 = vst.msk [vmem:[#allocation8 + $0x168] sm:$0xff] %vm3074_vm2, %v4315_v37  ;;  %4214 = vst.msk [vmem:[#allocation8 + $0x90] sm:$0xff] %vm3074_vm2, %v4205_v2  ;;  %v4452_v37 = vld [vmem:[#allocation8 + $0x1c0] sm:$0xff] }
 0xaa6   : > { %v5808_v2 = vpack.c.bf16 %v4453_v0, %v4452_v37  ;;  %v6115_v0 = vmov 0.0|0.0  }
 0xaa8   : > { %v4207_v39 = vpop.permute.xlu0 %4206  ;;  %v4333_v52 = vpop.permute.xlu1 %4332 }
 0xaa9   : > { %4215 = vst.msk [vmem:[#allocation8 + $0x98] sm:$0xff] %vm3074_vm2, %v4207_v39  ;;  %4342 = vst.msk [vmem:[#allocation8 + $0x190] sm:$0xff] %vm3074_vm2, %v4333_v52  ;;  %v4437_v39 = vld [vmem:[#allocation8 + $0x148] sm:$0xff] }
 0xaac   : > { %v4335_v13 = vpop.permute.xlu0 %4334  ;;  %v4269_v40 = vpop.permute.xlu1 %4268  ;;  %v4414_v34 = vld [vmem:[#allocation8 + $0x90] sm:$0xff] }
 0xaad   : > { %4343 = vst.msk [vmem:[#allocation8 + $0x198] sm:$0xff] %vm3074_vm2, %v4335_v13  ;;  %4278 = vst.msk [vmem:[#allocation8 + $0x110] sm:$0xff] %vm3074_vm2, %v4269_v40 }
 0xab0   : > { %v4271_v30 = vpop.permute.xlu0 %4270  ;;  %v4221_v33 = vpop.permute.xlu1 %4220  ;;  %v4415_v38 = vld [vmem:[#allocation8 + $0x98] sm:$0xff]  ;;  %v4446_v28 = vld [vmem:[#allocation8 + $0x190] sm:$0xff] }
 0xab1   : > { %4279 = vst.msk [vmem:[#allocation8 + $0x118] sm:$0xff] %vm3074_vm2, %v4271_v30  ;;  %4230 = vst.msk [vmem:[#allocation8 + $0xb0] sm:$0xff] %vm3074_vm2, %v4221_v33  ;;  %v5764_v27 = vpack.c.bf16 %v4415_v38, %v4414_v34  ;;  %v4436_v30 = vld [vmem:[#allocation8 + $0x140] sm:$0xff]  ;;  %v4425_v38 = vld [vmem:[#allocation8 + $0xe8] sm:$0xff] }
 0xab2   : > { %v5810_v34 = vpack.c.bf16 %v4437_v39, %v4436_v30 }
 0xab3   : > { %5765 = vmatprep.subr.bf16.mxu1 %v5764_v27 }
 0xab4   : > { %v4223_v5 = vpop.permute.xlu0 %4222  ;;  %5767 = vmatpush3.bf16.msra.mxu1 %v5766_v60  ;;  %v4157_v48 = vpop.permute.xlu1 %4156  ;;  %v4447_v9 = vld [vmem:[#allocation8 + $0x198] sm:$0xff]  ;;  %v4430_v11 = vld [vmem:[#allocation8 + $0x110] sm:$0xff] }
 0xab5   : > { %4231 = vst.msk [vmem:[#allocation8 + $0xb8] sm:$0xff] %vm3074_vm2, %v4223_v5  ;;  %4166 = vst.msk [vmem:[#allocation8 + $0x30] sm:$0xff] %vm3074_vm2, %v4157_v48  ;;  %5769 = vmatprep.subr.bf16.mxu1 %v5768_v46  ;;  %v5796_v29 = vpack.c.bf16 %v4447_v9, %v4446_v28  ;;  %v4424_v46 = vld [vmem:[#allocation8 + $0xe0] sm:$0xff]  ;;  %v4409_v5 = vld [vmem:[#allocation8 + $0x68] sm:$0xff] }
 0xab6   : > { %v5784_v1 = vpack.c.bf16 %v4425_v38, %v4424_v46  ;;  %v4408_v9 = vld [vmem:[#allocation8 + $0x60] sm:$0xff]  ;;  %v4660_v46 = vld [vmem:[%s8642_s13 + $0x48] sm:$0xff] }
 0xab7   : > { %5797 = vmatprep.subr.bf16.mxu0 %v5796_v29 }
 0xab8   : > { %v4159_v62 = vpop.permute.xlu0 %4158  ;;  %5771 = vmatpush3.bf16.msra.mxu1 %v5770_v18  ;;  %v4349_v43 = vpop.permute.xlu1 %4348  ;;  %v4431_v50 = vld [vmem:[#allocation8 + $0x118] sm:$0xff]  ;;  %v4418_v10 = vld [vmem:[#allocation8 + $0xb0] sm:$0xff]  ;;  %v5786_v18 = vpack.c.bf16 %v4409_v5, %v4408_v9 }
 0xab9   : > { %4167 = vst.msk [vmem:[#allocation8 + $0x38] sm:$0xff] %vm3074_vm2, %v4159_v62  ;;  %4358 = vst.msk [vmem:[#allocation8 + $0x1b0] sm:$0xff] %vm3074_vm2, %v4349_v43  ;;  %v5798_v15 = vpack.c.bf16 %v4431_v50, %v4430_v11  ;;  %v4457_v62 = vld [vmem:[#allocation8 + $0x1e8] sm:$0xff]  ;;  %v4661_v5 = vld [vmem:[%s8642_s13 + $0x50] sm:$0xff] }
 0xabb   : > { %5799 = vmatpush3.bf16.msra.mxu0 %v5798_v15 }
 0xabc   : > { %v4351_v16 = vpop.permute.xlu0 %4350  ;;  %5801 = vmatprep.subr.bf16.mxu0 %v5800_v8  ;;  %v4285_v58 = vpop.permute.xlu1 %4284  ;;  %v4419_v61 = vld [vmem:[#allocation8 + $0xb8] sm:$0xff]  ;;  %v4402_v12 = vld [vmem:[#allocation8 + $0x30] sm:$0xff]  ;;  %v4456_v8 = vld [vmem:[#allocation8 + $0x1e0] sm:$0xff] }
 0xabd   : > { %4359 = vst.msk [vmem:[#allocation8 + $0x1b8] sm:$0xff] %vm3074_vm2, %v4351_v16  ;;  %4294 = vst.msk [vmem:[#allocation8 + $0x130] sm:$0xff] %vm3074_vm2, %v4285_v58  ;;  %v5772_v49 = vpack.c.bf16 %v4419_v61, %v4418_v10  ;;  %v5816_v3 = vpack.c.bf16 %v4457_v62, %v4456_v8  ;;  %v4441_v16 = vld [vmem:[#allocation8 + $0x168] sm:$0xff] }
 0xabf   : > { %5773 = vmatprep.subr.bf16.mxu1 %v5772_v49  ;;  %5803 = vmatpush3.bf16.msra.mxu0 %v5802_v32  ;;  %v4440_v49 = vld [vmem:[#allocation8 + $0x160] sm:$0xff] }
 0xac0   : > { %v4287_v36 = vpop.permute.xlu0 %4286  ;;  %v4237_v25 = vpop.permute.xlu1 %4236  ;;  %v4403_v31 = vld [vmem:[#allocation8 + $0x38] sm:$0xff]  ;;  %v4450_v56 = vld [vmem:[#allocation8 + $0x1b0] sm:$0xff]  ;;  %v5818_v35 = vpack.c.bf16 %v4441_v16, %v4440_v49 }
 0xac1   : > { %4295 = vst.msk [vmem:[#allocation8 + $0x138] sm:$0xff] %vm3074_vm2, %v4287_v36  ;;  %4246 = vst.msk [vmem:[#allocation8 + $0xd0] sm:$0xff] %vm3074_vm2, %v4237_v25  ;;  %v5774_v59 = vpack.c.bf16 %v4403_v31, %v4402_v12 }
 0xac3   : > { %5775 = vmatpush3.bf16.msra.mxu1 %v5774_v59  ;;  %v4392_v59 = vld [vmem:[%s8640_s4] sm:$0xff] }
 0xac4   : > { %v4239_v44 = vpop.permute.xlu0 %4238  ;;  %5777 = vmatprep.subr.bf16.mxu1 %v5776_v63  ;;  %v4173_v4 = vpop.permute.xlu1 %4172  ;;  %v4451_v7 = vld [vmem:[#allocation8 + $0x1b8] sm:$0xff]  ;;  %v4434_v14 = vld [vmem:[#allocation8 + $0x130] sm:$0xff] }
 0xac5   : > { %4247 = vst.msk [vmem:[#allocation8 + $0xd8] sm:$0xff] %vm3074_vm2, %v4239_v44  ;;  %4182 = vst.msk [vmem:[#allocation8 + $0x50] sm:$0xff] %vm3074_vm2, %v4173_v4  ;;  %v5804_v20 = vpack.c.bf16 %v4451_v7, %v4450_v56  ;;  %v4394_v56 = vld [vmem:[%s8640_s4 + $0x10] sm:$0xff]  ;;  %v4651_v7 = vld [vmem:[%s8642_s13] sm:$0xff] }
 0xac7   : > { %5779 = vmatpush3.bf16.msra.mxu1 %v5778_v55  ;;  %5805 = vmatprep.subr.bf16.mxu0 %v5804_v20  ;;  %v4652_v55 = vld [vmem:[%s8642_s13 + $0x8] sm:$0xff]  ;;  %v4653_v20 = vld [vmem:[%s8642_s13 + $0x10] sm:$0xff] }
 0xac8   : > { %v4175_v57 = vpop.permute.xlu0 %4174  ;;  %v4365_v23 = vpop.permute.xlu1 %4364  ;;  %v4435_v22 = vld [vmem:[#allocation8 + $0x138] sm:$0xff]  ;;  %v4422_v40 = vld [vmem:[#allocation8 + $0xd0] sm:$0xff] }
 0xac9   : > { %4183 = vst.msk [vmem:[#allocation8 + $0x58] sm:$0xff] %vm3074_vm2, %v4175_v57  ;;  %4374 = vst.msk [vmem:[#allocation8 + $0x1d0] sm:$0xff] %vm3074_vm2, %v4365_v23  ;;  %v5806_v53 = vpack.c.bf16 %v4435_v22, %v4434_v14  ;;  %v5825_v57 = vpack.c.bf16 %v4652_v55, %v4651_v7  ;;  %v4654_v23 = vld [vmem:[%s8642_s13 + $0x18] sm:$0xff]  ;;  %v4655_v22 = vld [vmem:[%s8642_s13 + $0x20] sm:$0xff] }
 0xaca   : > { %v5828_v14 = vpack.c.bf16 %v4654_v23, %v4653_v20 }
 0xacb   : > { %5807 = vmatpush3.bf16.msra.mxu0 %v5806_v53  ;;  %v4656_v53 = vld [vmem:[%s8642_s13 + $0x28] sm:$0xff] }
 0xacc   : > { %v4367_v52 = vpop.permute.xlu0 %4366  ;;  %5809 = vmatprep.subr.bf16.mxu0 %v5808_v2  ;;  %v4301_v13 = vpop.permute.xlu1 %4300  ;;  %v4423_v51 = vld [vmem:[#allocation8 + $0xd8] sm:$0xff]  ;;  %v4406_v45 = vld [vmem:[#allocation8 + $0x50] sm:$0xff]  ;;  %v5831_v37 = vpack.c.bf16 %v4656_v53, %v4655_v22 }
 0xacd   : > { %4375 = vst.msk [vmem:[#allocation8 + $0x1d8] sm:$0xff] %vm3074_vm2, %v4367_v52  ;;  %4310 = vst.msk [vmem:[#allocation8 + $0x150] sm:$0xff] %vm3074_vm2, %v4301_v13  ;;  %v5780_v33 = vpack.c.bf16 %v4423_v51, %v4422_v40 }
 0xacf   : > { %5781 = vmatprep.subr.bf16.mxu1 %v5780_v33  ;;  %5811 = vmatpush3.bf16.msra.mxu0 %v5810_v34 }
 0xad0   : > { %v4303_v6 = vpop.permute.xlu0 %4302  ;;  %v4253_v27 = vpop.permute.xlu1 %4252  ;;  %v4407_v60 = vld [vmem:[#allocation8 + $0x58] sm:$0xff]  ;;  %v4454_v29 = vld [vmem:[#allocation8 + $0x1d0] sm:$0xff] }
 0xad1   : > { %4311 = vst.msk [vmem:[#allocation8 + $0x158] sm:$0xff] %vm3074_vm2, %v4303_v6  ;;  %4262 = vst.msk [vmem:[#allocation8 + $0xf0] sm:$0xff] %vm3074_vm2, %v4253_v27  ;;  %v5782_v21 = vpack.c.bf16 %v4407_v60, %v4406_v45  ;;  %v4657_v27 = vld [vmem:[%s8642_s13 + $0x30] sm:$0xff]  ;;  %v4658_v45 = vld [vmem:[%s8642_s13 + $0x38] sm:$0xff] }
 0xad2   : > { %v5834_v60 = vpack.c.bf16 %v4658_v45, %v4657_v27 }
 0xad3   : > { %5783 = vmatpush3.bf16.msra.mxu1 %v5782_v21  ;;  %v4659_v21 = vld [vmem:[%s8642_s13 + $0x40] sm:$0xff] }
 0xad4   : > { %v4255_v48 = vpop.permute.xlu0 %4254  ;;  %5785 = vmatprep.subr.bf16.mxu1 %v5784_v1  ;;  %v4189_v28 = vpop.permute.xlu1 %4188  ;;  %v4455_v54 = vld [vmem:[#allocation8 + $0x1d8] sm:$0xff]  ;;  %v4438_v50 = vld [vmem:[#allocation8 + $0x150] sm:$0xff]  ;;  %v5837_v1 = vpack.c.bf16 %v4660_v46, %v4659_v21 }
 0xad5   : > { %4263 = vst.msk [vmem:[#allocation8 + $0xf8] sm:$0xff] %vm3074_vm2, %v4255_v48  ;;  %4198 = vst.msk [vmem:[#allocation8 + $0x70] sm:$0xff] %vm3074_vm2, %v4189_v28  ;;  %v5812_v17 = vpack.c.bf16 %v4455_v54, %v4454_v29  ;;  %v4662_v48 = vld [vmem:[%s8642_s13 + $0x58] sm:$0xff]  ;;  %v4663_v54 = vld [vmem:[%s8642_s13 + $0x60] sm:$0xff] }
 0xad6   : > { %v5840_v28 = vpack.c.bf16 %v4662_v48, %v4661_v5 }
 0xad7   : > { %5787 = vmatpush3.bf16.msra.mxu1 %v5786_v18  ;;  %5813 = vmatprep.subr.bf16.mxu0 %v5812_v17  ;;  %v4664_v18 = vld [vmem:[%s8642_s13 + $0x68] sm:$0xff] }
 0xad8   : > { %v4191_v43 = vpop.permute.xlu0 %4190  ;;  %v4381_v11 = vpop.permute.xlu1 %4380  ;;  %v4439_v15 = vld [vmem:[#allocation8 + $0x158] sm:$0xff]  ;;  %v4426_v61 = vld [vmem:[#allocation8 + $0xf0] sm:$0xff]  ;;  %v5843_v62 = vpack.c.bf16 %v4664_v18, %v4663_v54 }
 0xad9   : > { %4199 = vst.msk [vmem:[#allocation8 + $0x78] sm:$0xff] %vm3074_vm2, %v4191_v43  ;;  %4390 = vst.msk [vmem:[#allocation8 + $0x1f0] sm:$0xff] %vm3074_vm2, %v4381_v11  ;;  %v5814_v19 = vpack.c.bf16 %v4439_v15, %v4438_v50  ;;  %v4665_v43 = vld [vmem:[%s8642_s13 + $0x70] sm:$0xff]  ;;  %v4666_v11 = vld [vmem:[%s8642_s13 + $0x78] sm:$0xff] }
 0xada   : > { %v5846_v50 = vpack.c.bf16 %v4666_v11, %v4665_v43 }
 0xadb   : > { %5815 = vmatpush3.bf16.msra.mxu0 %v5814_v19 }
 0xadc   : > { %v4383_v58 = vpop.permute.xlu0 %4382  ;;  %5817 = vmatprep.subr.bf16.mxu0 %v5816_v3  ;;  %v4317_v10 = vpop.permute.xlu1 %4316  ;;  %v4427_v24 = vld [vmem:[#allocation8 + $0xf8] sm:$0xff]  ;;  %v4410_v25 = vld [vmem:[#allocation8 + $0x70] sm:$0xff] }
 0xadd   : > { %4391 = vst.msk [vmem:[#allocation8 + $0x1f8] sm:$0xff] %vm3074_vm2, %v4383_v58  ;;  %4326 = vst.msk [vmem:[#allocation8 + $0x170] sm:$0xff] %vm3074_vm2, %v4317_v10  ;;  %v5788_v32 = vpack.c.bf16 %v4427_v24, %v4426_v61 }
 0xadf   : > { %5789 = vmatprep.subr.bf16.mxu1 %v5788_v32  ;;  %5819 = vmatpush3.bf16.msra.mxu0 %v5818_v35 }
 0xae0   : > { %v4319_v36 = vpop.permute.xlu0 %4318  ;;  %v4411_v12 = vld [vmem:[#allocation8 + $0x78] sm:$0xff]  ;;  %v4458_v42 = vld [vmem:[#allocation8 + $0x1f0] sm:$0xff] }
 0xae1   : > { %4327 = vst.msk [vmem:[#allocation8 + $0x178] sm:$0xff] %vm3074_vm2, %v4319_v36  ;;  %v5790_v31 = vpack.c.bf16 %v4411_v12, %v4410_v25  ;;  %vm4643_vm2 = vcmask 916230  }
 0xae3   : > { %5791 = vmatpush3.bf16.msra.mxu1 %v5790_v31 }
 0xae4   : > { %v4459_v63 = vld [vmem:[#allocation8 + $0x1f8] sm:$0xff]  ;;  %v4442_v44 = vld [vmem:[#allocation8 + $0x170] sm:$0xff]  ;;  %5824 = vmatprep.subr.bf16.mxu1 %v6115_v0 }
 0xae5   : > { %v5820_v41 = vpack.c.bf16 %v4459_v63, %v4458_v42 }
 0xae6   : > { %4531 = vmatmul.mubr.f32.vlgmr.msra.gmra.mrb[40].mxu1 %v4392_v59 }
 0xae7   : > { %5821 = vmatprep.subr.bf16.mxu0 %v5820_v41  ;;  %5826 = vmatpush3.bf16.msra.mxu1 %v5825_v57 }
 0xae8   : > { %v4443_v4 = vld [vmem:[#allocation8 + $0x178] sm:$0xff]  ;;  %5827 = vmatprep.subr.bf16.mxu1 %v6115_v0  ;;  %5453 = vmatprep.mubr.msk.f32.mxu1 %vm6118_vm13, %v6104_v26 }
 0xae9   : > { %v5822_v47 = vpack.c.bf16 %v4443_v4, %v4442_v44 }
 0xaeb   : > { %5823 = vmatpush3.bf16.msra.mxu0 %v5822_v47  ;;  %5829 = vmatpush3.bf16.msra.mxu1 %v5828_v14 }
 0xaec   : > { %5830 = vmatprep.subr.bf16.mxu1 %v6115_v0 }
 0xaed   : > { %v4464_v40 = vpop.permute.xlu1 %4463 }
 0xaee   : > { %4601 = vmatmul.mubr.f32.vlgmr.msra.gmra.mrb[40].mxu0 %v4394_v56 }
 0xaef   : > { %5832 = vmatpush3.bf16.msra.mxu1 %v5831_v37 }
 0xaf0   : > { %5833 = vmatprep.subr.bf16.mxu1 %v6115_v0 }
 0xaf3   : > { %5835 = vmatpush3.bf16.msra.mxu1 %v5834_v60 }
 0xaf4   : > { %5836 = vmatprep.subr.bf16.mxu1 %v6115_v0 }
 0xaf7   : > { %5838 = vmatpush3.bf16.msra.mxu1 %v5837_v1 }
 0xaf8   : > { %5839 = vmatprep.subr.bf16.mxu1 %v6115_v0 }
 0xafb   : > { %5841 = vmatpush3.bf16.msra.mxu1 %v5840_v28 }
 0xafc   : > { %5842 = vmatprep.subr.bf16.mxu1 %v6115_v0 }
 0xaff   : > { %5844 = vmatpush3.bf16.msra.mxu1 %v5843_v62 }
 0xb00   : > { %5845 = vmatprep.subr.bf16.mxu1 %v6115_v0 }
 0xb03   : > { %5847 = vmatpush3.bf16.msra.mxu1 %v5846_v50 }
 0xbb9   : > { %v5294_v2 = vpop.f32.mrb[40].mxu1 }
 0xbba   : > { %v5295_v39 = vpop.f32.mrb[41].mxu1 }
 0xbbb   : > { %v5296_v52 = vadd.f32 %v5295_v39, %v5294_v2 }
 0xbbd   : > { %v4533_v30 = vadd.f32 %v5296_v52, %v4464_v40 }
 0xbc1   : > { %v5329_v13 = vpop.f32.mrb[40].mxu0 }
 0xbc2   : > { %v5330_v51 = vpop.f32.mrb[41].mxu0 }
 0xbc3   : > { %v5331_v33 = vadd.f32 %v5330_v51, %v5329_v13 }
 0xbc5   : > { %v4603_v34 = vadd.f32 %v5331_v33, %v4533_v30 }
 0xbc7   : > { %v4607_v38 = vmin.f32 %v4603_v34, 0.0  ;;  %vm4606_vm12 = vcmp.gt.f32.partialorder %v4603_v34, 0.0 }
 0xbc9   : > { %v4608_v6 = vmul.f32 1.442695, %v4607_v38 }
 0xbcb   : > { %6002 = vpow2.f32 %v4608_v6 }
 0xbd5   : > { %v6003_v9 = vpop.eup %6002 }
 0xbd6   : > { %v4866_v29 = vadd.f32 -1.0, %v6003_v9 }
 0xbd8   : > { %v4611_v17 = vsel %vm4606_vm12, %v4603_v34, %v4866_v29 }
 0xbd9   : > { %4620 = vrot.lane.b32.xlu1 %v4611_v17, %s6116_s21  ;;  %4615 = vrot.lane.b32.xlu0 %v4611_v17, %s6117_s5  ;;  %4613 = vst.msk [vmem:[#allocation9] sm:$0x1] %vm4612_vm11, %v4611_v17  ;;  %s6014_s21 = scalar_lea.vmem %s6013_s27, 32 }
 0xbda   : > { %p6016_p1 = scmp.lt.s32.totalorder %s6014_s21, %s6008_s0 }
 0xbdc   : > { %p6017_p2 = por %p6016_p1, %p6015_p0 }
 0xbdd   : > { %4630 = vrot.lane.b32.xlu1 %v4611_v17, %s6119_s28  ;;  %4625 = vrot.lane.b32.xlu0 %v4611_v17, %s6120_s2 }
 0xbde   : > { %p6018_p3 = pnand %p6017_p2, %p6011_p13 }
 0xbe1   : > { %4640 = vrot.lane.b32.xlu1 %v4611_v17, %s6108_s15  ;;  %4635 = vrot.lane.b32.xlu0 %v4611_v17, %s6107_s30  ;;  %s8643_s15 = sld [smem:[#allocation44_spill]] }
 0xbe5   : > { %4645 = vrot.lane.b32.xlu0 %v4611_v17, %s8591_s16 }
 0xbe7   : > { %v4667_v61 = vld [vmem:[%s8643_s15] sm:$0x1] }
 0xc4b   : > { %v4621_v15 = vpop.permute.xlu1 %4620  ;;  %v4616_v19 = vpop.permute.xlu0 %4615 }
 0xc4c   : > { %4619 = vst.msk [vmem:[#allocation9 - $0x1] sm:$0x2] %vm4618_vm14, %v4616_v19 }
 0xc4d   : > { %4624 = vst.msk [vmem:[#allocation9 - $0x2] sm:$0x4] %vm4623_vm15, %v4621_v15 }
 0xc4f   : > { %v4631_v26 = vpop.permute.xlu1 %4630  ;;  %v4626_v8 = vpop.permute.xlu0 %4625 }
 0xc50   : > { %4629 = vst.msk [vmem:[#allocation9 - $0x3] sm:$0x8] %vm4628_vm0, %v4626_v8 }
 0xc51   : > { %4634 = vst.msk [vmem:[#allocation9 - $0x4] sm:$0x10] %vm4633_vm1, %v4631_v26 }
 0xc53   : > { %v4641_v3 = vpop.permute.xlu1 %4640  ;;  %v4636_v16 = vpop.permute.xlu0 %4635 }
 0xc54   : > { %4639 = vst.msk [vmem:[#allocation9 - $0x5] sm:$0x20] %vm4638_vm7, %v4636_v16 }
 0xc55   : > { %4644 = vst.msk [vmem:[#allocation9 - $0x6] sm:$0x40] %vm4643_vm2, %v4641_v3 }
 0xc57   : > { %v4646_v58 = vpop.permute.xlu0 %4645 }
 0xc58   : > { %4649 = vst.msk [vmem:[#allocation9 - $0x7] sm:$0x80] %vm4648_vm3, %v4646_v58 }
 0xc5f   : > { %v4650_v10 = vld [vmem:[#allocation9] sm:$0x1] }
 0xc60   : > { %5454 = vmatmul.mubr.f32.vlgmr.msra.gmra.mrb[42].mxu1 %v4650_v10 }
 0xd33   : > { %v4734_v24 = vpop.f32.mrb[42].mxu1 }
 0xd34   : > { %v4735_v49 = vadd.f32 %v4734_v24, %v4667_v61  ;;  %v5455_v32 = vpop.f32.mrb[43].mxu1 }
 0xd36   : > { %v4739_v35 = vsel %vm4738_vm4, %v4735_v49, -inf }
 0xd37   : > { %4740 = vmax.xlane.f32.xlu1 %v4739_v35 }
 0xdc4   : > { %v4741_v36 = vpop.xlane.xlu1 %4740 }
 0xdc5   : > { %v4742_v25 = vsub.f32 %v4735_v49, %v4741_v36 }
 0xdc7   : > { %v4743_v12 = vmul.f32 1.442695, %v4742_v25 }
 0xdc9   : > { %6004 = vpow2.f32 %v4743_v12 }
 0xdd3   : > { %v6005_v31 = vpop.eup %6004 }
 0xdd4   : > { %v4745_v59 = vsel %vm4738_vm4, %v6005_v31, 0.0 }
 0xdd5   : > { %4746 = vadd.xlane.f32.xlu0 %v4745_v59 }
 0xe62   : > { %v4747_v42 = vpop.xlane.xlu0 %4746 }
 0xe63   : > { %6006 = vlog2.f32 %v4747_v42 }
 0xe6d   : > { %v6007_v63 = vpop.eup %6006 }
 0xe6e   : > { %v4749_v41 = vmul.f32 0.6931472, %v6007_v63 }
 0xe70   : > { %v4750_v44 = vadd.f32 %v4749_v41, %v4741_v36 }
 0xe72   : > { %v4751_v4 = vsub.f32 %v4735_v49, %v4750_v44 }
 0xe74   : > { %4752 = vst.msk [vmem:[%s457_s18] sm:$0x1] %vm4738_vm4, %v4751_v4 }
 0xe75   : > { %6021 = shalt.err (!%p6018_p3)
}
 0xe76   : > { %s6022_s5 = scalar_lea.hbm %s8403_s11, 16  ;;  %s6026_s16 = scalar_lea.hbm %s8647_s7, 32 }
 0xe77   : > { %p6023_p4 = scmp.ne.s32.totalorder %s8403_s11, %s6022_s5  ;;  %p6027_p9 = scmp.lt.u32.totalorder %s8403_s11, %s8647_s7 }
 0xe78   : > { %p6028_p10 = scmp.lt.u32.totalorder %s6026_s16, %s6022_s5  ;;  %p6030_p12 = scmp.lt.u32.totalorder %s6022_s5, %s8403_s11 }
 0xe79   : > { %p6024_p7 = pnand %p6023_p4, %p6235_p5 }
 0xe7a   : > { %p6029_p11 = por %p6028_p10, %p6027_p9 }
 0xe7b   : > { %p6025_p8 = pneg %p6024_p7 }
 0xe7c   : > { %p6031_p13 = por %p6030_p12, %p6029_p11 }
 0xe7e   : > { %p6032_p0 = pnand %p6031_p13, %p6025_p8 }
 0xe80   : > { %6035 = shalt.err (!%p6032_p0)
}
 0xe81   : > { %5848 = dma.vmem_to_hbm [thread:$0]  (%p6235_p5), %s8405_s10, 16, %s8403_s11, %s4754_s29  }
 0xe82 PF: > { %s8648_s6 = sld [smem:[#allocation16_spill]]  ;;  %s8649_s24 = sld [smem:[#allocation13_spill]] }
 0xe88   : > { %p5854_p1 = scmp.ge.s32.totalorder %s8648_s6, 2  ;;  %s4778_s17 = sand.u32 1, %s8649_s24  }
 0xe89   : > { %s4779_s18 = scalar_lea.sflag [#allocation11], %s4778_s17 }
 0xe8a   : > { %p5851_p2 = pnand %p5854_p1, %p6239_p6 }
 0xe8c   : > { %6053 = dma.done.wait (!%p5851_p2), %s4779_s18, 16  }
 0xe8d   : > { %6055 = vsyncadd (!%p5851_p2), %s4779_s18, 4294967280  ;;  %s8651_s16 = sld [smem:[#allocation18_spill]]  ;;  %s8652_s29 = sld [smem:[#allocation14_spill]] }
 0xe8e   : > { %s8653_s30 = sld [smem:[#allocation15_spill]]  ;;  %s8654_s15 = sld [smem:[#allocation19_spill]] }
 0xe93   : > { %p24_p3 = scmp.ge.s32.totalorder %s8651_s16, 4  }
 0xe95   :  { %26 = sbr.rel (!%p24_p3) target bundleno = 18 (0x12), region = 114 }
 0xe9c   :  { %4783 = vsyncpa [#allocation11], 1 }
 0xe9d   :  { %4785 = vsyncpa [#allocation11 + $0x1], 1 }

</bundles_post_ra>
